<compile_context>
chip_gen: v7x
topology: tpu7x:2x2x1
jax: 0.10.0
libtpu: 0.0.40
codegen_flags: <defaults>
</compile_context>

<pallas_src>
import math
from functools import partial

import jax
import jax.numpy as jnp
from jax import lax
from jax.experimental import pallas as pl
from jax.experimental.pallas import tpu as pltpu


_COMPUTE_DTYPE = jnp.bfloat16          # MXU operand dtype (accumulation stays f32)

_VMEM_LIMIT_CACHE = None


def _vmem_limit_bytes():
    """Generation-aware scoped-VMEM limit (v7x: ~54 MiB, v5e/v6e: ~109 MiB)."""
    global _VMEM_LIMIT_CACHE
    if _VMEM_LIMIT_CACHE is None:
        try:
            cap = int(pltpu.get_tpu_info().vmem_capacity_bytes)
            if not cap or cap < (16 << 20):
                cap = 64 << 20
        except Exception:
            cap = 64 << 20            # assume the smallest (v7x per-core VMEM)
        _VMEM_LIMIT_CACHE = min(int(cap * 0.85), 112 << 20)
    return _VMEM_LIMIT_CACHE


def _round_up(x, m):
    return (x + m - 1) // m * m


# --------------------------- in-kernel math helpers -------------------------

_SQRT_HALF = 0.7071067811865476


def _erf_approx(z):
    # Abramowitz & Stegun 7.1.26, max abs error ~1.5e-7 (exact GELU to within
    # f32 precision).  The divide goes through pl.reciprocal so the epilogue
    # stays off the VALU critical path (matters most on v5e).
    a1, a2, a3, a4, a5 = (0.254829592, -0.284496736, 1.421413741,
                          -1.453152027, 1.061405429)
    p = 0.3275911
    sign = jnp.where(z < 0.0, -1.0, 1.0)
    za = jnp.abs(z)
    t = pl.reciprocal(1.0 + p * za)
    poly = ((((a5 * t + a4) * t + a3) * t + a2) * t + a1) * t
    return sign * (1.0 - poly * jnp.exp(-za * za))


def _gelu_exact(x):
    return 0.5 * x * (1.0 + _erf_approx(x * _SQRT_HALF))


def _transpose_small_minor(x, rows):
    # (M, k) -> (rows, M) with k small: done as one MXU contraction against a
    # k x k identity (single epilogue layout op; replaces nine per-tap
    # transposed dots of the old version and keeps the store lane-dense).
    k = x.shape[-1]
    eye = (lax.broadcasted_iota(jnp.int32, (k, k), 0)
           == lax.broadcasted_iota(jnp.int32, (k, k), 1)).astype(x.dtype)
    t = lax.dot_general(eye, x, dimension_numbers=(((1,), (1,)), ((), ())),
                        preferred_element_type=jnp.float32)
    return t[:rows, :]


# ------------------------------ Pallas kernels ------------------------------

def _matmul_kernel(x_ref, w_ref, b_ref, o_ref, *, apply_gelu, out_scale):
    acc = jnp.dot(x_ref[...], w_ref[...], preferred_element_type=jnp.float32)
    acc = acc + b_ref[...]
    if out_scale != 1.0:
        acc = acc * out_scale
    if apply_gelu:
        acc = _gelu_exact(acc)
    o_ref[...] = acc.astype(o_ref.dtype)


def _tail_kernel(top_ref, mid_ref, bot_ref, add_ref, w_ref, b_ref, o_ref,
                 xpad_ref, *, strip_h, W, cout):
    # top/bot_ref: (1, 1, W, Cin) halo rows;  mid_ref: (1, strip_h, W, Cin)
    # add_ref / o_ref: (1, Cout, strip_h*W)   w_ref: (9, Cin, Cout_pad)
    # xpad_ref (scratch): (strip_h+2, W+2, Cin) zero-bordered strip.
    cin = mid_ref.shape[-1]
    cout_pad = w_ref.shape[-1]
    s = pl.program_id(1)
    nstrip = pl.num_programs(1)
    dt = xpad_ref.dtype

    # Assemble the zero-padded strip in VMEM (no jnp.pad round trip in HBM).
    zcol = jnp.zeros((strip_h + 2, 1, cin), dt)
    xpad_ref[:, 0:1, :] = zcol
    xpad_ref[:, W + 1:W + 2, :] = zcol
    top_m = (s > 0).astype(dt)
    bot_m = (s < nstrip - 1).astype(dt)
    xpad_ref[0:1, 1:W + 1, :] = top_ref[0] * top_m
    xpad_ref[strip_h + 1:strip_h + 2, 1:W + 1, :] = bot_ref[0] * bot_m
    xpad_ref[1:strip_h + 1, 1:W + 1, :] = mid_ref[0]

    npix = strip_h * W
    acc = jnp.zeros((npix, cout_pad), jnp.float32)
    for t in range(9):
        dy, dx = divmod(t, 3)
        patch = xpad_ref[dy:dy + strip_h, dx:dx + W, :].reshape(npix, cin)
        acc = acc + jnp.dot(patch, w_ref[t], preferred_element_type=jnp.float32)

    # Single epilogue transpose -> lane-dense NCHW store, fused bias + residual.
    res = _transpose_small_minor(acc, cout)                    # (Cout, npix)
    o_ref[0] = (res + b_ref[...] + add_ref[0]).astype(o_ref.dtype)


# ------------------------------ kernel wrappers -----------------------------

def _pick_row_tile(m):
    # Large tiles amortize the ~0.35us/step pipeline overhead; keep >=2 grid
    # steps when possible so both v7x TensorCores get work.
    tiles = (4096, 2048, 1024, 512, 256, 128, 64, 32, 16, 8)
    for t in tiles:
        if m % t == 0 and m // t >= 2:
            return t
    for t in tiles:
        if m % t == 0:
            return t
    return m


def matmul_bias(x, w, b_row, *, apply_gelu=False, out_scale=1.0, out_dtype=None):
    """out = act((x @ w + b) * scale): row-tiled Pallas matmul, fused epilogue."""
    m, k = x.shape
    n = w.shape[1]
    out_dtype = x.dtype if out_dtype is None else out_dtype
    mp = m if m % 8 == 0 else _round_up(m, 8)
    if mp != m:
        # TODO(synk): handle the ragged last row-tile in-kernel instead of
        # pad + slice (only triggers when N*H*W is not a multiple of 8).
        x = jnp.pad(x, ((0, mp - m), (0, 0)))
    tm = _pick_row_tile(mp)
    out = pl.pallas_call(
        partial(_matmul_kernel, apply_gelu=apply_gelu, out_scale=out_scale),
        out_shape=jax.ShapeDtypeStruct((mp, n), out_dtype),
        grid_spec=pltpu.PrefetchScalarGridSpec(
            num_scalar_prefetch=0,
            grid=(mp // tm,),
            in_specs=[
                pl.BlockSpec((tm, k), lambda i: (i, 0)),
                pl.BlockSpec((k, n), lambda i: (0, 0)),
                pl.BlockSpec((1, n), lambda i: (0, 0)),
            ],
            out_specs=pl.BlockSpec((tm, n), lambda i: (i, 0)),
        ),
        compiler_params=pltpu.CompilerParams(
            dimension_semantics=("parallel",),
            vmem_limit_bytes=_vmem_limit_bytes()),
    )(x, w, b_row)
    return out if mp == m else out[:m]


def _im2col_3x3(x_nhwc):
    # 3x3 / stride 1 / pad 1 patches, tap-major channel order (dy, dx, c).
    # Only used for to_feat (Cin = colors is tiny, so the 9*Cin-wide patch
    # tensor is small); gives one well-shaped K=27 MXU dot per row tile.
    # TODO(synk): an in-kernel halo/tap-concat variant would remove this
    # small XLA round trip as well.
    n, h, w, c = x_nhwc.shape
    xp = jnp.pad(x_nhwc, ((0, 0), (1, 1), (1, 1), (0, 0)))
    taps = [xp[:, dy:dy + h, dx:dx + w, :] for dy in range(3) for dx in range(3)]
    return jnp.concatenate(taps, axis=-1).reshape(n * h * w, 9 * c)


def conv3x3_to_feat(x_nhwc, weight_oihw, bias, *, out_scale=1.0):
    """to_feat conv as (N*H*W, 9*Cin) @ (9*Cin, Cout); returns (N*H*W, Cout)."""
    cout, cin = weight_oihw.shape[:2]
    patches = _im2col_3x3(x_nhwc.astype(_COMPUTE_DTYPE))
    w27 = jnp.transpose(weight_oihw, (2, 3, 1, 0)).reshape(9 * cin, cout)
    w27 = w27.astype(_COMPUTE_DTYPE)
    brow = bias.reshape(1, cout).astype(jnp.float32)
    # TODO(synk): output last dim = dim (32) -> lane-masked stores; a
    # pixels-on-lanes layout for the whole feature path would fix that.
    return matmul_bias(patches, w27, brow, out_scale=out_scale,
                       out_dtype=_COMPUTE_DTYPE)


def _shuffle_fold_perm(c, r):
    # Output-channel permutation that folds PixelShuffle's channel reorder
    # into the conv weight columns: new channel p = (i*r + j)*C + c holds the
    # original channel c*r*r + i*r + j.
    p = jnp.arange(c * r * r)
    cc = p % c
    i = (p // c) // r
    j = (p // c) % r
    return cc * (r * r) + i * r + j


def conv1x1_shuffle_gelu(x_flat, weight_oi11, bias, *, r):
    """1x1 conv + (folded) PixelShuffle channel permutation + exact GELU."""
    cr2, cin = weight_oi11.shape[:2]
    c = cr2 // (r * r)
    perm = _shuffle_fold_perm(c, r)
    wmat = jnp.transpose(weight_oi11.reshape(cr2, cin), (1, 0))[:, perm]
    brow = bias[perm].reshape(1, cr2).astype(jnp.float32)
    return matmul_bias(x_flat.astype(_COMPUTE_DTYPE), wmat.astype(_COMPUTE_DTYPE),
                       brow, apply_gelu=True, out_dtype=_COMPUTE_DTYPE)


def _pick_strip_h(ho, wo, max_pixels):
    # Strip height for the tail conv: divides Ho, keeps the flattened strip a
    # multiple of 128 lanes (lane-dense store), fits the VMEM pixel budget,
    # and prefers >=2 strips so the grid has parallel work.
    divs = [d for d in range(1, ho + 1) if ho % d == 0]
    valid = [d for d in divs if (d * wo) % 128 == 0]
    if not valid:
        # Whole image as one strip (block == full array is always legal).
        # TODO(synk): ragged strip support for odd spatial sizes.
        return ho
    fitting = [d for d in valid if d * wo <= max_pixels] or [min(valid)]
    multi = [d for d in fitting if ho // d >= 2]
    return max(multi) if multi else max(fitting)


def conv3x3_tail(y_nhwc, weight_oihw, bias, base_flat):
    """Strip-tiled tail conv + fused bilinear residual; returns (N, Cout, Ho*Wo) f32."""
    n, ho, wo, cin = y_nhwc.shape
    cout = weight_oihw.shape[0]
    cout_pad = max(8, _round_up(cout, 8))
    wtap = jnp.transpose(weight_oihw, (2, 3, 1, 0)).reshape(9, cin, cout)
    wtap = jnp.pad(wtap, ((0, 0), (0, 0), (0, cout_pad - cout))).astype(_COMPUTE_DTYPE)
    bcol = bias.reshape(cout, 1).astype(jnp.float32)

    vmem_limit = _vmem_limit_bytes()
    # ~3 KB/pixel in-kernel footprint (acc + patches + inputs after 128-lane
    # padding, double-buffered); keep strips well under the scoped limit.
    max_pixels = max((vmem_limit // 2) // 3072, 128)
    strip_h = _pick_strip_h(ho, wo, max_pixels)
    n_strips = ho // strip_h
    npix = strip_h * wo

    y = y_nhwc.astype(_COMPUTE_DTYPE)
    base_flat = base_flat.astype(jnp.float32)

    return pl.pallas_call(
        partial(_tail_kernel, strip_h=strip_h, W=wo, cout=cout),
        out_shape=jax.ShapeDtypeStruct((n, cout, ho * wo), jnp.float32),
        grid_spec=pltpu.PrefetchScalarGridSpec(
            num_scalar_prefetch=0,
            grid=(n, n_strips),
            in_specs=[
                # top halo row (clamped at the image border, zeroed in-kernel)
                pl.BlockSpec((1, 1, wo, cin),
                             lambda b, s: (b, jnp.maximum(s * strip_h - 1, 0), 0, 0)),
                # main strip
                pl.BlockSpec((1, strip_h, wo, cin), lambda b, s: (b, s, 0, 0)),
                # bottom halo row
                pl.BlockSpec((1, 1, wo, cin),
                             lambda b, s: (b, jnp.minimum((s + 1) * strip_h, ho - 1), 0, 0)),
                # bilinear residual (already in NCHW-flat layout)
                pl.BlockSpec((1, cout, npix), lambda b, s: (b, 0, s)),
                pl.BlockSpec((9, cin, cout_pad), lambda b, s: (0, 0, 0)),
                pl.BlockSpec((cout, 1), lambda b, s: (0, 0)),
            ],
            out_specs=pl.BlockSpec((1, cout, npix), lambda b, s: (b, 0, s)),
            scratch_shapes=[pltpu.VMEM((strip_h + 2, wo + 2, cin), _COMPUTE_DTYPE)],
        ),
        compiler_params=pltpu.CompilerParams(
            dimension_semantics=("parallel", "parallel"),
            vmem_limit_bytes=vmem_limit),
    )(y, y, y, base_flat, wtap, bcol)


# --------------------------- pure-XLA layout helpers ------------------------

def pixel_shuffle_folded(x, r):
    # Spatial interleave half of PixelShuffle; the channel permutation was
    # folded into the producing conv's weight columns (channels are (i, j, c)).
    # TODO(synk): this interleave (and the bilinear base upsample) could be
    # fused into the tail kernel's input BlockSpec to remove one HBM round trip.
    n, h, w, rrc = x.shape
    c = rrc // (r * r)
    x = x.reshape(n, h, w, r, r, c)
    x = jnp.transpose(x, (0, 1, 3, 2, 4, 5))
    return x.reshape(n, h * r, w * r, c)


def _bilinear_matrix(out_size, in_size):
    # F.interpolate(mode='bilinear', align_corners=False) as a static (out, in)
    # interpolation matrix -> gather-free upsampling via einsum.
    src = (jnp.arange(out_size, dtype=jnp.float32) + 0.5) * (in_size / out_size) - 0.5
    src = jnp.maximum(src, 0.0)
    i0 = jnp.floor(src).astype(jnp.int32)
    frac = src - i0.astype(jnp.float32)
    i1 = jnp.minimum(i0 + 1, in_size - 1)
    i0 = jnp.minimum(i0, in_size - 1)
    oh0 = jax.nn.one_hot(i0, in_size, dtype=jnp.float32)
    oh1 = jax.nn.one_hot(i1, in_size, dtype=jnp.float32)
    return oh0 * (1.0 - frac)[:, None] + oh1 * frac[:, None]


def bilinear_upsample_nchw(x_nchw, scale):
    n, c, h, w = x_nchw.shape
    ah = _bilinear_matrix(h * scale, h)
    aw = _bilinear_matrix(w * scale, w)
    t = jnp.einsum('oh,nchw->ncow', ah, x_nchw)
    return jnp.einsum('ncow,pw->ncop', t, aw)


# ------------------------------- SRNet forward ------------------------------

def srnet_forward(x_nchw, params, scale):
    # Note: sub_mean / add_mean (MeanShift) are constructed by SRNet but never
    # applied in its forward(), so they are omitted here.
    x_nchw = x_nchw.astype(jnp.float32)
    n, colors, h, w = x_nchw.shape
    dim = params["to_feat"][0].shape[0]
    x_nhwc = jnp.transpose(x_nchw, (0, 2, 3, 1))

    # to_feat 3x3 conv.  TODO(synk): BasicBlock is not defined in the provided
    # source, so the `blocks` chain is treated as identity and
    # `blocks(x) + x == 2*x` is folded into the kernel epilogue (out_scale=2).
    feat = conv3x3_to_feat(x_nhwc, *params["to_feat"], out_scale=2.0)  # (N*H*W, dim)

    # Upsampling path.  PyTorch order is Conv -> PixelShuffle -> GELU; GELU is
    # elementwise so it commutes with the shuffle and is fused into the conv;
    # the shuffle's channel permutation is folded into the conv weights.
    if scale == 4:
        y = conv1x1_shuffle_gelu(feat, *params["up1"], r=2)
        y = pixel_shuffle_folded(y.reshape(n, h, w, dim * 4), 2)       # (N, 2H, 2W, dim)
        h2, w2 = h * 2, w * 2
        y = conv1x1_shuffle_gelu(y.reshape(n * h2 * w2, dim), *params["up2"], r=2)
        y = pixel_shuffle_folded(y.reshape(n, h2, w2, dim * 4), 2)     # (N, 4H, 4W, dim)
    else:
        y = conv1x1_shuffle_gelu(feat, *params["up1"], r=scale)
        y = pixel_shuffle_folded(y.reshape(n, h, w, dim * scale * scale), scale)

    ho, wo = h * scale, w * scale
    base_up = bilinear_upsample_nchw(x_nchw, scale)                    # (N, C, Ho, Wo) f32
    out = conv3x3_tail(y, *params["tail"], base_up.reshape(n, colors, ho * wo))
    return out.reshape(n, colors, ho, wo)                              # NCHW f32


# ------------------------------- parameters ---------------------------------

def init_params(key, colors, dim, scale):
    def conv_init(k, cout, cin, kh, kw):
        fan_in = cin * kh * kw
        bound = 1.0 / math.sqrt(fan_in)
        kw_, kb_ = jax.random.split(k)
        w = jax.random.uniform(kw_, (cout, cin, kh, kw), jnp.float32, -bound, bound)
        b = jax.random.uniform(kb_, (cout,), jnp.float32, -bound, bound)
        return w, b

    keys = jax.random.split(key, 4)
    params = {"to_feat": conv_init(keys[0], dim, colors, 3, 3)}
    if scale == 4:
        params["up1"] = conv_init(keys[1], dim * 4, dim, 1, 1)
        params["up2"] = conv_init(keys[2], dim * 4, dim, 1, 1)
    else:
        params["up1"] = conv_init(keys[1], dim * scale * scale, dim, 1, 1)
    params["tail"] = conv_init(keys[3], colors, dim, 3, 3)
    return params


if __name__ == "__main__":
    # args: colors=3, dim=32, scale=2 (num_heads/num_kernels/num_blocks only
    # parameterize BasicBlock, which is not defined in the provided source).
    colors, dim, scale = 3, 32, 2
    key = jax.random.PRNGKey(0)
    kx, kp = jax.random.split(key)
    x = jax.random.normal(kx, (2, colors, 16, 16), dtype=jnp.float32)
    params = init_params(kp, colors, dim, scale)

    fwd = jax.jit(partial(srnet_forward, scale=scale))
    out = fwd(x, params)
    jax.block_until_ready(out)
    assert out.shape == (2, colors, 16 * scale, 16 * scale)
    assert out.dtype == jnp.float32
    assert bool(jnp.isfinite(out).all())
    print("KERNEL_OK")
</pallas_src>

<mosaic_0001>
module attributes {stable_mosaic.version = 11 : i64} {
  func.func @_matmul_kernel(%arg0: i32, %arg1: memref<256x27xbf16, #tpu.memory_space<vmem>>, %arg2: memref<27x32xbf16, #tpu.memory_space<vmem>>, %arg3: memref<1x32xf32, #tpu.memory_space<vmem>>, %arg4: memref<256x32xbf16, #tpu.memory_space<vmem>>) attributes {dimension_semantics = [#tpu.dimension_semantics<parallel>], iteration_bounds = array<i64: 2>, scalar_prefetch = 0 : i64, scratch_operands = 0 : i64, tpu.core_type = #tpu.core_type<tc>, window_params = [{transform_indices = @transform_0, window_bounds = array<i64: 256, 27>}, {pipeline_mode = #tpu.pipeline_mode<synchronous>, transform_indices = @transform_1, window_bounds = array<i64: 27, 32>}, {pipeline_mode = #tpu.pipeline_mode<synchronous>, transform_indices = @transform_2, window_bounds = array<i64: 1, 32>}, {transform_indices = @transform_3, window_bounds = array<i64: 256, 32>}]} {
    %c0 = arith.constant 0 : index
    %c0_0 = arith.constant 0 : index
    %0 = vector.load %arg1[%c0, %c0_0] : memref<256x27xbf16, #tpu.memory_space<vmem>>, vector<256x27xbf16>
    %c0_1 = arith.constant 0 : index
    %c0_2 = arith.constant 0 : index
    %1 = vector.load %arg2[%c0_1, %c0_2] : memref<27x32xbf16, #tpu.memory_space<vmem>>, vector<27x32xbf16>
    %cst = arith.constant dense<0.000000e+00> : vector<256x32xf32>
    %2 = tpu.matmul %0, %1, %cst {dimension_numbers = #tpu.dot_dimension_numbers<[1], [0], [0], [1], [0, 0, 1, 1], [], []>} : vector<256x27xbf16>, vector<27x32xbf16>, vector<256x32xf32> -> vector<256x32xf32>
    %c0_3 = arith.constant 0 : index
    %c0_4 = arith.constant 0 : index
    %3 = vector.load %arg3[%c0_3, %c0_4] : memref<1x32xf32, #tpu.memory_space<vmem>>, vector<1x32xf32>
    %4 = vector.broadcast %3 : vector<1x32xf32> to vector<256x32xf32>
    %5 = arith.addf %2, %4 : vector<256x32xf32>
    %cst_5 = arith.constant 2.000000e+00 : f32
    %6 = vector.broadcast %cst_5 : f32 to vector<256x32xf32>
    %7 = arith.mulf %5, %6 : vector<256x32xf32>
    %8 = arith.truncf %7 : vector<256x32xf32> to vector<256x32xbf16>
    %c0_6 = arith.constant 0 : index
    %c0_7 = arith.constant 0 : index
    %9 = vector.load %arg4[%c0_6, %c0_7] : memref<256x32xbf16, #tpu.memory_space<vmem>>, vector<256x32xbf16>
    tpu.vector_store %arg4[%c0_6, %c0_7], %8 {strides = array<i32>} : memref<256x32xbf16, #tpu.memory_space<vmem>>, vector<256x32xbf16>,
    return
  }
  func.func @transform_0(%arg0: i32) -> (i32, i32) {
    %c0_i32 = arith.constant 0 : i32
    %c0_i32_0 = arith.constant 0 : i32
    return %arg0, %c0_i32 : i32, i32
  }
  func.func @transform_1(%arg0: i32) -> (i32, i32) {
    %c0_i32 = arith.constant 0 : i32
    %c0_i32_0 = arith.constant 0 : i32
    %c0_i32_1 = arith.constant 0 : i32
    return %c0_i32, %c0_i32_0 : i32, i32
  }
  func.func @transform_2(%arg0: i32) -> (i32, i32) {
    %c0_i32 = arith.constant 0 : i32
    %c0_i32_0 = arith.constant 0 : i32
    %c0_i32_1 = arith.constant 0 : i32
    return %c0_i32, %c0_i32_0 : i32, i32
  }
  func.func @transform_3(%arg0: i32) -> (i32, i32) {
    %c0_i32 = arith.constant 0 : i32
    %c0_i32_0 = arith.constant 0 : i32
    return %arg0, %c0_i32 : i32, i32
  }
}

module attributes {stable_mosaic.version = 11 : i64} {
  func.func @_matmul_kernel(%arg0: i32, %arg1: memref<256x32xbf16, #tpu.memory_space<vmem>>, %arg2: memref<32x128xbf16, #tpu.memory_space<vmem>>, %arg3: memref<1x128xf32, #tpu.memory_space<vmem>>, %arg4: memref<256x128xbf16, #tpu.memory_space<vmem>>) attributes {dimension_semantics = [#tpu.dimension_semantics<parallel>], iteration_bounds = array<i64: 2>, scalar_prefetch = 0 : i64, scratch_operands = 0 : i64, tpu.core_type = #tpu.core_type<tc>, window_params = [{transform_indices = @transform_0, window_bounds = array<i64: 256, 32>}, {pipeline_mode = #tpu.pipeline_mode<synchronous>, transform_indices = @transform_1, window_bounds = array<i64: 32, 128>}, {pipeline_mode = #tpu.pipeline_mode<synchronous>, transform_indices = @transform_2, window_bounds = array<i64: 1, 128>}, {transform_indices = @transform_3, window_bounds = array<i64: 256, 128>}]} {
    %c0 = arith.constant 0 : index
    %c0_0 = arith.constant 0 : index
    %0 = vector.load %arg1[%c0, %c0_0] : memref<256x32xbf16, #tpu.memory_space<vmem>>, vector<256x32xbf16>
    %c0_1 = arith.constant 0 : index
    %c0_2 = arith.constant 0 : index
    %1 = vector.load %arg2[%c0_1, %c0_2] : memref<32x128xbf16, #tpu.memory_space<vmem>>, vector<32x128xbf16>
    %cst = arith.constant dense<0.000000e+00> : vector<256x128xf32>
    %2 = tpu.matmul %0, %1, %cst {dimension_numbers = #tpu.dot_dimension_numbers<[1], [0], [0], [1], [0, 0, 1, 1], [], []>} : vector<256x32xbf16>, vector<32x128xbf16>, vector<256x128xf32> -> vector<256x128xf32>
    %c0_3 = arith.constant 0 : index
    %c0_4 = arith.constant 0 : index
    %3 = vector.load %arg3[%c0_3, %c0_4] : memref<1x128xf32, #tpu.memory_space<vmem>>, vector<1x128xf32>
    %4 = vector.broadcast %3 : vector<1x128xf32> to vector<256x128xf32>
    %5 = arith.addf %2, %4 : vector<256x128xf32>
    %cst_5 = arith.constant 5.000000e-01 : f32
    %6 = vector.broadcast %cst_5 : f32 to vector<256x128xf32>
    %7 = arith.mulf %6, %5 : vector<256x128xf32>
    %cst_6 = arith.constant 0.707106769 : f32
    %8 = vector.broadcast %cst_6 : f32 to vector<256x128xf32>
    %9 = arith.mulf %5, %8 : vector<256x128xf32>
    %cst_7 = arith.constant 0.000000e+00 : f32
    %10 = vector.broadcast %cst_7 : f32 to vector<256x128xf32>
    %11 = arith.cmpf olt, %9, %10 : vector<256x128xf32>
    %cst_8 = arith.constant -1.000000e+00 : f32
    %cst_9 = arith.constant 1.000000e+00 : f32
    %12 = vector.broadcast %cst_8 : f32 to vector<256x128xf32>
    %13 = vector.broadcast %cst_9 : f32 to vector<256x128xf32>
    %14 = arith.select %11, %12, %13 : vector<256x128xi1>, vector<256x128xf32>
    %15 = math.absf %9 : vector<256x128xf32>
    %cst_10 = arith.constant 0.327591091 : f32
    %16 = vector.broadcast %cst_10 : f32 to vector<256x128xf32>
    %17 = arith.mulf %16, %15 : vector<256x128xf32>
    %cst_11 = arith.constant 1.000000e+00 : f32
    %18 = vector.broadcast %cst_11 : f32 to vector<256x128xf32>
    %19 = arith.addf %18, %17 : vector<256x128xf32>
    %20 = tpu.reciprocal %19 : vector<256x128xf32> -> vector<256x128xf32>
    %cst_12 = arith.constant 1.06140542 : f32
    %21 = vector.broadcast %cst_12 : f32 to vector<256x128xf32>
    %22 = arith.mulf %21, %20 : vector<256x128xf32>
    %cst_13 = arith.constant -1.45315206 : f32
    %23 = vector.broadcast %cst_13 : f32 to vector<256x128xf32>
    %24 = arith.addf %22, %23 : vector<256x128xf32>
    %25 = arith.mulf %24, %20 : vector<256x128xf32>
    %cst_14 = arith.constant 1.42141378 : f32
    %26 = vector.broadcast %cst_14 : f32 to vector<256x128xf32>
    %27 = arith.addf %25, %26 : vector<256x128xf32>
    %28 = arith.mulf %27, %20 : vector<256x128xf32>
    %cst_15 = arith.constant -0.284496725 : f32
    %29 = vector.broadcast %cst_15 : f32 to vector<256x128xf32>
    %30 = arith.addf %28, %29 : vector<256x128xf32>
    %31 = arith.mulf %30, %20 : vector<256x128xf32>
    %cst_16 = arith.constant 0.254829586 : f32
    %32 = vector.broadcast %cst_16 : f32 to vector<256x128xf32>
    %33 = arith.addf %31, %32 : vector<256x128xf32>
    %34 = arith.mulf %33, %20 : vector<256x128xf32>
    %cst_17 = arith.constant 0.000000e+00 : f32
    %35 = vector.broadcast %cst_17 : f32 to vector<256x128xf32>
    %36 = arith.subf %35, %15 : vector<256x128xf32>
    %37 = arith.mulf %36, %15 : vector<256x128xf32>
    %38 = math.exp %37 : vector<256x128xf32>
    %39 = arith.mulf %34, %38 : vector<256x128xf32>
    %cst_18 = arith.constant 1.000000e+00 : f32
    %40 = vector.broadcast %cst_18 : f32 to vector<256x128xf32>
    %41 = arith.subf %40, %39 : vector<256x128xf32>
    %42 = arith.mulf %14, %41 : vector<256x128xf32>
    %cst_19 = arith.constant 1.000000e+00 : f32
    %43 = vector.broadcast %cst_19 : f32 to vector<256x128xf32>
    %44 = arith.addf %43, %42 : vector<256x128xf32>
    %45 = arith.mulf %7, %44 : vector<256x128xf32>
    %46 = arith.truncf %45 : vector<256x128xf32> to vector<256x128xbf16>
    %c0_20 = arith.constant 0 : index
    %c0_21 = arith.constant 0 : index
    %47 = vector.load %arg4[%c0_20, %c0_21] : memref<256x128xbf16, #tpu.memory_space<vmem>>, vector<256x128xbf16>
    tpu.vector_store %arg4[%c0_20, %c0_21], %46 {strides = array<i32>} : memref<256x128xbf16, #tpu.memory_space<vmem>>, vector<256x128xbf16>,
    return
  }
  func.func @transform_0(%arg0: i32) -> (i32, i32) {
    %c0_i32 = arith.constant 0 : i32
    %c0_i32_0 = arith.constant 0 : i32
    return %arg0, %c0_i32 : i32, i32
  }
  func.func @transform_1(%arg0: i32) -> (i32, i32) {
    %c0_i32 = arith.constant 0 : i32
    %c0_i32_0 = arith.constant 0 : i32
    %c0_i32_1 = arith.constant 0 : i32
    return %c0_i32, %c0_i32_0 : i32, i32
  }
  func.func @transform_2(%arg0: i32) -> (i32, i32) {
    %c0_i32 = arith.constant 0 : i32
    %c0_i32_0 = arith.constant 0 : i32
    %c0_i32_1 = arith.constant 0 : i32
    return %c0_i32, %c0_i32_0 : i32, i32
  }
  func.func @transform_3(%arg0: i32) -> (i32, i32) {
    %c0_i32 = arith.constant 0 : i32
    %c0_i32_0 = arith.constant 0 : i32
    return %arg0, %c0_i32 : i32, i32
  }
}

module attributes {stable_mosaic.version = 11 : i64} {
  func.func @_tail_kernel(%arg0: i32, %arg1: i32, %arg2: memref<1x1x32x32xbf16, #tpu.memory_space<vmem>>, %arg3: memref<1x16x32x32xbf16, #tpu.memory_space<vmem>>, %arg4: memref<1x1x32x32xbf16, #tpu.memory_space<vmem>>, %arg5: memref<1x3x512xf32, #tpu.memory_space<vmem>>, %arg6: memref<9x32x8xbf16, #tpu.memory_space<vmem>>, %arg7: memref<3x1xf32, #tpu.memory_space<vmem>>, %arg8: memref<1x3x512xf32, #tpu.memory_space<vmem>>, %arg9: memref<18x34x32xbf16, #tpu.memory_space<vmem>>) attributes {dimension_semantics = [#tpu.dimension_semantics<parallel>, #tpu.dimension_semantics<parallel>], iteration_bounds = array<i64: 2, 2>, scalar_prefetch = 0 : i64, scratch_operands = 1 : i64, tpu.core_type = #tpu.core_type<tc>, window_params = [{transform_indices = @transform_0, window_bounds = array<i64: 1, 1, 32, 32>}, {transform_indices = @transform_1, window_bounds = array<i64: 1, 16, 32, 32>}, {transform_indices = @transform_2, window_bounds = array<i64: 1, 1, 32, 32>}, {transform_indices = @transform_3, window_bounds = array<i64: 1, 3, 512>}, {pipeline_mode = #tpu.pipeline_mode<synchronous>, transform_indices = @transform_4, window_bounds = array<i64: 9, 32, 8>}, {pipeline_mode = #tpu.pipeline_mode<synchronous>, transform_indices = @transform_5, window_bounds = array<i64: 3, 1>}, {transform_indices = @transform_6, window_bounds = array<i64: 1, 3, 512>}]} {
    %cst = arith.constant 0.000000e+00 : bf16
    %0 = vector.broadcast %cst : bf16 to vector<18x1x32xbf16>
    %c0 = arith.constant 0 : index
    %c0_0 = arith.constant 0 : index
    %c0_1 = arith.constant 0 : index
    %1 = vector.load %arg9[%c0, %c0_0, %c0_1] : memref<18x34x32xbf16, #tpu.memory_space<vmem>>, vector<18x1x32xbf16>
    tpu.vector_store %arg9[%c0, %c0_0, %c0_1], %0 {strides = array<i32>} : memref<18x34x32xbf16, #tpu.memory_space<vmem>>, vector<18x1x32xbf16>,
    %c0_2 = arith.constant 0 : index
    %c33 = arith.constant 33 : index
    %c0_3 = arith.constant 0 : index
    %2 = vector.load %arg9[%c0_2, %c33, %c0_3] : memref<18x34x32xbf16, #tpu.memory_space<vmem>>, vector<18x1x32xbf16>
    tpu.vector_store %arg9[%c0_2, %c33, %c0_3], %0 {strides = array<i32>} : memref<18x34x32xbf16, #tpu.memory_space<vmem>>, vector<18x1x32xbf16>,
    %c0_i32 = arith.constant 0 : i32
    %3 = arith.cmpi sgt, %arg1, %c0_i32 : i32
    %4 = arith.extui %3 : i1 to i32
    %5 = arith.sitofp %4 : i32 to f32
    %6 = arith.truncf %5 : f32 to bf16
    %c1_i32 = arith.constant 1 : i32
    %7 = arith.cmpi slt, %arg1, %c1_i32 : i32
    %8 = arith.extui %7 : i1 to i32
    %9 = arith.sitofp %8 : i32 to f32
    %10 = arith.truncf %9 : f32 to bf16
    %c0_4 = arith.constant 0 : index
    %c0_5 = arith.constant 0 : index
    %c0_6 = arith.constant 0 : index
    %c0_7 = arith.constant 0 : index
    %11 = vector.load %arg2[%c0_4, %c0_5, %c0_6, %c0_7] : memref<1x1x32x32xbf16, #tpu.memory_space<vmem>>, vector<1x1x32x32xbf16>
    %12 = vector.shape_cast %11 : vector<1x1x32x32xbf16> to vector<1x32x32xbf16>
    %13 = vector.broadcast %6 : bf16 to vector<1x32x32xbf16>
    %14 = arith.mulf %12, %13 : vector<1x32x32xbf16>
    %c0_8 = arith.constant 0 : index
    %c1 = arith.constant 1 : index
    %c0_9 = arith.constant 0 : index
    %15 = vector.load %arg9[%c0_8, %c1, %c0_9] : memref<18x34x32xbf16, #tpu.memory_space<vmem>>, vector<1x32x32xbf16>
    tpu.vector_store %arg9[%c0_8, %c1, %c0_9], %14 {strides = array<i32>} : memref<18x34x32xbf16, #tpu.memory_space<vmem>>, vector<1x32x32xbf16>,
    %c0_10 = arith.constant 0 : index
    %c0_11 = arith.constant 0 : index
    %c0_12 = arith.constant 0 : index
    %c0_13 = arith.constant 0 : index
    %16 = vector.load %arg4[%c0_10, %c0_11, %c0_12, %c0_13] : memref<1x1x32x32xbf16, #tpu.memory_space<vmem>>, vector<1x1x32x32xbf16>
    %17 = vector.shape_cast %16 : vector<1x1x32x32xbf16> to vector<1x32x32xbf16>
    %18 = vector.broadcast %10 : bf16 to vector<1x32x32xbf16>
    %19 = arith.mulf %17, %18 : vector<1x32x32xbf16>
    %c17 = arith.constant 17 : index
    %c1_14 = arith.constant 1 : index
    %c0_15 = arith.constant 0 : index
    %20 = vector.load %arg9[%c17, %c1_14, %c0_15] : memref<18x34x32xbf16, #tpu.memory_space<vmem>>, vector<1x32x32xbf16>
    tpu.vector_store %arg9[%c17, %c1_14, %c0_15], %19 {strides = array<i32>} : memref<18x34x32xbf16, #tpu.memory_space<vmem>>, vector<1x32x32xbf16>,
    %c0_16 = arith.constant 0 : index
    %c0_17 = arith.constant 0 : index
    %c0_18 = arith.constant 0 : index
    %c0_19 = arith.constant 0 : index
    %21 = vector.load %arg3[%c0_16, %c0_17, %c0_18, %c0_19] : memref<1x16x32x32xbf16, #tpu.memory_space<vmem>>, vector<1x16x32x32xbf16>
    %22 = vector.shape_cast %21 : vector<1x16x32x32xbf16> to vector<16x32x32xbf16>
    %c1_20 = arith.constant 1 : index
    %c1_21 = arith.constant 1 : index
    %c0_22 = arith.constant 0 : index
    %23 = vector.load %arg9[%c1_20, %c1_21, %c0_22] : memref<18x34x32xbf16, #tpu.memory_space<vmem>>, vector<16x32x32xbf16>
    tpu.vector_store %arg9[%c1_20, %c1_21, %c0_22], %22 {strides = array<i32>} : memref<18x34x32xbf16, #tpu.memory_space<vmem>>, vector<16x32x32xbf16>,
    %cst_23 = arith.constant 0.000000e+00 : f32
    %24 = vector.broadcast %cst_23 : f32 to vector<512x8xf32>
    %c0_24 = arith.constant 0 : index
    %c0_25 = arith.constant 0 : index
    %c0_26 = arith.constant 0 : index
    %25 = vector.load %arg9[%c0_24, %c0_25, %c0_26] : memref<18x34x32xbf16, #tpu.memory_space<vmem>>, vector<16x32x32xbf16>
    %26 = vector.shape_cast %25 : vector<16x32x32xbf16> to vector<512x32xbf16>
    %c0_27 = arith.constant 0 : index
    %c0_28 = arith.constant 0 : index
    %c0_29 = arith.constant 0 : index
    %27 = vector.load %arg6[%c0_27, %c0_28, %c0_29] : memref<9x32x8xbf16, #tpu.memory_space<vmem>>, vector<1x32x8xbf16>
    %28 = vector.shape_cast %27 : vector<1x32x8xbf16> to vector<32x8xbf16>
    %cst_30 = arith.constant dense<0.000000e+00> : vector<512x8xf32>
    %29 = tpu.matmul %26, %28, %cst_30 {dimension_numbers = #tpu.dot_dimension_numbers<[1], [0], [0], [1], [0, 0, 1, 1], [], []>} : vector<512x32xbf16>, vector<32x8xbf16>, vector<512x8xf32> -> vector<512x8xf32>
    %30 = arith.addf %24, %29 : vector<512x8xf32>
    %c0_31 = arith.constant 0 : index
    %c1_32 = arith.constant 1 : index
    %c0_33 = arith.constant 0 : index
    %31 = vector.load %arg9[%c0_31, %c1_32, %c0_33] : memref<18x34x32xbf16, #tpu.memory_space<vmem>>, vector<16x32x32xbf16>
    %32 = vector.shape_cast %31 : vector<16x32x32xbf16> to vector<512x32xbf16>
    %c1_34 = arith.constant 1 : index
    %c0_35 = arith.constant 0 : index
    %c0_36 = arith.constant 0 : index
    %33 = vector.load %arg6[%c1_34, %c0_35, %c0_36] : memref<9x32x8xbf16, #tpu.memory_space<vmem>>, vector<1x32x8xbf16>
    %34 = vector.shape_cast %33 : vector<1x32x8xbf16> to vector<32x8xbf16>
    %cst_37 = arith.constant dense<0.000000e+00> : vector<512x8xf32>
    %35 = tpu.matmul %32, %34, %cst_37 {dimension_numbers = #tpu.dot_dimension_numbers<[1], [0], [0], [1], [0, 0, 1, 1], [], []>} : vector<512x32xbf16>, vector<32x8xbf16>, vector<512x8xf32> -> vector<512x8xf32>
    %36 = arith.addf %30, %35 : vector<512x8xf32>
    %c0_38 = arith.constant 0 : index
    %c2 = arith.constant 2 : index
    %c0_39 = arith.constant 0 : index
    %37 = vector.load %arg9[%c0_38, %c2, %c0_39] : memref<18x34x32xbf16, #tpu.memory_space<vmem>>, vector<16x32x32xbf16>
    %38 = vector.shape_cast %37 : vector<16x32x32xbf16> to vector<512x32xbf16>
    %c2_40 = arith.constant 2 : index
    %c0_41 = arith.constant 0 : index
    %c0_42 = arith.constant 0 : index
    %39 = vector.load %arg6[%c2_40, %c0_41, %c0_42] : memref<9x32x8xbf16, #tpu.memory_space<vmem>>, vector<1x32x8xbf16>
    %40 = vector.shape_cast %39 : vector<1x32x8xbf16> to vector<32x8xbf16>
    %cst_43 = arith.constant dense<0.000000e+00> : vector<512x8xf32>
    %41 = tpu.matmul %38, %40, %cst_43 {dimension_numbers = #tpu.dot_dimension_numbers<[1], [0], [0], [1], [0, 0, 1, 1], [], []>} : vector<512x32xbf16>, vector<32x8xbf16>, vector<512x8xf32> -> vector<512x8xf32>
    %42 = arith.addf %36, %41 : vector<512x8xf32>
    %c1_44 = arith.constant 1 : index
    %c0_45 = arith.constant 0 : index
    %c0_46 = arith.constant 0 : index
    %43 = vector.load %arg9[%c1_44, %c0_45, %c0_46] : memref<18x34x32xbf16, #tpu.memory_space<vmem>>, vector<16x32x32xbf16>
    %44 = vector.shape_cast %43 : vector<16x32x32xbf16> to vector<512x32xbf16>
    %c3 = arith.constant 3 : index
    %c0_47 = arith.constant 0 : index
    %c0_48 = arith.constant 0 : index
    %45 = vector.load %arg6[%c3, %c0_47, %c0_48] : memref<9x32x8xbf16, #tpu.memory_space<vmem>>, vector<1x32x8xbf16>
    %46 = vector.shape_cast %45 : vector<1x32x8xbf16> to vector<32x8xbf16>
    %cst_49 = arith.constant dense<0.000000e+00> : vector<512x8xf32>
    %47 = tpu.matmul %44, %46, %cst_49 {dimension_numbers = #tpu.dot_dimension_numbers<[1], [0], [0], [1], [0, 0, 1, 1], [], []>} : vector<512x32xbf16>, vector<32x8xbf16>, vector<512x8xf32> -> vector<512x8xf32>
    %48 = arith.addf %42, %47 : vector<512x8xf32>
    %c1_50 = arith.constant 1 : index
    %c1_51 = arith.constant 1 : index
    %c0_52 = arith.constant 0 : index
    %49 = vector.load %arg9[%c1_50, %c1_51, %c0_52] : memref<18x34x32xbf16, #tpu.memory_space<vmem>>, vector<16x32x32xbf16>
    %50 = vector.shape_cast %49 : vector<16x32x32xbf16> to vector<512x32xbf16>
    %c4 = arith.constant 4 : index
    %c0_53 = arith.constant 0 : index
    %c0_54 = arith.constant 0 : index
    %51 = vector.load %arg6[%c4, %c0_53, %c0_54] : memref<9x32x8xbf16, #tpu.memory_space<vmem>>, vector<1x32x8xbf16>
    %52 = vector.shape_cast %51 : vector<1x32x8xbf16> to vector<32x8xbf16>
    %cst_55 = arith.constant dense<0.000000e+00> : vector<512x8xf32>
    %53 = tpu.matmul %50, %52, %cst_55 {dimension_numbers = #tpu.dot_dimension_numbers<[1], [0], [0], [1], [0, 0, 1, 1], [], []>} : vector<512x32xbf16>, vector<32x8xbf16>, vector<512x8xf32> -> vector<512x8xf32>
    %54 = arith.addf %48, %53 : vector<512x8xf32>
    %c1_56 = arith.constant 1 : index
    %c2_57 = arith.constant 2 : index
    %c0_58 = arith.constant 0 : index
    %55 = vector.load %arg9[%c1_56, %c2_57, %c0_58] : memref<18x34x32xbf16, #tpu.memory_space<vmem>>, vector<16x32x32xbf16>
    %56 = vector.shape_cast %55 : vector<16x32x32xbf16> to vector<512x32xbf16>
    %c5 = arith.constant 5 : index
    %c0_59 = arith.constant 0 : index
    %c0_60 = arith.constant 0 : index
    %57 = vector.load %arg6[%c5, %c0_59, %c0_60] : memref<9x32x8xbf16, #tpu.memory_space<vmem>>, vector<1x32x8xbf16>
    %58 = vector.shape_cast %57 : vector<1x32x8xbf16> to vector<32x8xbf16>
    %cst_61 = arith.constant dense<0.000000e+00> : vector<512x8xf32>
    %59 = tpu.matmul %56, %58, %cst_61 {dimension_numbers = #tpu.dot_dimension_numbers<[1], [0], [0], [1], [0, 0, 1, 1], [], []>} : vector<512x32xbf16>, vector<32x8xbf16>, vector<512x8xf32> -> vector<512x8xf32>
    %60 = arith.addf %54, %59 : vector<512x8xf32>
    %c2_62 = arith.constant 2 : index
    %c0_63 = arith.constant 0 : index
    %c0_64 = arith.constant 0 : index
    %61 = vector.load %arg9[%c2_62, %c0_63, %c0_64] : memref<18x34x32xbf16, #tpu.memory_space<vmem>>, vector<16x32x32xbf16>
    %62 = vector.shape_cast %61 : vector<16x32x32xbf16> to vector<512x32xbf16>
    %c6 = arith.constant 6 : index
    %c0_65 = arith.constant 0 : index
    %c0_66 = arith.constant 0 : index
    %63 = vector.load %arg6[%c6, %c0_65, %c0_66] : memref<9x32x8xbf16, #tpu.memory_space<vmem>>, vector<1x32x8xbf16>
    %64 = vector.shape_cast %63 : vector<1x32x8xbf16> to vector<32x8xbf16>
    %cst_67 = arith.constant dense<0.000000e+00> : vector<512x8xf32>
    %65 = tpu.matmul %62, %64, %cst_67 {dimension_numbers = #tpu.dot_dimension_numbers<[1], [0], [0], [1], [0, 0, 1, 1], [], []>} : vector<512x32xbf16>, vector<32x8xbf16>, vector<512x8xf32> -> vector<512x8xf32>
    %66 = arith.addf %60, %65 : vector<512x8xf32>
    %c2_68 = arith.constant 2 : index
    %c1_69 = arith.constant 1 : index
    %c0_70 = arith.constant 0 : index
    %67 = vector.load %arg9[%c2_68, %c1_69, %c0_70] : memref<18x34x32xbf16, #tpu.memory_space<vmem>>, vector<16x32x32xbf16>
    %68 = vector.shape_cast %67 : vector<16x32x32xbf16> to vector<512x32xbf16>
    %c7 = arith.constant 7 : index
    %c0_71 = arith.constant 0 : index
    %c0_72 = arith.constant 0 : index
    %69 = vector.load %arg6[%c7, %c0_71, %c0_72] : memref<9x32x8xbf16, #tpu.memory_space<vmem>>, vector<1x32x8xbf16>
    %70 = vector.shape_cast %69 : vector<1x32x8xbf16> to vector<32x8xbf16>
    %cst_73 = arith.constant dense<0.000000e+00> : vector<512x8xf32>
    %71 = tpu.matmul %68, %70, %cst_73 {dimension_numbers = #tpu.dot_dimension_numbers<[1], [0], [0], [1], [0, 0, 1, 1], [], []>} : vector<512x32xbf16>, vector<32x8xbf16>, vector<512x8xf32> -> vector<512x8xf32>
    %72 = arith.addf %66, %71 : vector<512x8xf32>
    %c2_74 = arith.constant 2 : index
    %c2_75 = arith.constant 2 : index
    %c0_76 = arith.constant 0 : index
    %73 = vector.load %arg9[%c2_74, %c2_75, %c0_76] : memref<18x34x32xbf16, #tpu.memory_space<vmem>>, vector<16x32x32xbf16>
    %74 = vector.shape_cast %73 : vector<16x32x32xbf16> to vector<512x32xbf16>
    %c8 = arith.constant 8 : index
    %c0_77 = arith.constant 0 : index
    %c0_78 = arith.constant 0 : index
    %75 = vector.load %arg6[%c8, %c0_77, %c0_78] : memref<9x32x8xbf16, #tpu.memory_space<vmem>>, vector<1x32x8xbf16>
    %76 = vector.shape_cast %75 : vector<1x32x8xbf16> to vector<32x8xbf16>
    %cst_79 = arith.constant dense<0.000000e+00> : vector<512x8xf32>
    %77 = tpu.matmul %74, %76, %cst_79 {dimension_numbers = #tpu.dot_dimension_numbers<[1], [0], [0], [1], [0, 0, 1, 1], [], []>} : vector<512x32xbf16>, vector<32x8xbf16>, vector<512x8xf32> -> vector<512x8xf32>
    %78 = arith.addf %72, %77 : vector<512x8xf32>
    %79 = tpu.iota {dimensions = array<i32: 0>} : vector<8x8xi32>
    %80 = tpu.iota {dimensions = array<i32: 1>} : vector<8x8xi32>
    %81 = arith.cmpi eq, %79, %80 : vector<8x8xi32>
    %82 = arith.extui %81 : vector<8x8xi1> to vector<8x8xi32>
    %83 = arith.sitofp %82 : vector<8x8xi32> to vector<8x8xf32>
    %cst_80 = arith.constant dense<0.000000e+00> : vector<8x512xf32>
    %84 = tpu.matmul %83, %78, %cst_80 {dimension_numbers = #tpu.dot_dimension_numbers<[1], [1], [0], [0], [0, 0, 1, 0], [], []>} : vector<8x8xf32>, vector<512x8xf32>, vector<8x512xf32> -> vector<8x512xf32>
    %85 = vector.extract_strided_slice %84 {offsets = [0, 0], sizes = [3, 512], strides = [1, 1]} : vector<8x512xf32> to vector<3x512xf32>
    %c0_81 = arith.constant 0 : index
    %c0_82 = arith.constant 0 : index
    %86 = vector.load %arg7[%c0_81, %c0_82] : memref<3x1xf32, #tpu.memory_space<vmem>>, vector<3x1xf32>
    %87 = vector.broadcast %86 : vector<3x1xf32> to vector<3x512xf32>
    %88 = arith.addf %85, %87 : vector<3x512xf32>
    %c0_83 = arith.constant 0 : index
    %c0_84 = arith.constant 0 : index
    %c0_85 = arith.constant 0 : index
    %89 = vector.load %arg5[%c0_83, %c0_84, %c0_85] : memref<1x3x512xf32, #tpu.memory_space<vmem>>, vector<1x3x512xf32>
    %90 = vector.shape_cast %89 : vector<1x3x512xf32> to vector<3x512xf32>
    %91 = arith.addf %88, %90 : vector<3x512xf32>
    %c0_86 = arith.constant 0 : index
    %c0_87 = arith.constant 0 : index
    %c0_88 = arith.constant 0 : index
    %92 = vector.load %arg8[%c0_86, %c0_87, %c0_88] : memref<1x3x512xf32, #tpu.memory_space<vmem>>, vector<1x3x512xf32>
    %93 = vector.shape_cast %92 : vector<1x3x512xf32> to vector<3x512xf32>
    %94 = vector.shape_cast %91 : vector<3x512xf32> to vector<1x3x512xf32>
    tpu.vector_store %arg8[%c0_86, %c0_87, %c0_88], %94 {strides = array<i32>} : memref<1x3x512xf32, #tpu.memory_space<vmem>>, vector<1x3x512xf32>,
    return
  }
  func.func @transform_0(%arg0: i32, %arg1: i32) -> (i32, i32, i32, i32) {
    %c16_i32 = arith.constant 16 : i32
    %0 = arith.muli %arg1, %c16_i32 : i32
    %c1_i32 = arith.constant 1 : i32
    %1 = arith.subi %0, %c1_i32 : i32
    %c0_i32 = arith.constant 0 : i32
    %2 = arith.maxsi %1, %c0_i32 : i32
    %c0_i32_0 = arith.constant 0 : i32
    %c0_i32_1 = arith.constant 0 : i32
    %c0_i32_2 = arith.constant 0 : i32
    return %arg0, %2, %c0_i32_0, %c0_i32_1 : i32, i32, i32, i32
  }
  func.func @transform_1(%arg0: i32, %arg1: i32) -> (i32, i32, i32, i32) {
    %c0_i32 = arith.constant 0 : i32
    %c0_i32_0 = arith.constant 0 : i32
    %c0_i32_1 = arith.constant 0 : i32
    return %arg0, %arg1, %c0_i32, %c0_i32_0 : i32, i32, i32, i32
  }
  func.func @transform_2(%arg0: i32, %arg1: i32) -> (i32, i32, i32, i32) {
    %c1_i32 = arith.constant 1 : i32
    %0 = arith.addi %arg1, %c1_i32 : i32
    %c16_i32 = arith.constant 16 : i32
    %1 = arith.muli %0, %c16_i32 : i32
    %c31_i32 = arith.constant 31 : i32
    %2 = arith.minsi %1, %c31_i32 : i32
    %c0_i32 = arith.constant 0 : i32
    %c0_i32_0 = arith.constant 0 : i32
    %c0_i32_1 = arith.constant 0 : i32
    return %arg0, %2, %c0_i32, %c0_i32_0 : i32, i32, i32, i32
  }
  func.func @transform_3(%arg0: i32, %arg1: i32) -> (i32, i32, i32) {
    %c0_i32 = arith.constant 0 : i32
    %c0_i32_0 = arith.constant 0 : i32
    return %arg0, %c0_i32, %arg1 : i32, i32, i32
  }
  func.func @transform_4(%arg0: i32, %arg1: i32) -> (i32, i32, i32) {
    %c0_i32 = arith.constant 0 : i32
    %c0_i32_0 = arith.constant 0 : i32
    %c0_i32_1 = arith.constant 0 : i32
    %c0_i32_2 = arith.constant 0 : i32
    return %c0_i32, %c0_i32_0, %c0_i32_1 : i32, i32, i32
  }
  func.func @transform_5(%arg0: i32, %arg1: i32) -> (i32, i32) {
    %c0_i32 = arith.constant 0 : i32
    %c0_i32_0 = arith.constant 0 : i32
    %c0_i32_1 = arith.constant 0 : i32
    return %c0_i32, %c0_i32_0 : i32, i32
  }
  func.func @transform_6(%arg0: i32, %arg1: i32) -> (i32, i32, i32) {
    %c0_i32 = arith.constant 0 : i32
    %c0_i32_0 = arith.constant 0 : i32
    return %arg0, %c0_i32, %arg1 : i32, i32, i32
  }
}

</mosaic_0001>

<bundles_post_ra>
// kernel: srnet_forward.3
= control target key start
LH: loop header
LB: loop body
LE: loop exit
PB: predicated region body
PF: predicated region fallthrough
CT: control target
= control target key end

     0   :  { %s999_s12 = smov 0   ;;  %s1166_s0 = inlined_call_operand.vmem [shape: bf16[512,27], index: 0, kind: input, shape index: {}]   ;;  %s1167_s1 = inlined_call_operand.vmem [shape: bf16[27,32], index: 1, kind: input, shape index: {}]   ;;  %s1168_s2 = inlined_call_operand.vmem [shape: f32[1,32], index: 2, kind: input, shape index: {}]   ;;  %s1169_s3 = inlined_call_operand.vmem [shape: bf16[512,32], index: 3, kind: output, shape index: {}]  }
   0x1 LB: > { %s775_s13 = sadd.s32 4294967295, %s976_s12   ;;  %p779_p0 = scmp.ge.s32.totalorder %s976_s12, 1  ;;  %s976_s12 = sphi %s999_s12, %s13_s12  }
   0x2   : > { %p138_p1 = scmp.lt.s32.totalorder %s976_s12, 3 }
   0x4   : > { %p139_p2 = pnand %p779_p0, %p138_p1 }
   0x5   : > { %v952_v0 = vld [vmem:[%s1167_s1] sm:$0xff] (!%p139_p2)   ;;  %vm358_vm0 = vcmask (!%p139_p2), 1044480   ;;  %v953_v1 = vld [vmem:[%s1167_s1 + $0x8] sm:$0x3f] (!%p139_p2)   ;;  %vm359_vm1 = vcmask (!%p139_p2), 1045504   ;;  %s780_s18 = sshll.u32 (!%p139_p2), %s775_s13, 5 }
   0x6   : > { %142 = sbr.rel (%p139_p2) target bundleno = 265 (0x109), region = 32  ;;  %903 = vmatprep.subr.bf16.mxu0 (!%p139_p2), %v952_v0  ;;  %939 = vmatprep.subr.bf16.mxu1 (!%p139_p2), %v952_v0  ;;  %v978_v2 = vmov (!%p139_p2), 65535   ;;  %p163_p3 = scmp.lt.s32.totalorder (!%p139_p2), %s780_s18, 63  ;;  %vm309_vm2 = vcmask (!%p139_p2), 220160   ;;  %v1058_v22 = vld [vmem:[%s1168_s2] ss:$0 sm:$0xff] (!%p139_p2) }
   0x7   : > { %904 = vmatpush3.bf16.msra.mxu0 (!%p139_p2), %v952_v0  ;;  %941 = vmatpush3.bf16.msra.mxu1 (!%p139_p2), %v952_v0  ;;  %v360_v3 = vsel (!%p139_p2), %vm358_vm0, 4294967295, %v978_v2  ;;  %vm686_vm3 = vcmask (!%p139_p2), 257024  }
   0x8   : > { %v361_v4 = vsel (!%p139_p2), %vm359_vm1, %v360_v3, 0 }
   0x9   : > { %v363_v5 = vand.u32 (!%p139_p2), %v953_v1, %v361_v4 }
   0xb   : > { %905 = vmatprep.subr.bf16.mxu0 (!%p139_p2), %v363_v5  ;;  %940 = vmatprep.subr.bf16.mxu1 (!%p139_p2), %v363_v5 }
   0xc   : > { %906 = vmatpush3.bf16.msra.mxu0 (!%p139_p2), %v363_v5  ;;  %942 = vmatpush3.bf16.msra.mxu1 (!%p139_p2), %v363_v5 }
   0xd   : > { %s1171_s18 = smov (!%p163_p3, %s780_s18), 63 }
   0xe   : > { %s781_s19 = sshll.u32 %s1171_s18, 2 }
   0xf   : > { %s1021_s22 = scalar_lea.vmem %s1166_s0, %s781_s19  ;;  %s1070_s27 = scalar_lea.vmem %s1169_s3, %s781_s19 }
  0x10   : > { %v954_v6 = vld [vmem:[%s1021_s22] sm:$0xff]   ;;  %v956_v8 = vld [vmem:[%s1021_s22 + $0x8] sm:$0xff]   ;;  %v958_v10 = vld [vmem:[%s1021_s22 + $0x10] sm:$0xff]  }
  0x11   : > { %v955_v7 = vld [vmem:[%s1021_s22 + $0x40] sm:$0xff]   ;;  %907 = vmatprep.mubr.msk.bf16.mxu0 %vm309_vm2, %v954_v6  ;;  %v957_v9 = vld [vmem:[%s1021_s22 + $0x48] sm:$0xff]   ;;  %v959_v11 = vld [vmem:[%s1021_s22 + $0x50] sm:$0xff]  }
  0x12   : > { %923 = vmatprep.mubr.msk.bf16.mxu1 %vm309_vm2, %v955_v7  ;;  %908 = vmatmul.mubr.msk.bf16.vlgmr.msra.gmra.mrb[0].mxu0 %vm309_vm2, %v956_v8  ;;  %v960_v12 = vld [vmem:[%s1021_s22 + $0x18] sm:$0xff]   ;;  %v962_v14 = vld [vmem:[%s1021_s22 + $0x20] sm:$0xff]   ;;  %v964_v16 = vld [vmem:[%s1021_s22 + $0x28] sm:$0xff]  }
  0x13   : > { %924 = vmatmul.mubr.msk.bf16.vlgmr.msra.gmra.mrb[0].mxu1 %vm309_vm2, %v957_v9  ;;  %911 = vmatprep.mubr.msk.bf16.mxu0 %vm309_vm2, %v958_v10  ;;  %v961_v13 = vld [vmem:[%s1021_s22 + $0x58] sm:$0xff]   ;;  %v963_v15 = vld [vmem:[%s1021_s22 + $0x60] sm:$0xff]   ;;  %v965_v17 = vld [vmem:[%s1021_s22 + $0x68] sm:$0xff]  }
  0x14   : > { %927 = vmatprep.mubr.msk.bf16.mxu1 %vm309_vm2, %v959_v11  ;;  %v966_v18 = vld [vmem:[%s1021_s22 + $0x30] sm:$0xff]   ;;  %v968_v20 = vld [vmem:[%s1021_s22 + $0x38] sm:$0xff]  }
  0x15   : > { %v967_v19 = vld [vmem:[%s1021_s22 + $0x70] sm:$0xff]   ;;  %v969_v21 = vld [vmem:[%s1021_s22 + $0x78] sm:$0xff]  }
  0x1a   : > { %912 = vmatmul.mubr.msk.bf16.gmra.mrb[4].mxu0 %vm309_vm2, %v960_v12 }
  0x1b   : > { %928 = vmatmul.mubr.msk.bf16.gmra.mrb[4].mxu1 %vm309_vm2, %v961_v13  ;;  %915 = vmatprep.mubr.msk.bf16.mxu0 %vm309_vm2, %v962_v14 }
  0x1c   : > { %931 = vmatprep.mubr.msk.bf16.mxu1 %vm309_vm2, %v963_v15 }
  0x22   : > { %916 = vmatmul.mubr.msk.bf16.gmra.mrb[8].mxu0 %vm309_vm2, %v964_v16 }
  0x23   : > { %932 = vmatmul.mubr.msk.bf16.gmra.mrb[8].mxu1 %vm309_vm2, %v965_v17  ;;  %919 = vmatprep.mubr.msk.bf16.mxu0 %vm309_vm2, %v966_v18 }
  0x24   : > { %935 = vmatprep.mubr.msk.bf16.mxu1 %vm309_vm2, %v967_v19 }
  0x2a   : > { %920 = vmatmul.mubr.msk.bf16.gmra.mrb[12].mxu0 %vm309_vm2, %v968_v20 }
  0x2b   : > { %936 = vmatmul.mubr.msk.bf16.gmra.mrb[12].mxu1 %vm309_vm2, %v969_v21 }
  0xe5   : > { %v909_v23 = vpop.f32.mrb[0].mxu0 }
  0xe6   : > { %v408_v24 = vadd.f32 %v909_v23, %v1058_v22  ;;  %v925_v25 = vpop.f32.mrb[0].mxu1  ;;  %v399_v26 = vpop.f32.mrb[1].mxu0 }
  0xe7   : > { %v472_v27 = vadd.f32 %v925_v25, %v1058_v22  ;;  %v400_v28 = vadd.f32 %v1058_v22, %v399_v26  ;;  %v463_v29 = vpop.f32.mrb[1].mxu1  ;;  %v910_v30 = vpop.f32.mrb[2].mxu0 }
  0xe8   : > { %v528_v31 = vmul.f32 2.0, %v408_v24  ;;  %v464_v32 = vadd.f32 %v1058_v22, %v463_v29  ;;  %v411_v33 = vadd.f32 %v910_v30, %v1058_v22  ;;  %v926_v34 = vpop.f32.mrb[2].mxu1  ;;  %v402_v35 = vpop.f32.mrb[3].mxu0 }
  0xe9   : > { %v544_v36 = vmul.f32 2.0, %v472_v27  ;;  %v526_v37 = vmul.f32 2.0, %v400_v28  ;;  %v475_v38 = vadd.f32 %v926_v34, %v1058_v22  ;;  %v403_v39 = vadd.f32 %v1058_v22, %v402_v35  ;;  %v466_v40 = vpop.f32.mrb[3].mxu1 }
  0xea   : > { %v855_v41 = vpack.c.bf16 %v528_v31, %v528_v31  ;;  %v542_v42 = vmul.f32 2.0, %v464_v32  ;;  %v529_v43 = vmul.f32 2.0, %v411_v33  ;;  %v467_v44 = vadd.f32 %v1058_v22, %v466_v40 }
  0xeb   : > { %v871_v45 = vpack.c.bf16 %v544_v36, %v544_v36  ;;  %v853_v46 = vpack.c.bf16 %v526_v37, %v526_v37  ;;  %v545_v47 = vmul.f32 2.0, %v475_v38  ;;  %v527_v48 = vmul.f32 2.0, %v403_v39 }
  0xec   : > { %689 = vst.msk [vmem:[%s1070_s27 + $0x8] sm:$0xf] %vm686_vm3, %v855_v41  ;;  %v869_v49 = vpack.c.bf16 %v542_v42, %v542_v42  ;;  %v856_v50 = vpack.c.bf16 %v529_v43, %v529_v43  ;;  %v543_v51 = vmul.f32 2.0, %v467_v44 }
  0xed   : > { %705 = vst.msk [vmem:[%s1070_s27 + $0x48] sm:$0xf] %vm686_vm3, %v871_v45  ;;  %687 = vst.msk [vmem:[%s1070_s27] sm:$0xf] %vm686_vm3, %v853_v46  ;;  %v872_v52 = vpack.c.bf16 %v545_v47, %v545_v47  ;;  %v854_v53 = vpack.c.bf16 %v527_v48, %v527_v48  ;;  %v913_v54 = vpop.f32.mrb[4].mxu0 }
  0xee   : > { %703 = vst.msk [vmem:[%s1070_s27 + $0x40] sm:$0xf] %vm686_vm3, %v869_v49  ;;  %690 = vst.msk [vmem:[%s1070_s27 + $0xc] sm:$0xf] %vm686_vm3, %v856_v50  ;;  %v870_v55 = vpack.c.bf16 %v543_v51, %v543_v51  ;;  %v424_v56 = vadd.f32 %v913_v54, %v1058_v22  ;;  %v929_v57 = vpop.f32.mrb[4].mxu1  ;;  %v415_v58 = vpop.f32.mrb[5].mxu0 }
  0xef   : > { %706 = vst.msk [vmem:[%s1070_s27 + $0x4c] sm:$0xf] %vm686_vm3, %v872_v52  ;;  %688 = vst.msk [vmem:[%s1070_s27 + $0x4] sm:$0xf] %vm686_vm3, %v854_v53  ;;  %v488_v59 = vadd.f32 %v929_v57, %v1058_v22  ;;  %v416_v60 = vadd.f32 %v1058_v22, %v415_v58  ;;  %v479_v61 = vpop.f32.mrb[5].mxu1  ;;  %v914_v62 = vpop.f32.mrb[6].mxu0 }
  0xf0   : > { %704 = vst.msk [vmem:[%s1070_s27 + $0x44] sm:$0xf] %vm686_vm3, %v870_v55  ;;  %v532_v63 = vmul.f32 2.0, %v424_v56  ;;  %v480_v0 = vadd.f32 %v1058_v22, %v479_v61  ;;  %v427_v1 = vadd.f32 %v914_v62, %v1058_v22  ;;  %v930_v2 = vpop.f32.mrb[6].mxu1  ;;  %v418_v3 = vpop.f32.mrb[7].mxu0 }
  0xf1   : > { %v548_v4 = vmul.f32 2.0, %v488_v59  ;;  %v530_v5 = vmul.f32 2.0, %v416_v60  ;;  %v491_v6 = vadd.f32 %v930_v2, %v1058_v22  ;;  %v419_v7 = vadd.f32 %v1058_v22, %v418_v3  ;;  %v482_v8 = vpop.f32.mrb[7].mxu1 }
  0xf2   : > { %v859_v9 = vpack.c.bf16 %v532_v63, %v532_v63  ;;  %v546_v10 = vmul.f32 2.0, %v480_v0  ;;  %v533_v11 = vmul.f32 2.0, %v427_v1  ;;  %v483_v12 = vadd.f32 %v1058_v22, %v482_v8 }
  0xf3   : > { %v875_v13 = vpack.c.bf16 %v548_v4, %v548_v4  ;;  %v857_v14 = vpack.c.bf16 %v530_v5, %v530_v5  ;;  %v549_v15 = vmul.f32 2.0, %v491_v6  ;;  %v531_v16 = vmul.f32 2.0, %v419_v7 }
  0xf4   : > { %693 = vst.msk [vmem:[%s1070_s27 + $0x18] sm:$0xf] %vm686_vm3, %v859_v9  ;;  %v873_v17 = vpack.c.bf16 %v546_v10, %v546_v10  ;;  %v860_v18 = vpack.c.bf16 %v533_v11, %v533_v11  ;;  %v547_v19 = vmul.f32 2.0, %v483_v12 }
  0xf5   : > { %709 = vst.msk [vmem:[%s1070_s27 + $0x58] sm:$0xf] %vm686_vm3, %v875_v13  ;;  %691 = vst.msk [vmem:[%s1070_s27 + $0x10] sm:$0xf] %vm686_vm3, %v857_v14  ;;  %v876_v20 = vpack.c.bf16 %v549_v15, %v549_v15  ;;  %v858_v21 = vpack.c.bf16 %v531_v16, %v531_v16  ;;  %v917_v23 = vpop.f32.mrb[8].mxu0 }
  0xf6   : > { %707 = vst.msk [vmem:[%s1070_s27 + $0x50] sm:$0xf] %vm686_vm3, %v873_v17  ;;  %694 = vst.msk [vmem:[%s1070_s27 + $0x1c] sm:$0xf] %vm686_vm3, %v860_v18  ;;  %v874_v24 = vpack.c.bf16 %v547_v19, %v547_v19  ;;  %v440_v25 = vadd.f32 %v917_v23, %v1058_v22  ;;  %v933_v26 = vpop.f32.mrb[8].mxu1  ;;  %v431_v27 = vpop.f32.mrb[9].mxu0 }
  0xf7   : > { %710 = vst.msk [vmem:[%s1070_s27 + $0x5c] sm:$0xf] %vm686_vm3, %v876_v20  ;;  %692 = vst.msk [vmem:[%s1070_s27 + $0x14] sm:$0xf] %vm686_vm3, %v858_v21  ;;  %v504_v28 = vadd.f32 %v933_v26, %v1058_v22  ;;  %v432_v29 = vadd.f32 %v1058_v22, %v431_v27  ;;  %v495_v30 = vpop.f32.mrb[9].mxu1  ;;  %v918_v31 = vpop.f32.mrb[10].mxu0 }
  0xf8   : > { %708 = vst.msk [vmem:[%s1070_s27 + $0x54] sm:$0xf] %vm686_vm3, %v874_v24  ;;  %v536_v32 = vmul.f32 2.0, %v440_v25  ;;  %v496_v33 = vadd.f32 %v1058_v22, %v495_v30  ;;  %v443_v34 = vadd.f32 %v918_v31, %v1058_v22  ;;  %v934_v35 = vpop.f32.mrb[10].mxu1  ;;  %v434_v36 = vpop.f32.mrb[11].mxu0 }
  0xf9   : > { %v552_v37 = vmul.f32 2.0, %v504_v28  ;;  %v534_v38 = vmul.f32 2.0, %v432_v29  ;;  %v507_v39 = vadd.f32 %v934_v35, %v1058_v22  ;;  %v435_v40 = vadd.f32 %v1058_v22, %v434_v36  ;;  %v498_v41 = vpop.f32.mrb[11].mxu1 }
  0xfa   : > { %v863_v42 = vpack.c.bf16 %v536_v32, %v536_v32  ;;  %v550_v43 = vmul.f32 2.0, %v496_v33  ;;  %v537_v44 = vmul.f32 2.0, %v443_v34  ;;  %v499_v45 = vadd.f32 %v1058_v22, %v498_v41 }
  0xfb   : > { %v879_v46 = vpack.c.bf16 %v552_v37, %v552_v37  ;;  %v861_v47 = vpack.c.bf16 %v534_v38, %v534_v38  ;;  %v553_v48 = vmul.f32 2.0, %v507_v39  ;;  %v535_v49 = vmul.f32 2.0, %v435_v40 }
  0xfc   : > { %697 = vst.msk [vmem:[%s1070_s27 + $0x28] sm:$0xf] %vm686_vm3, %v863_v42  ;;  %v877_v50 = vpack.c.bf16 %v550_v43, %v550_v43  ;;  %v864_v51 = vpack.c.bf16 %v537_v44, %v537_v44  ;;  %v551_v52 = vmul.f32 2.0, %v499_v45 }
  0xfd   : > { %713 = vst.msk [vmem:[%s1070_s27 + $0x68] sm:$0xf] %vm686_vm3, %v879_v46  ;;  %695 = vst.msk [vmem:[%s1070_s27 + $0x20] sm:$0xf] %vm686_vm3, %v861_v47  ;;  %v880_v53 = vpack.c.bf16 %v553_v48, %v553_v48  ;;  %v862_v54 = vpack.c.bf16 %v535_v49, %v535_v49  ;;  %v921_v55 = vpop.f32.mrb[12].mxu0 }
  0xfe   : > { %711 = vst.msk [vmem:[%s1070_s27 + $0x60] sm:$0xf] %vm686_vm3, %v877_v50  ;;  %698 = vst.msk [vmem:[%s1070_s27 + $0x2c] sm:$0xf] %vm686_vm3, %v864_v51  ;;  %v878_v56 = vpack.c.bf16 %v551_v52, %v551_v52  ;;  %v456_v57 = vadd.f32 %v921_v55, %v1058_v22  ;;  %v937_v58 = vpop.f32.mrb[12].mxu1  ;;  %v447_v59 = vpop.f32.mrb[13].mxu0 }
  0xff   : > { %714 = vst.msk [vmem:[%s1070_s27 + $0x6c] sm:$0xf] %vm686_vm3, %v880_v53  ;;  %696 = vst.msk [vmem:[%s1070_s27 + $0x24] sm:$0xf] %vm686_vm3, %v862_v54  ;;  %v520_v60 = vadd.f32 %v937_v58, %v1058_v22  ;;  %v448_v61 = vadd.f32 %v1058_v22, %v447_v59  ;;  %v511_v62 = vpop.f32.mrb[13].mxu1  ;;  %v922_v63 = vpop.f32.mrb[14].mxu0 }
 0x100   : > { %712 = vst.msk [vmem:[%s1070_s27 + $0x64] sm:$0xf] %vm686_vm3, %v878_v56  ;;  %v540_v0 = vmul.f32 2.0, %v456_v57  ;;  %v512_v1 = vadd.f32 %v1058_v22, %v511_v62  ;;  %v459_v2 = vadd.f32 %v922_v63, %v1058_v22  ;;  %v938_v3 = vpop.f32.mrb[14].mxu1  ;;  %v450_v4 = vpop.f32.mrb[15].mxu0 }
 0x101   : > { %v556_v5 = vmul.f32 2.0, %v520_v60  ;;  %v538_v6 = vmul.f32 2.0, %v448_v61  ;;  %v523_v7 = vadd.f32 %v938_v3, %v1058_v22  ;;  %v451_v8 = vadd.f32 %v1058_v22, %v450_v4  ;;  %v514_v9 = vpop.f32.mrb[15].mxu1 }
 0x102   : > { %v867_v10 = vpack.c.bf16 %v540_v0, %v540_v0  ;;  %v554_v11 = vmul.f32 2.0, %v512_v1  ;;  %v541_v12 = vmul.f32 2.0, %v459_v2  ;;  %v515_v13 = vadd.f32 %v1058_v22, %v514_v9 }
 0x103   : > { %v883_v14 = vpack.c.bf16 %v556_v5, %v556_v5  ;;  %v865_v15 = vpack.c.bf16 %v538_v6, %v538_v6  ;;  %v557_v16 = vmul.f32 2.0, %v523_v7  ;;  %v539_v17 = vmul.f32 2.0, %v451_v8 }
 0x104   : > { %701 = vst.msk [vmem:[%s1070_s27 + $0x38] sm:$0xf] %vm686_vm3, %v867_v10  ;;  %v881_v18 = vpack.c.bf16 %v554_v11, %v554_v11  ;;  %v868_v19 = vpack.c.bf16 %v541_v12, %v541_v12  ;;  %v555_v20 = vmul.f32 2.0, %v515_v13 }
 0x105   : > { %717 = vst.msk [vmem:[%s1070_s27 + $0x78] sm:$0xf] %vm686_vm3, %v883_v14  ;;  %699 = vst.msk [vmem:[%s1070_s27 + $0x30] sm:$0xf] %vm686_vm3, %v865_v15  ;;  %v884_v21 = vpack.c.bf16 %v557_v16, %v557_v16  ;;  %v866_v23 = vpack.c.bf16 %v539_v17, %v539_v17 }
 0x106   : > { %715 = vst.msk [vmem:[%s1070_s27 + $0x70] sm:$0xf] %vm686_vm3, %v881_v18  ;;  %702 = vst.msk [vmem:[%s1070_s27 + $0x3c] sm:$0xf] %vm686_vm3, %v868_v19  ;;  %v882_v22 = vpack.c.bf16 %v555_v20, %v555_v20 }
 0x107   : > { %718 = vst.msk [vmem:[%s1070_s27 + $0x7c] sm:$0xf] %vm686_vm3, %v884_v21  ;;  %700 = vst.msk [vmem:[%s1070_s27 + $0x34] sm:$0xf] %vm686_vm3, %v866_v23 }
 0x108   : > { %716 = vst.msk [vmem:[%s1070_s27 + $0x74] sm:$0xf] %vm686_vm3, %v882_v22 }
 0x109 PF: > { %s13_s12 = sadd.s32 1, %s976_s12  }
 0x10a   : > { %p10_p4 = scmp.ge.s32.totalorder %s13_s12, 4  }
 0x10c   :  { %12 = sbr.rel (!%p10_p4) target bundleno = 1 (0x1), region = 62 }

// kernel: srnet_forward.4
= control target key start
LH: loop header
LB: loop body
LE: loop exit
PB: predicated region body
PF: predicated region fallthrough
CT: control target
= control target key end

     0   :  { %s2016_s12 = smov 0   ;;  %s2928_s0 = inlined_call_operand.vmem [shape: bf16[512,32], index: 0, kind: input, shape index: {}]   ;;  %s2929_s1 = inlined_call_operand.vmem [shape: bf16[32,128], index: 1, kind: input, shape index: {}]   ;;  %s2930_s2 = inlined_call_operand.vmem [shape: f32[1,128], index: 2, kind: input, shape index: {}]   ;;  %s2931_s3 = inlined_call_operand.vmem [shape: bf16[512,128], index: 3, kind: output, shape index: {}]  }
   0x1 LB: > { %s1568_s13 = sadd.s32 4294967295, %s1993_s12   ;;  %p1572_p0 = scmp.ge.s32.totalorder %s1993_s12, 1  ;;  %s1993_s12 = sphi %s2016_s12, %s13_s12  }
   0x2   : > { %p138_p1 = scmp.lt.s32.totalorder %s1993_s12, 3 }
   0x4   : > { %p139_p2 = pnand %p1572_p0, %p138_p1 }
   0x6   : > { %142 = sbr.rel (%p139_p2) target bundleno = 471 (0x1d7), region = 32 }
   0xd   : > { %v1840_v0 = vld [vmem:[%s2929_s1] sm:$0xff]   ;;  %s1573_s16 = sshll.u32 %s1568_s13, 5  ;;  %v1841_v1 = vld [vmem:[%s2929_s1 + $0x8] sm:$0xff]   ;;  %vm310_vm0 = vcmask 261120  }
   0xe   : > { %p163_p3 = scmp.lt.s32.totalorder %s1573_s16, 63  ;;  %1791 = vmatprep.subr.bf16.mxu0 %v1840_v0  ;;  %1827 = vmatprep.subr.bf16.mxu1 %v1840_v0  ;;  %v2075_v18 = vld [vmem:[%s2930_s2] ss:$0 sm:$0xff] }
   0xf   : > { %1792 = vmatpush3.bf16.msra.mxu0 %v1840_v0  ;;  %1829 = vmatpush3.bf16.msra.mxu1 %v1840_v0 }
  0x10   : > { %s2952_s16 = smov (!%p163_p3, %s1573_s16), 63  ;;  %1793 = vmatprep.subr.bf16.mxu0 %v1841_v1  ;;  %1828 = vmatprep.subr.bf16.mxu1 %v1841_v1 }
  0x11   : > { %s1574_s19 = sshll.u32 %s2952_s16, 2 }
  0x12   : > { %s2038_s22 = scalar_lea.vmem %s2928_s0, %s1574_s19  ;;  %s2318_s27 = scalar_lea.vmem %s2931_s3, %s1574_s19 }
  0x13   : > { %1794 = vmatpush3.bf16.msra.mxu0 %v1841_v1  ;;  %1830 = vmatpush3.bf16.msra.mxu1 %v1841_v1  ;;  %v1842_v2 = vld [vmem:[%s2038_s22] sm:$0xff]   ;;  %v1844_v4 = vld [vmem:[%s2038_s22 + $0x8] sm:$0xff]   ;;  %v1846_v6 = vld [vmem:[%s2038_s22 + $0x10] sm:$0xff]  }
  0x14   : > { %v1843_v3 = vld [vmem:[%s2038_s22 + $0x40] sm:$0xff]   ;;  %1795 = vmatprep.mubr.msk.bf16.mxu0 %vm310_vm0, %v1842_v2  ;;  %v1845_v5 = vld [vmem:[%s2038_s22 + $0x48] sm:$0xff]   ;;  %v1847_v7 = vld [vmem:[%s2038_s22 + $0x50] sm:$0xff]  }
  0x15   : > { %1811 = vmatprep.mubr.msk.bf16.mxu1 %vm310_vm0, %v1843_v3  ;;  %v1848_v8 = vld [vmem:[%s2038_s22 + $0x18] sm:$0xff]   ;;  %v1850_v10 = vld [vmem:[%s2038_s22 + $0x20] sm:$0xff]   ;;  %v1852_v12 = vld [vmem:[%s2038_s22 + $0x28] sm:$0xff]  }
  0x16   : > { %1796 = vmatmul.mubr.msk.bf16.vlgmr.msra.gmra.mrb[0].mxu0 %vm310_vm0, %v1844_v4  ;;  %1812 = vmatmul.mubr.msk.bf16.vlgmr.msra.gmra.mrb[0].mxu1 %vm310_vm0, %v1845_v5  ;;  %v1849_v9 = vld [vmem:[%s2038_s22 + $0x58] sm:$0xff]   ;;  %v1851_v11 = vld [vmem:[%s2038_s22 + $0x60] sm:$0xff]   ;;  %v1853_v13 = vld [vmem:[%s2038_s22 + $0x68] sm:$0xff]  }
  0x17   : > { %1799 = vmatprep.mubr.msk.bf16.mxu0 %vm310_vm0, %v1846_v6  ;;  %1815 = vmatprep.mubr.msk.bf16.mxu1 %vm310_vm0, %v1847_v7  ;;  %v1854_v14 = vld [vmem:[%s2038_s22 + $0x30] sm:$0xff]   ;;  %v1856_v16 = vld [vmem:[%s2038_s22 + $0x38] sm:$0xff]  }
  0x18   : > { %v1855_v15 = vld [vmem:[%s2038_s22 + $0x70] sm:$0xff]   ;;  %v1857_v17 = vld [vmem:[%s2038_s22 + $0x78] sm:$0xff]  }
  0x1e   : > { %1800 = vmatmul.mubr.msk.bf16.gmra.mrb[4].mxu0 %vm310_vm0, %v1848_v8  ;;  %1816 = vmatmul.mubr.msk.bf16.gmra.mrb[4].mxu1 %vm310_vm0, %v1849_v9 }
  0x1f   : > { %1803 = vmatprep.mubr.msk.bf16.mxu0 %vm310_vm0, %v1850_v10  ;;  %1819 = vmatprep.mubr.msk.bf16.mxu1 %vm310_vm0, %v1851_v11  ;;  %v2932_v10 = vmov 1.0  }
  0x26   : > { %1804 = vmatmul.mubr.msk.bf16.gmra.mrb[8].mxu0 %vm310_vm0, %v1852_v12  ;;  %1820 = vmatmul.mubr.msk.bf16.gmra.mrb[8].mxu1 %vm310_vm0, %v1853_v13 }
  0x27   : > { %1807 = vmatprep.mubr.msk.bf16.mxu0 %vm310_vm0, %v1854_v14  ;;  %1823 = vmatprep.mubr.msk.bf16.mxu1 %vm310_vm0, %v1855_v15 }
  0x2e   : > { %1808 = vmatmul.mubr.msk.bf16.gmra.mrb[12].mxu0 %vm310_vm0, %v1856_v16  ;;  %1824 = vmatmul.mubr.msk.bf16.gmra.mrb[12].mxu1 %vm310_vm0, %v1857_v17 }
  0xe9   : > { %v1797_v19 = vpop.f32.mrb[0].mxu0  ;;  %v1813_v21 = vpop.f32.mrb[0].mxu1 }
  0xea   : > { %v402_v20 = vadd.f32 %v1797_v19, %v2075_v18  ;;  %v393_v22 = vpop.f32.mrb[1].mxu0  ;;  %v466_v23 = vadd.f32 %v1813_v21, %v2075_v18  ;;  %v457_v25 = vpop.f32.mrb[1].mxu1 }
  0xeb   : > { %v394_v24 = vadd.f32 %v2075_v18, %v393_v22  ;;  %v1798_v26 = vpop.f32.mrb[2].mxu0  ;;  %v2081_v28 = vadd.f32 %v2075_v18, %v457_v25  ;;  %v1814_v29 = vpop.f32.mrb[2].mxu1 }
  0xec   : > { %v554_v27 = vmul.f32 0.70710677, %v402_v20  ;;  %v396_v30 = vpop.f32.mrb[3].mxu0  ;;  %v570_v31 = vmul.f32 0.70710677, %v466_v23  ;;  %v460_v36 = vpop.f32.mrb[3].mxu1  ;;  %v2092_v46 = vadd.f32 %v1798_v26, %v2075_v18  ;;  %v2116_v63 = vadd.f32 %v1814_v29, %v2075_v18 }
  0xed   : > { %v552_v32 = vmul.f32 0.70710677, %v394_v24  ;;  %v2084_v34 = vmul.f32 0.70710677, %v2081_v28  ;;  %v2104_v56 = vmul.f32 0.5, %v402_v20  ;;  %v2108_v60 = vmul.f32 0.5, %v466_v23 }
  0xee   : > { %v650_v33 = vand.u32 2147483647, %v554_v27  ;;  %v666_v35 = vand.u32 2147483647, %v570_v31  ;;  %v2110_v61 = vmul.f32 0.5, %v394_v24  ;;  %vm586_vm1 = vcmp.lt.f32.partialorder %v554_v27, 0.0 }
  0xef   : > { %v648_v39 = vand.u32 2147483647, %v552_v32  ;;  %v664_v41 = vand.u32 2147483647, %v2084_v34  ;;  %v2113_v62 = vmul.f32 0.70710677, %v2092_v46  ;;  %v2119_v1 = vadd.f32 %v2075_v18, %v396_v30 }
  0xf0   : > { %v682_v37 = vmul.f32 0.3275911, %v650_v33  ;;  %v698_v38 = vmul.f32 0.3275911, %v666_v35  ;;  %v1066_v49 = vsub.f32 0.0, %v650_v33  ;;  %v1082_v52 = vsub.f32 0.0, %v666_v35 }
  0xf1   : > { %v2087_v42 = vpop.f32.mrb[4].mxu0  ;;  %v2089_v43 = vpop.f32.mrb[4].mxu1  ;;  %v680_v45 = vmul.f32 0.3275911, %v648_v39  ;;  %v696_v50 = vmul.f32 0.3275911, %v664_v41  ;;  %v2139_v14 = vadd.f32 %v2075_v18, %v460_v36 }
  0xf2   : > { %v714_v40 = vadd.f32 1.0, %v682_v37  ;;  %v730_v44 = vadd.f32 1.0, %v698_v38  ;;  %v2094_v47 = vpop.f32.mrb[5].mxu0  ;;  %v2096_v48 = vpop.f32.mrb[5].mxu1  ;;  %v1064_v57 = vsub.f32 0.0, %v648_v39  ;;  %v1098_v0 = vmul.f32 %v1066_v49, %v650_v33 }
  0xf3   : > { %v2098_v51 = vpop.f32.mrb[6].mxu0  ;;  %v712_v53 = vadd.f32 1.0, %v680_v45  ;;  %v2100_v54 = vpop.f32.mrb[6].mxu1  ;;  %v728_v58 = vadd.f32 1.0, %v696_v50  ;;  %vm602_vm2 = vcmp.lt.f32.partialorder %v570_v31, 0.0  ;;  %v1114_v2 = vmul.f32 %v1082_v52, %v666_v35 }
  0xf4   : > { %1858 = vrcp.f32 %v714_v40  ;;  %v2102_v55 = vpop.f32.mrb[7].mxu0  ;;  %v2106_v59 = vpop.f32.mrb[7].mxu1  ;;  %vm584_vm3 = vcmp.lt.f32.partialorder %v552_v32, 0.0  ;;  %v651_v3 = vand.u32 2147483647, %v2113_v62  ;;  %v1096_v5 = vmul.f32 %v1064_v57, %v648_v39 }
  0xf5   : > { %1860 = vrcp.f32 %v730_v44  ;;  %v1080_v6 = vsub.f32 0.0, %v664_v41  ;;  %v2125_v7 = vmul.f32 0.70710677, %v2116_v63  ;;  %v2133_v11 = vsel %vm586_vm1, -1.0, %v2932_v10 }
  0xf6   : > { %1862 = vrcp.f32 %v712_v53  ;;  %v683_v12 = vmul.f32 0.3275911, %v651_v3  ;;  %v2136_v13 = vmul.f32 0.70710677, %v2119_v1  ;;  %v1132_v16 = vmul.f32 1.442695, %v1098_v0 }
  0xf7   : > { %1864 = vrcp.f32 %v728_v58  ;;  %v2145_v17 = vsel %vm602_vm2, -1.0, %v2932_v10  ;;  %v2149_v19 = vsel %vm584_vm3, -1.0, %v2932_v10  ;;  %v667_v20 = vand.u32 2147483647, %v2125_v7 }
  0xf8   : > { %v1164_v21 = vmul.f32 1.442695, %v1114_v2  ;;  %vm600_vm4 = vcmp.lt.f32.partialorder %v2084_v34, 0.0  ;;  %v715_v22 = vadd.f32 1.0, %v683_v12  ;;  %v1128_v26 = vmul.f32 1.442695, %v1096_v5 }
  0xf9   : > { %v2122_v4 = vpop.f32.mrb[8].mxu0  ;;  %v2127_v8 = vpop.f32.mrb[8].mxu1  ;;  %v1112_v27 = vmul.f32 %v1080_v6, %v664_v41  ;;  %v699_v29 = vmul.f32 0.3275911, %v667_v20  ;;  %v2160_v30 = vand.u32 2147483647, %v2136_v13 }
  0xfa   : > { %v2129_v9 = vpop.f32.mrb[9].mxu0  ;;  %v2141_v15 = vpop.f32.mrb[9].mxu1  ;;  %1866 = vrcp.f32 %v715_v22  ;;  %v1067_v33 = vsub.f32 0.0, %v651_v3  ;;  %v2166_v35 = vmul.f32 0.70710677, %v2139_v14  ;;  %v2177_v44 = vsel %vm600_vm4, -1.0, %v2932_v10 }
  0xfb   : > { %v2153_v23 = vpop.f32.mrb[10].mxu0  ;;  %v2155_v24 = vpop.f32.mrb[10].mxu1  ;;  %1868 = vpow2.f32 %v1132_v16  ;;  %v731_v38 = vadd.f32 1.0, %v699_v29  ;;  %v681_v39 = vmul.f32 0.3275911, %v2160_v30  ;;  %v2180_v45 = vmul.f32 0.5, %v2092_v46 }
  0xfc   : > { %2934 = vst [vmem:[#allocation2_spill] sm:$0xff] %v2153_v23  ;;  %2935 = vst [vmem:[#allocation3_spill] sm:$0xff] %v2155_v24  ;;  %v2168_v36 = vpop.f32.mrb[11].mxu0  ;;  %v2172_v40 = vpop.f32.mrb[11].mxu1  ;;  %1870 = vpow2.f32 %v1164_v21  ;;  %v2186_v53 = vmul.f32 1.442695, %v1112_v27  ;;  %v1099_v12 = vmul.f32 %v1067_v33, %v651_v3 }
  0xfd   : > { %2936 = vst [vmem:[#allocation4_spill] sm:$0xff] %v2168_v36  ;;  %2937 = vst [vmem:[#allocation5_spill] sm:$0xff] %v2172_v40  ;;  %1872 = vrcp.f32 %v731_v38  ;;  %v713_v57 = vadd.f32 1.0, %v681_v39  ;;  %v2193_v2 = vand.u32 2147483647, %v2166_v35  ;;  %vm587_vm5 = vcmp.lt.f32.partialorder %v2113_v62, 0.0 }
  0xfe   : > { %v2157_v25 = vpop.eup %1858  ;;  %1874 = vpow2.f32 %v1128_v26  ;;  %v1083_v16 = vsub.f32 0.0, %v667_v20  ;;  %v2203_v26 = vmul.f32 0.5, %v2116_v63  ;;  %v2213_v33 = vsel %vm587_vm5, -1.0, %v2932_v10 }
  0xff   : > { %v2162_v31 = vpop.eup %1860  ;;  %v778_v32 = vmul.f32 1.0614054, %v2157_v25  ;;  %1876 = vrcp.f32 %v713_v57  ;;  %vm603_vm6 = vcmp.lt.f32.partialorder %v2125_v7, 0.0  ;;  %vm585_vm7 = vcmp.lt.f32.partialorder %v2136_v13, 0.0 }
 0x100   : > { %v794_v37 = vmul.f32 1.0614054, %v2162_v31  ;;  %v2184_v50 = vpop.eup %1862  ;;  %vm601_vm8 = vcmp.lt.f32.partialorder %v2166_v35, 0.0  ;;  %v537_v35 = vmul.f32 0.5, %v2139_v14 }
 0x101   : > { %v810_v41 = vadd.f32 -1.4531521, %v778_v32  ;;  %v2182_v49 = vpop.f32.mrb[12].mxu0  ;;  %v2188_v58 = vpop.f32.mrb[12].mxu1  ;;  %v776_v34 = vmul.f32 1.0614054, %v2184_v50 }
 0x102   : > { %2938 = vst [vmem:[#allocation6_spill] sm:$0xff] %v2182_v49  ;;  %v826_v52 = vadd.f32 -1.4531521, %v794_v37  ;;  %2939 = vst [vmem:[#allocation7_spill] sm:$0xff] %v2188_v58  ;;  %v2195_v46 = vpop.f32.mrb[13].mxu0  ;;  %v2197_v5 = vpop.eup %1864  ;;  %v2208_v37 = vadd.f32 %v2087_v42, %v2075_v18 }
 0x103   : > { %v842_v0 = vmul.f32 %v2157_v25, %v810_v41  ;;  %2940 = vst [vmem:[#allocation8_spill] sm:$0xff] %v2195_v46  ;;  %v808_v22 = vadd.f32 -1.4531521, %v776_v34  ;;  %v792_v27 = vmul.f32 1.0614054, %v2197_v5 }
 0x104   : > { %v858_v6 = vmul.f32 %v2162_v31, %v826_v52  ;;  %v697_v32 = vmul.f32 0.3275911, %v2193_v2  ;;  %v1134_v41 = vmul.f32 1.442695, %v1099_v12  ;;  %v1115_v52 = vmul.f32 %v1083_v16, %v667_v20  ;;  %v2216_v57 = vpop.eup %1866 }
 0x105   : > { %v874_v21 = vadd.f32 1.4214138, %v842_v0  ;;  %v840_v62 = vmul.f32 %v2184_v50, %v808_v22  ;;  %v824_v3 = vadd.f32 -1.4531521, %v792_v27  ;;  %v779_v22 = vmul.f32 1.0614054, %v2216_v57 }
 0x106   : > { %v890_v29 = vadd.f32 1.4214138, %v858_v6  ;;  %v729_v63 = vadd.f32 1.0, %v697_v32  ;;  %v1065_v6 = vsub.f32 0.0, %v2160_v30  ;;  %v2222_v27 = vmul.f32 0.70710677, %v2208_v37 }
 0x107   : > { %v906_v38 = vmul.f32 %v2157_v25, %v874_v21  ;;  %v872_v34 = vadd.f32 1.4214138, %v840_v62  ;;  %v856_v42 = vmul.f32 %v2197_v5, %v824_v3  ;;  %v1869_v21 = vpop.eup %1868  ;;  %v2227_v32 = vmul.f32 0.5, %v2119_v1 }
 0x108   : > { %v922_v39 = vmul.f32 %v2162_v31, %v890_v29  ;;  %1878 = vrcp.f32 %v729_v63  ;;  %v1871_v29 = vpop.eup %1870  ;;  %v2235_v63 = vand.u32 2147483647, %v2222_v27  ;;  %v1097_v40 = vmul.f32 %v1065_v6, %v2160_v30 }
 0x109   : > { %v938_v0 = vadd.f32 -0.28449672, %v906_v38  ;;  %v904_v12 = vmul.f32 %v2184_v50, %v872_v34  ;;  %v888_v16 = vadd.f32 1.4214138, %v856_v42  ;;  %v2229_v38 = vpop.f32.mrb[13].mxu1  ;;  %v2231_v62 = vpop.eup %1872  ;;  %1880 = vpow2.f32 %v1134_v41 }
 0x10a   : > { %v954_v46 = vadd.f32 -0.28449672, %v922_v39  ;;  %2941 = vst [vmem:[#allocation9_spill] sm:$0xff] %v2229_v38  ;;  %v811_v39 = vadd.f32 -1.4531521, %v779_v22  ;;  %v1875_v10 = vpop.eup %1874  ;;  %v1081_v30 = vsub.f32 0.0, %v2193_v2  ;;  %1882 = vpow2.f32 %v2186_v53 }
 0x10b   : > { %v970_v20 = vmul.f32 %v2157_v25, %v938_v0  ;;  %v936_v0 = vadd.f32 -0.28449672, %v904_v12  ;;  %v920_v34 = vmul.f32 %v2197_v5, %v888_v16  ;;  %v795_v42 = vmul.f32 1.0614054, %v2231_v62  ;;  %v2241_v36 = vpop.eup %1876 }
 0x10c   : > { %v986_v3 = vmul.f32 %v2162_v31, %v954_v46  ;;  %v843_v49 = vmul.f32 %v2216_v57, %v811_v39  ;;  %v1166_v38 = vmul.f32 1.442695, %v1115_v52  ;;  %v777_v16 = vmul.f32 1.0614054, %v2241_v36 }
 0x10d   : > { %v1002_v58 = vadd.f32 0.2548296, %v970_v20  ;;  %v968_v41 = vmul.f32 %v2184_v50, %v936_v0  ;;  %v952_v22 = vadd.f32 -0.28449672, %v920_v34  ;;  %v827_v24 = vadd.f32 -1.4531521, %v795_v42 }
 0x10e   : > { %v1018_v1 = vadd.f32 0.2548296, %v986_v3  ;;  %v875_v12 = vadd.f32 1.4214138, %v843_v49  ;;  %v686_v3 = vmul.f32 0.3275911, %v2235_v63  ;;  %1884 = vpow2.f32 %v1166_v38 }
 0x10f   : > { %v1034_v46 = vmul.f32 %v2157_v25, %v1002_v58  ;;  %v1000_v39 = vadd.f32 0.2548296, %v968_v41  ;;  %v859_v52 = vmul.f32 %v2231_v62, %v827_v24  ;;  %v809_v58 = vadd.f32 -1.4531521, %v777_v16 }
 0x110   : > { %v1050_v20 = vmul.f32 %v2162_v31, %v1018_v1  ;;  %v907_v25 = vmul.f32 %v2216_v57, %v875_v12  ;;  %v718_v6 = vadd.f32 1.0, %v686_v3  ;;  %v984_v0 = vmul.f32 %v2197_v5, %v952_v22 }
 0x111   : > { %v1194_v23 = vmul.f32 %v1869_v21, %v1034_v46  ;;  %v891_v31 = vadd.f32 1.4214138, %v859_v52  ;;  %v1130_v49 = vmul.f32 1.442695, %v1097_v40  ;;  %v841_v1 = vmul.f32 %v2241_v36, %v809_v58 }
 0x112   : > { %v2253_v34 = vpop.eup %1878  ;;  %v1210_v42 = vmul.f32 %v1871_v29, %v1050_v20  ;;  %v939_v21 = vadd.f32 -0.28449672, %v907_v25  ;;  %1886 = vrcp.f32 %v718_v6  ;;  %v1032_v46 = vmul.f32 %v2184_v50, %v1000_v39  ;;  %v2262_v29 = vpop.f32.mrb[14].mxu0 }
 0x113   : > { %v1226_v24 = vsub.f32 1.0, %v1194_v23  ;;  %v923_v53 = vmul.f32 %v2231_v62, %v891_v31  ;;  %v1113_v41 = vmul.f32 %v1081_v30, %v2193_v2  ;;  %v1881_v12 = vpop.eup %1880  ;;  %v873_v40 = vadd.f32 1.4214138, %v841_v1 }
 0x114   : > { %v971_v22 = vmul.f32 %v2216_v57, %v939_v21  ;;  %v793_v38 = vmul.f32 1.0614054, %v2253_v34  ;;  %v1016_v20 = vadd.f32 0.2548296, %v984_v0  ;;  %1888 = vpow2.f32 %v1130_v49  ;;  %v2274_v49 = vpop.f32.mrb[14].mxu1  ;;  %v1883_v1 = vpop.eup %1882 }
 0x115   : > { %v955_v16 = vadd.f32 -0.28449672, %v923_v53  ;;  %v1242_v23 = vsub.f32 1.0, %v1210_v42  ;;  %v905_v3 = vmul.f32 %v2241_v36, %v873_v40  ;;  %v1258_v39 = vmul.f32 %v1226_v24, %v2133_v11 }
 0x116   : > { %v1003_v50 = vadd.f32 0.2548296, %v971_v22  ;;  %v825_v2 = vadd.f32 -1.4531521, %v793_v38  ;;  %v1192_v52 = vmul.f32 %v1875_v10, %v1032_v46  ;;  %v1162_v25 = vmul.f32 1.442695, %v1113_v41 }
 0x117   : > { %v987_v30 = vmul.f32 %v2231_v62, %v955_v16  ;;  %v937_v6 = vadd.f32 -0.28449672, %v905_v3  ;;  %v2272_v31 = vadd.f32 %v2089_v43, %v2075_v18  ;;  %v1048_v42 = vmul.f32 %v2197_v5, %v1016_v20 }
 0x118   : > { %v1035_v58 = vmul.f32 %v2216_v57, %v1003_v50  ;;  %v857_v0 = vmul.f32 %v2253_v34, %v825_v2  ;;  %v2942_v21 = vmov 1.0   ;;  %v1274_v24 = vmul.f32 %v1242_v23, %v2145_v17  ;;  %v1885_v41 = vpop.eup %1884 }
 0x119   : > { %v635_v10 = vsel %vm603_vm6, -1.0, %v2942_v21  ;;  %v1019_v11 = vadd.f32 0.2548296, %v987_v30  ;;  %v617_v57 = vsel %vm585_vm7, -1.0, %v2942_v21  ;;  %v969_v43 = vmul.f32 %v2241_v36, %v937_v6 }
 0x11a   : > { %v1195_v46 = vmul.f32 %v1881_v12, %v1035_v58  ;;  %v889_v53 = vadd.f32 1.4214138, %v857_v0  ;;  %v1290_v22 = vadd.f32 1.0, %v1258_v39  ;;  %v1224_v40 = vsub.f32 1.0, %v1192_v52 }
 0x11b   : > { %v1051_v5 = vmul.f32 %v2231_v62, %v1019_v11  ;;  %1890 = vpow2.f32 %v1162_v25  ;;  %v1001_v20 = vadd.f32 0.2548296, %v969_v43  ;;  %v2290_v16 = vmul.f32 0.70710677, %v2272_v31 }
 0x11c   : > { %v2286_v7 = vpop.eup %1886  ;;  %v1227_v38 = vsub.f32 1.0, %v1195_v46  ;;  %v921_v13 = vmul.f32 %v2253_v34, %v889_v53  ;;  %v1208_v17 = vmul.f32 %v1883_v1, %v1048_v42  ;;  %v2295_v50 = vadd.f32 %v2075_v18, %v2094_v47  ;;  %v2305_v1 = vpop.f32.mrb[15].mxu0 }
 0x11d   : > { %v1211_v12 = vmul.f32 %v1885_v41, %v1051_v5  ;;  %v782_v23 = vmul.f32 1.0614054, %v2286_v7  ;;  %v1306_v3 = vadd.f32 1.0, %v1274_v24  ;;  %v1033_v2 = vmul.f32 %v2241_v36, %v1001_v20 }
 0x11e   : > { %v1259_v62 = vmul.f32 %v1227_v38, %v2213_v33  ;;  %v953_v39 = vadd.f32 -0.28449672, %v921_v13  ;;  %v1889_v52 = vpop.eup %1888  ;;  %v1322_v30 = vmul.f32 %v1290_v22, %v2104_v56  ;;  %v1256_v25 = vmul.f32 %v1224_v40, %v2149_v19 }
 0x11f   : > { %v1243_v58 = vsub.f32 1.0, %v1211_v12  ;;  %v814_v6 = vadd.f32 -1.4531521, %v782_v23  ;;  %v1193_v42 = vmul.f32 %v1889_v52, %v1033_v2  ;;  %v2303_v47 = vand.u32 2147483647, %v2290_v16 }
 0x120   : > { %v1291_v0 = vadd.f32 1.0, %v1259_v62  ;;  %v985_v11 = vmul.f32 %v2253_v34, %v953_v39  ;;  %v1240_v33 = vsub.f32 1.0, %v1208_v17  ;;  %v2309_v56 = vmul.f32 0.70710677, %v2295_v50  ;;  %v2326_v62 = vpop.f32.mrb[15].mxu1 }
 0x121   : > { %v1275_v36 = vmul.f32 %v1243_v58, %v635_v10  ;;  %v846_v24 = vmul.f32 %v2286_v7, %v814_v6  ;;  %v1225_v46 = vsub.f32 1.0, %v1193_v42  ;;  %v702_v53 = vmul.f32 0.3275911, %v2303_v47 }
 0x122   : > { %v1323_v19 = vmul.f32 %v1291_v0, %v2180_v45  ;;  %v1017_v43 = vadd.f32 0.2548296, %v985_v11  ;;  %v1288_v41 = vadd.f32 1.0, %v1256_v25  ;;  %v1338_v13 = vmul.f32 %v1306_v3, %v2108_v60 }
 0x123   : > { %v1307_v10 = vadd.f32 1.0, %v1275_v36  ;;  %v878_v22 = vadd.f32 1.4214138, %v846_v24  ;;  %v1257_v5 = vmul.f32 %v1225_v46, %v617_v57  ;;  %v734_v38 = vadd.f32 1.0, %v702_v53 }
 0x124   : > { %v1686_v40 = vpack.c.bf16 %v1323_v19, %v1322_v30  ;;  %v1049_v45 = vmul.f32 %v2253_v34, %v1017_v43  ;;  %v1272_v17 = vmul.f32 %v1240_v33, %v2177_v44  ;;  %v1070_v23 = vsub.f32 0.0, %v2235_v63 }
 0x125   : > { %v1891_v20 = vpop.eup %1890  ;;  %v1339_v12 = vmul.f32 %v1307_v10, %v2203_v26  ;;  %v1289_v2 = vadd.f32 1.0, %v1257_v5  ;;  %1892 = vrcp.f32 %v734_v38  ;;  %v652_v57 = vand.u32 2147483647, %v2309_v56 }
 0x126   : > { %1758 = vst [vmem:[%s2318_s27 + $0x8] sm:$0xff] %v1686_v40   ;;  %v1209_v39 = vmul.f32 %v1891_v20, %v1049_v45  ;;  %v1320_v34 = vmul.f32 %v1288_v41, %v2110_v61  ;;  %v2333_v60 = vadd.f32 %v2075_v18, %v2096_v48  ;;  %v910_v3 = vmul.f32 %v2286_v7, %v878_v22 }
 0x127   : > { %v1726_v52 = vpack.c.bf16 %v1339_v12, %v1338_v13  ;;  %v1321_v44 = vmul.f32 %v1289_v2, %v2227_v32  ;;  %v684_v30 = vmul.f32 0.3275911, %v652_v57  ;;  %v1304_v25 = vadd.f32 1.0, %v1272_v17 }
 0x128   : > { %v1241_v26 = vsub.f32 1.0, %v1209_v39  ;;  %v633_v58 = vsel %vm601_vm8, -1.0, %v2942_v21  ;;  %v2342_v61 = vmul.f32 0.70710677, %v2333_v60  ;;  %v1102_v48 = vmul.f32 %v1070_v23, %v2235_v63 }
 0x129   : > { %1766 = vst [vmem:[%s2318_s27 + $0x48] sm:$0xff] %v1726_v52   ;;  %v1681_v6 = vpack.c.bf16 %v1321_v44, %v1320_v34  ;;  %v716_v42 = vadd.f32 1.0, %v684_v30  ;;  %v536_v32 = vmul.f32 0.5, %v2081_v28  ;;  %v2351_v33 = vadd.f32 %v2098_v51, %v2075_v18 }
 0x12a   : > { %v1273_v0 = vmul.f32 %v1241_v26, %v633_v58  ;;  %v2347_v11 = vand.u32 2147483647, %v2342_v61  ;;  %v942_v24 = vadd.f32 -0.28449672, %v910_v3  ;;  %v1140_v43 = vmul.f32 1.442695, %v1102_v48 }
 0x12b   : > { %1682 = vst [vmem:[%s2318_s27] sm:$0xff] %v1681_v6   ;;  %1894 = vrcp.f32 %v716_v42  ;;  %v1336_v19 = vmul.f32 %v1304_v25, %v536_v32  ;;  %v2357_v28 = vmul.f32 0.70710677, %v2351_v33  ;;  %v2361_v53 = vadd.f32 %v2100_v54, %v2075_v18 }
 0x12c   : > { %v1305_v36 = vadd.f32 1.0, %v1273_v0  ;;  %v700_v63 = vmul.f32 0.3275911, %v2347_v11  ;;  %v974_v10 = vmul.f32 %v2286_v7, %v942_v24  ;;  %v1086_v22 = vsub.f32 0.0, %v2303_v47 }
 0x12d   : > { %v2368_v40 = vand.u32 2147483647, %v2357_v28  ;;  %vm590_vm9 = vcmp.lt.f32.partialorder %v2222_v27, 0.0  ;;  %v2374_v54 = vadd.f32 %v2075_v18, %v2102_v55  ;;  %v1068_v45 = vsub.f32 0.0, %v652_v57 }
 0x12e   : > { %v1337_v46 = vmul.f32 %v1305_v36, %v537_v35  ;;  %v732_v51 = vadd.f32 1.0, %v700_v63  ;;  %v2379_v20 = vmul.f32 0.70710677, %v2361_v53  ;;  %vm606_vm10 = vcmp.lt.f32.partialorder %v2290_v16, 0.0 }
 0x12f   : > { %v2363_v41 = vpop.eup %1892  ;;  %v687_v38 = vmul.f32 0.3275911, %v2368_v40  ;;  %v1006_v17 = vadd.f32 0.2548296, %v974_v10  ;;  %v1118_v12 = vmul.f32 %v1086_v22, %v2303_v47  ;;  %v2385_v55 = vmul.f32 0.5, %v2208_v37 }
 0x130   : > { %v1721_v14 = vpack.c.bf16 %v1337_v46, %v1336_v19  ;;  %v798_v5 = vmul.f32 1.0614054, %v2363_v41  ;;  %1896 = vrcp.f32 %v732_v51  ;;  %v671_v2 = vand.u32 2147483647, %v2379_v20 }
 0x131   : > { %1898 = vpow2.f32 %v1140_v43  ;;  %v719_v23 = vadd.f32 1.0, %v687_v38  ;;  %v2390_v39 = vsel %vm590_vm9, -1.0, %v2942_v21  ;;  %v2394_v52 = vmul.f32 0.70710677, %v2374_v54 }
 0x132   : > { %1765 = vst [vmem:[%s2318_s27 + $0x40] sm:$0xff] %v1721_v14   ;;  %v830_v13 = vadd.f32 -1.4531521, %v798_v5  ;;  %v2399_v47 = vmul.f32 0.5, %v2272_v31  ;;  %v1100_v44 = vmul.f32 %v1068_v45, %v652_v57  ;;  %v703_v26 = vmul.f32 0.3275911, %v671_v2 }
 0x133   : > { %1900 = vrcp.f32 %v719_v23  ;;  %v2402_v37 = vsel %vm606_vm10, -1.0, %v2942_v21  ;;  %vm588_vm11 = vcmp.lt.f32.partialorder %v2309_v56, 0.0  ;;  %v1038_v30 = vmul.f32 %v2286_v7, %v1006_v17 }
 0x134   : > { %v862_v34 = vmul.f32 %v2363_v41, %v830_v13  ;;  %v1172_v25 = vmul.f32 1.442695, %v1118_v12  ;;  %v2408_v58 = vmul.f32 0.5, %v2295_v50  ;;  %v735_v6 = vadd.f32 1.0, %v703_v26 }
 0x135   : > { %v2396_v16 = vpop.eup %1894  ;;  %v2412_v0 = vand.u32 2147483647, %v2394_v52  ;;  %v2416_v48 = vadd.f32 %v2075_v18, %v2106_v59  ;;  %v2419_v56 = vsel %vm588_vm11, -1.0, %v2942_v21  ;;  %v1136_v42 = vmul.f32 1.442695, %v1100_v44 }
 0x136   : > { %v894_v3 = vadd.f32 1.4214138, %v862_v34  ;;  %v780_v27 = vmul.f32 1.0614054, %v2396_v16  ;;  %vm604_vm12 = vcmp.lt.f32.partialorder %v2342_v61, 0.0  ;;  %1902 = vrcp.f32 %v735_v6 }
 0x137   : > { %v1084_v32 = vsub.f32 0.0, %v2347_v11  ;;  %v1071_v35 = vsub.f32 0.0, %v2368_v40  ;;  %v685_v36 = vmul.f32 0.3275911, %v2412_v0  ;;  %1904 = vpow2.f32 %v1172_v25 }
 0x138   : > { %v926_v31 = vmul.f32 %v2363_v41, %v894_v3  ;;  %v812_v57 = vadd.f32 -1.4531521, %v780_v27  ;;  %v2430_v63 = vmul.f32 0.70710677, %v2416_v48  ;;  %v2433_v43 = vsel %vm604_vm12, -1.0, %v2942_v21 }
 0x139   : > { %v717_v51 = vadd.f32 1.0, %v685_v36  ;;  %v1087_v10 = vsub.f32 0.0, %v671_v2  ;;  %v2438_v5 = vadd.f32 %v2122_v4, %v2075_v18  ;;  %v1116_v38 = vmul.f32 %v1084_v32, %v2347_v11 }
 0x13a   : > { %v2422_v7 = vpop.eup %1896  ;;  %v844_v50 = vmul.f32 %v2396_v16, %v812_v57  ;;  %v958_v59 = vadd.f32 -0.28449672, %v926_v31  ;;  %v669_v22 = vand.u32 2147483647, %v2430_v63  ;;  %v2443_v13 = vmul.f32 0.5, %v2351_v33 }
 0x13b   : > { %v1899_v24 = vpop.eup %1898  ;;  %v796_v19 = vmul.f32 1.0614054, %v2422_v7  ;;  %1906 = vrcp.f32 %v717_v51  ;;  %v1103_v34 = vmul.f32 %v1071_v35, %v2368_v40  ;;  %vm591_vm13 = vcmp.lt.f32.partialorder %v2357_v28, 0.0 }
 0x13c   : > { %v1198_v61 = vmul.f32 %v1899_v24, %v1038_v30  ;;  %v876_v46 = vadd.f32 1.4214138, %v844_v50  ;;  %v990_v12 = vmul.f32 %v2363_v41, %v958_v59  ;;  %v701_v44 = vmul.f32 0.3275911, %v669_v22 }
 0x13d   : > { %v828_v14 = vadd.f32 -1.4531521, %v796_v19  ;;  %v2445_v17 = vpop.eup %1900  ;;  %v1119_v27 = vmul.f32 %v1087_v10, %v671_v2  ;;  %v2453_v30 = vmul.f32 0.70710677, %v2438_v5  ;;  %1908 = vpow2.f32 %v1136_v42 }
 0x13e   : > { %v908_v45 = vmul.f32 %v2396_v16, %v876_v46  ;;  %v1230_v26 = vsub.f32 1.0, %v1198_v61  ;;  %v783_v3 = vmul.f32 1.0614054, %v2445_v17  ;;  %v733_v33 = vadd.f32 1.0, %v701_v44 }
 0x13f   : > { %v860_v23 = vmul.f32 %v2422_v7, %v828_v14  ;;  %v1168_v25 = vmul.f32 1.442695, %v1116_v38  ;;  %v2456_v31 = vmul.f32 0.5, %v2361_v53  ;;  %v1022_v57 = vadd.f32 0.2548296, %v990_v12 }
 0x140   : > { %v940_v4 = vadd.f32 -0.28449672, %v908_v45  ;;  %v815_v6 = vadd.f32 -1.4531521, %v783_v3  ;;  %v2458_v40 = vpop.eup %1902  ;;  %v1142_v50 = vmul.f32 1.442695, %v1103_v34  ;;  %1910 = vrcp.f32 %v733_v33 }
 0x141   : > { %v892_v11 = vadd.f32 1.4214138, %v860_v23  ;;  %v1069_v32 = vsub.f32 0.0, %v2412_v0  ;;  %v2465_v2 = vsel %vm591_vm13, -1.0, %v2942_v21  ;;  %v799_v36 = vmul.f32 1.0614054, %v2458_v40  ;;  %v1905_v53 = vpop.eup %1904 }
 0x142   : > { %v972_v35 = vmul.f32 %v2396_v16, %v940_v4  ;;  %v847_v42 = vmul.f32 %v2445_v17, %v815_v6  ;;  %v1262_v24 = vmul.f32 %v1230_v26, %v2390_v39  ;;  %v1174_v19 = vmul.f32 1.442695, %v1119_v27 }
 0x143   : > { %v924_v59 = vmul.f32 %v2422_v7, %v892_v11  ;;  %v2472_v61 = vand.u32 2147483647, %v2453_v30  ;;  %vm607_vm14 = vcmp.lt.f32.partialorder %v2379_v20, 0.0  ;;  %v831_v51 = vadd.f32 -1.4531521, %v799_v36 }
 0x144   : > { %v879_v46 = vadd.f32 1.4214138, %v847_v42  ;;  %v1085_v28 = vsub.f32 0.0, %v669_v22  ;;  %v1054_v14 = vmul.f32 %v2363_v41, %v1022_v57  ;;  %1912 = vpow2.f32 %v1142_v50 }
 0x145   : > { %v1101_v10 = vmul.f32 %v1069_v32, %v2412_v0  ;;  %v690_v45 = vmul.f32 0.3275911, %v2472_v61  ;;  %v2478_v38 = vpop.eup %1906  ;;  %v1004_v39 = vadd.f32 0.2548296, %v972_v35  ;;  %v863_v23 = vmul.f32 %v2458_v40, %v831_v51 }
 0x146   : > { %v911_v12 = vmul.f32 %v2445_v17, %v879_v46  ;;  %v2484_v34 = vadd.f32 %v2127_v8, %v2075_v18  ;;  %v1294_v44 = vadd.f32 1.0, %v1262_v24  ;;  %v956_v26 = vadd.f32 -0.28449672, %v924_v59 }
 0x147   : > { %v781_v41 = vmul.f32 1.0614054, %v2478_v38  ;;  %v722_v4 = vadd.f32 1.0, %v690_v45  ;;  %v895_v0 = vadd.f32 1.4214138, %v863_v23  ;;  %1914 = vpow2.f32 %v1174_v19  ;;  %v1909_v57 = vpop.eup %1908 }
 0x148   : > { %v943_v3 = vadd.f32 -0.28449672, %v911_v12  ;;  %v1117_v11 = vmul.f32 %v1085_v28, %v669_v22  ;;  %v1214_v27 = vmul.f32 %v1905_v53, %v1054_v14  ;;  %v1138_v6 = vmul.f32 1.442695, %v1101_v10 }
 0x149   : > { %v813_v33 = vadd.f32 -1.4531521, %v781_v41  ;;  %1916 = vrcp.f32 %v722_v4  ;;  %v927_v8 = vmul.f32 %v2458_v40, %v895_v0  ;;  %v2490_v32 = vmul.f32 0.70710677, %v2484_v34 }
 0x14a   : > { %1918 = vpow2.f32 %v1168_v25  ;;  %v975_v50 = vmul.f32 %v2445_v17, %v943_v3  ;;  %v2492_v35 = vpop.eup %1910  ;;  %v1036_v42 = vmul.f32 %v2396_v16, %v1004_v39  ;;  %v988_v36 = vmul.f32 %v2422_v7, %v956_v26 }
 0x14b   : > { %v639_v22 = vsel %vm607_vm14, -1.0, %v2942_v21  ;;  %v845_v53 = vmul.f32 %v2478_v38, %v813_v33  ;;  %v2501_v25 = vmul.f32 %v1294_v44, %v2385_v55  ;;  %v959_v59 = vadd.f32 -0.28449672, %v927_v8 }
 0x14c   : > { %v1007_v24 = vadd.f32 0.2548296, %v975_v50  ;;  %v1170_v19 = vmul.f32 1.442695, %v1117_v11  ;;  %v1246_v46 = vsub.f32 1.0, %v1214_v27  ;;  %1920 = vpow2.f32 %v1138_v6 }
 0x14d   : > { %v877_v51 = vadd.f32 1.4214138, %v845_v53  ;;  %v797_v28 = vmul.f32 1.0614054, %v2492_v35  ;;  %v991_v14 = vmul.f32 %v2458_v40, %v959_v59  ;;  %v2507_v20 = vand.u32 2147483647, %v2490_v32 }
 0x14e   : > { %v1039_v16 = vmul.f32 %v2445_v17, %v1007_v24  ;;  %v2511_v10 = vadd.f32 %v2075_v18, %v2129_v9  ;;  %v1913_v55 = vpop.eup %1912  ;;  %v1196_v45 = vmul.f32 %v1909_v57, %v1036_v42  ;;  %v1020_v39 = vadd.f32 0.2548296, %v988_v36 }
 0x14f   : > { %v909_v12 = vmul.f32 %v2478_v38, %v877_v51  ;;  %v829_v23 = vadd.f32 -1.4531521, %v797_v28  ;;  %v1023_v26 = vadd.f32 0.2548296, %v991_v14  ;;  %vm589_vm15 = vcmp.lt.f32.partialorder %v2394_v52, 0.0 }
 0x150   : > { %v1199_v44 = vmul.f32 %v1913_v55, %v1039_v16  ;;  %v706_v17 = vmul.f32 0.3275911, %v2507_v20  ;;  %v1278_v41 = vmul.f32 %v1246_v46, %v2402_v37  ;;  %1922 = vpow2.f32 %v1170_v19 }
 0x151   : > { %v941_v4 = vadd.f32 -0.28449672, %v909_v12  ;;  %v861_v3 = vmul.f32 %v2492_v35, %v829_v23  ;;  %v1915_v9 = vpop.eup %1914  ;;  %v1055_v11 = vmul.f32 %v2458_v40, %v1023_v26  ;;  %v2520_v33 = vmul.f32 0.70710677, %v2511_v10 }
 0x152   : > { %v1231_v0 = vsub.f32 1.0, %v1199_v44  ;;  %v738_v27 = vadd.f32 1.0, %v706_v17  ;;  %v1228_v57 = vsub.f32 1.0, %v1196_v45  ;;  %v1052_v50 = vmul.f32 %v2422_v7, %v1020_v39 }
 0x153   : > { %v2522_v6 = vpop.eup %1916  ;;  %v973_v8 = vmul.f32 %v2478_v38, %v941_v4  ;;  %v893_v37 = vadd.f32 1.4214138, %v861_v3  ;;  %v1215_v53 = vmul.f32 %v1915_v9, %v1055_v11  ;;  %v1310_v40 = vadd.f32 1.0, %v1278_v41 }
 0x154   : > { %v1919_v42 = vpop.eup %1918  ;;  %v1263_v36 = vmul.f32 %v1231_v0, %v2465_v2  ;;  %v786_v24 = vmul.f32 1.0614054, %v2522_v6  ;;  %1924 = vrcp.f32 %v738_v27  ;;  %v2531_v46 = vadd.f32 %v2075_v18, %v2141_v15 }
 0x155   : > { %v1005_v59 = vadd.f32 0.2548296, %v973_v8  ;;  %v925_v19 = vmul.f32 %v2492_v35, %v893_v37  ;;  %v1247_v7 = vsub.f32 1.0, %v1215_v53  ;;  %v2534_v16 = vand.u32 2147483647, %v2520_v33  ;;  %v2943_v53 = vld [vmem:[#allocation2_spill] sm:$0xff] }
 0x156   : > { %v1295_v51 = vadd.f32 1.0, %v1263_v36  ;;  %v818_v28 = vadd.f32 -1.4531521, %v786_v24  ;;  %v1921_v14 = vpop.eup %1920  ;;  %v1260_v2 = vmul.f32 %v1228_v57, %v2419_v56  ;;  %v1212_v55 = vmul.f32 %v1919_v42, %v1052_v50 }
 0x157   : > { %v1037_v45 = vmul.f32 %v2478_v38, %v1005_v59  ;;  %v957_v39 = vadd.f32 -0.28449672, %v925_v19  ;;  %v1279_v23 = vmul.f32 %v1247_v7, %v639_v22  ;;  %v688_v18 = vmul.f32 0.3275911, %v2534_v16 }
 0x158   : > { %v1327_v12 = vmul.f32 %v1295_v51, %v2443_v13  ;;  %v850_v44 = vmul.f32 %v2522_v6, %v818_v28  ;;  %v621_v15 = vsel %vm589_vm15, -1.0, %v2942_v21  ;;  %v2546_v56 = vmul.f32 0.70710677, %v2531_v46 }
 0x159   : > { %v1197_v26 = vmul.f32 %v1921_v14, %v1037_v45  ;;  %v989_v17 = vmul.f32 %v2492_v35, %v957_v39  ;;  %v1311_v41 = vadd.f32 1.0, %v1279_v23  ;;  %v1074_v13 = vsub.f32 0.0, %v2472_v61  ;;  %v2944_v39 = vld [vmem:[#allocation3_spill] sm:$0xff] }
 0x15a   : > { %v1696_v38 = vpack.c.bf16 %v1327_v12, %v2501_v25  ;;  %v720_v22 = vadd.f32 1.0, %v688_v18  ;;  %v1923_v4 = vpop.eup %1922  ;;  %v1342_v3 = vmul.f32 %v1310_v40, %v2399_v47  ;;  %v1244_v9 = vsub.f32 1.0, %v1212_v55 }
 0x15b   : > { %v1229_v0 = vsub.f32 1.0, %v1197_v26  ;;  %v1021_v11 = vadd.f32 0.2548296, %v989_v17  ;;  %v1292_v52 = vadd.f32 1.0, %v1260_v2  ;;  %v1343_v27 = vmul.f32 %v1311_v41, %v2456_v31  ;;  %v2565_v31 = vld [vmem:[%s2930_s2] ss:$0 sm:$0xff] }
 0x15c   : > { %1760 = vst [vmem:[%s2318_s27 + $0x18] sm:$0xff] %v1696_v38   ;;  %v882_v57 = vadd.f32 1.4214138, %v850_v44  ;;  %1926 = vrcp.f32 %v720_v22  ;;  %v525_v50 = vmul.f32 0.5, %v2374_v54  ;;  %v2556_v37 = vand.u32 2147483647, %v2546_v56 }
 0x15d   : > { %v1261_v25 = vmul.f32 %v1229_v0, %v621_v15  ;;  %v1053_v8 = vmul.f32 %v2492_v35, %v1021_v11  ;;  %v1736_v47 = vpack.c.bf16 %v1343_v27, %v1342_v3  ;;  %vm605_vm0 = vcmp.lt.f32.partialorder %v2430_v63, 0.0 }
 0x15e   : > { %v2558_v42 = vpop.eup %1924  ;;  %v1106_v36 = vmul.f32 %v1074_v13, %v2472_v61  ;;  %v2569_v54 = vadd.f32 %v2565_v31, %v2943_v53  ;;  %v1276_v35 = vmul.f32 %v1244_v9, %v2433_v43  ;;  %v1324_v19 = vmul.f32 %v1292_v52, %v2408_v58 }
 0x15f   : > { %v1293_v24 = vadd.f32 1.0, %v1261_v25  ;;  %v1213_v40 = vmul.f32 %v1923_v4, %v1053_v8  ;;  %v802_v59 = vmul.f32 1.0614054, %v2558_v42  ;;  %1768 = vst [vmem:[%s2318_s27 + $0x58] sm:$0xff] %v1736_v47   ;;  %v914_v61 = vmul.f32 %v2522_v6, %v882_v57  ;;  %v2945_v8 = vld [vmem:[#allocation4_spill] sm:$0xff] }
 0x160   : > { %v704_v51 = vmul.f32 0.3275911, %v2556_v37  ;;  %v2578_v2 = vmul.f32 0.70710677, %v2569_v54  ;;  %v637_v43 = vsel %vm605_vm0, -1.0, %v2942_v21  ;;  %v2585_v58 = vadd.f32 %v2565_v31, %v2944_v39 }
 0x161   : > { %v1325_v7 = vmul.f32 %v1293_v24, %v525_v50  ;;  %v1245_v28 = vsub.f32 1.0, %v1213_v40  ;;  %v834_v14 = vadd.f32 -1.4531521, %v802_v59  ;;  %v1148_v55 = vmul.f32 1.442695, %v1106_v36 }
 0x162   : > { %v736_v45 = vadd.f32 1.0, %v704_v51  ;;  %v1308_v12 = vadd.f32 1.0, %v1276_v35  ;;  %v946_v18 = vadd.f32 -0.28449672, %v914_v61  ;;  %v1090_v26 = vsub.f32 0.0, %v2507_v20  ;;  %v2946_v35 = vld [vmem:[#allocation5_spill] sm:$0xff] }
 0x163   : > { %v1691_v23 = vpack.c.bf16 %v1325_v7, %v1324_v19  ;;  %v1277_v44 = vmul.f32 %v1245_v28, %v637_v43  ;;  %v866_v15 = vmul.f32 %v2558_v42, %v834_v14  ;;  %v540_v17 = vmul.f32 0.5, %v2333_v60 }
 0x164   : > { %1928 = vrcp.f32 %v736_v45  ;;  %v541_v63 = vmul.f32 0.5, %v2416_v48  ;;  %v2593_v41 = vand.u32 2147483647, %v2578_v2  ;;  %v1072_v22 = vsub.f32 0.0, %v2534_v16 }
 0x165   : > { %1759 = vst [vmem:[%s2318_s27 + $0x10] sm:$0xff] %v1691_v23   ;;  %v1309_v38 = vadd.f32 1.0, %v1277_v44  ;;  %1930 = vpow2.f32 %v1148_v55  ;;  %v2599_v4 = vmul.f32 0.70710677, %v2585_v58  ;;  %v1340_v3 = vmul.f32 %v1308_v12, %v540_v17 }
 0x166   : > { %v2595_v13 = vpop.eup %1926  ;;  %v691_v0 = vmul.f32 0.3275911, %v2593_v41  ;;  %v978_v48 = vmul.f32 %v2522_v6, %v946_v18  ;;  %v898_v11 = vadd.f32 1.4214138, %v866_v15  ;;  %v1122_v52 = vmul.f32 %v1090_v26, %v2507_v20 }
 0x167   : > { %v1341_v9 = vmul.f32 %v1309_v38, %v541_v63  ;;  %v784_v60 = vmul.f32 1.0614054, %v2595_v13  ;;  %v2606_v27 = vand.u32 2147483647, %v2599_v4  ;;  %v2610_v47 = vadd.f32 %v2565_v31, %v2945_v8 }
 0x168   : > { %v723_v25 = vadd.f32 1.0, %v691_v0  ;;  %v1104_v36 = vmul.f32 %v1072_v22, %v2534_v16  ;;  %v2617_v24 = vadd.f32 %v2565_v31, %v2946_v35  ;;  %v2620_v20 = vmul.f32 0.5, %v2438_v5 }
 0x169   : > { %v1731_v57 = vpack.c.bf16 %v1341_v9, %v1340_v3  ;;  %v816_v50 = vadd.f32 -1.4531521, %v784_v60  ;;  %v707_v53 = vmul.f32 0.3275911, %v2606_v27  ;;  %vm594_vm1 = vcmp.lt.f32.partialorder %v2453_v30, 0.0 }
 0x16a   : > { %1932 = vrcp.f32 %v723_v25  ;;  %v1010_v40 = vadd.f32 0.2548296, %v978_v48  ;;  %v930_v19 = vmul.f32 %v2558_v42, %v898_v11  ;;  %v1180_v61 = vmul.f32 1.442695, %v1122_v52  ;;  %v2947_v52 = vld [vmem:[#allocation6_spill] sm:$0xff] }
 0x16b   : > { %1767 = vst [vmem:[%s2318_s27 + $0x50] sm:$0xff] %v1731_v57   ;;  %v739_v59 = vadd.f32 1.0, %v707_v53  ;;  %v848_v16 = vmul.f32 %v2595_v13, %v816_v50  ;;  %v2626_v51 = vmul.f32 0.70710677, %v2610_v47  ;;  %v2631_v28 = vmul.f32 0.5, %v2484_v34 }
 0x16c   : > { %vm610_vm2 = vcmp.lt.f32.partialorder %v2490_v32, 0.0  ;;  %vm592_vm3 = vcmp.lt.f32.partialorder %v2520_v33, 0.0  ;;  %v1144_v5 = vmul.f32 1.442695, %v1104_v36  ;;  %v1088_v43 = vsub.f32 0.0, %v2556_v37  ;;  %v2948_v36 = vld [vmem:[#allocation7_spill] sm:$0xff] }
 0x16d   : > { %1934 = vrcp.f32 %v739_v59  ;;  %v2638_v55 = vmul.f32 0.70710677, %v2617_v24  ;;  %v626_v39 = vsel %vm594_vm1, -1.0, %v2942_v21  ;;  %v1042_v34 = vmul.f32 %v2522_v6, %v1010_v40 }
 0x16e   : > { %v2628_v7 = vpop.eup %1928  ;;  %v1075_v12 = vsub.f32 0.0, %v2593_v41  ;;  %v657_v23 = vand.u32 2147483647, %v2626_v51  ;;  %v962_v44 = vadd.f32 -0.28449672, %v930_v19  ;;  %1936 = vpow2.f32 %v1180_v61 }
 0x16f   : > { %v800_v14 = vmul.f32 1.0614054, %v2628_v7  ;;  %v1931_v45 = vpop.eup %1930  ;;  %v880_v18 = vadd.f32 1.4214138, %v848_v16  ;;  %v2649_v26 = vsel %vm610_vm2, -1.0, %v2942_v21  ;;  %v2654_v30 = vsel %vm592_vm3, -1.0, %v2942_v21 }
 0x170   : > { %1938 = vpow2.f32 %v1144_v5  ;;  %v689_v6 = vmul.f32 0.3275911, %v657_v23  ;;  %v1120_v63 = vmul.f32 %v1088_v43, %v2556_v37  ;;  %v2659_v38 = vmul.f32 0.5, %v2569_v54 }
 0x171   : > { %v832_v15 = vadd.f32 -1.4531521, %v800_v14  ;;  %v673_v22 = vand.u32 2147483647, %v2638_v55  ;;  %v1202_v3 = vmul.f32 %v1931_v45, %v1042_v34  ;;  %vm595_vm4 = vcmp.lt.f32.partialorder %v2578_v2, 0.0 }
 0x172   : > { %v1091_v32 = vsub.f32 0.0, %v2606_v27  ;;  %v721_v9 = vadd.f32 1.0, %v689_v6  ;;  %v994_v60 = vmul.f32 %v2558_v42, %v962_v44  ;;  %v912_v0 = vmul.f32 %v2595_v13, %v880_v18 }
 0x173   : > { %v864_v17 = vmul.f32 %v2628_v7, %v832_v15  ;;  %v1107_v48 = vmul.f32 %v1075_v12, %v2593_v41  ;;  %v705_v37 = vmul.f32 0.3275911, %v673_v22  ;;  %v2672_v57 = vadd.f32 %v2565_v31, %v2947_v52 }
 0x174   : > { %v2664_v33 = vpop.eup %1932  ;;  %1940 = vrcp.f32 %v721_v9  ;;  %v1176_v50 = vmul.f32 1.442695, %v1120_v63  ;;  %v2675_v25 = vmul.f32 0.5, %v2585_v58  ;;  %v2679_v53 = vadd.f32 %v2565_v31, %v2948_v36 }
 0x175   : > { %v896_v11 = vadd.f32 1.4214138, %v864_v17  ;;  %v787_v54 = vmul.f32 1.0614054, %v2664_v33  ;;  %v737_v8 = vadd.f32 1.0, %v705_v37  ;;  %v1234_v35 = vsub.f32 1.0, %v1202_v3 }
 0x176   : > { %v2684_v41 = vsel %vm595_vm4, -1.0, %v2942_v21  ;;  %v1123_v59 = vmul.f32 %v1091_v32, %v2606_v27  ;;  %v1026_v61 = vadd.f32 0.2548296, %v994_v60  ;;  %v944_v16 = vadd.f32 -0.28449672, %v912_v0 }
 0x177   : > { %v819_v40 = vadd.f32 -1.4531521, %v787_v54  ;;  %v2687_v19 = vpop.eup %1934  ;;  %v1150_v58 = vmul.f32 1.442695, %v1107_v48  ;;  %1942 = vrcp.f32 %v737_v8  ;;  %v928_v5 = vmul.f32 %v2628_v7, %v896_v11 }
 0x178   : > { %v803_v43 = vmul.f32 1.0614054, %v2687_v19  ;;  %v2693_v45 = vmul.f32 0.70710677, %v2672_v57  ;;  %v1937_v2 = vpop.eup %1936  ;;  %1944 = vpow2.f32 %v1176_v50  ;;  %vm611_vm5 = vcmp.lt.f32.partialorder %v2599_v4, 0.0 }
 0x179   : > { %v851_v14 = vmul.f32 %v2664_v33, %v819_v40  ;;  %v1073_v27 = vsub.f32 0.0, %v657_v23  ;;  %v2697_v34 = vmul.f32 0.70710677, %v2679_v53  ;;  %v1266_v44 = vmul.f32 %v1234_v35, %v626_v39 }
 0x17a   : > { %v1939_v12 = vpop.eup %1938  ;;  %v835_v15 = vadd.f32 -1.4531521, %v803_v43  ;;  %v1182_v6 = vmul.f32 1.442695, %v1123_v59  ;;  %v976_v17 = vmul.f32 %v2595_v13, %v944_v16  ;;  %1946 = vpow2.f32 %v1150_v58 }
 0x17b   : > { %v883_v18 = vadd.f32 1.4214138, %v851_v14  ;;  %v1089_v63 = vsub.f32 0.0, %v673_v22  ;;  %v2701_v3 = vand.u32 2147483647, %v2693_v45  ;;  %v1058_v32 = vmul.f32 %v2558_v42, %v1026_v61 }
 0x17c   : > { %v960_v9 = vadd.f32 -0.28449672, %v928_v5  ;;  %v867_v0 = vmul.f32 %v2687_v19, %v835_v15  ;;  %v2709_v39 = vsel %vm611_vm5, -1.0, %v2942_v21  ;;  %v1105_v48 = vmul.f32 %v1073_v27, %v657_v23 }
 0x17d   : > { %v915_v60 = vmul.f32 %v2664_v33, %v883_v18  ;;  %v694_v37 = vmul.f32 0.3275911, %v2701_v3  ;;  %v2713_v11 = vand.u32 2147483647, %v2697_v34  ;;  %v1298_v52 = vadd.f32 1.0, %v1266_v44 }
 0x17e   : > { %v2715_v54 = vpop.eup %1940  ;;  %v899_v50 = vadd.f32 1.4214138, %v867_v0  ;;  %1948 = vpow2.f32 %v1182_v6  ;;  %v1008_v8 = vadd.f32 0.2548296, %v976_v17  ;;  %v1121_v35 = vmul.f32 %v1089_v63, %v673_v22  ;;  %v2949_v6 = vld [vmem:[#allocation8_spill] sm:$0xff] }
 0x17f   : > { %v947_v42 = vadd.f32 -0.28449672, %v915_v60  ;;  %v785_v36 = vmul.f32 1.0614054, %v2715_v54  ;;  %v726_v40 = vadd.f32 1.0, %v694_v37  ;;  %v1218_v4 = vmul.f32 %v1937_v2, %v1058_v32 }
 0x180   : > { %v992_v59 = vmul.f32 %v2628_v7, %v960_v9  ;;  %v931_v61 = vmul.f32 %v2687_v19, %v899_v50  ;;  %v1146_v5 = vmul.f32 1.442695, %v1105_v48  ;;  %v710_v14 = vmul.f32 0.3275911, %v2713_v11 }
 0x181   : > { %v979_v23 = vmul.f32 %v2664_v33, %v947_v42  ;;  %v2721_v16 = vpop.eup %1942  ;;  %v817_v58 = vadd.f32 -1.4531521, %v785_v36  ;;  %1950 = vrcp.f32 %v726_v40  ;;  %v1040_v2 = vmul.f32 %v2595_v13, %v1008_v8 }
 0x182   : > { %v963_v27 = vadd.f32 -0.28449672, %v931_v61  ;;  %v801_v44 = vmul.f32 1.0614054, %v2721_v16  ;;  %v1945_v22 = vpop.eup %1944  ;;  %v1178_v15 = vmul.f32 1.442695, %v1121_v35  ;;  %v2729_v17 = vadd.f32 %v2565_v31, %v2949_v6 }
 0x183   : > { %v1011_v43 = vadd.f32 0.2548296, %v979_v23  ;;  %v849_v18 = vmul.f32 %v2715_v54, %v817_v58  ;;  %v1024_v63 = vadd.f32 0.2548296, %v992_v59  ;;  %v1330_v48 = vmul.f32 %v1298_v52, %v2620_v20 }
 0x184   : > { %v995_v9 = vmul.f32 %v2687_v19, %v963_v27  ;;  %v833_v60 = vadd.f32 -1.4531521, %v801_v44  ;;  %v1947_v0 = vpop.eup %1946  ;;  %v1250_v37 = vsub.f32 1.0, %v1218_v4  ;;  %v742_v50 = vadd.f32 1.0, %v710_v14  ;;  %v2950_v27 = vld [vmem:[#allocation9_spill] sm:$0xff] }
 0x185   : > { %v1043_v32 = vmul.f32 %v2664_v33, %v1011_v43  ;;  %v881_v42 = vadd.f32 1.4214138, %v849_v18  ;;  %vm608_vm6 = vcmp.lt.f32.partialorder %v2546_v56, 0.0  ;;  %1952 = vpow2.f32 %v1146_v5 }
 0x186   : > { %v1027_v8 = vadd.f32 0.2548296, %v995_v9  ;;  %v865_v36 = vmul.f32 %v2721_v16, %v833_v60  ;;  %v1200_v35 = vmul.f32 %v1939_v12, %v1040_v2  ;;  %1954 = vpow2.f32 %v1178_v15 }
 0x187   : > { %v1203_v13 = vmul.f32 %v1947_v0, %v1043_v32  ;;  %v913_v40 = vmul.f32 %v2715_v54, %v881_v42  ;;  %v2738_v33 = vmul.f32 0.70710677, %v2729_v17  ;;  %v1056_v20 = vmul.f32 %v2628_v7, %v1024_v63 }
 0x188   : > { %v1949_v59 = vpop.eup %1948  ;;  %v1059_v4 = vmul.f32 %v2687_v19, %v1027_v8  ;;  %v897_v23 = vadd.f32 1.4214138, %v865_v36  ;;  %v1282_v61 = vmul.f32 %v1250_v37, %v2649_v26  ;;  %1956 = vrcp.f32 %v742_v50 }
 0x189   : > { %v1235_v52 = vsub.f32 1.0, %v1203_v13  ;;  %v945_v58 = vadd.f32 -0.28449672, %v913_v40  ;;  %v2744_v5 = vand.u32 2147483647, %v2738_v33  ;;  %v2750_v44 = vadd.f32 %v2565_v31, %v2950_v27 }
 0x18a   : > { %v1219_v14 = vmul.f32 %v1949_v59, %v1059_v4  ;;  %v929_v43 = vmul.f32 %v2721_v16, %v897_v23  ;;  %v1232_v19 = vsub.f32 1.0, %v1200_v35  ;;  %vm593_vm7 = vcmp.lt.f32.partialorder %v2626_v51, 0.0 }
 0x18b   : > { %v1267_v12 = vmul.f32 %v1235_v52, %v2684_v41  ;;  %v2752_v7 = vpop.eup %1950  ;;  %v977_v26 = vmul.f32 %v2715_v54, %v945_v58  ;;  %v692_v2 = vmul.f32 0.3275911, %v2744_v5  ;;  %v1216_v18 = vmul.f32 %v1945_v22, %v1056_v20 }
 0x18c   : > { %v1251_v6 = vsub.f32 1.0, %v1219_v14  ;;  %v961_v41 = vadd.f32 -0.28449672, %v929_v43  ;;  %v1314_v63 = vadd.f32 1.0, %v1282_v61  ;;  %v790_v9 = vmul.f32 1.0614054, %v2752_v7 }
 0x18d   : > { %v1299_v15 = vadd.f32 1.0, %v1267_v12  ;;  %v1009_v32 = vadd.f32 0.2548296, %v977_v26  ;;  %v724_v60 = vadd.f32 1.0, %v692_v2  ;;  %v2762_v50 = vmul.f32 0.70710677, %v2750_v44 }
 0x18e   : > { %v1283_v37 = vmul.f32 %v1251_v6, %v2709_v39  ;;  %v993_v42 = vmul.f32 %v2721_v16, %v961_v41  ;;  %v1264_v22 = vmul.f32 %v1232_v19, %v2654_v30  ;;  %v2768_v8 = vadd.f32 %v2565_v31, %v2262_v29 }
 0x18f   : > { %v1331_v0 = vmul.f32 %v1299_v15, %v2659_v38  ;;  %v1041_v13 = vmul.f32 %v2715_v54, %v1009_v32  ;;  %1958 = vrcp.f32 %v724_v60  ;;  %v1953_v36 = vpop.eup %1952  ;;  %v1248_v35 = vsub.f32 1.0, %v1216_v18 }
 0x190   : > { %v1315_v40 = vadd.f32 1.0, %v1283_v37  ;;  %v1025_v39 = vadd.f32 0.2548296, %v993_v42  ;;  %v1955_v59 = vpop.eup %1954  ;;  %v640_v20 = vsel %vm608_vm6, -1.0, %v2942_v21  ;;  %vm609_vm8 = vcmp.lt.f32.partialorder %v2638_v55, 0.0 }
 0x191   : > { %v1706_v38 = vpack.c.bf16 %v1331_v0, %v1330_v48  ;;  %v1201_v52 = vmul.f32 %v1953_v36, %v1041_v13  ;;  %v822_v30 = vadd.f32 -1.4531521, %v790_v9  ;;  %v1346_v54 = vmul.f32 %v1314_v63, %v2631_v28 }
 0x192   : > { %v1347_v29 = vmul.f32 %v1315_v40, %v2675_v25  ;;  %v1057_v4 = vmul.f32 %v2721_v16, %v1025_v39  ;;  %v2779_v48 = vand.u32 2147483647, %v2762_v50  ;;  %v2781_v23 = vpop.eup %1956  ;;  %v1296_v61 = vadd.f32 1.0, %v1264_v22 }
 0x193   : > { %1762 = vst [vmem:[%s2318_s27 + $0x28] sm:$0xff] %v1706_v38   ;;  %v625_v56 = vsel %vm593_vm7, -1.0, %v2942_v21  ;;  %v1233_v58 = vsub.f32 1.0, %v1201_v52  ;;  %v2787_v12 = vmul.f32 0.70710677, %v2768_v8  ;;  %v1280_v28 = vmul.f32 %v1248_v35, %v640_v20 }
 0x194   : > { %v1746_v14 = vpack.c.bf16 %v1347_v29, %v1346_v54  ;;  %v1217_v25 = vmul.f32 %v1955_v59, %v1057_v4  ;;  %v708_v43 = vmul.f32 0.3275911, %v2779_v48  ;;  %v528_v16 = vmul.f32 0.5, %v2511_v10 }
 0x195   : > { %v1265_v27 = vmul.f32 %v1233_v58, %v625_v56  ;;  %v854_v19 = vmul.f32 %v2752_v7, %v822_v30  ;;  %v544_v26 = vmul.f32 0.5, %v2531_v46  ;;  %v806_v51 = vmul.f32 1.0614054, %v2781_v23 }
 0x196   : > { %1770 = vst [vmem:[%s2318_s27 + $0x68] sm:$0xff] %v1746_v14   ;;  %v1249_v2 = vsub.f32 1.0, %v1217_v25  ;;  %v740_v18 = vadd.f32 1.0, %v708_v43  ;;  %v529_v15 = vmul.f32 0.5, %v2610_v47  ;;  %v641_v41 = vsel %vm609_vm8, -1.0, %v2942_v21 }
 0x197   : > { %v1297_v6 = vadd.f32 1.0, %v1265_v27  ;;  %v663_v63 = vand.u32 2147483647, %v2787_v12  ;;  %v1328_v10 = vmul.f32 %v1296_v61, %v528_v16  ;;  %v1312_v32 = vadd.f32 1.0, %v1280_v28 }
 0x198   : > { %v1281_v9 = vmul.f32 %v1249_v2, %v641_v41  ;;  %1960 = vrcp.f32 %v740_v18  ;;  %v886_v0 = vadd.f32 1.4214138, %v854_v19  ;;  %v2804_v47 = vadd.f32 %v2565_v31, %v2274_v49 }
 0x199   : > { %v2800_v46 = vpop.eup %1958  ;;  %v1329_v60 = vmul.f32 %v1297_v6, %v529_v15  ;;  %v695_v37 = vmul.f32 0.3275911, %v663_v63  ;;  %v545_v42 = vmul.f32 0.5, %v2617_v24  ;;  %v1078_v22 = vsub.f32 0.0, %v2701_v3 }
 0x19a   : > { %v1313_v55 = vadd.f32 1.0, %v1281_v9  ;;  %v838_v13 = vadd.f32 -1.4531521, %v806_v51  ;;  %v788_v35 = vmul.f32 1.0614054, %v2800_v46  ;;  %v1344_v40 = vmul.f32 %v1312_v32, %v544_v26 }
 0x19b   : > { %v1701_v36 = vpack.c.bf16 %v1329_v60, %v1328_v10  ;;  %v727_v38 = vadd.f32 1.0, %v695_v37  ;;  %v918_v59 = vmul.f32 %v2752_v7, %v886_v0  ;;  %v2812_v49 = vmul.f32 0.70710677, %v2804_v47 }
 0x19c   : > { %v1345_v39 = vmul.f32 %v1313_v55, %v545_v42  ;;  %v1110_v24 = vmul.f32 %v1078_v22, %v2701_v3  ;;  %v870_v52 = vmul.f32 %v2781_v23, %v838_v13  ;;  %v820_v30 = vadd.f32 -1.4531521, %v788_v35 }
 0x19d   : > { %1761 = vst [vmem:[%s2318_s27 + $0x20] sm:$0xff] %v1701_v36   ;;  %1962 = vrcp.f32 %v727_v38  ;;  %v679_v54 = vand.u32 2147483647, %v2812_v49  ;;  %v2819_v29 = vadd.f32 %v2565_v31, %v2305_v1  ;;  %v950_v4 = vadd.f32 -0.28449672, %v918_v59 }
 0x19e   : > { %v1741_v20 = vpack.c.bf16 %v1345_v39, %v1344_v40  ;;  %v1094_v61 = vsub.f32 0.0, %v2713_v11  ;;  %v1156_v28 = vmul.f32 1.442695, %v1110_v24  ;;  %v902_v14 = vadd.f32 1.4214138, %v870_v52 }
 0x19f   : > { %v711_v56 = vmul.f32 0.3275911, %v679_v54  ;;  %v2826_v3 = vmul.f32 0.70710677, %v2819_v29  ;;  %v852_v25 = vmul.f32 %v2800_v46, %v820_v30  ;;  %v1079_v16 = vsub.f32 0.0, %v663_v63 }
 0x1a0   : > { %1769 = vst [vmem:[%s2318_s27 + $0x60] sm:$0xff] %v1741_v20   ;;  %v982_v19 = vmul.f32 %v2752_v7, %v950_v4  ;;  %v1126_v26 = vmul.f32 %v1094_v61, %v2713_v11  ;;  %v2835_v2 = vadd.f32 %v2565_v31, %v2326_v62  ;;  %v934_v51 = vmul.f32 %v2781_v23, %v902_v14 }
 0x1a1   : > { %v743_v27 = vadd.f32 1.0, %v711_v56  ;;  %v661_v1 = vand.u32 2147483647, %v2826_v3  ;;  %v1076_v18 = vsub.f32 0.0, %v2744_v5  ;;  %v884_v41 = vadd.f32 1.4214138, %v852_v25 }
 0x1a2   : > { %v2823_v58 = vpop.eup %1960  ;;  %v1111_v32 = vmul.f32 %v1079_v16, %v663_v63  ;;  %v1014_v11 = vadd.f32 0.2548296, %v982_v19  ;;  %v1188_v0 = vmul.f32 1.442695, %v1126_v26  ;;  %v2843_v37 = vmul.f32 0.70710677, %v2835_v2 }
 0x1a3   : > { %v804_v43 = vmul.f32 1.0614054, %v2823_v58  ;;  %1964 = vrcp.f32 %v743_v27  ;;  %v693_v15 = vmul.f32 0.3275911, %v661_v1  ;;  %v966_v62 = vadd.f32 -0.28449672, %v934_v51 }
 0x1a4   : > { %1966 = vpow2.f32 %v1156_v28  ;;  %v1108_v31 = vmul.f32 %v1076_v18, %v2744_v5  ;;  %v916_v55 = vmul.f32 %v2800_v46, %v884_v41  ;;  %v1158_v13 = vmul.f32 1.442695, %v1111_v32 }
 0x1a5   : > { %v836_v10 = vadd.f32 -1.4531521, %v804_v43  ;;  %v725_v60 = vadd.f32 1.0, %v693_v15  ;;  %v1095_v36 = vsub.f32 0.0, %v679_v54  ;;  %v2850_v35 = vand.u32 2147483647, %v2843_v37 }
 0x1a6   : > { %v1046_v38 = vmul.f32 %v2752_v7, %v1014_v11  ;;  %v1092_v40 = vsub.f32 0.0, %v2779_v48  ;;  %v998_v5 = vmul.f32 %v2781_v23, %v966_v62  ;;  %v1152_v39 = vmul.f32 1.442695, %v1108_v31 }
 0x1a7   : > { %v2839_v6 = vpop.eup %1962  ;;  %1968 = vrcp.f32 %v725_v60  ;;  %v868_v22 = vmul.f32 %v2823_v58, %v836_v10  ;;  %v709_v20 = vmul.f32 0.3275911, %v2850_v35  ;;  %v948_v52 = vadd.f32 -0.28449672, %v916_v55 }
 0x1a8   : > { %v791_v9 = vmul.f32 1.0614054, %v2839_v6  ;;  %1970 = vpow2.f32 %v1188_v0  ;;  %v1127_v4 = vmul.f32 %v1095_v36, %v679_v54  ;;  %v1077_v28 = vsub.f32 0.0, %v661_v1 }
 0x1a9   : > { %v900_v30 = vadd.f32 1.4214138, %v868_v22  ;;  %1972 = vpow2.f32 %v1158_v13  ;;  %v741_v14 = vadd.f32 1.0, %v709_v20  ;;  %v1124_v43 = vmul.f32 %v1092_v40, %v2779_v48 }
 0x1aa   : > { %v823_v42 = vadd.f32 -1.4531521, %v791_v9  ;;  %v1030_v16 = vadd.f32 0.2548296, %v998_v5  ;;  %v980_v26 = vmul.f32 %v2800_v46, %v948_v52  ;;  %v1190_v18 = vmul.f32 1.442695, %v1127_v4 }
 0x1ab   : > { %1974 = vrcp.f32 %v741_v14  ;;  %v932_v51 = vmul.f32 %v2823_v58, %v900_v30  ;;  %v1109_v10 = vmul.f32 %v1077_v28, %v661_v1  ;;  %v534_v32 = vmul.f32 0.5, %v2672_v57 }
 0x1ac   : > { %v855_v63 = vmul.f32 %v2839_v6, %v823_v42  ;;  %1976 = vpow2.f32 %v1152_v39  ;;  %vm598_vm9 = vcmp.lt.f32.partialorder %v2693_v45, 0.0  ;;  %v1184_v48 = vmul.f32 1.442695, %v1124_v43 }
 0x1ad   : > { %v2856_v24 = vpop.eup %1964  ;;  %v1062_v11 = vmul.f32 %v2781_v23, %v1030_v16  ;;  %v1012_v42 = vadd.f32 0.2548296, %v980_v26  ;;  %v964_v55 = vadd.f32 -0.28449672, %v932_v51  ;;  %1978 = vpow2.f32 %v1190_v18 }
 0x1ae   : > { %v887_v59 = vadd.f32 1.4214138, %v855_v63  ;;  %v1967_v61 = vpop.eup %1966  ;;  %v807_v7 = vmul.f32 1.0614054, %v2856_v24  ;;  %v1154_v57 = vmul.f32 1.442695, %v1109_v10  ;;  %1980 = vpow2.f32 %v1184_v48 }
 0x1af   : > { %v1206_v25 = vmul.f32 %v1967_v61, %v1046_v38  ;;  %v1093_v36 = vsub.f32 0.0, %v2850_v35  ;;  %v630_v38 = vsel %vm598_vm9, -1.0, %v2942_v21  ;;  %vm614_vm10 = vcmp.lt.f32.partialorder %v2697_v34, 0.0 }
 0x1b0   : > { %v919_v56 = vmul.f32 %v2839_v6, %v887_v59  ;;  %v839_v19 = vadd.f32 -1.4531521, %v807_v7  ;;  %vm599_vm11 = vcmp.lt.f32.partialorder %v2787_v12, 0.0  ;;  %v1044_v59 = vmul.f32 %v2800_v46, %v1012_v42 }
 0x1b1   : > { %v2863_v54 = vpop.eup %1968  ;;  %v1238_v60 = vsub.f32 1.0, %v1206_v25  ;;  %v996_v20 = vmul.f32 %v2823_v58, %v964_v55  ;;  %1982 = vpow2.f32 %v1154_v57  ;;  %v1125_v61 = vmul.f32 %v1093_v36, %v2850_v35 }
 0x1b2   : > { %v951_v27 = vadd.f32 -0.28449672, %v919_v56  ;;  %v871_v41 = vmul.f32 %v2856_v24, %v839_v19  ;;  %v789_v9 = vmul.f32 1.0614054, %v2863_v54  ;;  %v1971_v31 = vpop.eup %1970  ;;  %v646_v56 = vsel %vm614_vm10, -1.0, %v2942_v21 }
 0x1b3   : > { %v1973_v63 = vpop.eup %1972  ;;  %v1270_v40 = vmul.f32 %v1238_v60, %v630_v38  ;;  %v1222_v5 = vmul.f32 %v1971_v31, %v1062_v11  ;;  %v631_v46 = vsel %vm599_vm11, -1.0, %v2942_v21  ;;  %v1028_v26 = vadd.f32 0.2548296, %v996_v20 }
 0x1b4   : > { %v983_v15 = vmul.f32 %v2839_v6, %v951_v27  ;;  %v903_v62 = vadd.f32 1.4214138, %v871_v41  ;;  %v821_v22 = vadd.f32 -1.4531521, %v789_v9  ;;  %v535_v34 = vmul.f32 0.5, %v2768_v8 }
 0x1b5   : > { %v2882_v30 = vpop.eup %1974  ;;  %v1302_v25 = vadd.f32 1.0, %v1270_v40  ;;  %v1254_v43 = vsub.f32 1.0, %v1222_v5  ;;  %v1186_v12 = vmul.f32 1.442695, %v1125_v61  ;;  %vm596_vm12 = vcmp.lt.f32.partialorder %v2738_v33, 0.0 }
 0x1b6   : > { %v1015_v0 = vadd.f32 0.2548296, %v983_v15  ;;  %v935_v1 = vmul.f32 %v2856_v24, %v903_v62  ;;  %v853_v23 = vmul.f32 %v2863_v54, %v821_v22  ;;  %v805_v28 = vmul.f32 1.0614054, %v2882_v30  ;;  %v1977_v14 = vpop.eup %1976 }
 0x1b7   : > { %v1204_v19 = vmul.f32 %v1977_v14, %v1044_v59  ;;  %v1979_v41 = vpop.eup %1978  ;;  %vm615_vm13 = vcmp.lt.f32.partialorder %v2812_v49, 0.0  ;;  %v1334_v9 = vmul.f32 %v1302_v25, %v534_v32  ;;  %v1286_v60 = vmul.f32 %v1254_v43, %v646_v56 }
 0x1b8   : > { %v1047_v13 = vmul.f32 %v2839_v6, %v1015_v0  ;;  %v967_v6 = vadd.f32 -0.28449672, %v935_v1  ;;  %v885_v52 = vadd.f32 1.4214138, %v853_v23  ;;  %v837_v51 = vadd.f32 -1.4531521, %v805_v28  ;;  %v1981_v22 = vpop.eup %1980 }
 0x1b9   : > { %v1236_v62 = vsub.f32 1.0, %v1204_v19  ;;  %v1060_v8 = vmul.f32 %v2823_v58, %v1028_v26  ;;  %1984 = vpow2.f32 %v1186_v12  ;;  %v647_v49 = vsel %vm615_vm13, -1.0, %v2942_v21 }
 0x1ba   : > { %v1207_v39 = vmul.f32 %v1973_v63, %v1047_v13  ;;  %v999_v4 = vmul.f32 %v2856_v24, %v967_v6  ;;  %v917_v7 = vmul.f32 %v2863_v54, %v885_v52  ;;  %v869_v48 = vmul.f32 %v2882_v30, %v837_v51 }
 0x1bb   : > { %v1983_v32 = vpop.eup %1982  ;;  %v1318_v57 = vadd.f32 1.0, %v1286_v60  ;;  %v628_v36 = vsel %vm596_vm12, -1.0, %v2942_v21  ;;  %vm597_vm14 = vcmp.lt.f32.partialorder %v2826_v3, 0.0  ;;  %v1220_v38 = vmul.f32 %v1981_v22, %v1060_v8 }
 0x1bc   : > { %v1239_v45 = vsub.f32 1.0, %v1207_v39  ;;  %v1031_v27 = vadd.f32 0.2548296, %v999_v4  ;;  %v949_v35 = vadd.f32 -0.28449672, %v917_v7  ;;  %v1268_v63 = vmul.f32 %v1236_v62, %v628_v36 }
 0x1bd   : > { %v550_v5 = vmul.f32 0.5, %v2679_v53  ;;  %vm612_vm15 = vcmp.lt.f32.partialorder %v2762_v50, 0.0  ;;  %v629_v52 = vsel %vm597_vm14, -1.0, %v2942_v21  ;;  %v532_v53 = vmul.f32 0.5, %v2729_v17 }
 0x1be   : > { %v1271_v16 = vmul.f32 %v1239_v45, %v631_v46  ;;  %v1063_v15 = vmul.f32 %v2856_v24, %v1031_v27  ;;  %v981_v10 = vmul.f32 %v2863_v54, %v949_v35  ;;  %v901_v24 = vadd.f32 1.4214138, %v869_v48 }
 0x1bf   : > { %v1350_v20 = vmul.f32 %v1318_v57, %v550_v5  ;;  %v1300_v3 = vadd.f32 1.0, %v1268_v63  ;;  %v1252_v45 = vsub.f32 1.0, %v1220_v38  ;;  %v644_v14 = vsel %vm612_vm15, -1.0, %v2942_v21 }
 0x1c0   : > { %v1303_v18 = vadd.f32 1.0, %v1271_v16  ;;  %v1223_v0 = vmul.f32 %v1979_v41, %v1063_v15  ;;  %v1013_v31 = vadd.f32 0.2548296, %v981_v10  ;;  %v933_v1 = vmul.f32 %v2882_v30, %v901_v24 }
 0x1c1   : > { %vm613_vm0 = vcmp.lt.f32.partialorder %v2843_v37, 0.0  ;;  %v1332_v50 = vmul.f32 %v1300_v3, %v532_v53  ;;  %v1284_v25 = vmul.f32 %v1252_v45, %v644_v14  ;;  %v549_v35 = vmul.f32 0.5, %v2835_v2 }
 0x1c2   : > { %v1335_v11 = vmul.f32 %v1303_v18, %v535_v34  ;;  %v1255_v55 = vsub.f32 1.0, %v1223_v0  ;;  %v1045_v13 = vmul.f32 %v2863_v54, %v1013_v31  ;;  %v965_v40 = vadd.f32 -0.28449672, %v933_v1 }
 0x1c3   : > { %v551_v54 = vmul.f32 0.5, %v2804_v47  ;;  %v533_v47 = vmul.f32 0.5, %v2819_v29  ;;  %v1985_v28 = vpop.eup %1984  ;;  %v645_v17 = vsel %vm613_vm0, -1.0, %v2942_v21  ;;  %v1316_v26 = vadd.f32 1.0, %v1284_v25 }
 0x1c4   : > { %v1716_v42 = vpack.c.bf16 %v1335_v11, %v1334_v9  ;;  %v1287_v58 = vmul.f32 %v1255_v55, %v647_v49  ;;  %v1205_v23 = vmul.f32 %v1983_v32, %v1045_v13  ;;  %v997_v59 = vmul.f32 %v2882_v30, %v965_v40 }
 0x1c6   : > { %1764 = vst [vmem:[%s2318_s27 + $0x38] sm:$0xff] %v1716_v42   ;;  %v1319_v39 = vadd.f32 1.0, %v1287_v58  ;;  %v1237_v6 = vsub.f32 1.0, %v1205_v23  ;;  %v1029_v61 = vadd.f32 0.2548296, %v997_v59 }
 0x1c8   : > { %v1351_v33 = vmul.f32 %v1319_v39, %v551_v54  ;;  %v1269_v4 = vmul.f32 %v1237_v6, %v629_v52  ;;  %v1061_v7 = vmul.f32 %v2882_v30, %v1029_v61  ;;  %v548_v30 = vmul.f32 0.5, %v2750_v44 }
 0x1ca   : > { %v1756_v56 = vpack.c.bf16 %v1351_v33, %v1350_v20  ;;  %v1301_v46 = vadd.f32 1.0, %v1269_v4  ;;  %v1221_v16 = vmul.f32 %v1985_v28, %v1061_v7  ;;  %v1348_v34 = vmul.f32 %v1316_v26, %v548_v30 }
 0x1cc   : > { %1772 = vst [vmem:[%s2318_s27 + $0x78] sm:$0xff] %v1756_v56   ;;  %v1333_v43 = vmul.f32 %v1301_v46, %v533_v47  ;;  %v1253_v19 = vsub.f32 1.0, %v1221_v16 }
 0x1ce   : > { %v1711_v27 = vpack.c.bf16 %v1333_v43, %v1332_v50  ;;  %v1285_v29 = vmul.f32 %v1253_v19, %v645_v17 }
 0x1d0   : > { %1763 = vst [vmem:[%s2318_s27 + $0x30] sm:$0xff] %v1711_v27   ;;  %v1317_v51 = vadd.f32 1.0, %v1285_v29 }
 0x1d2   : > { %v1349_v18 = vmul.f32 %v1317_v51, %v549_v35 }
 0x1d4   : > { %v1751_v37 = vpack.c.bf16 %v1349_v18, %v1348_v34 }
 0x1d6   : > { %1771 = vst [vmem:[%s2318_s27 + $0x70] sm:$0xff] %v1751_v37  }
 0x1d7 PF: > { %s13_s12 = sadd.s32 1, %s1993_s12  }
 0x1d8   : > { %p10_p4 = scmp.ge.s32.totalorder %s13_s12, 4  }
 0x1da   :  { %12 = sbr.rel (!%p10_p4) target bundleno = 1 (0x1), region = 62 }

// kernel: srnet_forward.5
= control target key start
LH: loop header
LB: loop body
LE: loop exit
PB: predicated region body
PF: predicated region fallthrough
CT: control target
= control target key end

     0   :  { %s13331_s21 = smov 0   ;;  %s13333_s22 = smov 0   ;;  %s16097_s0 = inlined_call_operand.vmem [shape: bf16[2,32,32,32], index: 0, kind: input, shape index: {}, may-alias: {0,1,2}]   ;;  %s16098_s1 = inlined_call_operand.vmem [shape: bf16[2,32,32,32], index: 1, kind: input, shape index: {}, may-alias: {0,1,2}]   ;;  %s16099_s2 = inlined_call_operand.vmem [shape: bf16[2,32,32,32], index: 2, kind: input, shape index: {}, may-alias: {0,1,2}]   ;;  %s16100_s3 = inlined_call_operand.vmem [shape: f32[2,3,1024], index: 3, kind: input, shape index: {}]   ;;  %s16101_s4 = inlined_call_operand.vmem [shape: bf16[9,32,8], index: 4, kind: input, shape index: {}]   ;;  %s16102_s5 = inlined_call_operand.vmem [shape: f32[3,1], index: 5, kind: input, shape index: {}]   ;;  %s16103_s6 = inlined_call_operand.vmem [shape: f32[2,3,1024], index: 6, kind: output, shape index: {}]  }
   0x1   :  { %s13335_s23 = smov 0   ;;  %s13337_s24 = smov 0  }
   0x2   :  { %s13339_s25 = smov 0  }
   0x3 LB: > { %s25_s26 = sadd.s32 1, %s13284_s23  ;;  %s28_s27 = sadd.s32 1, %s13288_s24  ;;  %s13292_s25 = sphi %s13339_s25, %s16_s25   ;;  %s13288_s24 = sphi %s13337_s24, %s16208_s24   ;;  %s13284_s23 = sphi %s13335_s23, %s16207_s23   ;;  %s13280_s22 = sphi %s13333_s22, %s16206_s22   ;;  %s13276_s21 = sphi %s13331_s21, %s16205_s21  }
   0x4   : > { %p26_p0 = scmp.ge.s32.totalorder %s25_s26, 2  ;;  %p10584_p1 = scmp.ge.s32.totalorder %s13292_s25, 1 }
   0x5   : > { %p315_p2 = scmp.lt.s32.totalorder %s13292_s25, 5 }
   0x6   : > { %s16210_s26 = smov (%p26_p0, %s25_s26), 0  ;;  %s16212_s27 = smov (!%p26_p0, %s28_s27), %s13288_s24 }
   0x7   : > { %p316_p3 = pnand %p10584_p1, %p315_p2  ;;  %p30_p4 = scmp.ge.s32.totalorder %s16212_s27, 2 }
   0x9   : > { %s16214_s27 = smov (%p30_p4, %s16212_s27), 0  ;;  %319 = sbr.rel (%p316_p3) target bundleno = 1400 (0x578), region = 44 }
  0x10   : > { %v13000_v0 = vld [vmem:[%s16101_s4 + $0x40] sm:$0xff]   ;;  %s13367_s30 = sshll.u32 %s13276_s21, 4  ;;  %v13001_v1 = vld [vmem:[%s16101_s4 + $0x48] sm:$0xff]   ;;  %p393_p5 = scmp.lt.s32.totalorder %s13280_s22, 1  ;;  %vm455_vm0 = vcmask 253952   ;;  %v16124_v3 = vmov 0 }
  0x11   : > { %12009 = vmatprep.subr.bf16.mxu0 %v13000_v0  ;;  %p409_p6 = scmp.lt.s32.totalorder %s13367_s30, 31  ;;  %vm456_vm1 = vsmask.f32 256  ;;  %v461_v2 = vld [vmem:[#allocation2 + $0x14] sm:$0x1]  ;;  %v16127_v5 = vmov 0 }
  0x12   : > { %12010 = vmatpush3.bf16.msra.mxu0 %v13000_v0  ;;  %s16216_s22 = smov (!%p393_p5, %s13280_s22), 1  ;;  %vm13376_vm2 = vmand %vm455_vm0, %vm456_vm1  ;;  %vm512_vm3 = vsmask.f32 7938  ;;  %v517_v6 = vld [vmem:[#allocation2 + $0x24] sm:$0x1]  ;;  %v13002_v8 = vld [vmem:[%s16101_s4 + $0x10] sm:$0xff]  }
  0x13   : > { %v16125_v3 = vsel %vm13376_vm2, 4294967295, %v16124_v3  ;;  %12011 = vmatprep.subr.bf16.mxu0 %v13001_v1  ;;  %s410_s9 = scalar_select %p409_p6, %s13367_s30, 31  ;;  %v462_v4 = vsel %vm13376_vm2, 0, %v461_v2  ;;  %vm13384_vm4 = vmand %vm455_vm0, %vm512_vm3  ;;  %11737 = vmatprep.subr.bf16.mxu1 %v13002_v8  ;;  %v13003_v9 = vld [vmem:[%s16101_s4 + $0x18] sm:$0xff]   ;;  %v464_v10 = vld [vmem:[#allocation2 + $0x28] sm:$0x1] }
  0x14   : > { %16126 = vst [vmem:[#allocation3_spill] sm:$0xff] %v16125_v3  ;;  %v16128_v5 = vsel %vm13384_vm4, 4294967295, %v16127_v5  ;;  %s13389_s10 = sshll.u32 %s16216_s22, 7  ;;  %463 = vst [vmem:[#allocation2 + $0x14] sm:$0x1] %v462_v4  ;;  %v518_v7 = vsel %vm13384_vm4, 0, %v517_v6  ;;  %11738 = vmatpush3.bf16.msra.mxu1 %v13002_v8 }
  0x15   : > { %16129 = vst [vmem:[#allocation4_spill] sm:$0xff] %v16128_v5  ;;  %s10596_s11 = sshll.u32 %s410_s9, 2  ;;  %s13397_s14 = sadd.s32 4294967295, %s13367_s30  ;;  %519 = vst [vmem:[#allocation2 + $0x24] sm:$0x1] %v518_v7  ;;  %vm648_vm6 = vcmask 257024   ;;  %11739 = vmatprep.subr.bf16.mxu1 %v13003_v9 }
  0x16   : > { %12012 = vmatpush3.bf16.msra.mxu0 %v13001_v1  ;;  %s413_s15 = sadd.s32 %s10596_s11, %s13389_s10  ;;  %vm606_vm5 = vsmask.f32 4368  ;;  %v465_v11 = vsel %vm13376_vm2, 0, %v464_v10  ;;  %p391_p7 = scmp.gt.s32.totalorder %s13397_s14, 0  ;;  %vm13425_vm8 = vmand %vm648_vm6, %vm512_vm3  ;;  %v458_v38 = vld [vmem:[#allocation2] sm:$0x1] }
  0x17   : > { %s10598_s16 = sshll.u32 %s413_s15, 2  ;;  %466 = vst [vmem:[#allocation2 + $0x28] sm:$0x1] %v465_v11  ;;  %p568_p8 = scmp.gt.s32.totalorder %s13276_s21, 0  ;;  %vm13418_vm7 = vmor %vm456_vm1, %vm606_vm5  ;;  %v520_v48 = vld [vmem:[#allocation2 + $0x38] sm:$0x1] }
  0x18   : > { %s13406_s28 = scalar_lea.vmem %s16098_s1, %s10598_s16  ;;  %11740 = vmatpush3.bf16.msra.mxu1 %v13003_v9  ;;  %p10587_p9 = scmp.lt.s32.totalorder %s13397_s14, 31  ;;  %v514_v54 = vld [vmem:[#allocation2 + $0x10] sm:$0x1]  ;;  %v459_v61 = vsel %vm13376_vm2, 0, %v458_v38  ;;  %v521_v62 = vsel %vm13384_vm4, 0, %v520_v48  ;;  %vm2475_vm11 = vcmask 261120  }
  0x19   : > { %v722_v12 = vld [vmem:[%s13406_s28] sm:$0xf]  ;;  %v723_v13 = vld [vmem:[%s13406_s28 + $0x4] sm:$0xf]  ;;  %v724_v14 = vld [vmem:[%s13406_s28 + $0x8] sm:$0xf] }
  0x1a   : > { %v787_v15 = vshrl.u32 %v722_v12, 16  ;;  %v790_v16 = vshll.u32 %v722_v12, 16  ;;  %v795_v17 = vshrl.u32 %v723_v13, 16  ;;  %v798_v18 = vshll.u32 %v723_v13, 16  ;;  %v725_v19 = vld [vmem:[%s13406_s28 + $0xc] sm:$0xf] }
  0x1b   : > { %v804_v20 = vshrl.u32 %v724_v14, 16  ;;  %v807_v21 = vshll.u32 %v724_v14, 16  ;;  %v813_v22 = vshrl.u32 %v725_v19, 16  ;;  %v816_v23 = vshll.u32 %v725_v19, 16  ;;  %v1427_v27 = vld [vmem:[#allocation2 + $0x14] sm:$0xf] }
  0x1c   : > { %v789_v25 = vrot.slane %v787_v15, 7  ;;  %v797_v26 = vrot.slane %v795_v17, 7  ;;  %v726_v31 = vld [vmem:[%s13406_s28 + $0x10] sm:$0xf]  ;;  %v727_v32 = vld [vmem:[%s13406_s28 + $0x14] sm:$0xf] }
  0x1d   : > { %v806_v29 = vrot.slane %v804_v20, 7  ;;  %v815_v30 = vrot.slane %v813_v22, 7  ;;  %v1433_v37 = vld [vmem:[#allocation2 + $0x24] sm:$0x1]  ;;  %s392_s29 = scalar_select %p391_p7, %s13397_s14, 0  ;;  %v822_v46 = vshrl.u32 %v726_v31, 16 }
  0x1e   : > { %v792_v33 = vor.u32 %v790_v16, %v789_v25  ;;  %v793_v34 = vrot.slane %v789_v25, 4  ;;  %v800_v35 = vor.u32 %v798_v18, %v797_v26  ;;  %v802_v36 = vrot.slane %v797_v26, 4  ;;  %v728_v43 = vld [vmem:[%s13406_s28 + $0x18] sm:$0xf]  ;;  %s569_s7 = scalar_select %p568_p8, 1, 0 }
  0x1f   : > { %v809_v39 = vor.u32 %v807_v21, %v806_v29  ;;  %v811_v40 = vrot.slane %v806_v29, 4  ;;  %v818_v41 = vor.u32 %v816_v23, %v815_v30  ;;  %v820_v42 = vrot.slane %v815_v30, 4  ;;  %s16218_s29 = smov (!%p10587_p9, %s392_s29), 31  ;;  %v13455_v53 = vld [vmem:[%s13406_s28 + $0x1c] sm:$0xf]  ;;  %p581_p11 = scmp.lt.s32.totalorder %s13276_s21, 1 }
  0x20   : > { %v801_v44 = vsel %vm13418_vm7, %v793_v34, %v800_v35  ;;  %v1428_v45 = vsel %vm13425_vm8, %v792_v33, %v1427_v27  ;;  %v825_v47 = vshll.u32 %v726_v31, 16  ;;  %v830_v52 = vshrl.u32 %v727_v32, 16  ;;  %s13452_s8 = scvt.s32.f32 %s569_s7  ;;  %v1436_v59 = vld [vmem:[#allocation2 + $0x28] sm:$0xf]  ;;  %v467_v63 = vld [vmem:[#allocation2 + $0x3c] sm:$0x1] }
  0x21   : > { %v810_v49 = vsel %vm13418_vm7, %v802_v36, %v809_v39  ;;  %1429 = vst [vmem:[#allocation2 + $0x14] sm:$0xf] %v1428_v45  ;;  %1430 = vst.msk [vmem:[#allocation2 + $0x18] sm:$0xf] %vm648_vm6, %v801_v44  ;;  %v819_v50 = vsel %vm13418_vm7, %v811_v40, %v818_v41  ;;  %v1434_v51 = vsel %vm13376_vm2, %v820_v42, %v1433_v37  ;;  %v824_v55 = vrot.slane %v822_v46, 7  ;;  %s10592_s9 = sshll.u32 %s16218_s29, 2 }
  0x22   : > { %1431 = vst.msk [vmem:[#allocation2 + $0x1c] sm:$0xf] %vm648_vm6, %v810_v49  ;;  %1432 = vst.msk [vmem:[#allocation2 + $0x20] sm:$0xf] %vm648_vm6, %v819_v50  ;;  %v833_v56 = vshll.u32 %v727_v32, 16  ;;  %v839_v57 = vshrl.u32 %v728_v43, 16  ;;  %s13476_s14 = sadd.s32 %s13389_s10, %s10592_s9  ;;  %p572_p10 = scmp.ne.f32.partialorder %s13452_s8, %s13452_s8 }
  0x23   : > { %1435 = vst [vmem:[#allocation2 + $0x24] sm:$0x1] %v1434_v51  ;;  %v842_v58 = vshll.u32 %v728_v43, 16  ;;  %v832_v60 = vrot.slane %v830_v52, 7  ;;  %v827_v0 = vor.u32 %v825_v47, %v824_v55  ;;  %v828_v1 = vrot.slane %v824_v55, 4  ;;  %s573_s11 = sshrl.u32 %s13452_s8, 16 }
  0x24   : > { %v13463_v2 = vrot.slane %v839_v57, 7  ;;  %460 = vst [vmem:[#allocation2] sm:$0x1] %v459_v61  ;;  %522 = vst [vmem:[#allocation2 + $0x38] sm:$0x1] %v521_v62  ;;  %v848_v4 = vshrl.u32 %v13455_v53, 16 }
  0x25   : > { %v835_v6 = vor.u32 %v833_v56, %v832_v60  ;;  %v837_v7 = vrot.slane %v832_v60, 4  ;;  %s574_s12 = sand.u32 1, %s573_s11  ;;  %v515_v8 = vsel %vm13384_vm4, 0, %v514_v54  ;;  %vm1655_vm9 = vsmask.f32 3328  ;;  %s10594_s17 = sshll.u32 %s13476_s14, 2 }
  0x26   : > { %v844_v9 = vor.u32 %v842_v58, %v13463_v2  ;;  %v1437_v10 = vsel %vm13425_vm8, %v827_v0, %v1436_v59  ;;  %s575_s13 = sadd.s32 32767, %s574_s12  ;;  %516 = vst [vmem:[#allocation2 + $0x10] sm:$0x1] %v515_v8  ;;  %vm1656_vm10 = vsmask.f32 7440  ;;  %v851_v12 = vshll.u32 %v13455_v53, 16  ;;  %s401_s29 = scalar_lea.vmem %s16097_s0, %s10594_s17 }
  0x27   : > { %v836_v11 = vsel %vm13418_vm7, %v828_v1, %v835_v6  ;;  %1438 = vst [vmem:[#allocation2 + $0x28] sm:$0xf] %v1437_v10  ;;  %s13479_s15 = sadd.s32 %s575_s13, %s13452_s8  ;;  %v468_v13 = vsel %vm13376_vm2, 0, %v467_v63  ;;  %v13492_v17 = vrot.slane %v848_v4, 7  ;;  %v13500_v23 = vld [vmem:[%s13406_s28 + $0x20] sm:$0xf]  ;;  %vm13521_vm12 = vmor %vm1655_vm9, %vm1656_vm10 }
  0x28   : > { %v4929_v14 = vld [vmem:[#allocation2 + $0x14] sm:$0xf]  ;;  %v13484_v15 = vld [vmem:[#allocation2 + $0x18] sm:$0xf]  ;;  %v845_v16 = vsel %vm13418_vm7, %v837_v7, %v844_v9  ;;  %1439 = vst.msk [vmem:[#allocation2 + $0x2c] sm:$0xf] %vm648_vm6, %v836_v11 }
  0x29   : > { %s577_s16 = sand.u32 4294901760, %s13479_s15  ;;  %469 = vst [vmem:[#allocation2 + $0x3c] sm:$0x1] %v468_v13  ;;  %v13494_v18 = vld [vmem:[#allocation2 + $0x1c] sm:$0xf]  ;;  %v5010_v19 = vshrl.u32 %v4929_v14, 16  ;;  %v853_v38 = vor.u32 %v851_v12, %v13492_v17 }
  0x2a   : > { %v5013_v20 = vshll.u32 %v4929_v14, 16  ;;  %v5019_v21 = vshll.u32 %v13484_v15, 16  ;;  %v5023_v22 = vshrl.u32 %v13484_v15, 16  ;;  %1440 = vst.msk [vmem:[#allocation2 + $0x30] sm:$0xf] %vm648_vm6, %v845_v16  ;;  %v5029_v25 = vshll.u32 %v13494_v18, 16 }
  0x2b   : > { %v5033_v26 = vshrl.u32 %v13494_v18, 16  ;;  %v13504_v27 = vld [vmem:[#allocation2 + $0x20] sm:$0xf]  ;;  %v846_v29 = vrot.slane %v13463_v2, 4  ;;  %v5012_v30 = vrot.slane %v5010_v19, 4  ;;  %s16220_s16 = smov (%p572_p10, %s577_s16), 2143289344 }
  0x2c   : > { %v5015_v31 = vrot.slane %v5013_v20, 5  ;;  %v5021_v32 = vrot.slane %v5019_v21, 5  ;;  %v5025_v33 = vrot.slane %v5023_v22, 4  ;;  %v13508_v34 = vld [vmem:[#allocation2 + $0x24] sm:$0x1]  ;;  %v5031_v35 = vrot.slane %v5029_v25, 5 }
  0x2d   : > { %v5035_v36 = vrot.slane %v5033_v26, 4  ;;  %v5039_v37 = vshll.u32 %v13504_v27, 16  ;;  %v5043_v41 = vshrl.u32 %v13504_v27, 16  ;;  %v5049_v42 = vshll.u32 %v13508_v34, 16  ;;  %s580_s18 = sshrl.u32 %s16220_s16, 16  ;;  %s11362_s15 = sadd.s32 16, %s13367_s30 }
  0x2e   : > { %v5016_v39 = vor.u32 %v5015_v31, %v5012_v30  ;;  %v5026_v40 = vor.u32 %v5025_v33, %v5021_v32  ;;  %v16134_v43 = vmov 0  ;;  %v4934_v46 = vld [vmem:[#allocation2 + $0x28] sm:$0xf]  ;;  %v855_v47 = vrot.slane %v13492_v17, 4  ;;  %s598_s7 = sshll.u32 %s580_s18, 16  ;;  %p14608_p12 = scmp.lt.s32.totalorder %s11362_s15, 31 }
  0x2f   : > { %v16135_v43 = vsel %vm13521_vm12, 4294967295, %v16134_v43  ;;  %v5036_v44 = vor.u32 %v5035_v36, %v5031_v35  ;;  %v5041_v45 = vrot.slane %v5039_v37, 5  ;;  %v857_v48 = vshrl.u32 %v13500_v23, 16  ;;  %v4935_v53 = vld [vmem:[#allocation2 + $0x2c] sm:$0xf]  ;;  %s599_s8 = sor.u32 %s598_s7, %s580_s18  ;;  %v13048_v24 = vld [vmem:[%s16101_s4 + $0x78] sm:$0xff]  }
  0x30   : > { %16136 = vst [vmem:[#allocation5_spill] sm:$0xff] %v16135_v43  ;;  %v5017_v49 = vrot.slane %v5016_v39, 4  ;;  %v5027_v50 = vrot.slane %v5026_v40, 4  ;;  %v6376_v51 = vrot.slane %v13494_v18, 5  ;;  %v5045_v52 = vrot.slane %v5043_v41, 4  ;;  %s16222_s15 = smov (!%p14608_p12, %s11362_s15), 31 }
  0x31   : > { %v5037_v54 = vrot.slane %v5036_v44, 4  ;;  %v5051_v55 = vrot.slane %v5049_v42, 5  ;;  %v13532_v56 = vld [vmem:[#allocation2 + $0x30] sm:$0xf]  ;;  %v5054_v57 = vshrl.u32 %v4934_v46, 16  ;;  %v5057_v58 = vshll.u32 %v4934_v46, 16 }
  0x32   : > { %v5022_v59 = vsel %vm13521_vm12, %v5017_v49, %v5021_v32  ;;  %v5032_v60 = vsel %vm13521_vm12, %v5027_v50, %v5031_v35  ;;  %v5046_v61 = vor.u32 %v5045_v52, %v5041_v45  ;;  %v5063_v62 = vshll.u32 %v4935_v53, 16  ;;  %v1442_v63 = vld [vmem:[#allocation2 + $0x38] sm:$0x1]  ;;  %v594_v6 = vld [vmem:[%s401_s29] sm:$0xf]  ;;  %s16224_s15 = smov (!%p14608_p12, %s16222_s15), 31 }
  0x33   : > { %v10908_v0 = vcombine.low %v5022_v59, %v5032_v60  ;;  %v5042_v1 = vsel %vm13521_vm12, %v5037_v54, %v5041_v45  ;;  %v5056_v2 = vrot.slane %v5054_v57, 4  ;;  %v5059_v4 = vrot.slane %v5057_v58, 5  ;;  %v595_v7 = vld [vmem:[%s401_s29 + $0x4] sm:$0xf]  ;;  %v596_v12 = vld [vmem:[%s401_s29 + $0x8] sm:$0xf] }
  0x34   : > { %v5047_v8 = vrot.slane %v5046_v61, 4  ;;  %v5065_v9 = vrot.slane %v5063_v62, 5  ;;  %v5067_v10 = vshrl.u32 %v4935_v53, 16  ;;  %v5073_v11 = vshll.u32 %v13532_v56, 16  ;;  %v597_v14 = vld [vmem:[%s401_s29 + $0xc] sm:$0xf] }
  0x35   : > { %12013 = vmatprep.mubr.msk.bf16.mxu0 %vm2475_vm11, %v10908_v0  ;;  %v5060_v13 = vor.u32 %v5059_v4, %v5056_v2  ;;  %v600_v16 = vstv %s599_s8  ;;  %v854_v17 = vsel %vm13418_vm7, %v846_v29, %v853_v38  ;;  %v1443_v19 = vsel %vm13376_vm2, %v855_v47, %v1442_v63  ;;  %v650_v50 = vld [vmem:[#allocation2] sm:$0xf]  ;;  %s582_s13 = scalar_select %p581_p11, 1, 0 }
  0x36   : > { %v5052_v20 = vsel %vm13521_vm12, %v5047_v8, %v5051_v55  ;;  %v5069_v21 = vrot.slane %v5067_v10, 4  ;;  %v5075_v22 = vrot.slane %v5073_v11, 5  ;;  %v602_v25 = vmul.bf16 %v600_v16, %v594_v6  ;;  %1441 = vst.msk [vmem:[#allocation2 + $0x34] sm:$0xf] %vm648_vm6, %v854_v17  ;;  %1444 = vst [vmem:[#allocation2 + $0x38] sm:$0x1] %v1443_v19 }
  0x37   : > { %v10909_v26 = vcombine.low %v5042_v1, %v5052_v20  ;;  %v5061_v30 = vrot.slane %v5060_v13, 4  ;;  %v603_v31 = vmul.bf16 %v600_v16, %v595_v7  ;;  %v604_v32 = vmul.bf16 %v600_v16, %v596_v12  ;;  %v731_v10 = vld [vmem:[%s13406_s28 + $0x24] sm:$0xf]  ;;  %v13569_v19 = vld [vmem:[%s13406_s28 + $0x28] sm:$0xf]  ;;  %s14586_s14 = scvt.s32.f32 %s582_s13  ;;  %s10606_s9 = sshll.u32 %s13276_s21, 2 }
  0x38   : > { %v5070_v33 = vor.u32 %v5069_v21, %v5065_v9  ;;  %v605_v35 = vmul.bf16 %v600_v16, %v597_v14  ;;  %v609_v36 = vshrl.u32 %v602_v25, 16  ;;  %v612_v29 = vshll.u32 %v602_v25, 16  ;;  %p437_p0 = scmp.lt.s32.totalorder %s10606_s9, 7 }
  0x39   : > { %12014 = vmatmul.mubr.msk.bf16.vlgmr.msra.gmra.mrb[0].mxu0 %vm2475_vm11, %v10909_v26  ;;  %v5066_v37 = vsel %vm13521_vm12, %v5061_v30, %v5065_v9  ;;  %v617_v38 = vshrl.u32 %v603_v31, 16  ;;  %v620_v39 = vshll.u32 %v603_v31, 16  ;;  %v626_v40 = vshrl.u32 %v604_v32, 16  ;;  %v657_v9 = vld [vmem:[#allocation2 + $0x10] sm:$0x1]  ;;  %s586_s16 = sshrl.u32 %s14586_s14, 16  ;;  %p585_p13 = scmp.ne.f32.partialorder %s14586_s14, %s14586_s14 }
  0x3a   : > { %v5071_v41 = vrot.slane %v5070_v33, 4  ;;  %v611_v42 = vrot.slane %v609_v36, 7  ;;  %v629_v44 = vshll.u32 %v604_v32, 16  ;;  %v635_v45 = vshrl.u32 %v605_v35, 16  ;;  %v1445_v31 = vld [vmem:[#allocation2 + $0x3c] sm:$0xf] }
  0x3b   : > { %v619_v46 = vrot.slane %v617_v38, 7  ;;  %v628_v47 = vrot.slane %v626_v40, 7  ;;  %v638_v49 = vshll.u32 %v605_v35, 16  ;;  %v5077_v52 = vshrl.u32 %v13532_v56, 16  ;;  %s587_s18 = sand.u32 1, %s586_s16  ;;  %s16228_s9 = smov (!%p437_p0, %s10606_s9), 7 }
  0x3c   : > { %v5076_v53 = vsel %vm13521_vm12, %v5071_v41, %v5075_v22  ;;  %v614_v54 = vor.u32 %v612_v29, %v611_v42  ;;  %v615_v55 = vrot.slane %v611_v42, 4  ;;  %v637_v57 = vrot.slane %v635_v45, 7  ;;  %v13577_v29 = vld [vmem:[#allocation2 + $0x14] sm:$0xf]  ;;  %s588_s19 = sadd.s32 32767, %s587_s18 }
  0x3d   : > { %v10910_v58 = vcombine.low %v5066_v37, %v5076_v53  ;;  %v622_v59 = vor.u32 %v620_v39, %v619_v46  ;;  %v624_v60 = vrot.slane %v619_v46, 4  ;;  %v631_v61 = vor.u32 %v629_v44, %v628_v47  ;;  %v4937_v62 = vld [vmem:[#allocation2 + $0x34] sm:$0xf]  ;;  %v4938_v63 = vld [vmem:[#allocation2 + $0x38] sm:$0x1]  ;;  %s14616_s30 = sadd.s32 %s588_s19, %s14586_s14 }
  0x3e   : > { %v633_v0 = vrot.slane %v628_v47, 4  ;;  %v640_v1 = vor.u32 %v638_v49, %v637_v57  ;;  %v651_v2 = vsel %vm13425_vm8, %v614_v54, %v650_v50  ;;  %v5079_v4 = vrot.slane %v5077_v52, 4  ;;  %s590_s29 = sand.u32 4294901760, %s14616_s30 }
  0x3f   : > { %12017 = vmatprep.mubr.msk.bf16.mxu0 %vm2475_vm11, %v10910_v58  ;;  %v623_v56 = vsel %vm13418_vm7, %v615_v55, %v622_v59  ;;  %v632_v6 = vsel %vm13418_vm7, %v624_v60, %v631_v61  ;;  %652 = vst [vmem:[#allocation2] sm:$0xf] %v651_v2  ;;  %v5083_v7 = vshll.u32 %v4937_v62, 16  ;;  %v5087_v8 = vshrl.u32 %v4937_v62, 16  ;;  %s16226_s29 = smov (%p585_p13, %s590_s29), 2143289344 }
  0x40   : > { %v641_v11 = vsel %vm13418_vm7, %v633_v0, %v640_v1  ;;  %654 = vst.msk [vmem:[#allocation2 + $0x4] sm:$0xf] %vm648_vm6, %v623_v56  ;;  %655 = vst.msk [vmem:[#allocation2 + $0x8] sm:$0xf] %vm648_vm6, %v632_v6  ;;  %v5080_v12 = vor.u32 %v5079_v4, %v5075_v22  ;;  %v5093_v13 = vshll.u32 %v4938_v63, 16  ;;  %v642_v14 = vrot.slane %v637_v57, 4 }
  0x41   : > { %656 = vst.msk [vmem:[#allocation2 + $0xc] sm:$0xf] %vm648_vm6, %v641_v11  ;;  %v5085_v16 = vrot.slane %v5083_v7, 5  ;;  %v5089_v17 = vrot.slane %v5087_v8, 4  ;;  %v859_v20 = vrot.slane %v857_v48, 7  ;;  %v860_v21 = vshll.u32 %v13500_v23, 16 }
  0x42   : > { %v6373_v25 = vrot.slane %v13484_v15, 5  ;;  %v5081_v26 = vrot.slane %v5080_v12, 4  ;;  %v658_v30 = vsel %vm13376_vm2, %v642_v14, %v657_v9  ;;  %v865_v22 = vshrl.u32 %v731_v10, 16  ;;  %v1576_v4 = vld [vmem:[#allocation2 + $0x18] sm:$0xf]  ;;  %s593_s11 = sshrl.u32 %s16226_s29, 16 }
  0x43   : > { %v5090_v32 = vor.u32 %v5089_v17, %v5085_v16  ;;  %v5095_v33 = vrot.slane %v5093_v13, 5  ;;  %659 = vst [vmem:[#allocation2 + $0x10] sm:$0x1] %v658_v30  ;;  %v862_v35 = vor.u32 %v860_v21, %v859_v20  ;;  %v868_v36 = vshll.u32 %v731_v10, 16  ;;  %s664_s12 = sshll.u32 %s593_s11, 16 }
  0x44   : > { %v13581_v48 = vrot.slane %v6376_v51, 4  ;;  %v6379_v23 = vrot.slane %v13504_v27, 5  ;;  %v863_v37 = vrot.slane %v859_v20, 4  ;;  %v867_v38 = vrot.slane %v865_v22, 7  ;;  %s665_s13 = sor.u32 %s664_s12, %s593_s11 }
  0x45   : > { %v5086_v39 = vsel %vm13521_vm12, %v5081_v26, %v5085_v16  ;;  %v5091_v40 = vrot.slane %v5090_v32, 4  ;;  %v874_v41 = vshrl.u32 %v13569_v19, 16  ;;  %v1446_v42 = vsel %vm13425_vm8, %v862_v35, %v1445_v31 }
  0x46   : > { %v1571_v44 = vld [vmem:[#allocation2] sm:$0xf]  ;;  %v872_v45 = vrot.slane %v867_v38, 4  ;;  %v877_v46 = vshll.u32 %v13569_v19, 16  ;;  %1447 = vst [vmem:[#allocation2 + $0x3c] sm:$0xf] %v1446_v42  ;;  %v870_v57 = vor.u32 %v868_v36, %v867_v38 }
  0x47   : > { %v1703_v47 = vshrl.u32 %v13577_v29, 16  ;;  %v1706_v49 = vshll.u32 %v13577_v29, 16  ;;  %v1572_v50 = vld [vmem:[#allocation2 + $0x4] sm:$0xf]  ;;  %v1573_v52 = vld [vmem:[#allocation2 + $0x8] sm:$0xf]  ;;  %v5096_v55 = vsel %vm13521_vm12, %v5091_v40, %v5095_v33 }
  0x48   : > { %v1659_v53 = vshrl.u32 %v1571_v44, 16  ;;  %v1662_v54 = vshll.u32 %v1571_v44, 16  ;;  %v1574_v58 = vld [vmem:[#allocation2 + $0xc] sm:$0xf]  ;;  %v1668_v59 = vshll.u32 %v1572_v50, 16  ;;  %v1672_v60 = vshrl.u32 %v1572_v50, 16 }
  0x49   : > { %v1678_v61 = vshll.u32 %v1573_v52, 16  ;;  %v1682_v62 = vshrl.u32 %v1573_v52, 16  ;;  %v10911_v1 = vcombine.low %v5086_v39, %v5096_v55  ;;  %v13594_v2 = vrot.slane %v874_v41, 7  ;;  %v523_v40 = vld [vmem:[#allocation2 + $0x4c] sm:$0x1] }
  0x4a   : > { %v1661_v63 = vrot.slane %v1659_v53, 4  ;;  %v1664_v0 = vrot.slane %v1662_v54, 5  ;;  %v1670_v56 = vrot.slane %v1668_v59, 5  ;;  %v1674_v6 = vrot.slane %v1672_v60, 4  ;;  %v1639_v9 = vld [vmem:[#allocation2 + $0x10] sm:$0x1] }
  0x4b   : > { %v1680_v7 = vrot.slane %v1678_v61, 5  ;;  %v1684_v8 = vrot.slane %v1682_v62, 4  ;;  %12018 = vmatmul.mubr.msk.bf16.gmra.mrb[4].mxu0 %vm2475_vm11, %v10911_v1  ;;  %v1688_v11 = vshll.u32 %v1574_v58, 16  ;;  %v1692_v12 = vshrl.u32 %v1574_v58, 16  ;;  %v733_v55 = vld [vmem:[%s13406_s28 + $0x2c] sm:$0xf] }
  0x4c   : > { %v1665_v10 = vor.u32 %v1664_v0, %v1661_v63  ;;  %v1698_v13 = vshll.u32 %v1639_v9, 16  ;;  %v1675_v14 = vor.u32 %v1674_v6, %v1670_v56  ;;  %v871_v17 = vsel %vm13418_vm7, %v863_v37, %v870_v57  ;;  %v1577_v37 = vld [vmem:[#allocation2 + $0x1c] sm:$0xf]  ;;  %v1578_v63 = vld [vmem:[#allocation2 + $0x20] sm:$0xf] }
  0x4d   : > { %v1685_v16 = vor.u32 %v1684_v8, %v1680_v7  ;;  %v1712_v19 = vshll.u32 %v1576_v4, 16  ;;  %v1690_v21 = vrot.slane %v1688_v11, 5  ;;  %v1694_v26 = vrot.slane %v1692_v12, 4  ;;  %1448 = vst.msk [vmem:[#allocation2 + $0x40] sm:$0xf] %vm648_vm6, %v871_v17 }
  0x4e   : > { %v1666_v20 = vrot.slane %v1665_v10, 4  ;;  %v1700_v30 = vrot.slane %v1698_v13, 5  ;;  %v4939_v22 = vld [vmem:[#allocation2 + $0x3c] sm:$0xf]  ;;  %v1676_v31 = vrot.slane %v1675_v14, 4  ;;  %v879_v33 = vor.u32 %v877_v46, %v13594_v2 }
  0x4f   : > { %v1686_v32 = vrot.slane %v1685_v16, 4  ;;  %v5098_v35 = vshrl.u32 %v4939_v22, 16  ;;  %v1695_v29 = vor.u32 %v1694_v26, %v1690_v21  ;;  %v5101_v38 = vshll.u32 %v4939_v22, 16  ;;  %v1640_v17 = vld [vmem:[#allocation2 + $0x24] sm:$0x1] }
  0x50   : > { %v1671_v36 = vsel %vm13521_vm12, %v1666_v20, %v1670_v56  ;;  %v1705_v39 = vrot.slane %v1703_v47, 4  ;;  %v1681_v41 = vsel %vm13521_vm12, %v1676_v31, %v1680_v7  ;;  %v880_v44 = vsel %vm13418_vm7, %v872_v45, %v879_v33 }
  0x51   : > { %v1691_v42 = vsel %vm13521_vm12, %v1686_v32, %v1690_v21  ;;  %v5100_v46 = vrot.slane %v5098_v35, 4  ;;  %v10616_v50 = vcombine.low %v1671_v36, %v1681_v41  ;;  %v1696_v52 = vrot.slane %v1695_v29, 4  ;;  %1449 = vst.msk [vmem:[#allocation2 + $0x44] sm:$0xf] %vm648_vm6, %v880_v44  ;;  %v470_v36 = vld [vmem:[#allocation2 + $0x50] sm:$0x1] }
  0x52   : > { %v5103_v53 = vrot.slane %v5101_v38, 5  ;;  %v1708_v54 = vrot.slane %v1706_v49, 5  ;;  %v1714_v57 = vrot.slane %v1712_v19, 5  ;;  %v1716_v47 = vshrl.u32 %v1576_v4, 16  ;;  %v734_v29 = vld [vmem:[%s13406_s28 + $0x30] sm:$0xf] }
  0x53   : > { %v1722_v58 = vshll.u32 %v1577_v37, 16  ;;  %v524_v59 = vsel %vm13384_vm4, 0, %v523_v40  ;;  %11741 = vmatprep.mubr.msk.bf16.mxu1 %vm2475_vm11, %v10616_v50  ;;  %v1701_v60 = vsel %vm13521_vm12, %v1696_v52, %v1700_v30  ;;  %v881_v62 = vrot.slane %v13594_v2, 4 }
  0x54   : > { %v5104_v45 = vor.u32 %v5103_v53, %v5100_v46  ;;  %v1709_v61 = vor.u32 %v1708_v54, %v1705_v39  ;;  %525 = vst [vmem:[#allocation2 + $0x4c] sm:$0x1] %v524_v59  ;;  %v10617_v0 = vcombine.low %v1691_v42, %v1701_v60  ;;  %v4940_v49 = vld [vmem:[#allocation2 + $0x40] sm:$0xf]  ;;  %v1718_v1 = vrot.slane %v1716_v47, 4 }
  0x55   : > { %v1724_v56 = vrot.slane %v1722_v58, 5  ;;  %v883_v4 = vshrl.u32 %v733_v55, 16  ;;  %v5107_v7 = vshll.u32 %v4940_v49, 16  ;;  %v5111_v8 = vshrl.u32 %v4940_v49, 16  ;;  %v735_v42 = vld [vmem:[%s13406_s28 + $0x34] sm:$0xf] }
  0x56   : > { %v5105_v6 = vrot.slane %v5104_v45, 4  ;;  %v1710_v9 = vrot.slane %v1709_v61, 4  ;;  %11742 = vmatmul.mubr.msk.bf16.vlgmr.msra.gmra.mrb[0].mxu1 %vm2475_vm11, %v10617_v0  ;;  %v1719_v10 = vor.u32 %v1718_v1, %v1714_v57  ;;  %v886_v12 = vshll.u32 %v733_v55, 16  ;;  %v736_v53 = vld [vmem:[%s13406_s28 + $0x38] sm:$0xf] }
  0x57   : > { %v885_v11 = vrot.slane %v883_v4, 7  ;;  %v1726_v13 = vshrl.u32 %v1577_v37, 16  ;;  %v5109_v14 = vrot.slane %v5107_v7, 5  ;;  %v5113_v16 = vrot.slane %v5111_v8, 4  ;;  %v1579_v58 = vld [vmem:[#allocation2 + $0x28] sm:$0xf] }
  0x58   : > { %v1715_v2 = vsel %vm13521_vm12, %v1710_v9, %v1714_v57  ;;  %v1732_v19 = vshll.u32 %v1578_v63, 16  ;;  %v4941_v20 = vld [vmem:[#allocation2 + $0x44] sm:$0xf]  ;;  %v1720_v21 = vrot.slane %v1719_v10, 4  ;;  %v1736_v57 = vshrl.u32 %v1578_v63, 16 }
  0x59   : > { %v888_v26 = vor.u32 %v886_v12, %v885_v11  ;;  %v890_v30 = vrot.slane %v885_v11, 4  ;;  %v1728_v22 = vrot.slane %v1726_v13, 4  ;;  %v5110_v31 = vsel %vm13521_vm12, %v5105_v6, %v5109_v14 }
  0x5a   : > { %v5114_v32 = vor.u32 %v5113_v16, %v5109_v14  ;;  %v5117_v33 = vshll.u32 %v4941_v20, 16  ;;  %v5121_v35 = vshrl.u32 %v4941_v20, 16  ;;  %v1725_v38 = vsel %vm13521_vm12, %v1720_v21, %v1724_v56 }
  0x5b   : > { %v889_v37 = vsel %vm13418_vm7, %v881_v62, %v888_v26  ;;  %v1451_v39 = vld [vmem:[#allocation2 + $0x4c] sm:$0x1]  ;;  %v1729_v40 = vor.u32 %v1728_v22, %v1724_v56  ;;  %v1734_v41 = vrot.slane %v1732_v19, 5  ;;  %v10618_v50 = vcombine.low %v1715_v2, %v1725_v38 }
  0x5c   : > { %v5115_v44 = vrot.slane %v5114_v32, 4  ;;  %v5119_v46 = vrot.slane %v5117_v33, 5  ;;  %1450 = vst.msk [vmem:[#allocation2 + $0x48] sm:$0xf] %vm648_vm6, %v889_v37  ;;  %v1452_v52 = vsel %vm13376_vm2, %v890_v30, %v1451_v39  ;;  %v5123_v54 = vrot.slane %v5121_v35, 4 }
  0x5d   : > { %1453 = vst [vmem:[#allocation2 + $0x4c] sm:$0x1] %v1452_v52  ;;  %v1730_v55 = vrot.slane %v1729_v40, 4  ;;  %v1742_v47 = vshll.u32 %v1640_v17, 16  ;;  %11745 = vmatprep.mubr.msk.bf16.mxu1 %vm2475_vm11, %v10618_v50  ;;  %v471_v60 = vsel %vm13376_vm2, 0, %v470_v36  ;;  %v892_v45 = vshrl.u32 %v734_v29, 16 }
  0x5e   : > { %v5120_v59 = vsel %vm13521_vm12, %v5115_v44, %v5119_v46  ;;  %v895_v61 = vshll.u32 %v734_v29, 16  ;;  %v1580_v62 = vld [vmem:[#allocation2 + $0x2c] sm:$0xf]  ;;  %v5124_v49 = vor.u32 %v5123_v54, %v5119_v46  ;;  %v1738_v56 = vrot.slane %v1736_v57, 4  ;;  %472 = vst [vmem:[#allocation2 + $0x50] sm:$0x1] %v471_v60 }
  0x5f   : > { %v10912_v0 = vcombine.low %v5110_v31, %v5120_v59  ;;  %v1735_v1 = vsel %vm13521_vm12, %v1730_v55, %v1734_v41  ;;  %v1744_v63 = vrot.slane %v1742_v47, 5  ;;  %v894_v4 = vrot.slane %v892_v45, 7  ;;  %v1581_v29 = vld [vmem:[#allocation2 + $0x30] sm:$0xf]  ;;  %v526_v44 = vld [vmem:[#allocation2 + $0x60] sm:$0x1] }
  0x60   : > { %v900_v6 = vshrl.u32 %v735_v42, 16  ;;  %v903_v7 = vshll.u32 %v735_v42, 16  ;;  %v5125_v8 = vrot.slane %v5124_v49, 4  ;;  %v1739_v9 = vor.u32 %v1738_v56, %v1734_v41  ;;  %v737_v54 = vld [vmem:[%s13406_s28 + $0x3c] sm:$0xf] }
  0x61   : > { %12021 = vmatprep.mubr.msk.bf16.mxu0 %vm2475_vm11, %v10912_v0  ;;  %v909_v10 = vshrl.u32 %v736_v53, 16  ;;  %v912_v11 = vshll.u32 %v736_v53, 16  ;;  %v897_v12 = vor.u32 %v895_v61, %v894_v4  ;;  %v898_v13 = vrot.slane %v894_v4, 4  ;;  %v1582_v55 = vld [vmem:[#allocation2 + $0x34] sm:$0xf] }
  0x62   : > { %v902_v14 = vrot.slane %v900_v6, 7  ;;  %v1747_v16 = vshrl.u32 %v1579_v58, 16  ;;  %v1740_v17 = vrot.slane %v1739_v9, 4  ;;  %v1750_v20 = vshll.u32 %v1579_v58, 16 }
  0x63   : > { %v4942_v2 = vld [vmem:[#allocation2 + $0x48] sm:$0xf]  ;;  %v13640_v19 = vrot.slane %v909_v10, 7  ;;  %v1756_v21 = vshll.u32 %v1580_v62, 16  ;;  %v1760_v59 = vshrl.u32 %v1580_v62, 16  ;;  %v1766_v45 = vshll.u32 %v1581_v29, 16 }
  0x64   : > { %v4943_v26 = vld [vmem:[#allocation2 + $0x4c] sm:$0x1]  ;;  %v5127_v30 = vshll.u32 %v4942_v2, 16  ;;  %v5131_v22 = vshrl.u32 %v4942_v2, 16  ;;  %v905_v31 = vor.u32 %v903_v7, %v902_v14  ;;  %v907_v32 = vrot.slane %v902_v14, 4  ;;  %v13005_v2 = vld [vmem:[%s16101_s4 + $0x50] sm:$0xff]  }
  0x65   : > { %v5137_v33 = vshll.u32 %v4943_v26, 16  ;;  %v1745_v35 = vsel %vm13521_vm12, %v1740_v17, %v1744_v63  ;;  %v914_v36 = vor.u32 %v912_v11, %v13640_v19  ;;  %v1749_v38 = vrot.slane %v1747_v16, 4  ;;  %v1454_v42 = vld [vmem:[#allocation2 + $0x50] sm:$0xf]  ;;  %12077 = vmatprep.subr.bf16.mxu0 %v13005_v2 }
  0x66   : > { %v5129_v37 = vrot.slane %v5127_v30, 5  ;;  %v5133_v39 = vrot.slane %v5131_v22, 4  ;;  %v10619_v40 = vcombine.low %v1735_v1, %v1745_v35  ;;  %v906_v41 = vsel %vm13418_vm7, %v898_v13, %v905_v31  ;;  %v473_v35 = vld [vmem:[#allocation2 + $0x64] sm:$0x1]  ;;  %12078 = vmatpush3.bf16.msra.mxu0 %v13005_v2 }
  0x67   : > { %v5139_v46 = vrot.slane %v5137_v33, 5  ;;  %v915_v50 = vsel %vm13418_vm7, %v907_v32, %v914_v36  ;;  %v1455_v52 = vsel %vm13425_vm8, %v897_v12, %v1454_v42  ;;  %1457 = vst.msk [vmem:[#allocation2 + $0x54] sm:$0xf] %vm648_vm6, %v906_v41  ;;  %v1752_v53 = vrot.slane %v1750_v20, 5 }
  0x68   : > { %v5130_v57 = vsel %vm13521_vm12, %v5125_v8, %v5129_v37  ;;  %v5134_v47 = vor.u32 %v5133_v39, %v5129_v37  ;;  %11746 = vmatmul.mubr.msk.bf16.gmra.mrb[4].mxu1 %vm2475_vm11, %v10619_v40  ;;  %1456 = vst [vmem:[#allocation2 + $0x50] sm:$0xf] %v1455_v52  ;;  %1458 = vst.msk [vmem:[#allocation2 + $0x58] sm:$0xf] %vm648_vm6, %v915_v50  ;;  %v1758_v58 = vrot.slane %v1756_v21, 5  ;;  %v527_v61 = vsel %vm13384_vm4, 0, %v526_v44 }
  0x69   : > { %v1753_v60 = vor.u32 %v1752_v53, %v1749_v38  ;;  %v916_v0 = vrot.slane %v13640_v19, 4  ;;  %v1762_v1 = vrot.slane %v1760_v59, 4  ;;  %528 = vst [vmem:[#allocation2 + $0x60] sm:$0x1] %v527_v61  ;;  %v918_v56 = vshrl.u32 %v737_v54, 16 }
  0x6a   : > { %v5135_v49 = vrot.slane %v5134_v47, 4  ;;  %v921_v63 = vshll.u32 %v737_v54, 16  ;;  %v1768_v6 = vrot.slane %v1766_v45, 5  ;;  %v1770_v7 = vshrl.u32 %v1581_v29, 16  ;;  %v1641_v39 = vld [vmem:[#allocation2 + $0x38] sm:$0x1] }
  0x6b   : > { %v1754_v4 = vrot.slane %v1753_v60, 4  ;;  %v1776_v8 = vshll.u32 %v1582_v55, 16  ;;  %v1763_v62 = vor.u32 %v1762_v1, %v1758_v58  ;;  %v920_v10 = vrot.slane %v918_v56, 7  ;;  %v738_v50 = vld [vmem:[%s13406_s28 + $0x40] sm:$0xf] }
  0x6c   : > { %v5140_v9 = vsel %vm13521_vm12, %v5135_v49, %v5139_v46  ;;  %v1780_v11 = vshrl.u32 %v1582_v55, 16  ;;  %v1772_v14 = vrot.slane %v1770_v7, 4  ;;  %v739_v60 = vld [vmem:[%s13406_s28 + $0x44] sm:$0xf]  ;;  %v1786_v61 = vshll.u32 %v1641_v39, 16 }
  0x6d   : > { %v10913_v12 = vcombine.low %v5130_v57, %v5140_v9  ;;  %v1759_v13 = vsel %vm13521_vm12, %v1754_v4, %v1758_v58  ;;  %v13664_v16 = vrot.slane %v1776_v8, 5  ;;  %v1764_v19 = vrot.slane %v1763_v62, 4 }
  0x6e   : > { %v4945_v17 = vld [vmem:[#allocation2 + $0x54] sm:$0xf]  ;;  %v923_v20 = vor.u32 %v921_v63, %v920_v10  ;;  %v925_v21 = vrot.slane %v920_v10, 4  ;;  %v1782_v26 = vrot.slane %v1780_v11, 4  ;;  %v1773_v33 = vor.u32 %v1772_v14, %v1768_v6 }
  0x6f   : > { %12022 = vmatmul.mubr.msk.bf16.gmra.mrb[8].mxu0 %vm2475_vm11, %v10913_v12  ;;  %v4944_v30 = vld [vmem:[#allocation2 + $0x50] sm:$0xf]  ;;  %v4946_v22 = vld [vmem:[#allocation2 + $0x58] sm:$0xf]  ;;  %v5151_v31 = vshll.u32 %v4945_v17, 16  ;;  %v5155_v32 = vshrl.u32 %v4945_v17, 16  ;;  %v1769_v37 = vsel %vm13521_vm12, %v1764_v19, %v1768_v6 }
  0x70   : > { %v5142_v36 = vshrl.u32 %v4944_v30, 16  ;;  %v5145_v29 = vshll.u32 %v4944_v30, 16  ;;  %v5161_v38 = vshll.u32 %v4946_v22, 16  ;;  %v10620_v42 = vcombine.low %v1759_v13, %v1769_v37  ;;  %v1460_v46 = vld [vmem:[#allocation2 + $0x60] sm:$0x1] }
  0x71   : > { %v5153_v40 = vrot.slane %v5151_v31, 5  ;;  %v5157_v41 = vrot.slane %v5155_v32, 4  ;;  %v924_v44 = vsel %vm13418_vm7, %v916_v0, %v923_v20  ;;  %v1461_v55 = vsel %vm13376_vm2, %v925_v21, %v1460_v46  ;;  %v740_v6 = vld [vmem:[%s13406_s28 + $0x48] sm:$0xf]  ;;  %v1583_v19 = vld [vmem:[#allocation2 + $0x3c] sm:$0xf] }
  0x72   : > { %v5144_v52 = vrot.slane %v5142_v36, 4  ;;  %v5147_v53 = vrot.slane %v5145_v29, 5  ;;  %v5163_v54 = vrot.slane %v5161_v38, 5  ;;  %1459 = vst.msk [vmem:[#allocation2 + $0x5c] sm:$0xf] %vm648_vm6, %v924_v44  ;;  %11749 = vmatprep.mubr.msk.bf16.mxu1 %vm2475_vm11, %v10620_v42  ;;  %v5165_v47 = vshrl.u32 %v4946_v22, 16 }
  0x73   : > { %v5158_v57 = vor.u32 %v5157_v41, %v5153_v40  ;;  %1462 = vst [vmem:[#allocation2 + $0x60] sm:$0x1] %v1461_v55  ;;  %v1774_v58 = vrot.slane %v1773_v33, 4  ;;  %v1783_v59 = vor.u32 %v1782_v26, %v13664_v16  ;;  %v474_v0 = vsel %vm13376_vm2, 0, %v473_v35  ;;  %v1584_v29 = vld [vmem:[#allocation2 + $0x40] sm:$0xf] }
  0x74   : > { %v5148_v45 = vor.u32 %v5147_v53, %v5144_v52  ;;  %v927_v49 = vshrl.u32 %v738_v50, 16  ;;  %v5167_v56 = vrot.slane %v5165_v47, 4  ;;  %475 = vst [vmem:[#allocation2 + $0x64] sm:$0x1] %v474_v0  ;;  %v1788_v8 = vrot.slane %v1786_v61, 5 }
  0x75   : > { %v5159_v1 = vrot.slane %v5158_v57, 4  ;;  %v1779_v63 = vsel %vm13521_vm12, %v1774_v58, %v13664_v16  ;;  %v1784_v4 = vrot.slane %v1783_v59, 4  ;;  %v930_v62 = vshll.u32 %v738_v50, 16  ;;  %v529_v38 = vld [vmem:[#allocation2 + $0x74] sm:$0x1] }
  0x76   : > { %v5149_v7 = vrot.slane %v5148_v45, 4  ;;  %v929_v9 = vrot.slane %v927_v49, 7  ;;  %v5168_v11 = vor.u32 %v5167_v56, %v5163_v54  ;;  %v935_v12 = vshrl.u32 %v739_v60, 16  ;;  %v1585_v41 = vld [vmem:[#allocation2 + $0x44] sm:$0xf] }
  0x77   : > { %v5164_v10 = vsel %vm13521_vm12, %v5159_v1, %v5163_v54  ;;  %v938_v13 = vshll.u32 %v739_v60, 16  ;;  %v1789_v2 = vsel %vm13521_vm12, %v1784_v4, %v1788_v8  ;;  %v944_v35 = vshrl.u32 %v740_v6, 16  ;;  %v741_v54 = vld [vmem:[%s13406_s28 + $0x4c] sm:$0xf]  ;;  %v1586_v0 = vld [vmem:[#allocation2 + $0x48] sm:$0xf] }
  0x78   : > { %v5154_v14 = vsel %vm13521_vm12, %v5149_v7, %v5153_v40  ;;  %v932_v16 = vor.u32 %v930_v62, %v929_v9  ;;  %v933_v17 = vrot.slane %v929_v9, 4  ;;  %v5169_v26 = vrot.slane %v5168_v11, 4 }
  0x79   : > { %v10914_v20 = vcombine.low %v5154_v14, %v5164_v10  ;;  %v4947_v21 = vld [vmem:[#allocation2 + $0x5c] sm:$0xf]  ;;  %v10621_v30 = vcombine.low %v1779_v63, %v1789_v2  ;;  %v937_v22 = vrot.slane %v935_v12, 7  ;;  %v947_v36 = vshll.u32 %v740_v6, 16  ;;  %v1642_v12 = vld [vmem:[#allocation2 + $0x4c] sm:$0x1] }
  0x7a   : > { %v4948_v31 = vld [vmem:[#allocation2 + $0x60] sm:$0x1]  ;;  %v5171_v32 = vshll.u32 %v4947_v21, 16  ;;  %v5175_v33 = vshrl.u32 %v4947_v21, 16  ;;  %v1791_v42 = vshrl.u32 %v1583_v19, 16  ;;  %v946_v50 = vrot.slane %v944_v35, 7 }
  0x7b   : > { %12025 = vmatprep.mubr.msk.bf16.mxu0 %vm2475_vm11, %v10914_v20  ;;  %v5181_v37 = vshll.u32 %v4948_v31, 16  ;;  %11750 = vmatmul.mubr.msk.bf16.gmra.mrb[8].mxu1 %vm2475_vm11, %v10621_v30  ;;  %v940_v39 = vor.u32 %v938_v13, %v937_v22  ;;  %v942_v40 = vrot.slane %v937_v22, 4  ;;  %v1463_v52 = vld [vmem:[#allocation2 + $0x64] sm:$0xf]  ;;  %v1794_v53 = vshll.u32 %v1583_v19, 16 }
  0x7c   : > { %v5173_v44 = vrot.slane %v5171_v32, 5  ;;  %v5177_v46 = vrot.slane %v5175_v33, 4  ;;  %v1464_v47 = vsel %vm13425_vm8, %v932_v16, %v1463_v52  ;;  %v1793_v58 = vrot.slane %v1791_v42, 4 }
  0x7d   : > { %v5183_v55 = vrot.slane %v5181_v37, 5  ;;  %v941_v57 = vsel %vm13418_vm7, %v933_v17, %v940_v39  ;;  %v949_v45 = vor.u32 %v947_v36, %v946_v50  ;;  %1465 = vst [vmem:[#allocation2 + $0x64] sm:$0xf] %v1464_v47  ;;  %v1796_v61 = vrot.slane %v1794_v53, 5  ;;  %v476_v53 = vld [vmem:[#allocation2 + $0x78] sm:$0x1] }
  0x7e   : > { %v5174_v59 = vsel %vm13521_vm12, %v5169_v26, %v5173_v44  ;;  %v5178_v60 = vor.u32 %v5177_v46, %v5173_v44  ;;  %1466 = vst.msk [vmem:[#allocation2 + $0x68] sm:$0xf] %vm648_vm6, %v941_v57  ;;  %v1800_v49 = vshll.u32 %v1584_v29, 16  ;;  %v1804_v1 = vshrl.u32 %v1584_v29, 16 }
  0x7f   : > { %v1810_v56 = vshll.u32 %v1585_v41, 16  ;;  %v530_v63 = vsel %vm13384_vm4, 0, %v529_v38  ;;  %v950_v6 = vsel %vm13418_vm7, %v942_v40, %v949_v45  ;;  %v1797_v7 = vor.u32 %v1796_v61, %v1793_v58 }
  0x80   : > { %v5179_v4 = vrot.slane %v5178_v60, 4  ;;  %531 = vst [vmem:[#allocation2 + $0x74] sm:$0x1] %v530_v63  ;;  %v951_v8 = vrot.slane %v946_v50, 4  ;;  %1467 = vst.msk [vmem:[#allocation2 + $0x6c] sm:$0xf] %vm648_vm6, %v950_v6 }
  0x81   : > { %v1802_v9 = vrot.slane %v1800_v49, 5  ;;  %v1806_v62 = vrot.slane %v1804_v1, 4  ;;  %v1812_v10 = vrot.slane %v1810_v56, 5  ;;  %v953_v11 = vshrl.u32 %v741_v54, 16  ;;  %v743_v49 = vld [vmem:[%s13406_s28 + $0x54] sm:$0xf] }
  0x82   : > { %v5184_v13 = vsel %vm13521_vm12, %v5179_v4, %v5183_v55  ;;  %v1798_v14 = vrot.slane %v1797_v7, 4  ;;  %v956_v2 = vshll.u32 %v741_v54, 16  ;;  %v1814_v16 = vshrl.u32 %v1585_v41, 16 }
  0x83   : > { %v10915_v17 = vcombine.low %v5174_v59, %v5184_v13  ;;  %v1807_v19 = vor.u32 %v1806_v62, %v1802_v9  ;;  %v955_v20 = vrot.slane %v953_v11, 7  ;;  %v1820_v21 = vshll.u32 %v1586_v0, 16  ;;  %v744_v62 = vld [vmem:[%s13406_s28 + $0x58] sm:$0xf] }
  0x84   : > { %v6382_v26 = vrot.slane %v13508_v34, 5  ;;  %v1816_v30 = vrot.slane %v1814_v16, 4  ;;  %v1824_v22 = vshrl.u32 %v1586_v0, 16  ;;  %v1830_v31 = vshll.u32 %v1642_v12, 16  ;;  %v4949_v32 = vld [vmem:[#allocation2 + $0x64] sm:$0xf] }
  0x85   : > { %12026 = vmatmul.mubr.msk.bf16.gmra.mrb[12].mxu0 %vm2475_vm11, %v10915_v17  ;;  %v4950_v33 = vld [vmem:[#allocation2 + $0x68] sm:$0xf]  ;;  %v1803_v35 = vsel %vm13521_vm12, %v1798_v14, %v1802_v9  ;;  %v1808_v36 = vrot.slane %v1807_v19, 4  ;;  %v958_v29 = vor.u32 %v956_v2, %v955_v20  ;;  %v960_v38 = vrot.slane %v955_v20, 4  ;;  %v742_v0 = vld [vmem:[%s13406_s28 + $0x50] sm:$0xf] }
  0x86   : > { %v5186_v37 = vshrl.u32 %v4949_v32, 16  ;;  %v5189_v39 = vshll.u32 %v4949_v32, 16  ;;  %v5195_v40 = vshll.u32 %v4950_v33, 16  ;;  %v5199_v41 = vshrl.u32 %v4950_v33, 16 }
  0x87   : > { %v1813_v42 = vsel %vm13521_vm12, %v1808_v36, %v1812_v10  ;;  %v959_v44 = vsel %vm13418_vm7, %v951_v8, %v958_v29  ;;  %v1469_v46 = vld [vmem:[#allocation2 + $0x74] sm:$0x1]  ;;  %v1817_v50 = vor.u32 %v1816_v30, %v1812_v10  ;;  %v1822_v52 = vrot.slane %v1820_v21, 5  ;;  %v4951_v54 = vld [vmem:[#allocation2 + $0x6c] sm:$0xf] }
  0x88   : > { %v5188_v55 = vrot.slane %v5186_v37, 4  ;;  %v5191_v57 = vrot.slane %v5189_v39, 5  ;;  %v5197_v47 = vrot.slane %v5195_v40, 5  ;;  %v5201_v58 = vrot.slane %v5199_v41, 4  ;;  %1468 = vst.msk [vmem:[#allocation2 + $0x70] sm:$0xf] %vm648_vm6, %v959_v44 }
  0x89   : > { %v5205_v59 = vshll.u32 %v4951_v54, 16  ;;  %v10622_v60 = vcombine.low %v1803_v35, %v1813_v42  ;;  %v1470_v45 = vsel %vm13376_vm2, %v960_v38, %v1469_v46  ;;  %v5209_v61 = vshrl.u32 %v4951_v54, 16  ;;  %v1587_v39 = vld [vmem:[#allocation2 + $0x50] sm:$0xf] }
  0x8a   : > { %v5192_v1 = vor.u32 %v5191_v57, %v5188_v55  ;;  %v5202_v56 = vor.u32 %v5201_v58, %v5197_v47  ;;  %1471 = vst [vmem:[#allocation2 + $0x74] sm:$0x1] %v1470_v45  ;;  %v1818_v63 = vrot.slane %v1817_v50, 4  ;;  %v1826_v4 = vrot.slane %v1824_v22, 4  ;;  %v1588_v50 = vld [vmem:[#allocation2 + $0x54] sm:$0xf] }
  0x8b   : > { %v5207_v6 = vrot.slane %v5205_v59, 5  ;;  %11753 = vmatprep.mubr.msk.bf16.mxu1 %vm2475_vm11, %v10622_v60  ;;  %v5211_v7 = vrot.slane %v5209_v61, 4  ;;  %v1832_v8 = vrot.slane %v1830_v31, 5  ;;  %v477_v9 = vsel %vm13376_vm2, 0, %v476_v53 }
  0x8c   : > { %v5193_v10 = vrot.slane %v5192_v1, 4  ;;  %v5203_v11 = vrot.slane %v5202_v56, 4  ;;  %v1823_v12 = vsel %vm13521_vm12, %v1818_v63, %v1822_v52  ;;  %v1827_v13 = vor.u32 %v1826_v4, %v1822_v52  ;;  %478 = vst [vmem:[#allocation2 + $0x78] sm:$0x1] %v477_v9  ;;  %v532_v52 = vld [vmem:[#allocation2 + $0x88] sm:$0x1] }
  0x8d   : > { %v5212_v14 = vor.u32 %v5211_v7, %v5207_v6  ;;  %v962_v2 = vshrl.u32 %v742_v0, 16  ;;  %v965_v16 = vshll.u32 %v742_v0, 16  ;;  %v970_v17 = vshrl.u32 %v743_v49, 16  ;;  %v745_v0 = vld [vmem:[%s13406_s28 + $0x5c] sm:$0xf] }
  0x8e   : > { %v5198_v19 = vsel %vm13521_vm12, %v5193_v10, %v5197_v47  ;;  %v5208_v20 = vsel %vm13521_vm12, %v5203_v11, %v5207_v6  ;;  %v1828_v21 = vrot.slane %v1827_v13, 4  ;;  %v973_v30 = vshll.u32 %v743_v49, 16  ;;  %v1589_v47 = vld [vmem:[#allocation2 + $0x58] sm:$0xf]  ;;  %v1590_v9 = vld [vmem:[#allocation2 + $0x5c] sm:$0xf] }
  0x8f   : > { %v10916_v22 = vcombine.low %v5198_v19, %v5208_v20  ;;  %v4952_v31 = vld [vmem:[#allocation2 + $0x70] sm:$0xf]  ;;  %v5213_v32 = vrot.slane %v5212_v14, 4  ;;  %v964_v33 = vrot.slane %v962_v2, 7  ;;  %v972_v35 = vrot.slane %v970_v17, 7 }
  0x90   : > { %v5215_v36 = vshll.u32 %v4952_v31, 16  ;;  %v5219_v29 = vshrl.u32 %v4952_v31, 16  ;;  %v1833_v38 = vsel %vm13521_vm12, %v1828_v21, %v1832_v8  ;;  %v979_v37 = vshrl.u32 %v744_v62, 16  ;;  %v479_v13 = vld [vmem:[#allocation2 + $0x8c] sm:$0x1] }
  0x91   : > { %12029 = vmatprep.mubr.msk.bf16.mxu0 %vm2475_vm11, %v10916_v22  ;;  %v4953_v40 = vld [vmem:[#allocation2 + $0x74] sm:$0x1]  ;;  %v10623_v41 = vcombine.low %v1823_v12, %v1833_v38  ;;  %v967_v42 = vor.u32 %v965_v16, %v964_v33  ;;  %v968_v44 = vrot.slane %v964_v33, 4  ;;  %v975_v46 = vor.u32 %v973_v30, %v972_v35  ;;  %v1643_v22 = vld [vmem:[#allocation2 + $0x60] sm:$0x1] }
  0x92   : > { %v5217_v53 = vrot.slane %v5215_v36, 5  ;;  %v5221_v54 = vrot.slane %v5219_v29, 4  ;;  %v5225_v55 = vshll.u32 %v4953_v40, 16  ;;  %v977_v57 = vrot.slane %v972_v35, 4 }
  0x93   : > { %11754 = vmatmul.mubr.msk.bf16.gmra.mrb[12].mxu1 %vm2475_vm11, %v10623_v41  ;;  %v976_v58 = vsel %vm13418_vm7, %v968_v44, %v975_v46  ;;  %v981_v59 = vrot.slane %v979_v37, 7  ;;  %v982_v60 = vshll.u32 %v744_v62, 16  ;;  %v1472_v45 = vld [vmem:[#allocation2 + $0x78] sm:$0xf]  ;;  %v1835_v61 = vshrl.u32 %v1587_v39, 16 }
  0x94   : > { %v5218_v49 = vsel %vm13521_vm12, %v5213_v32, %v5217_v53  ;;  %v5222_v1 = vor.u32 %v5221_v54, %v5217_v53  ;;  %v5227_v56 = vrot.slane %v5225_v55, 5  ;;  %v1473_v63 = vsel %vm13425_vm8, %v967_v42, %v1472_v45  ;;  %1475 = vst.msk [vmem:[#allocation2 + $0x7c] sm:$0xf] %vm648_vm6, %v976_v58 }
  0x95   : > { %v984_v4 = vor.u32 %v982_v60, %v981_v59  ;;  %1474 = vst [vmem:[#allocation2 + $0x78] sm:$0xf] %v1473_v63  ;;  %v1837_v6 = vrot.slane %v1835_v61, 4  ;;  %v1838_v7 = vshll.u32 %v1587_v39, 16  ;;  %v1844_v8 = vshll.u32 %v1588_v50, 16 }
  0x96   : > { %v5223_v62 = vrot.slane %v5222_v1, 4  ;;  %v1848_v10 = vshrl.u32 %v1588_v50, 16  ;;  %v1854_v11 = vshll.u32 %v1589_v47, 16  ;;  %v533_v12 = vsel %vm13384_vm4, 0, %v532_v52 }
  0x97   : > { %v985_v14 = vsel %vm13418_vm7, %v977_v57, %v984_v4  ;;  %v1840_v2 = vrot.slane %v1838_v7, 5  ;;  %v1846_v16 = vrot.slane %v1844_v8, 5  ;;  %534 = vst [vmem:[#allocation2 + $0x88] sm:$0x1] %v533_v12  ;;  %v986_v17 = vrot.slane %v981_v59, 4 }
  0x98   : > { %v5228_v19 = vsel %vm13521_vm12, %v5223_v62, %v5227_v56  ;;  %1476 = vst.msk [vmem:[#allocation2 + $0x80] sm:$0xf] %vm648_vm6, %v985_v14  ;;  %v1850_v20 = vrot.slane %v1848_v10, 4  ;;  %v1856_v21 = vrot.slane %v1854_v11, 5  ;;  %v988_v30 = vshrl.u32 %v745_v0, 16 }
  0x99   : > { %v10917_v31 = vcombine.low %v5218_v49, %v5228_v19  ;;  %v1841_v32 = vor.u32 %v1840_v2, %v1837_v6  ;;  %v991_v33 = vshll.u32 %v745_v0, 16  ;;  %v1858_v35 = vshrl.u32 %v1589_v47, 16  ;;  %v746_v62 = vld [vmem:[%s13406_s28 + $0x60] sm:$0xf]  ;;  %v747_v10 = vld [vmem:[%s13406_s28 + $0x64] sm:$0xf] }
  0x9a   : > { %v1851_v36 = vor.u32 %v1850_v20, %v1846_v16  ;;  %v990_v29 = vrot.slane %v988_v30, 7  ;;  %v1864_v38 = vshll.u32 %v1590_v9, 16  ;;  %v1868_v37 = vshrl.u32 %v1590_v9, 16 }
  0x9b   : > { %12030 = vmatmul.mubr.msk.bf16.gmra.mrb[16].mxu0 %vm2475_vm11, %v10917_v31  ;;  %v4955_v39 = vld [vmem:[#allocation2 + $0x7c] sm:$0xf]  ;;  %v1842_v40 = vrot.slane %v1841_v32, 4  ;;  %v1860_v41 = vrot.slane %v1858_v35, 4  ;;  %v1874_v42 = vshll.u32 %v1643_v22, 16  ;;  %v480_v44 = vsel %vm13376_vm2, 0, %v479_v13 }
  0x9c   : > { %v4954_v46 = vld [vmem:[#allocation2 + $0x78] sm:$0xf]  ;;  %v5239_v50 = vshll.u32 %v4955_v39, 16  ;;  %v5243_v52 = vshrl.u32 %v4955_v39, 16  ;;  %v1852_v53 = vrot.slane %v1851_v36, 4  ;;  %v993_v54 = vor.u32 %v991_v33, %v990_v29 }
  0x9d   : > { %481 = vst [vmem:[#allocation2 + $0x8c] sm:$0x1] %v480_v44  ;;  %v5230_v55 = vshrl.u32 %v4954_v46, 16  ;;  %v5233_v57 = vshll.u32 %v4954_v46, 16  ;;  %v1847_v47 = vsel %vm13521_vm12, %v1842_v40, %v1846_v16  ;;  %v995_v58 = vrot.slane %v990_v29, 4 }
  0x9e   : > { %v5241_v59 = vrot.slane %v5239_v50, 5  ;;  %v5245_v60 = vrot.slane %v5243_v52, 4  ;;  %v1857_v45 = vsel %vm13521_vm12, %v1852_v53, %v1856_v21  ;;  %v994_v61 = vsel %vm13418_vm7, %v986_v17, %v993_v54  ;;  %v1478_v0 = vld [vmem:[#allocation2 + $0x88] sm:$0x1] }
  0x9f   : > { %v4956_v49 = vld [vmem:[#allocation2 + $0x80] sm:$0xf]  ;;  %v5232_v1 = vrot.slane %v5230_v55, 4  ;;  %v5235_v56 = vrot.slane %v5233_v57, 5  ;;  %v10624_v63 = vcombine.low %v1847_v47, %v1857_v45  ;;  %1477 = vst.msk [vmem:[#allocation2 + $0x84] sm:$0xf] %vm648_vm6, %v994_v61  ;;  %v1479_v4 = vsel %vm13376_vm2, %v995_v58, %v1478_v0 }
  0xa0   : > { %v5246_v6 = vor.u32 %v5245_v60, %v5241_v59  ;;  %v5249_v7 = vshll.u32 %v4956_v49, 16  ;;  %1480 = vst [vmem:[#allocation2 + $0x88] sm:$0x1] %v1479_v4  ;;  %v5253_v8 = vshrl.u32 %v4956_v49, 16  ;;  %v1861_v9 = vor.u32 %v1860_v41, %v1856_v21  ;;  %v748_v22 = vld [vmem:[%s13406_s28 + $0x68] sm:$0xf] }
  0xa1   : > { %v5236_v11 = vor.u32 %v5235_v56, %v5232_v1  ;;  %11757 = vmatprep.mubr.msk.bf16.mxu1 %vm2475_vm11, %v10624_v63  ;;  %v1866_v12 = vrot.slane %v1864_v38, 5  ;;  %v1870_v13 = vrot.slane %v1868_v37, 4  ;;  %v1876_v14 = vrot.slane %v1874_v42, 5  ;;  %v1591_v45 = vld [vmem:[#allocation2 + $0x64] sm:$0xf] }
  0xa2   : > { %v5247_v2 = vrot.slane %v5246_v6, 4  ;;  %v5251_v16 = vrot.slane %v5249_v7, 5  ;;  %v5255_v17 = vrot.slane %v5253_v8, 4  ;;  %v1862_v19 = vrot.slane %v1861_v9, 4  ;;  %v1592_v61 = vld [vmem:[#allocation2 + $0x68] sm:$0xf] }
  0xa3   : > { %v5237_v20 = vrot.slane %v5236_v11, 4  ;;  %v1871_v30 = vor.u32 %v1870_v13, %v1866_v12  ;;  %v997_v31 = vshrl.u32 %v746_v62, 16  ;;  %v1000_v32 = vshll.u32 %v746_v62, 16  ;;  %v535_v0 = vld [vmem:[#allocation2 + $0x9c] sm:$0x1] }
  0xa4   : > { %v5252_v21 = vsel %vm13521_vm12, %v5247_v2, %v5251_v16  ;;  %v5256_v33 = vor.u32 %v5255_v17, %v5251_v16  ;;  %v1867_v35 = vsel %vm13521_vm12, %v1862_v19, %v1866_v12  ;;  %v1005_v36 = vshrl.u32 %v747_v10, 16  ;;  %v1481_v57 = vld [vmem:[#allocation2 + $0x8c] sm:$0xf]  ;;  %v1594_v19 = vld [vmem:[#allocation2 + $0x70] sm:$0xf] }
  0xa5   : > { %v5242_v29 = vsel %vm13521_vm12, %v5237_v20, %v5241_v59  ;;  %v1872_v38 = vrot.slane %v1871_v30, 4  ;;  %v999_v37 = vrot.slane %v997_v31, 7  ;;  %v1008_v39 = vshll.u32 %v747_v10, 16  ;;  %v1593_v4 = vld [vmem:[#allocation2 + $0x6c] sm:$0xf] }
  0xa6   : > { %v10918_v40 = vcombine.low %v5242_v29, %v5252_v21  ;;  %v4957_v41 = vld [vmem:[#allocation2 + $0x84] sm:$0xf]  ;;  %v5257_v42 = vrot.slane %v5256_v33, 4  ;;  %v1007_v44 = vrot.slane %v1005_v36, 7  ;;  %v1014_v46 = vshrl.u32 %v748_v22, 16 }
  0xa7   : > { %v4958_v50 = vld [vmem:[#allocation2 + $0x88] sm:$0x1]  ;;  %v5259_v52 = vshll.u32 %v4957_v41, 16  ;;  %v5263_v53 = vshrl.u32 %v4957_v41, 16  ;;  %v1877_v54 = vsel %vm13521_vm12, %v1872_v38, %v1876_v14  ;;  %v1002_v55 = vor.u32 %v1000_v32, %v999_v37  ;;  %v749_v62 = vld [vmem:[%s13406_s28 + $0x6c] sm:$0xf] }
  0xa8   : > { %12033 = vmatprep.mubr.msk.bf16.mxu0 %vm2475_vm11, %v10918_v40  ;;  %v5269_v47 = vshll.u32 %v4958_v50, 16  ;;  %v10625_v58 = vcombine.low %v1867_v35, %v1877_v54  ;;  %v1003_v59 = vrot.slane %v999_v37, 4  ;;  %v1010_v60 = vor.u32 %v1008_v39, %v1007_v44 }
  0xa9   : > { %v5261_v49 = vrot.slane %v5259_v52, 5  ;;  %v5265_v1 = vrot.slane %v5263_v53, 4  ;;  %v1012_v56 = vrot.slane %v1007_v44, 4  ;;  %v13777_v63 = vrot.slane %v1014_v46, 7 }
  0xaa   : > { %v5271_v6 = vrot.slane %v5269_v47, 5  ;;  %11758 = vmatmul.mubr.msk.bf16.gmra.mrb[16].mxu1 %vm2475_vm11, %v10625_v58  ;;  %v1011_v7 = vsel %vm13418_vm7, %v1003_v59, %v1010_v60  ;;  %v1017_v8 = vshll.u32 %v748_v22, 16  ;;  %v1482_v9 = vsel %vm13425_vm8, %v1002_v55, %v1481_v57 }
  0xab   : > { %v5262_v10 = vsel %vm13521_vm12, %v5257_v42, %v5261_v49  ;;  %v5266_v11 = vor.u32 %v5265_v1, %v5261_v49  ;;  %1483 = vst [vmem:[#allocation2 + $0x8c] sm:$0xf] %v1482_v9  ;;  %1484 = vst.msk [vmem:[#allocation2 + $0x90] sm:$0xf] %vm648_vm6, %v1011_v7  ;;  %v1879_v12 = vshrl.u32 %v1591_v45, 16  ;;  %v1882_v13 = vshll.u32 %v1591_v45, 16 }
  0xac   : > { %v1019_v14 = vor.u32 %v1017_v8, %v13777_v63  ;;  %v1888_v2 = vshll.u32 %v1592_v61, 16  ;;  %v1892_v16 = vshrl.u32 %v1592_v61, 16  ;;  %v1898_v17 = vshll.u32 %v1593_v4, 16  ;;  %v1644_v1 = vld [vmem:[#allocation2 + $0x74] sm:$0x1] }
  0xad   : > { %v5267_v20 = vrot.slane %v5266_v11, 4  ;;  %v1881_v30 = vrot.slane %v1879_v12, 4  ;;  %v1884_v22 = vrot.slane %v1882_v13, 5  ;;  %v536_v31 = vsel %vm13384_vm4, 0, %v535_v0  ;;  %v482_v12 = vld [vmem:[#allocation2 + $0xa0] sm:$0x1] }
  0xae   : > { %v1020_v32 = vsel %vm13418_vm7, %v1012_v56, %v1019_v14  ;;  %v1890_v21 = vrot.slane %v1888_v2, 5  ;;  %v1894_v33 = vrot.slane %v1892_v16, 4  ;;  %v1900_v35 = vrot.slane %v1898_v17, 5  ;;  %537 = vst [vmem:[#allocation2 + $0x9c] sm:$0x1] %v536_v31 }
  0xaf   : > { %v5272_v36 = vsel %vm13521_vm12, %v5267_v20, %v5271_v6  ;;  %1485 = vst.msk [vmem:[#allocation2 + $0x94] sm:$0xf] %vm648_vm6, %v1020_v32  ;;  %v1885_v29 = vor.u32 %v1884_v22, %v1881_v30  ;;  %v1021_v38 = vrot.slane %v13777_v63, 4  ;;  %v1023_v37 = vshrl.u32 %v749_v62, 16  ;;  %v750_v13 = vld [vmem:[%s13406_s28 + $0x70] sm:$0xf] }
  0xb0   : > { %v10919_v39 = vcombine.low %v5262_v10, %v5272_v36  ;;  %v1895_v40 = vor.u32 %v1894_v33, %v1890_v21  ;;  %v1026_v41 = vshll.u32 %v749_v62, 16  ;;  %v1902_v42 = vshrl.u32 %v1593_v4, 16  ;;  %v752_v32 = vld [vmem:[%s13406_s28 + $0x78] sm:$0xf] }
  0xb1   : > { %v1886_v44 = vrot.slane %v1885_v29, 4  ;;  %v1025_v46 = vrot.slane %v1023_v37, 7  ;;  %v1908_v50 = vshll.u32 %v1594_v19, 16  ;;  %v1912_v52 = vshrl.u32 %v1594_v19, 16  ;;  %v751_v19 = vld [vmem:[%s13406_s28 + $0x74] sm:$0xf] }
  0xb2   : > { %12034 = vmatmul.mubr.msk.bf16.gmra.mrb[20].mxu0 %vm2475_vm11, %v10919_v39  ;;  %v4959_v53 = vld [vmem:[#allocation2 + $0x8c] sm:$0xf]  ;;  %v4960_v54 = vld [vmem:[#allocation2 + $0x90] sm:$0xf]  ;;  %v1896_v55 = vrot.slane %v1895_v40, 4  ;;  %v1904_v57 = vrot.slane %v1902_v42, 4 }
  0xb3   : > { %v5274_v47 = vshrl.u32 %v4959_v53, 16  ;;  %v5277_v58 = vshll.u32 %v4959_v53, 16  ;;  %v5283_v59 = vshll.u32 %v4960_v54, 16  ;;  %v5287_v60 = vshrl.u32 %v4960_v54, 16 }
  0xb4   : > { %v1891_v45 = vsel %vm13521_vm12, %v1886_v44, %v1890_v21  ;;  %v1901_v61 = vsel %vm13521_vm12, %v1896_v55, %v1900_v35  ;;  %v1028_v0 = vor.u32 %v1026_v41, %v1025_v46  ;;  %v1030_v49 = vrot.slane %v1025_v46, 4 }
  0xb5   : > { %v5276_v56 = vrot.slane %v5274_v47, 4  ;;  %v5279_v63 = vrot.slane %v5277_v58, 5  ;;  %v5285_v4 = vrot.slane %v5283_v59, 5  ;;  %v5289_v6 = vrot.slane %v5287_v60, 4  ;;  %v1487_v7 = vld [vmem:[#allocation2 + $0x9c] sm:$0x1] }
  0xb6   : > { %v4961_v8 = vld [vmem:[#allocation2 + $0x94] sm:$0xf]  ;;  %v10626_v9 = vcombine.low %v1891_v45, %v1901_v61  ;;  %v1029_v62 = vsel %vm13418_vm7, %v1021_v38, %v1028_v0  ;;  %v1488_v10 = vsel %vm13376_vm2, %v1030_v49, %v1487_v7  ;;  %v1905_v11 = vor.u32 %v1904_v57, %v1900_v35  ;;  %v1595_v58 = vld [vmem:[#allocation2 + $0x78] sm:$0xf] }
  0xb7   : > { %v5280_v14 = vor.u32 %v5279_v63, %v5276_v56  ;;  %v5290_v2 = vor.u32 %v5289_v6, %v5285_v4  ;;  %v5293_v16 = vshll.u32 %v4961_v8, 16  ;;  %1486 = vst.msk [vmem:[#allocation2 + $0x98] sm:$0xf] %vm648_vm6, %v1029_v62  ;;  %1489 = vst [vmem:[#allocation2 + $0x9c] sm:$0x1] %v1488_v10  ;;  %v5297_v17 = vshrl.u32 %v4961_v8, 16 }
  0xb8   : > { %11761 = vmatprep.mubr.msk.bf16.mxu1 %vm2475_vm11, %v10626_v9  ;;  %v1906_v20 = vrot.slane %v1905_v11, 4  ;;  %v1910_v30 = vrot.slane %v1908_v50, 5  ;;  %v1914_v22 = vrot.slane %v1912_v52, 4  ;;  %v1918_v31 = vshll.u32 %v1644_v1, 16  ;;  %v1597_v62 = vld [vmem:[#allocation2 + $0x80] sm:$0xf] }
  0xb9   : > { %v5281_v21 = vrot.slane %v5280_v14, 4  ;;  %v5291_v33 = vrot.slane %v5290_v2, 4  ;;  %v5295_v35 = vrot.slane %v5293_v16, 5  ;;  %v5299_v36 = vrot.slane %v5297_v17, 4  ;;  %v538_v10 = vld [vmem:[#allocation2 + $0xb0] sm:$0x1] }
  0xba   : > { %v1911_v29 = vsel %vm13521_vm12, %v1906_v20, %v1910_v30  ;;  %v1915_v38 = vor.u32 %v1914_v22, %v1910_v30  ;;  %v1920_v37 = vrot.slane %v1918_v31, 5  ;;  %v483_v39 = vsel %vm13376_vm2, 0, %v482_v12  ;;  %v753_v2 = vld [vmem:[%s13406_s28 + $0x7c] sm:$0xf] }
  0xbb   : > { %v5286_v40 = vsel %vm13521_vm12, %v5281_v21, %v5285_v4  ;;  %v5296_v41 = vsel %vm13521_vm12, %v5291_v33, %v5295_v35  ;;  %v5300_v42 = vor.u32 %v5299_v36, %v5295_v35  ;;  %484 = vst [vmem:[#allocation2 + $0xa0] sm:$0x1] %v483_v39  ;;  %v1032_v44 = vshrl.u32 %v750_v13, 16  ;;  %v1596_v4 = vld [vmem:[#allocation2 + $0x7c] sm:$0xf] }
  0xbc   : > { %v10920_v46 = vcombine.low %v5286_v40, %v5296_v41  ;;  %v1916_v50 = vrot.slane %v1915_v38, 4  ;;  %v1035_v52 = vshll.u32 %v750_v13, 16  ;;  %v1040_v53 = vshrl.u32 %v751_v19, 16  ;;  %v1598_v41 = vld [vmem:[#allocation2 + $0x84] sm:$0xf] }
  0xbd   : > { %v5301_v54 = vrot.slane %v5300_v42, 4  ;;  %v1034_v55 = vrot.slane %v1032_v44, 7  ;;  %v1043_v57 = vshll.u32 %v751_v19, 16  ;;  %v1049_v47 = vshrl.u32 %v752_v32, 16 }
  0xbe   : > { %12037 = vmatprep.mubr.msk.bf16.mxu0 %vm2475_vm11, %v10920_v46  ;;  %v4962_v59 = vld [vmem:[#allocation2 + $0x98] sm:$0xf]  ;;  %v4963_v60 = vld [vmem:[#allocation2 + $0x9c] sm:$0x1]  ;;  %v1921_v45 = vsel %vm13521_vm12, %v1916_v50, %v1920_v37  ;;  %v1042_v61 = vrot.slane %v1040_v53, 7  ;;  %v1052_v0 = vshll.u32 %v752_v32, 16 }
  0xbf   : > { %v5303_v49 = vshll.u32 %v4962_v59, 16  ;;  %v5307_v1 = vshrl.u32 %v4962_v59, 16  ;;  %v5313_v56 = vshll.u32 %v4963_v60, 16  ;;  %v10627_v63 = vcombine.low %v1911_v29, %v1921_v45 }
  0xc0   : > { %v1037_v6 = vor.u32 %v1035_v52, %v1034_v55  ;;  %v1038_v7 = vrot.slane %v1034_v55, 4  ;;  %v1045_v8 = vor.u32 %v1043_v57, %v1042_v61  ;;  %v1047_v9 = vrot.slane %v1042_v61, 4  ;;  %v1645_v52 = vld [vmem:[#allocation2 + $0x88] sm:$0x1] }
  0xc1   : > { %v5305_v11 = vrot.slane %v5303_v49, 5  ;;  %v5309_v12 = vrot.slane %v5307_v1, 4  ;;  %v5315_v13 = vrot.slane %v5313_v56, 5  ;;  %11762 = vmatmul.mubr.msk.bf16.gmra.mrb[20].mxu1 %vm2475_vm11, %v10627_v63  ;;  %v1051_v14 = vrot.slane %v1049_v47, 7 }
  0xc2   : > { %v1046_v16 = vsel %vm13418_vm7, %v1038_v7, %v1045_v8  ;;  %v1490_v17 = vld [vmem:[#allocation2 + $0xa0] sm:$0xf]  ;;  %v1923_v19 = vshrl.u32 %v1595_v58, 16  ;;  %v1926_v20 = vshll.u32 %v1595_v58, 16  ;;  %v1932_v30 = vshll.u32 %v1596_v4, 16 }
  0xc3   : > { %v5306_v22 = vsel %vm13521_vm12, %v5301_v54, %v5305_v11  ;;  %v5310_v31 = vor.u32 %v5309_v12, %v5305_v11  ;;  %v1054_v32 = vor.u32 %v1052_v0, %v1051_v14  ;;  %v1491_v21 = vsel %vm13425_vm8, %v1037_v6, %v1490_v17  ;;  %1493 = vst.msk [vmem:[#allocation2 + $0xa4] sm:$0xf] %vm648_vm6, %v1046_v16 }
  0xc4   : > { %1492 = vst [vmem:[#allocation2 + $0xa0] sm:$0xf] %v1491_v21  ;;  %v1925_v33 = vrot.slane %v1923_v19, 4  ;;  %v1928_v35 = vrot.slane %v1926_v20, 5  ;;  %v1934_v36 = vrot.slane %v1932_v30, 5  ;;  %v1936_v29 = vshrl.u32 %v1596_v4, 16 }
  0xc5   : > { %v5311_v38 = vrot.slane %v5310_v31, 4  ;;  %v1055_v37 = vsel %vm13418_vm7, %v1047_v9, %v1054_v32  ;;  %v1942_v39 = vshll.u32 %v1597_v62, 16  ;;  %v539_v40 = vsel %vm13384_vm4, 0, %v538_v10 }
  0xc6   : > { %1494 = vst.msk [vmem:[#allocation2 + $0xa8] sm:$0xf] %vm648_vm6, %v1055_v37  ;;  %v1929_v42 = vor.u32 %v1928_v35, %v1925_v33  ;;  %v1938_v44 = vrot.slane %v1936_v29, 4  ;;  %540 = vst [vmem:[#allocation2 + $0xb0] sm:$0x1] %v539_v40  ;;  %v1056_v46 = vrot.slane %v1051_v14, 4 }
  0xc7   : > { %v1058_v50 = vshrl.u32 %v753_v2, 16  ;;  %v5316_v53 = vsel %vm13521_vm12, %v5311_v38, %v5315_v13  ;;  %v1944_v54 = vrot.slane %v1942_v39, 5  ;;  %v1061_v55 = vshll.u32 %v753_v2, 16  ;;  %v485_v2 = vld [vmem:[#allocation2 + $0xb4] sm:$0x1] }
  0xc8   : > { %v1946_v57 = vshrl.u32 %v1597_v62, 16  ;;  %v10921_v47 = vcombine.low %v5306_v22, %v5316_v53  ;;  %v1930_v58 = vrot.slane %v1929_v42, 4  ;;  %v1939_v59 = vor.u32 %v1938_v44, %v1934_v36  ;;  %v754_v22 = vld [vmem:[%s13406_s28 + $0x80] sm:$0xf]  ;;  %v755_v35 = vld [vmem:[%s13406_s28 + $0x84] sm:$0xf] }
  0xc9   : > { %v1060_v60 = vrot.slane %v1058_v50, 7  ;;  %v1952_v61 = vshll.u32 %v1598_v41, 16  ;;  %v1956_v0 = vshrl.u32 %v1598_v41, 16  ;;  %v1962_v49 = vshll.u32 %v1645_v52, 16  ;;  %v756_v39 = vld [vmem:[%s13406_s28 + $0x88] sm:$0xf] }
  0xca   : > { %v1948_v45 = vrot.slane %v1946_v57, 4  ;;  %12038 = vmatmul.mubr.msk.bf16.gmra.mrb[24].mxu0 %vm2475_vm11, %v10921_v47  ;;  %v4965_v1 = vld [vmem:[#allocation2 + $0xa4] sm:$0xf]  ;;  %v1935_v56 = vsel %vm13521_vm12, %v1930_v58, %v1934_v36  ;;  %v1940_v63 = vrot.slane %v1939_v59, 4  ;;  %v486_v44 = vsel %vm13376_vm2, 0, %v485_v2 }
  0xcb   : > { %v1063_v4 = vor.u32 %v1061_v55, %v1060_v60  ;;  %v1065_v6 = vrot.slane %v1060_v60, 4  ;;  %v4964_v7 = vld [vmem:[#allocation2 + $0xa0] sm:$0xf]  ;;  %v5327_v8 = vshll.u32 %v4965_v1, 16  ;;  %v5331_v9 = vshrl.u32 %v4965_v1, 16 }
  0xcc   : > { %v1949_v62 = vor.u32 %v1948_v45, %v1944_v54  ;;  %v13841_v10 = vrot.slane %v1952_v61, 5  ;;  %v5318_v11 = vshrl.u32 %v4964_v7, 16  ;;  %v5321_v12 = vshll.u32 %v4964_v7, 16  ;;  %487 = vst [vmem:[#allocation2 + $0xb4] sm:$0x1] %v486_v44 }
  0xcd   : > { %v1945_v13 = vsel %vm13521_vm12, %v1940_v63, %v1944_v54  ;;  %v1064_v14 = vsel %vm13418_vm7, %v1056_v46, %v1063_v4  ;;  %v4966_v16 = vld [vmem:[#allocation2 + $0xa8] sm:$0xf]  ;;  %v5329_v17 = vrot.slane %v5327_v8, 5  ;;  %v5333_v19 = vrot.slane %v5331_v9, 4  ;;  %v1496_v30 = vld [vmem:[#allocation2 + $0xb0] sm:$0x1] }
  0xce   : > { %v10628_v20 = vcombine.low %v1935_v56, %v1945_v13  ;;  %1495 = vst.msk [vmem:[#allocation2 + $0xac] sm:$0xf] %vm648_vm6, %v1064_v14  ;;  %v5320_v31 = vrot.slane %v5318_v11, 4  ;;  %v5323_v32 = vrot.slane %v5321_v12, 5  ;;  %v5337_v21 = vshll.u32 %v4966_v16, 16 }
  0xcf   : > { %v1497_v33 = vsel %vm13376_vm2, %v1065_v6, %v1496_v30  ;;  %v5334_v36 = vor.u32 %v5333_v19, %v5329_v17  ;;  %v5341_v29 = vshrl.u32 %v4966_v16, 16  ;;  %v1950_v38 = vrot.slane %v1949_v62, 4  ;;  %v1599_v8 = vld [vmem:[#allocation2 + $0x8c] sm:$0xf]  ;;  %v1600_v9 = vld [vmem:[#allocation2 + $0x90] sm:$0xf] }
  0xd0   : > { %11765 = vmatprep.mubr.msk.bf16.mxu1 %vm2475_vm11, %v10628_v20  ;;  %1498 = vst [vmem:[#allocation2 + $0xb0] sm:$0x1] %v1497_v33  ;;  %v1958_v37 = vrot.slane %v1956_v0, 4  ;;  %v5324_v40 = vor.u32 %v5323_v32, %v5320_v31  ;;  %v5339_v41 = vrot.slane %v5337_v21, 5  ;;  %v1964_v42 = vrot.slane %v1962_v49, 5 }
  0xd1   : > { %v5335_v46 = vrot.slane %v5334_v36, 4  ;;  %v5343_v50 = vrot.slane %v5341_v29, 4  ;;  %v1955_v52 = vsel %vm13521_vm12, %v1950_v38, %v13841_v10  ;;  %v1067_v55 = vshrl.u32 %v754_v22, 16  ;;  %v1601_v14 = vld [vmem:[#allocation2 + $0x94] sm:$0xf] }
  0xd2   : > { %v1959_v53 = vor.u32 %v1958_v37, %v13841_v10  ;;  %v5325_v54 = vrot.slane %v5324_v40, 4  ;;  %v1070_v57 = vshll.u32 %v754_v22, 16  ;;  %v1075_v47 = vshrl.u32 %v755_v35, 16  ;;  %v541_v2 = vld [vmem:[#allocation2 + $0xc4] sm:$0x1] }
  0xd3   : > { %v5340_v58 = vsel %vm13521_vm12, %v5335_v46, %v5339_v41  ;;  %v5344_v59 = vor.u32 %v5343_v50, %v5339_v41  ;;  %v1078_v45 = vshll.u32 %v755_v35, 16  ;;  %v1069_v49 = vrot.slane %v1067_v55, 7  ;;  %v1499_v21 = vld [vmem:[#allocation2 + $0xb4] sm:$0xf]  ;;  %v757_v38 = vld [vmem:[%s13406_s28 + $0x8c] sm:$0xf] }
  0xd4   : > { %v1960_v60 = vrot.slane %v1959_v53, 4  ;;  %v5330_v61 = vsel %vm13521_vm12, %v5325_v54, %v5329_v17  ;;  %v1077_v1 = vrot.slane %v1075_v47, 7  ;;  %v1084_v56 = vshrl.u32 %v756_v39, 16  ;;  %v1602_v47 = vld [vmem:[#allocation2 + $0x98] sm:$0xf] }
  0xd5   : > { %v4967_v0 = vld [vmem:[#allocation2 + $0xac] sm:$0xf]  ;;  %v10922_v63 = vcombine.low %v5330_v61, %v5340_v58  ;;  %v5345_v4 = vrot.slane %v5344_v59, 4  ;;  %v1072_v11 = vor.u32 %v1070_v57, %v1069_v49  ;;  %v1073_v12 = vrot.slane %v1069_v49, 4  ;;  %v1646_v61 = vld [vmem:[#allocation2 + $0x9c] sm:$0x1] }
  0xd6   : > { %v5347_v6 = vshll.u32 %v4967_v0, 16  ;;  %v5351_v7 = vshrl.u32 %v4967_v0, 16  ;;  %v1965_v10 = vsel %vm13521_vm12, %v1960_v60, %v1964_v42  ;;  %v1080_v13 = vor.u32 %v1078_v45, %v1077_v1 }
  0xd7   : > { %v4968_v62 = vld [vmem:[#allocation2 + $0xb0] sm:$0x1]  ;;  %12041 = vmatprep.mubr.msk.bf16.mxu0 %vm2475_vm11, %v10922_v63  ;;  %v10629_v20 = vcombine.low %v1955_v52, %v1965_v10  ;;  %v1082_v22 = vrot.slane %v1077_v1, 4  ;;  %v13869_v31 = vrot.slane %v1084_v56, 7  ;;  %v1087_v32 = vshll.u32 %v756_v39, 16 }
  0xd8   : > { %v5349_v16 = vrot.slane %v5347_v6, 5  ;;  %v5353_v17 = vrot.slane %v5351_v7, 4  ;;  %v5357_v19 = vshll.u32 %v4968_v62, 16  ;;  %v1081_v30 = vsel %vm13418_vm7, %v1073_v12, %v1080_v13  ;;  %v488_v52 = vld [vmem:[#allocation2 + $0xc8] sm:$0x1] }
  0xd9   : > { %11766 = vmatmul.mubr.msk.bf16.gmra.mrb[24].mxu1 %vm2475_vm11, %v10629_v20  ;;  %v1500_v29 = vsel %vm13425_vm8, %v1072_v11, %v1499_v21  ;;  %1502 = vst.msk [vmem:[#allocation2 + $0xb8] sm:$0xf] %vm648_vm6, %v1081_v30  ;;  %v1089_v37 = vor.u32 %v1087_v32, %v13869_v31  ;;  %v1967_v40 = vshrl.u32 %v1599_v8, 16  ;;  %v1970_v41 = vshll.u32 %v1599_v8, 16 }
  0xda   : > { %v5350_v33 = vsel %vm13521_vm12, %v5345_v4, %v5349_v16  ;;  %v5354_v35 = vor.u32 %v5353_v17, %v5349_v16  ;;  %v5359_v36 = vrot.slane %v5357_v19, 5  ;;  %1501 = vst [vmem:[#allocation2 + $0xb4] sm:$0xf] %v1500_v29  ;;  %v1976_v39 = vshll.u32 %v1600_v9, 16 }
  0xdb   : > { %v1980_v44 = vshrl.u32 %v1600_v9, 16  ;;  %v1986_v46 = vshll.u32 %v1601_v14, 16  ;;  %v542_v50 = vsel %vm13384_vm4, 0, %v541_v2  ;;  %v1090_v53 = vsel %vm13418_vm7, %v1082_v22, %v1089_v37 }
  0xdc   : > { %v5355_v42 = vrot.slane %v5354_v35, 4  ;;  %v1969_v54 = vrot.slane %v1967_v40, 4  ;;  %v1972_v55 = vrot.slane %v1970_v41, 5  ;;  %v1978_v57 = vrot.slane %v1976_v39, 5  ;;  %543 = vst [vmem:[#allocation2 + $0xc4] sm:$0x1] %v542_v50 }
  0xdd   : > { %1503 = vst.msk [vmem:[#allocation2 + $0xbc] sm:$0xf] %vm648_vm6, %v1090_v53  ;;  %v1982_v59 = vrot.slane %v1980_v44, 4  ;;  %v1988_v60 = vrot.slane %v1986_v46, 5  ;;  %v1091_v45 = vrot.slane %v13869_v31, 4  ;;  %v1093_v1 = vshrl.u32 %v757_v38, 16 }
  0xde   : > { %v5360_v58 = vsel %vm13521_vm12, %v5355_v42, %v5359_v36  ;;  %v1973_v49 = vor.u32 %v1972_v55, %v1969_v54  ;;  %v1096_v56 = vshll.u32 %v757_v38, 16  ;;  %v1990_v4 = vshrl.u32 %v1601_v14, 16  ;;  %v758_v40 = vld [vmem:[%s13406_s28 + $0x90] sm:$0xf]  ;;  %v759_v46 = vld [vmem:[%s13406_s28 + $0x94] sm:$0xf] }
  0xdf   : > { %v10923_v0 = vcombine.low %v5350_v33, %v5360_v58  ;;  %v1983_v63 = vor.u32 %v1982_v59, %v1978_v57  ;;  %v1996_v6 = vshll.u32 %v1602_v47, 16  ;;  %v2000_v7 = vshrl.u32 %v1602_v47, 16 }
  0xe0   : > { %v4970_v8 = vld [vmem:[#allocation2 + $0xb8] sm:$0xf]  ;;  %v1974_v9 = vrot.slane %v1973_v49, 4  ;;  %v1095_v62 = vrot.slane %v1093_v1, 7  ;;  %v2006_v10 = vshll.u32 %v1646_v61, 16  ;;  %v489_v11 = vsel %vm13376_vm2, 0, %v488_v52 }
  0xe1   : > { %12042 = vmatmul.mubr.msk.bf16.gmra.mrb[28].mxu0 %vm2475_vm11, %v10923_v0  ;;  %v4969_v12 = vld [vmem:[#allocation2 + $0xb4] sm:$0xf]  ;;  %v5371_v13 = vshll.u32 %v4970_v8, 16  ;;  %v5375_v2 = vshrl.u32 %v4970_v8, 16  ;;  %v1984_v16 = vrot.slane %v1983_v63, 4  ;;  %v1992_v17 = vrot.slane %v1990_v4, 4 }
  0xe2   : > { %490 = vst [vmem:[#allocation2 + $0xc8] sm:$0x1] %v489_v11  ;;  %v5362_v19 = vshrl.u32 %v4969_v12, 16  ;;  %v5365_v14 = vshll.u32 %v4969_v12, 16  ;;  %v1979_v20 = vsel %vm13521_vm12, %v1974_v9, %v1978_v57  ;;  %v1098_v30 = vor.u32 %v1096_v56, %v1095_v62  ;;  %v760_v56 = vld [vmem:[%s13406_s28 + $0x98] sm:$0xf] }
  0xe3   : > { %v5373_v22 = vrot.slane %v5371_v13, 5  ;;  %v5377_v31 = vrot.slane %v5375_v2, 4  ;;  %v1989_v32 = vsel %vm13521_vm12, %v1984_v16, %v1988_v60  ;;  %v1100_v21 = vrot.slane %v1095_v62, 4  ;;  %v1505_v33 = vld [vmem:[#allocation2 + $0xc4] sm:$0x1] }
  0xe4   : > { %v4971_v35 = vld [vmem:[#allocation2 + $0xbc] sm:$0xf]  ;;  %v5364_v36 = vrot.slane %v5362_v19, 4  ;;  %v5367_v29 = vrot.slane %v5365_v14, 5  ;;  %v10630_v38 = vcombine.low %v1979_v20, %v1989_v32  ;;  %v1099_v37 = vsel %vm13418_vm7, %v1091_v45, %v1098_v30  ;;  %v1604_v14 = vld [vmem:[#allocation2 + $0xa4] sm:$0xf] }
  0xe5   : > { %v5378_v41 = vor.u32 %v5377_v31, %v5373_v22  ;;  %v5381_v39 = vshll.u32 %v4971_v35, 16  ;;  %1504 = vst.msk [vmem:[#allocation2 + $0xc0] sm:$0xf] %vm648_vm6, %v1099_v37  ;;  %v1506_v42 = vsel %vm13376_vm2, %v1100_v21, %v1505_v33  ;;  %v5385_v44 = vshrl.u32 %v4971_v35, 16  ;;  %v1603_v21 = vld [vmem:[#allocation2 + $0xa0] sm:$0xf] }
  0xe6   : > { %v5368_v50 = vor.u32 %v5367_v29, %v5364_v36  ;;  %11769 = vmatprep.mubr.msk.bf16.mxu1 %vm2475_vm11, %v10630_v38  ;;  %1507 = vst [vmem:[#allocation2 + $0xc4] sm:$0x1] %v1506_v42  ;;  %v1993_v52 = vor.u32 %v1992_v17, %v1988_v60  ;;  %v1998_v53 = vrot.slane %v1996_v6, 5  ;;  %v2002_v54 = vrot.slane %v2000_v7, 4 }
  0xe7   : > { %v5379_v55 = vrot.slane %v5378_v41, 4  ;;  %v5383_v57 = vrot.slane %v5381_v39, 5  ;;  %v5387_v47 = vrot.slane %v5385_v44, 4  ;;  %v2008_v58 = vrot.slane %v2006_v10, 5  ;;  %v1605_v39 = vld [vmem:[#allocation2 + $0xa8] sm:$0xf] }
  0xe8   : > { %v5369_v59 = vrot.slane %v5368_v50, 4  ;;  %v1994_v45 = vrot.slane %v1993_v52, 4  ;;  %v2003_v61 = vor.u32 %v2002_v54, %v1998_v53  ;;  %v1102_v0 = vshrl.u32 %v758_v40, 16  ;;  %v544_v52 = vld [vmem:[#allocation2 + $0xd8] sm:$0x1] }
  0xe9   : > { %v5384_v49 = vsel %vm13521_vm12, %v5379_v55, %v5383_v57  ;;  %v5388_v1 = vor.u32 %v5387_v47, %v5383_v57  ;;  %v1105_v63 = vshll.u32 %v758_v40, 16  ;;  %v1110_v4 = vshrl.u32 %v759_v46, 16  ;;  %v1508_v19 = vld [vmem:[#allocation2 + $0xc8] sm:$0xf]  ;;  %v761_v47 = vld [vmem:[%s13406_s28 + $0x9c] sm:$0xf] }
  0xea   : > { %v5374_v60 = vsel %vm13521_vm12, %v5369_v59, %v5373_v22  ;;  %v1999_v6 = vsel %vm13521_vm12, %v1994_v45, %v1998_v53  ;;  %v2004_v7 = vrot.slane %v2003_v61, 4  ;;  %v1104_v8 = vrot.slane %v1102_v0, 7 }
  0xeb   : > { %v10924_v9 = vcombine.low %v5374_v60, %v5384_v49  ;;  %v5389_v62 = vrot.slane %v5388_v1, 4  ;;  %v1112_v10 = vrot.slane %v1110_v4, 7  ;;  %v1113_v11 = vshll.u32 %v759_v46, 16 }
  0xec   : > { %v4972_v12 = vld [vmem:[#allocation2 + $0xc0] sm:$0xf]  ;;  %v2009_v13 = vsel %vm13521_vm12, %v2004_v7, %v2008_v58  ;;  %v1107_v2 = vor.u32 %v1105_v63, %v1104_v8  ;;  %v1108_v16 = vrot.slane %v1104_v8, 4  ;;  %v1119_v17 = vshrl.u32 %v760_v56, 16  ;;  %v1606_v63 = vld [vmem:[#allocation2 + $0xac] sm:$0xf] }
  0xed   : > { %12045 = vmatprep.mubr.msk.bf16.mxu0 %vm2475_vm11, %v10924_v9  ;;  %v4973_v20 = vld [vmem:[#allocation2 + $0xc4] sm:$0x1]  ;;  %v5391_v30 = vshll.u32 %v4972_v12, 16  ;;  %v5395_v22 = vshrl.u32 %v4972_v12, 16  ;;  %v10631_v31 = vcombine.low %v1999_v6, %v2009_v13  ;;  %v1115_v32 = vor.u32 %v1113_v11, %v1112_v10 }
  0xee   : > { %v5401_v33 = vshll.u32 %v4973_v20, 16  ;;  %v1117_v35 = vrot.slane %v1112_v10, 4  ;;  %v13912_v36 = vrot.slane %v1119_v17, 7  ;;  %v1122_v29 = vshll.u32 %v760_v56, 16 }
  0xef   : > { %v5393_v38 = vrot.slane %v5391_v30, 5  ;;  %v5397_v37 = vrot.slane %v5395_v22, 4  ;;  %11770 = vmatmul.mubr.msk.bf16.gmra.mrb[28].mxu1 %vm2475_vm11, %v10631_v31  ;;  %v1116_v40 = vsel %vm13418_vm7, %v1108_v16, %v1115_v32  ;;  %v1509_v41 = vsel %vm13425_vm8, %v1107_v2, %v1508_v19 }
  0xf0   : > { %v5403_v42 = vrot.slane %v5401_v33, 5  ;;  %v1124_v44 = vor.u32 %v1122_v29, %v13912_v36  ;;  %1510 = vst [vmem:[#allocation2 + $0xc8] sm:$0xf] %v1509_v41  ;;  %1511 = vst.msk [vmem:[#allocation2 + $0xcc] sm:$0xf] %vm648_vm6, %v1116_v40  ;;  %v2011_v46 = vshrl.u32 %v1603_v21, 16 }
  0xf1   : > { %v2014_v50 = vshll.u32 %v1603_v21, 16  ;;  %v5394_v53 = vsel %vm13521_vm12, %v5389_v62, %v5393_v38  ;;  %v5398_v54 = vor.u32 %v5397_v37, %v5393_v38  ;;  %v2020_v55 = vshll.u32 %v1604_v14, 16  ;;  %v491_v41 = vld [vmem:[#allocation2 + $0xdc] sm:$0x1] }
  0xf2   : > { %v2024_v57 = vshrl.u32 %v1604_v14, 16  ;;  %v1125_v58 = vsel %vm13418_vm7, %v1117_v35, %v1124_v44  ;;  %v2013_v59 = vrot.slane %v2011_v46, 4  ;;  %v2030_v61 = vshll.u32 %v1605_v39, 16 }
  0xf3   : > { %v2016_v45 = vrot.slane %v2014_v50, 5  ;;  %v5399_v0 = vrot.slane %v5398_v54, 4  ;;  %1512 = vst.msk [vmem:[#allocation2 + $0xd0] sm:$0xf] %vm648_vm6, %v1125_v58  ;;  %v2022_v49 = vrot.slane %v2020_v55, 5  ;;  %v545_v56 = vsel %vm13384_vm4, 0, %v544_v52 }
  0xf4   : > { %v2026_v1 = vrot.slane %v2024_v57, 4  ;;  %v2032_v60 = vrot.slane %v2030_v61, 5  ;;  %546 = vst [vmem:[#allocation2 + $0xd8] sm:$0x1] %v545_v56  ;;  %v1126_v6 = vrot.slane %v13912_v36, 4  ;;  %v1128_v7 = vshrl.u32 %v761_v47, 16 }
  0xf5   : > { %v2017_v4 = vor.u32 %v2016_v45, %v2013_v59  ;;  %v5404_v8 = vsel %vm13521_vm12, %v5399_v0, %v5403_v42  ;;  %v1131_v62 = vshll.u32 %v761_v47, 16  ;;  %v2034_v10 = vshrl.u32 %v1605_v39, 16  ;;  %v1647_v52 = vld [vmem:[#allocation2 + $0xb0] sm:$0x1]  ;;  %v762_v47 = vld [vmem:[%s13406_s28 + $0xa0] sm:$0xf] }
  0xf6   : > { %v2027_v9 = vor.u32 %v2026_v1, %v2022_v49  ;;  %v10925_v11 = vcombine.low %v5394_v53, %v5404_v8  ;;  %v1130_v13 = vrot.slane %v1128_v7, 7  ;;  %v2040_v2 = vshll.u32 %v1606_v63, 16  ;;  %v763_v0 = vld [vmem:[%s13406_s28 + $0xa4] sm:$0xf] }
  0xf7   : > { %v2018_v12 = vrot.slane %v2017_v4, 4  ;;  %v4974_v16 = vld [vmem:[#allocation2 + $0xc8] sm:$0xf]  ;;  %v4975_v17 = vld [vmem:[#allocation2 + $0xcc] sm:$0xf]  ;;  %v2036_v14 = vrot.slane %v2034_v10, 4 }
  0xf8   : > { %v2028_v19 = vrot.slane %v2027_v9, 4  ;;  %12046 = vmatmul.mubr.msk.bf16.gmra.mrb[32].mxu0 %vm2475_vm11, %v10925_v11  ;;  %v5406_v20 = vshrl.u32 %v4974_v16, 16  ;;  %v5409_v30 = vshll.u32 %v4974_v16, 16  ;;  %v5415_v22 = vshll.u32 %v4975_v17, 16 }
  0xf9   : > { %v5419_v31 = vshrl.u32 %v4975_v17, 16  ;;  %v2023_v32 = vsel %vm13521_vm12, %v2018_v12, %v2022_v49  ;;  %v1133_v33 = vor.u32 %v1131_v62, %v1130_v13  ;;  %v1135_v35 = vrot.slane %v1130_v13, 4  ;;  %v764_v49 = vld [vmem:[%s13406_s28 + $0xa8] sm:$0xf]  ;;  %v1607_v12 = vld [vmem:[#allocation2 + $0xb4] sm:$0xf] }
  0xfa   : > { %v2033_v21 = vsel %vm13521_vm12, %v2028_v19, %v2032_v60  ;;  %v4976_v36 = vld [vmem:[#allocation2 + $0xd0] sm:$0xf]  ;;  %v5408_v29 = vrot.slane %v5406_v20, 4  ;;  %v5411_v38 = vrot.slane %v5409_v30, 5  ;;  %v5417_v37 = vrot.slane %v5415_v22, 5 }
  0xfb   : > { %v5421_v40 = vrot.slane %v5419_v31, 4  ;;  %v5425_v39 = vshll.u32 %v4976_v36, 16  ;;  %v10632_v42 = vcombine.low %v2023_v32, %v2033_v21  ;;  %v1134_v44 = vsel %vm13418_vm7, %v1126_v6, %v1133_v33  ;;  %v1514_v46 = vld [vmem:[#allocation2 + $0xd8] sm:$0x1] }
  0xfc   : > { %v5429_v50 = vshrl.u32 %v4976_v36, 16  ;;  %v5412_v53 = vor.u32 %v5411_v38, %v5408_v29  ;;  %1513 = vst.msk [vmem:[#allocation2 + $0xd4] sm:$0xf] %vm648_vm6, %v1134_v44  ;;  %v1515_v55 = vsel %vm13376_vm2, %v1135_v35, %v1514_v46  ;;  %v2037_v57 = vor.u32 %v2036_v14, %v2032_v60  ;;  %v1608_v44 = vld [vmem:[#allocation2 + $0xb8] sm:$0xf] }
  0xfd   : > { %v5422_v54 = vor.u32 %v5421_v40, %v5417_v37  ;;  %v5427_v58 = vrot.slane %v5425_v39, 5  ;;  %11773 = vmatprep.mubr.msk.bf16.mxu1 %vm2475_vm11, %v10632_v42  ;;  %1516 = vst [vmem:[#allocation2 + $0xd8] sm:$0x1] %v1515_v55  ;;  %v2042_v45 = vrot.slane %v2040_v2, 5  ;;  %v2044_v61 = vshrl.u32 %v1606_v63, 16 }
  0xfe   : > { %v5431_v59 = vrot.slane %v5429_v50, 4  ;;  %v5413_v1 = vrot.slane %v5412_v53, 4  ;;  %v2038_v4 = vrot.slane %v2037_v57, 4  ;;  %v2050_v6 = vshll.u32 %v1647_v52, 16  ;;  %v547_v46 = vld [vmem:[#allocation2 + $0xec] sm:$0x1] }
  0xff   : > { %v5423_v56 = vrot.slane %v5422_v54, 4  ;;  %v13948_v7 = vrot.slane %v6379_v23, 4  ;;  %v2046_v8 = vrot.slane %v2044_v61, 4  ;;  %v492_v60 = vsel %vm13376_vm2, 0, %v491_v41  ;;  %v1609_v55 = vld [vmem:[#allocation2 + $0xbc] sm:$0xf] }
 0x100   : > { %v1137_v9 = vshrl.u32 %v762_v47, 16  ;;  %v5418_v62 = vsel %vm13521_vm12, %v5413_v1, %v5417_v37  ;;  %v5432_v10 = vor.u32 %v5431_v59, %v5427_v58  ;;  %v2043_v11 = vsel %vm13521_vm12, %v2038_v4, %v2042_v45  ;;  %493 = vst [vmem:[#allocation2 + $0xdc] sm:$0x1] %v492_v60 }
 0x101   : > { %v5428_v63 = vsel %vm13521_vm12, %v5423_v56, %v5427_v58  ;;  %v2047_v2 = vor.u32 %v2046_v8, %v2042_v45  ;;  %v2052_v16 = vrot.slane %v2050_v6, 5  ;;  %v1140_v19 = vshll.u32 %v762_v47, 16  ;;  %v765_v56 = vld [vmem:[%s13406_s28 + $0xac] sm:$0xf] }
 0x102   : > { %v10926_v13 = vcombine.low %v5418_v62, %v5428_v63  ;;  %v1139_v17 = vrot.slane %v1137_v9, 7  ;;  %v1145_v14 = vshrl.u32 %v763_v0, 16  ;;  %v1148_v20 = vshll.u32 %v763_v0, 16 }
 0x103   : > { %v1154_v30 = vshrl.u32 %v764_v49, 16  ;;  %v4977_v22 = vld [vmem:[#allocation2 + $0xd4] sm:$0xf]  ;;  %v2048_v31 = vrot.slane %v2047_v2, 4  ;;  %v1157_v21 = vshll.u32 %v764_v49, 16  ;;  %v2055_v33 = vshrl.u32 %v1607_v12, 16 }
 0x104   : > { %12049 = vmatprep.mubr.msk.bf16.mxu0 %vm2475_vm11, %v10926_v13  ;;  %v1143_v32 = vrot.slane %v1139_v17, 4  ;;  %v4978_v35 = vld [vmem:[#allocation2 + $0xd8] sm:$0x1]  ;;  %v5435_v36 = vshll.u32 %v4977_v22, 16  ;;  %v5439_v29 = vshrl.u32 %v4977_v22, 16  ;;  %v1142_v38 = vor.u32 %v1140_v19, %v1139_v17 }
 0x105   : > { %v1147_v37 = vrot.slane %v1145_v14, 7  ;;  %v5433_v40 = vrot.slane %v5432_v10, 4  ;;  %v5445_v41 = vshll.u32 %v4978_v35, 16  ;;  %v2053_v39 = vsel %vm13521_vm12, %v2048_v31, %v2052_v16  ;;  %v1610_v16 = vld [vmem:[#allocation2 + $0xc0] sm:$0xf] }
 0x106   : > { %v13961_v42 = vrot.slane %v1154_v30, 7  ;;  %v5437_v50 = vrot.slane %v5435_v36, 5  ;;  %v5441_v52 = vrot.slane %v5439_v29, 4  ;;  %v10633_v53 = vcombine.low %v2043_v11, %v2053_v39 }
 0x107   : > { %v1150_v54 = vor.u32 %v1148_v20, %v1147_v37  ;;  %v1152_v57 = vrot.slane %v1147_v37, 4  ;;  %v1517_v58 = vld [vmem:[#allocation2 + $0xdc] sm:$0xf]  ;;  %v2057_v59 = vrot.slane %v2055_v33, 4  ;;  %v2058_v45 = vshll.u32 %v1607_v12, 16 }
 0x108   : > { %v1159_v47 = vor.u32 %v1157_v21, %v13961_v42  ;;  %v5442_v61 = vor.u32 %v5441_v52, %v5437_v50  ;;  %v5447_v0 = vrot.slane %v5445_v41, 5  ;;  %11774 = vmatmul.mubr.msk.bf16.gmra.mrb[32].mxu1 %vm2475_vm11, %v10633_v53  ;;  %v1518_v1 = vsel %vm13425_vm8, %v1142_v38, %v1517_v58  ;;  %v1648_v20 = vld [vmem:[#allocation2 + $0xc4] sm:$0x1] }
 0x109   : > { %v1151_v49 = vsel %vm13418_vm7, %v1143_v32, %v1150_v54  ;;  %1519 = vst [vmem:[#allocation2 + $0xdc] sm:$0xf] %v1518_v1  ;;  %v2060_v6 = vrot.slane %v2058_v45, 5  ;;  %v2064_v8 = vshll.u32 %v1608_v44, 16  ;;  %v2068_v60 = vshrl.u32 %v1608_v44, 16 }
 0x10a   : > { %v1160_v4 = vsel %vm13418_vm7, %v1152_v57, %v1159_v47  ;;  %1520 = vst.msk [vmem:[#allocation2 + $0xe0] sm:$0xf] %vm648_vm6, %v1151_v49  ;;  %v5438_v9 = vsel %vm13521_vm12, %v5433_v40, %v5437_v50  ;;  %v5443_v62 = vrot.slane %v5442_v61, 4  ;;  %v2074_v63 = vshll.u32 %v1609_v55, 16  ;;  %v494_v49 = vld [vmem:[#allocation2 + $0xf0] sm:$0x1] }
 0x10b   : > { %1521 = vst.msk [vmem:[#allocation2 + $0xe4] sm:$0xf] %vm648_vm6, %v1160_v4  ;;  %v548_v10 = vsel %vm13384_vm4, 0, %v547_v46  ;;  %v2061_v11 = vor.u32 %v2060_v6, %v2057_v59  ;;  %v2066_v12 = vrot.slane %v2064_v8, 5  ;;  %v2070_v13 = vrot.slane %v2068_v60, 4 }
 0x10c   : > { %549 = vst [vmem:[#allocation2 + $0xec] sm:$0x1] %v548_v10  ;;  %v1163_v2 = vshrl.u32 %v765_v56, 16  ;;  %v5448_v17 = vsel %vm13521_vm12, %v5443_v62, %v5447_v0  ;;  %v2076_v19 = vrot.slane %v2074_v63, 5  ;;  %v1166_v14 = vshll.u32 %v765_v56, 16 }
 0x10d   : > { %v2078_v30 = vshrl.u32 %v1609_v55, 16  ;;  %v10927_v22 = vcombine.low %v5438_v9, %v5448_v17  ;;  %v2062_v31 = vrot.slane %v2061_v11, 4  ;;  %v2071_v32 = vor.u32 %v2070_v13, %v2066_v12  ;;  %v766_v8 = vld [vmem:[%s13406_s28 + $0xb0] sm:$0xf]  ;;  %v767_v10 = vld [vmem:[%s13406_s28 + $0xb4] sm:$0xf] }
 0x10e   : > { %v1165_v21 = vrot.slane %v1163_v2, 7  ;;  %v1161_v33 = vrot.slane %v13961_v42, 4  ;;  %v2084_v36 = vshll.u32 %v1610_v16, 16  ;;  %v2088_v29 = vshrl.u32 %v1610_v16, 16 }
 0x10f   : > { %v2080_v35 = vrot.slane %v2078_v30, 4  ;;  %12050 = vmatmul.mubr.msk.bf16.gmra.mrb[36].mxu0 %vm2475_vm11, %v10927_v22  ;;  %v2072_v38 = vrot.slane %v2071_v32, 4  ;;  %v2094_v41 = vshll.u32 %v1648_v20, 16  ;;  %v2067_v46 = vsel %vm13521_vm12, %v2062_v31, %v2066_v12 }
 0x110   : > { %v1168_v37 = vor.u32 %v1166_v14, %v1165_v21  ;;  %v1170_v40 = vrot.slane %v1165_v21, 4  ;;  %v4979_v39 = vld [vmem:[#allocation2 + $0xdc] sm:$0xf]  ;;  %v2086_v52 = vrot.slane %v2084_v36, 5  ;;  %v2090_v53 = vrot.slane %v2088_v29, 4 }
 0x111   : > { %v4980_v44 = vld [vmem:[#allocation2 + $0xe0] sm:$0xf]  ;;  %v2081_v50 = vor.u32 %v2080_v35, %v2076_v19  ;;  %v5450_v42 = vshrl.u32 %v4979_v39, 16  ;;  %v5453_v55 = vshll.u32 %v4979_v39, 16  ;;  %v2077_v59 = vsel %vm13521_vm12, %v2072_v38, %v2076_v19  ;;  %v768_v14 = vld [vmem:[%s13406_s28 + $0xb8] sm:$0xf] }
 0x112   : > { %v4981_v54 = vld [vmem:[#allocation2 + $0xe4] sm:$0xf]  ;;  %v5459_v57 = vshll.u32 %v4980_v44, 16  ;;  %v5463_v47 = vshrl.u32 %v4980_v44, 16  ;;  %v1169_v45 = vsel %vm13418_vm7, %v1161_v33, %v1168_v37  ;;  %v10634_v9 = vcombine.low %v2067_v46, %v2077_v59  ;;  %v1611_v21 = vld [vmem:[#allocation2 + $0xc8] sm:$0xf] }
 0x113   : > { %v5469_v58 = vshll.u32 %v4981_v54, 16  ;;  %v1523_v61 = vld [vmem:[#allocation2 + $0xec] sm:$0x1]  ;;  %v5473_v0 = vshrl.u32 %v4981_v54, 16  ;;  %v5452_v1 = vrot.slane %v5450_v42, 4  ;;  %v5455_v56 = vrot.slane %v5453_v55, 5 }
 0x114   : > { %v5461_v4 = vrot.slane %v5459_v57, 5  ;;  %v5465_v6 = vrot.slane %v5463_v47, 4  ;;  %1522 = vst.msk [vmem:[#allocation2 + $0xe8] sm:$0xf] %vm648_vm6, %v1169_v45  ;;  %v1524_v62 = vsel %vm13376_vm2, %v1170_v40, %v1523_v61  ;;  %v2082_v13 = vrot.slane %v2081_v50, 4  ;;  %11777 = vmatprep.mubr.msk.bf16.mxu1 %vm2475_vm11, %v10634_v9  ;;  %v13006_v38 = vld [vmem:[%s16101_s4 + $0x58] sm:$0xff]  }
 0x115   : > { %v5471_v60 = vrot.slane %v5469_v58, 5  ;;  %v5475_v63 = vrot.slane %v5473_v0, 4  ;;  %v5456_v11 = vor.u32 %v5455_v56, %v5452_v1  ;;  %1525 = vst [vmem:[#allocation2 + $0xec] sm:$0x1] %v1524_v62  ;;  %v2091_v2 = vor.u32 %v2090_v53, %v2086_v52  ;;  %v1612_v44 = vld [vmem:[#allocation2 + $0xcc] sm:$0xf]  ;;  %12079 = vmatprep.subr.bf16.mxu0 %v13006_v38 }
 0x116   : > { %v5466_v12 = vor.u32 %v5465_v6, %v5461_v4  ;;  %v2096_v17 = vrot.slane %v2094_v41, 5  ;;  %v495_v19 = vsel %vm13376_vm2, 0, %v494_v49  ;;  %v1172_v20 = vshrl.u32 %v766_v8, 16  ;;  %12080 = vmatpush3.bf16.msra.mxu0 %v13006_v38  ;;  %v550_v49 = vld [vmem:[#allocation2 + $0x100] sm:$0x1] }
 0x117   : > { %v5476_v16 = vor.u32 %v5475_v63, %v5471_v60  ;;  %v5457_v30 = vrot.slane %v5456_v11, 4  ;;  %v2087_v31 = vsel %vm13521_vm12, %v2082_v13, %v2086_v52  ;;  %v2092_v32 = vrot.slane %v2091_v2, 4  ;;  %496 = vst [vmem:[#allocation2 + $0xf0] sm:$0x1] %v495_v19 }
 0x118   : > { %v5467_v22 = vrot.slane %v5466_v12, 4  ;;  %v1174_v35 = vrot.slane %v1172_v20, 7  ;;  %v1175_v36 = vshll.u32 %v766_v8, 16  ;;  %v1180_v29 = vshrl.u32 %v767_v10, 16  ;;  %v1613_v8 = vld [vmem:[#allocation2 + $0xd0] sm:$0xf] }
 0x119   : > { %v13999_v33 = vrot.slane %v5476_v16, 4  ;;  %v5462_v37 = vsel %vm13521_vm12, %v5457_v30, %v5461_v4  ;;  %v2097_v41 = vsel %vm13521_vm12, %v2092_v32, %v2096_v17  ;;  %v1183_v39 = vshll.u32 %v767_v10, 16  ;;  %v769_v16 = vld [vmem:[%s13406_s28 + $0xbc] sm:$0xf]  ;;  %v13007_v17 = vld [vmem:[%s16101_s4] sm:$0xff]  }
 0x11a   : > { %v5472_v40 = vsel %vm13521_vm12, %v5467_v22, %v5471_v60  ;;  %v10635_v52 = vcombine.low %v2087_v31, %v2097_v41  ;;  %v1177_v53 = vor.u32 %v1175_v36, %v1174_v35  ;;  %v1178_v54 = vrot.slane %v1174_v35, 4  ;;  %v13008_v22 = vld [vmem:[%s16101_s4 + $0x8] sm:$0xff]   ;;  %v1614_v35 = vld [vmem:[#allocation2 + $0xd4] sm:$0xf]  ;;  %11805 = vmatprep.subr.bf16.mxu1 %v13007_v17 }
 0x11b   : > { %v10928_v46 = vcombine.low %v5462_v37, %v5472_v40  ;;  %v4982_v50 = vld [vmem:[#allocation2 + $0xe8] sm:$0xf]  ;;  %v1182_v57 = vrot.slane %v1180_v29, 7  ;;  %v1189_v47 = vshrl.u32 %v768_v14, 16  ;;  %v1192_v59 = vshll.u32 %v768_v14, 16  ;;  %11806 = vmatpush3.bf16.msra.mxu1 %v13007_v17 }
 0x11c   : > { %v5479_v42 = vshll.u32 %v4982_v50, 16  ;;  %v5483_v55 = vshrl.u32 %v4982_v50, 16  ;;  %v4983_v58 = vld [vmem:[#allocation2 + $0xec] sm:$0x1]  ;;  %11778 = vmatmul.mubr.msk.bf16.gmra.mrb[36].mxu1 %vm2475_vm11, %v10635_v52  ;;  %v2099_v45 = vshrl.u32 %v1611_v21, 16  ;;  %v2102_v61 = vshll.u32 %v1611_v21, 16  ;;  %11807 = vmatprep.subr.bf16.mxu1 %v13008_v22 }
 0x11d   : > { %12053 = vmatprep.mubr.msk.bf16.mxu0 %vm2475_vm11, %v10928_v46  ;;  %v2108_v0 = vshll.u32 %v1612_v44, 16  ;;  %v5489_v4 = vshll.u32 %v4983_v58, 16  ;;  %v1185_v6 = vor.u32 %v1183_v39, %v1182_v57  ;;  %v1187_v60 = vrot.slane %v1182_v57, 4  ;;  %v1649_v40 = vld [vmem:[#allocation2 + $0xd8] sm:$0x1] }
 0x11e   : > { %v5481_v1 = vrot.slane %v5479_v42, 5  ;;  %v5485_v56 = vrot.slane %v5483_v55, 4  ;;  %v1191_v9 = vrot.slane %v1189_v47, 7  ;;  %v1526_v62 = vld [vmem:[#allocation2 + $0xf0] sm:$0xf]  ;;  %v2101_v63 = vrot.slane %v2099_v45, 4 }
 0x11f   : > { %v2104_v10 = vrot.slane %v2102_v61, 5  ;;  %v5491_v13 = vrot.slane %v5489_v4, 5  ;;  %v1186_v2 = vsel %vm13418_vm7, %v1178_v54, %v1185_v6  ;;  %v1527_v14 = vsel %vm13425_vm8, %v1177_v53, %v1526_v62  ;;  %v497_v50 = vld [vmem:[#allocation2 + $0x104] sm:$0x1]  ;;  %11808 = vmatpush3.bf16.msra.mxu1 %v13008_v22  ;;  %v13165_v43 = vld [vmem:[#allocation2 + $0xec] sm:$0x1] }
 0x120   : > { %v5482_v11 = vsel %vm13521_vm12, %v13999_v33, %v5481_v1  ;;  %v5486_v12 = vor.u32 %v5485_v56, %v5481_v1  ;;  %v1194_v19 = vor.u32 %v1192_v59, %v1191_v9  ;;  %1529 = vst.msk [vmem:[#allocation2 + $0xf4] sm:$0xf] %vm648_vm6, %v1186_v2  ;;  %v2110_v30 = vrot.slane %v2108_v0, 5  ;;  %1528 = vst [vmem:[#allocation2 + $0xf0] sm:$0xf] %v1527_v14 }
 0x121   : > { %v2105_v20 = vor.u32 %v2104_v10, %v2101_v63  ;;  %v2112_v32 = vshrl.u32 %v1612_v44, 16  ;;  %v2118_v21 = vshll.u32 %v1613_v8, 16  ;;  %v551_v33 = vsel %vm13384_vm4, 0, %v550_v49 }
 0x122   : > { %v5487_v31 = vrot.slane %v5486_v12, 4  ;;  %v1195_v36 = vsel %vm13418_vm7, %v1187_v60, %v1194_v19  ;;  %552 = vst [vmem:[#allocation2 + $0x100] sm:$0x1] %v551_v33  ;;  %v1196_v38 = vrot.slane %v1191_v9, 4  ;;  %v1198_v37 = vshrl.u32 %v769_v16, 16 }
 0x123   : > { %v2106_v29 = vrot.slane %v2105_v20, 4  ;;  %1530 = vst.msk [vmem:[#allocation2 + $0xf8] sm:$0xf] %vm648_vm6, %v1195_v36  ;;  %v2114_v39 = vrot.slane %v2112_v32, 4  ;;  %v2120_v44 = vrot.slane %v2118_v21, 5  ;;  %v1201_v46 = vshll.u32 %v769_v16, 16 }
 0x124   : > { %v5492_v41 = vsel %vm13521_vm12, %v5487_v31, %v5491_v13  ;;  %v1200_v54 = vrot.slane %v1198_v37, 7  ;;  %v2122_v42 = vshrl.u32 %v1613_v8, 16  ;;  %v2128_v57 = vshll.u32 %v1614_v35, 16  ;;  %v770_v16 = vld [vmem:[%s13406_s28 + $0xc0] sm:$0xf] }
 0x125   : > { %v10929_v52 = vcombine.low %v5482_v11, %v5492_v41  ;;  %v2111_v53 = vsel %vm13521_vm12, %v2106_v29, %v2110_v30  ;;  %v2115_v55 = vor.u32 %v2114_v39, %v2110_v30  ;;  %v2132_v47 = vshrl.u32 %v1614_v35, 16  ;;  %v771_v33 = vld [vmem:[%s13406_s28 + $0xc4] sm:$0xf] }
 0x126   : > { %v2138_v58 = vshll.u32 %v1649_v40, 16  ;;  %v1203_v59 = vor.u32 %v1201_v46, %v1200_v54  ;;  %v1205_v45 = vrot.slane %v1200_v54, 4  ;;  %v2124_v61 = vrot.slane %v2122_v42, 4 }
 0x127   : > { %12054 = vmatmul.mubr.msk.bf16.gmra.mrb[40].mxu0 %vm2475_vm11, %v10929_v52  ;;  %v498_v0 = vsel %vm13376_vm2, 0, %v497_v50  ;;  %v4985_v49 = vld [vmem:[#allocation2 + $0xf4] sm:$0xf]  ;;  %v2116_v1 = vrot.slane %v2115_v55, 4  ;;  %v2130_v56 = vrot.slane %v2128_v57, 5  ;;  %v2134_v4 = vrot.slane %v2132_v47, 4 }
 0x128   : > { %v2140_v6 = vrot.slane %v2138_v58, 5  ;;  %499 = vst [vmem:[#allocation2 + $0x104] sm:$0x1] %v498_v0  ;;  %v4984_v8 = vld [vmem:[#allocation2 + $0xf0] sm:$0xf]  ;;  %v5503_v60 = vshll.u32 %v4985_v49, 16  ;;  %v1204_v62 = vsel %vm13418_vm7, %v1196_v38, %v1203_v59  ;;  %v2125_v63 = vor.u32 %v2124_v61, %v2120_v44 }
 0x129   : > { %v5507_v9 = vshrl.u32 %v4985_v49, 16  ;;  %v5494_v10 = vshrl.u32 %v4984_v8, 16  ;;  %v5497_v11 = vshll.u32 %v4984_v8, 16  ;;  %v2121_v12 = vsel %vm13521_vm12, %v2116_v1, %v2120_v44  ;;  %1531 = vst.msk [vmem:[#allocation2 + $0xfc] sm:$0xf] %vm648_vm6, %v1204_v62 }
 0x12a   : > { %v1532_v13 = vld [vmem:[#allocation2 + $0x100] sm:$0x1]  ;;  %v2135_v2 = vor.u32 %v2134_v4, %v2130_v56  ;;  %v4986_v17 = vld [vmem:[#allocation2 + $0xf8] sm:$0xf]  ;;  %v5505_v19 = vrot.slane %v5503_v60, 5  ;;  %v10636_v20 = vcombine.low %v2111_v53, %v2121_v12  ;;  %v2126_v36 = vrot.slane %v2125_v63, 4 }
 0x12b   : > { %v5509_v14 = vrot.slane %v5507_v9, 4  ;;  %v1533_v30 = vsel %vm13376_vm2, %v1205_v45, %v1532_v13  ;;  %v5496_v22 = vrot.slane %v5494_v10, 4  ;;  %v5499_v31 = vrot.slane %v5497_v11, 5  ;;  %v772_v52 = vld [vmem:[%s13406_s28 + $0xc8] sm:$0xf] }
 0x12c   : > { %v5513_v32 = vshll.u32 %v4986_v17, 16  ;;  %1534 = vst [vmem:[#allocation2 + $0x100] sm:$0x1] %v1533_v30  ;;  %v5517_v21 = vshrl.u32 %v4986_v17, 16  ;;  %11781 = vmatprep.mubr.msk.bf16.mxu1 %vm2475_vm11, %v10636_v20  ;;  %v2136_v29 = vrot.slane %v2135_v2, 4  ;;  %v1207_v38 = vshrl.u32 %v770_v16, 16 }
 0x12d   : > { %v5510_v35 = vor.u32 %v5509_v14, %v5505_v19  ;;  %v5500_v37 = vor.u32 %v5499_v31, %v5496_v22  ;;  %v1210_v39 = vshll.u32 %v770_v16, 16  ;;  %v2131_v46 = vsel %vm13521_vm12, %v2126_v36, %v2130_v56  ;;  %v1615_v47 = vld [vmem:[#allocation2 + $0xdc] sm:$0xf]  ;;  %v1616_v8 = vld [vmem:[#allocation2 + $0xe0] sm:$0xf] }
 0x12e   : > { %v5515_v40 = vrot.slane %v5513_v32, 5  ;;  %v5519_v41 = vrot.slane %v5517_v21, 4  ;;  %v2141_v50 = vsel %vm13521_vm12, %v2136_v29, %v2140_v6  ;;  %v1209_v53 = vrot.slane %v1207_v38, 7  ;;  %v1617_v16 = vld [vmem:[#allocation2 + $0xe4] sm:$0xf] }
 0x12f   : > { %v5511_v44 = vrot.slane %v5510_v35, 4  ;;  %v5501_v54 = vrot.slane %v5500_v37, 4  ;;  %v10637_v55 = vcombine.low %v2131_v46, %v2141_v50  ;;  %v1215_v57 = vshrl.u32 %v771_v33, 16  ;;  %v1535_v49 = vld [vmem:[#allocation2 + $0x104] sm:$0xf] }
 0x130   : > { %v5520_v42 = vor.u32 %v5519_v41, %v5515_v40  ;;  %v4987_v59 = vld [vmem:[#allocation2 + $0xfc] sm:$0xf]  ;;  %v1212_v45 = vor.u32 %v1210_v39, %v1209_v53  ;;  %v1213_v61 = vrot.slane %v1209_v53, 4  ;;  %v1218_v0 = vshll.u32 %v771_v33, 16  ;;  %v553_v17 = vld [vmem:[#allocation2 + $0x114] sm:$0x1] }
 0x131   : > { %v5516_v58 = vsel %vm13521_vm12, %v5511_v44, %v5515_v40  ;;  %v5506_v1 = vsel %vm13521_vm12, %v5501_v54, %v5505_v19  ;;  %v5523_v4 = vshll.u32 %v4987_v59, 16  ;;  %v5527_v6 = vshrl.u32 %v4987_v59, 16  ;;  %11782 = vmatmul.mubr.msk.bf16.gmra.mrb[40].mxu1 %vm2475_vm11, %v10637_v55  ;;  %v773_v39 = vld [vmem:[%s13406_s28 + $0xcc] sm:$0xf]  ;;  %v1618_v53 = vld [vmem:[#allocation2 + $0xe8] sm:$0xf] }
 0x132   : > { %v5521_v56 = vrot.slane %v5520_v42, 4  ;;  %v10930_v60 = vcombine.low %v5506_v1, %v5516_v58  ;;  %v1217_v62 = vrot.slane %v1215_v57, 7  ;;  %v1224_v63 = vshrl.u32 %v772_v52, 16 }
 0x133   : > { %v4988_v9 = vld [vmem:[#allocation2 + $0x100] sm:$0x1]  ;;  %v1227_v10 = vshll.u32 %v772_v52, 16  ;;  %v5525_v11 = vrot.slane %v5523_v4, 5  ;;  %v5529_v12 = vrot.slane %v5527_v6, 4  ;;  %v1536_v2 = vsel %vm13425_vm8, %v1212_v45, %v1535_v49 }
 0x134   : > { %v5533_v13 = vshll.u32 %v4988_v9, 16  ;;  %12057 = vmatprep.mubr.msk.bf16.mxu0 %vm2475_vm11, %v10930_v60  ;;  %v1220_v19 = vor.u32 %v1218_v0, %v1217_v62  ;;  %v1222_v14 = vrot.slane %v1217_v62, 4  ;;  %v1226_v20 = vrot.slane %v1224_v63, 7  ;;  %1537 = vst [vmem:[#allocation2 + $0x104] sm:$0xf] %v1536_v2 }
 0x135   : > { %v2143_v30 = vshrl.u32 %v1615_v47, 16  ;;  %v5526_v22 = vsel %vm13521_vm12, %v5521_v56, %v5525_v11  ;;  %v5530_v31 = vor.u32 %v5529_v12, %v5525_v11  ;;  %v2146_v21 = vshll.u32 %v1615_v47, 16 }
 0x136   : > { %v5535_v32 = vrot.slane %v5533_v13, 5  ;;  %v1221_v33 = vsel %vm13418_vm7, %v1213_v61, %v1220_v19  ;;  %v1229_v35 = vor.u32 %v1227_v10, %v1226_v20  ;;  %v2152_v29 = vshll.u32 %v1616_v8, 16 }
 0x137   : > { %v2145_v36 = vrot.slane %v2143_v30, 4  ;;  %v5531_v38 = vrot.slane %v5530_v31, 4  ;;  %1538 = vst.msk [vmem:[#allocation2 + $0x108] sm:$0xf] %vm648_vm6, %v1221_v33  ;;  %v2148_v37 = vrot.slane %v2146_v21, 5  ;;  %v2156_v40 = vshrl.u32 %v1616_v8, 16 }
 0x138   : > { %v2162_v41 = vshll.u32 %v1617_v16, 16  ;;  %v1230_v44 = vsel %vm13418_vm7, %v1222_v14, %v1229_v35  ;;  %v2154_v46 = vrot.slane %v2152_v29, 5  ;;  %v554_v50 = vsel %vm13384_vm4, 0, %v553_v17  ;;  %v500_v17 = vld [vmem:[#allocation2 + $0x118] sm:$0x1] }
 0x139   : > { %v1231_v52 = vrot.slane %v1226_v20, 4  ;;  %v5536_v54 = vsel %vm13521_vm12, %v5531_v38, %v5535_v32  ;;  %1539 = vst.msk [vmem:[#allocation2 + $0x10c] sm:$0xf] %vm648_vm6, %v1230_v44  ;;  %v2149_v42 = vor.u32 %v2148_v37, %v2145_v36  ;;  %v2158_v55 = vrot.slane %v2156_v40, 4  ;;  %555 = vst [vmem:[#allocation2 + $0x114] sm:$0x1] %v554_v50 }
 0x13a   : > { %v2164_v57 = vrot.slane %v2162_v41, 5  ;;  %v10931_v47 = vcombine.low %v5526_v22, %v5536_v54  ;;  %v1233_v58 = vshrl.u32 %v773_v39, 16  ;;  %v1236_v59 = vshll.u32 %v773_v39, 16  ;;  %v774_v22 = vld [vmem:[%s13406_s28 + $0xd0] sm:$0xf] }
 0x13b   : > { %v2166_v45 = vshrl.u32 %v1617_v16, 16  ;;  %v4989_v61 = vld [vmem:[#allocation2 + $0x104] sm:$0xf]  ;;  %v2150_v0 = vrot.slane %v2149_v42, 4  ;;  %v2159_v49 = vor.u32 %v2158_v55, %v2154_v46  ;;  %v2172_v1 = vshll.u32 %v1618_v53, 16 }
 0x13c   : > { %v2176_v56 = vshrl.u32 %v1618_v53, 16  ;;  %12058 = vmatmul.mubr.msk.bf16.gmra.mrb[44].mxu0 %vm2475_vm11, %v10931_v47  ;;  %v5538_v4 = vshrl.u32 %v4989_v61, 16  ;;  %v5541_v6 = vshll.u32 %v4989_v61, 16  ;;  %v1235_v8 = vrot.slane %v1233_v58, 7  ;;  %v1650_v36 = vld [vmem:[#allocation2 + $0xec] sm:$0x1] }
 0x13d   : > { %v2168_v60 = vrot.slane %v2166_v45, 4  ;;  %v2155_v9 = vsel %vm13521_vm12, %v2150_v0, %v2154_v46  ;;  %v2160_v62 = vrot.slane %v2159_v49, 4  ;;  %v2174_v63 = vrot.slane %v2172_v1, 5  ;;  %v775_v38 = vld [vmem:[%s13406_s28 + $0xd4] sm:$0xf] }
 0x13e   : > { %v2178_v10 = vrot.slane %v2176_v56, 4  ;;  %v4990_v11 = vld [vmem:[#allocation2 + $0x108] sm:$0xf]  ;;  %v5540_v12 = vrot.slane %v5538_v4, 4  ;;  %v5543_v13 = vrot.slane %v5541_v6, 5  ;;  %v1238_v2 = vor.u32 %v1236_v59, %v1235_v8 }
 0x13f   : > { %v1240_v16 = vrot.slane %v1235_v8, 4  ;;  %v5547_v19 = vshll.u32 %v4990_v11, 16  ;;  %v5551_v14 = vshrl.u32 %v4990_v11, 16  ;;  %v2165_v20 = vsel %vm13521_vm12, %v2160_v62, %v2164_v57  ;;  %v776_v44 = vld [vmem:[%s13406_s28 + $0xd8] sm:$0xf] }
 0x140   : > { %v2169_v30 = vor.u32 %v2168_v60, %v2164_v57  ;;  %v4991_v31 = vld [vmem:[#allocation2 + $0x10c] sm:$0xf]  ;;  %v5544_v32 = vor.u32 %v5543_v13, %v5540_v12  ;;  %v10638_v21 = vcombine.low %v2155_v9, %v2165_v20  ;;  %v1239_v33 = vsel %vm13418_vm7, %v1231_v52, %v1238_v2  ;;  %v1541_v35 = vld [vmem:[#allocation2 + $0x114] sm:$0x1]  ;;  %v1619_v11 = vld [vmem:[#allocation2 + $0xf0] sm:$0xf] }
 0x141   : > { %v2179_v29 = vor.u32 %v2178_v10, %v2174_v63  ;;  %v5549_v37 = vrot.slane %v5547_v19, 5  ;;  %v5553_v40 = vrot.slane %v5551_v14, 4  ;;  %v5557_v41 = vshll.u32 %v4991_v31, 16  ;;  %1540 = vst.msk [vmem:[#allocation2 + $0x110] sm:$0xf] %vm648_vm6, %v1239_v33 }
 0x142   : > { %v1542_v39 = vsel %vm13376_vm2, %v1240_v16, %v1541_v35  ;;  %v5545_v46 = vrot.slane %v5544_v32, 4  ;;  %11785 = vmatprep.mubr.msk.bf16.mxu1 %vm2475_vm11, %v10638_v21  ;;  %v5561_v50 = vshrl.u32 %v4991_v31, 16  ;;  %v2170_v53 = vrot.slane %v2169_v30, 4  ;;  %v556_v31 = vld [vmem:[#allocation2 + $0x128] sm:$0x1] }
 0x143   : > { %1543 = vst [vmem:[#allocation2 + $0x114] sm:$0x1] %v1542_v39  ;;  %v2180_v52 = vrot.slane %v2179_v29, 4  ;;  %v5554_v54 = vor.u32 %v5553_v40, %v5549_v37  ;;  %v5559_v42 = vrot.slane %v5557_v41, 5  ;;  %v2182_v55 = vshll.u32 %v1650_v36, 16 }
 0x144   : > { %v501_v57 = vsel %vm13376_vm2, 0, %v500_v17  ;;  %v5550_v47 = vsel %vm13521_vm12, %v5545_v46, %v5549_v37  ;;  %v5563_v58 = vrot.slane %v5561_v50, 4  ;;  %v2175_v59 = vsel %vm13521_vm12, %v2170_v53, %v2174_v63  ;;  %v1620_v17 = vld [vmem:[#allocation2 + $0xf4] sm:$0xf]  ;;  %v1621_v35 = vld [vmem:[#allocation2 + $0xf8] sm:$0xf] }
 0x145   : > { %502 = vst [vmem:[#allocation2 + $0x118] sm:$0x1] %v501_v57  ;;  %v1242_v45 = vshrl.u32 %v774_v22, 16  ;;  %v5555_v61 = vrot.slane %v5554_v54, 4  ;;  %v2184_v0 = vrot.slane %v2182_v55, 5  ;;  %v1245_v49 = vshll.u32 %v774_v22, 16 }
 0x146   : > { %v1250_v1 = vshrl.u32 %v775_v38, 16  ;;  %v5564_v56 = vor.u32 %v5563_v58, %v5559_v42  ;;  %v1253_v6 = vshll.u32 %v775_v38, 16  ;;  %v1259_v8 = vshrl.u32 %v776_v44, 16  ;;  %v777_v55 = vld [vmem:[%s13406_s28 + $0xdc] sm:$0xf] }
 0x147   : > { %v1244_v4 = vrot.slane %v1242_v45, 7  ;;  %v5560_v60 = vsel %vm13521_vm12, %v5555_v61, %v5559_v42  ;;  %v2185_v9 = vsel %vm13521_vm12, %v2180_v52, %v2184_v0  ;;  %v1262_v10 = vshll.u32 %v776_v44, 16  ;;  %v1622_v45 = vld [vmem:[#allocation2 + $0xfc] sm:$0xf] }
 0x148   : > { %v1252_v62 = vrot.slane %v1250_v1, 7  ;;  %v10932_v63 = vcombine.low %v5550_v47, %v5560_v60  ;;  %v4992_v12 = vld [vmem:[#allocation2 + $0x110] sm:$0xf]  ;;  %v5565_v13 = vrot.slane %v5564_v56, 4  ;;  %v10639_v2 = vcombine.low %v2175_v59, %v2185_v9  ;;  %v1651_v60 = vld [vmem:[#allocation2 + $0x100] sm:$0x1] }
 0x149   : > { %v1247_v16 = vor.u32 %v1245_v49, %v1244_v4  ;;  %v5567_v14 = vshll.u32 %v4992_v12, 16  ;;  %v5571_v20 = vshrl.u32 %v4992_v12, 16  ;;  %v1248_v30 = vrot.slane %v1244_v4, 4 }
 0x14a   : > { %v4993_v19 = vld [vmem:[#allocation2 + $0x114] sm:$0x1]  ;;  %v1255_v22 = vor.u32 %v1253_v6, %v1252_v62  ;;  %12061 = vmatprep.mubr.msk.bf16.mxu0 %vm2475_vm11, %v10932_v63  ;;  %11786 = vmatmul.mubr.msk.bf16.gmra.mrb[44].mxu1 %vm2475_vm11, %v10639_v2  ;;  %v1257_v21 = vrot.slane %v1252_v62, 4  ;;  %v14101_v33 = vrot.slane %v1259_v8, 7  ;;  %v2187_v36 = vshrl.u32 %v1619_v11, 16 }
 0x14b   : > { %v5577_v32 = vshll.u32 %v4993_v19, 16  ;;  %v5569_v29 = vrot.slane %v5567_v14, 5  ;;  %v5573_v38 = vrot.slane %v5571_v20, 4  ;;  %v2190_v41 = vshll.u32 %v1619_v11, 16 }
 0x14c   : > { %v1256_v37 = vsel %vm13418_vm7, %v1248_v30, %v1255_v22  ;;  %v1544_v40 = vld [vmem:[#allocation2 + $0x118] sm:$0xf]  ;;  %v1264_v44 = vor.u32 %v1262_v10, %v14101_v33  ;;  %v2189_v50 = vrot.slane %v2187_v36, 4  ;;  %v2196_v42 = vshll.u32 %v1620_v17, 16 }
 0x14d   : > { %v5579_v39 = vrot.slane %v5577_v32, 5  ;;  %v1545_v46 = vsel %vm13425_vm8, %v1247_v16, %v1544_v40  ;;  %1547 = vst.msk [vmem:[#allocation2 + $0x11c] sm:$0xf] %vm648_vm6, %v1256_v37  ;;  %v5570_v53 = vsel %vm13521_vm12, %v5565_v13, %v5569_v29  ;;  %v5574_v52 = vor.u32 %v5573_v38, %v5569_v29  ;;  %v503_v38 = vld [vmem:[#allocation2 + $0x12c] sm:$0x1] }
 0x14e   : > { %1546 = vst [vmem:[#allocation2 + $0x118] sm:$0xf] %v1545_v46  ;;  %v2192_v54 = vrot.slane %v2190_v41, 5  ;;  %v1265_v57 = vsel %vm13418_vm7, %v1257_v21, %v1264_v44  ;;  %v2200_v47 = vshrl.u32 %v1620_v17, 16  ;;  %v2206_v58 = vshll.u32 %v1621_v35, 16 }
 0x14f   : > { %v557_v59 = vsel %vm13384_vm4, 0, %v556_v31  ;;  %v5575_v61 = vrot.slane %v5574_v52, 4  ;;  %1548 = vst.msk [vmem:[#allocation2 + $0x120] sm:$0xf] %vm648_vm6, %v1265_v57  ;;  %v2198_v49 = vrot.slane %v2196_v42, 5  ;;  %v1266_v1 = vrot.slane %v14101_v33, 4 }
 0x150   : > { %v2193_v0 = vor.u32 %v2192_v54, %v2189_v50  ;;  %558 = vst [vmem:[#allocation2 + $0x128] sm:$0x1] %v557_v59  ;;  %v2202_v56 = vrot.slane %v2200_v47, 4  ;;  %v2208_v4 = vrot.slane %v2206_v58, 5  ;;  %v1268_v6 = vshrl.u32 %v777_v55, 16 }
 0x151   : > { %v1271_v8 = vshll.u32 %v777_v55, 16  ;;  %v5580_v9 = vsel %vm13521_vm12, %v5575_v61, %v5579_v39  ;;  %v2210_v10 = vshrl.u32 %v1621_v35, 16  ;;  %v2216_v11 = vshll.u32 %v1622_v45, 16  ;;  %v778_v42 = vld [vmem:[%s13406_s28 + $0xe0] sm:$0xf] }
 0x152   : > { %v2194_v62 = vrot.slane %v2193_v0, 4  ;;  %v10933_v63 = vcombine.low %v5570_v53, %v5580_v9  ;;  %v2203_v12 = vor.u32 %v2202_v56, %v2198_v49  ;;  %v1270_v13 = vrot.slane %v1268_v6, 7  ;;  %v779_v59 = vld [vmem:[%s13406_s28 + $0xe4] sm:$0xf] }
 0x153   : > { %v2220_v2 = vshrl.u32 %v1622_v45, 16  ;;  %v2212_v19 = vrot.slane %v2210_v10, 4  ;;  %v14122_v14 = vrot.slane %v2216_v11, 5  ;;  %v2226_v20 = vshll.u32 %v1651_v60, 16  ;;  %v780_v45 = vld [vmem:[%s13406_s28 + $0xe8] sm:$0xf] }
 0x154   : > { %v4995_v16 = vld [vmem:[#allocation2 + $0x11c] sm:$0xf]  ;;  %v2199_v17 = vsel %vm13521_vm12, %v2194_v62, %v2198_v49  ;;  %12062 = vmatmul.mubr.msk.bf16.gmra.mrb[48].mxu0 %vm2475_vm11, %v10933_v63  ;;  %v2204_v32 = vrot.slane %v2203_v12, 4  ;;  %v1273_v21 = vor.u32 %v1271_v8, %v1270_v13  ;;  %v1275_v36 = vrot.slane %v1270_v13, 4  ;;  %v14139_v56 = vld [vmem:[%s16101_s4 + $0x60] sm:$0xff]  }
 0x155   : > { %v4994_v30 = vld [vmem:[#allocation2 + $0x118] sm:$0xf]  ;;  %v5591_v22 = vshll.u32 %v4995_v16, 16  ;;  %v5595_v31 = vshrl.u32 %v4995_v16, 16  ;;  %v2213_v29 = vor.u32 %v2212_v19, %v2208_v4  ;;  %v2222_v49 = vrot.slane %v2220_v2, 4  ;;  %12145 = vmatprep.subr.bf16.mxu0 %v14139_v56 }
 0x156   : > { %v5582_v33 = vshrl.u32 %v4994_v30, 16  ;;  %v5585_v35 = vshll.u32 %v4994_v30, 16  ;;  %v4996_v37 = vld [vmem:[#allocation2 + $0x120] sm:$0xf]  ;;  %v2209_v39 = vsel %vm13521_vm12, %v2204_v32, %v2208_v4  ;;  %v1274_v44 = vsel %vm13418_vm7, %v1266_v1, %v1273_v21  ;;  %v1623_v30 = vld [vmem:[#allocation2 + $0x104] sm:$0xf] }
 0x157   : > { %v5593_v40 = vrot.slane %v5591_v22, 5  ;;  %v5597_v41 = vrot.slane %v5595_v31, 4  ;;  %v1550_v46 = vld [vmem:[#allocation2 + $0x128] sm:$0x1]  ;;  %v5601_v52 = vshll.u32 %v4996_v37, 16  ;;  %v10640_v54 = vcombine.low %v2199_v17, %v2209_v39 }
 0x158   : > { %v5584_v50 = vrot.slane %v5582_v33, 4  ;;  %v5587_v53 = vrot.slane %v5585_v35, 5  ;;  %1549 = vst.msk [vmem:[#allocation2 + $0x124] sm:$0xf] %vm648_vm6, %v1274_v44  ;;  %v1551_v57 = vsel %vm13376_vm2, %v1275_v36, %v1550_v46  ;;  %v5605_v47 = vshrl.u32 %v4996_v37, 16 }
 0x159   : > { %v5598_v55 = vor.u32 %v5597_v41, %v5593_v40  ;;  %v2214_v58 = vrot.slane %v2213_v29, 4  ;;  %v5603_v0 = vrot.slane %v5601_v52, 5  ;;  %11789 = vmatprep.mubr.msk.bf16.mxu1 %vm2475_vm11, %v10640_v54  ;;  %1552 = vst [vmem:[#allocation2 + $0x128] sm:$0x1] %v1551_v57  ;;  %v2228_v1 = vrot.slane %v2226_v20, 5 }
 0x15a   : > { %v5588_v61 = vor.u32 %v5587_v53, %v5584_v50  ;;  %v5607_v6 = vrot.slane %v5605_v47, 4  ;;  %v504_v60 = vsel %vm13376_vm2, 0, %v503_v38  ;;  %v2223_v62 = vor.u32 %v2222_v49, %v14122_v14  ;;  %v1624_v38 = vld [vmem:[#allocation2 + $0x108] sm:$0xf]  ;;  %v1625_v54 = vld [vmem:[#allocation2 + $0x10c] sm:$0xf] }
 0x15b   : > { %v5599_v4 = vrot.slane %v5598_v55, 4  ;;  %v2219_v8 = vsel %vm13521_vm12, %v2214_v58, %v14122_v14  ;;  %505 = vst [vmem:[#allocation2 + $0x12c] sm:$0x1] %v504_v60  ;;  %v1277_v10 = vshrl.u32 %v778_v42, 16  ;;  %v1280_v11 = vshll.u32 %v778_v42, 16 }
 0x15c   : > { %v5589_v9 = vrot.slane %v5588_v61, 4  ;;  %v5608_v12 = vor.u32 %v5607_v6, %v5603_v0  ;;  %v1285_v13 = vshrl.u32 %v779_v59, 16  ;;  %v1288_v2 = vshll.u32 %v779_v59, 16  ;;  %v559_v42 = vld [vmem:[#allocation2 + $0x13c] sm:$0x1] }
 0x15d   : > { %v5604_v63 = vsel %vm13521_vm12, %v5599_v4, %v5603_v0  ;;  %v2224_v17 = vrot.slane %v2223_v62, 4  ;;  %v1279_v19 = vrot.slane %v1277_v10, 7  ;;  %v1294_v20 = vshrl.u32 %v780_v45, 16 }
 0x15e   : > { %v5594_v16 = vsel %vm13521_vm12, %v5589_v9, %v5593_v40  ;;  %v5609_v31 = vrot.slane %v5608_v12, 4  ;;  %v1287_v32 = vrot.slane %v1285_v13, 7  ;;  %v1297_v21 = vshll.u32 %v780_v45, 16 }
 0x15f   : > { %v10934_v22 = vcombine.low %v5594_v16, %v5604_v63  ;;  %v4997_v14 = vld [vmem:[#allocation2 + $0x124] sm:$0xf]  ;;  %v2229_v36 = vsel %vm13521_vm12, %v2224_v17, %v2228_v1  ;;  %v1282_v29 = vor.u32 %v1280_v11, %v1279_v19  ;;  %v1283_v41 = vrot.slane %v1279_v19, 4  ;;  %v781_v1 = vld [vmem:[%s13406_s28 + $0xec] sm:$0xf] }
 0x160   : > { %v5611_v33 = vshll.u32 %v4997_v14, 16  ;;  %v5615_v35 = vshrl.u32 %v4997_v14, 16  ;;  %v4998_v37 = vld [vmem:[#allocation2 + $0x128] sm:$0x1]  ;;  %v10641_v40 = vcombine.low %v2219_v8, %v2229_v36  ;;  %v1290_v39 = vor.u32 %v1288_v2, %v1287_v32  ;;  %v1626_v63 = vld [vmem:[#allocation2 + $0x110] sm:$0xf] }
 0x161   : > { %12065 = vmatprep.mubr.msk.bf16.mxu0 %vm2475_vm11, %v10934_v22  ;;  %v1292_v44 = vrot.slane %v1287_v32, 4  ;;  %v5621_v53 = vshll.u32 %v4998_v37, 16  ;;  %v1296_v52 = vrot.slane %v1294_v20, 7  ;;  %v2231_v47 = vshrl.u32 %v1623_v30, 16  ;;  %v1652_v17 = vld [vmem:[#allocation2 + $0x114] sm:$0x1] }
 0x162   : > { %v5613_v46 = vrot.slane %v5611_v33, 5  ;;  %v5617_v50 = vrot.slane %v5615_v35, 4  ;;  %11790 = vmatmul.mubr.msk.bf16.gmra.mrb[48].mxu1 %vm2475_vm11, %v10641_v40  ;;  %v1291_v55 = vsel %vm13418_vm7, %v1283_v41, %v1290_v39  ;;  %v1553_v57 = vld [vmem:[#allocation2 + $0x12c] sm:$0xf]  ;;  %v2234_v58 = vshll.u32 %v1623_v30, 16 }
 0x163   : > { %v2240_v59 = vshll.u32 %v1624_v38, 16  ;;  %v5623_v0 = vrot.slane %v5621_v53, 5  ;;  %v1299_v49 = vor.u32 %v1297_v21, %v1296_v52  ;;  %1556 = vst.msk [vmem:[#allocation2 + $0x130] sm:$0xf] %vm648_vm6, %v1291_v55  ;;  %v1554_v4 = vsel %vm13425_vm8, %v1282_v29, %v1553_v57 }
 0x164   : > { %v5614_v45 = vsel %vm13521_vm12, %v5609_v31, %v5613_v46  ;;  %v5618_v61 = vor.u32 %v5617_v50, %v5613_v46  ;;  %v2233_v6 = vrot.slane %v2231_v47, 4  ;;  %v2236_v8 = vrot.slane %v2234_v58, 5  ;;  %1555 = vst [vmem:[#allocation2 + $0x12c] sm:$0xf] %v1554_v4  ;;  %v506_v47 = vld [vmem:[#allocation2 + $0x140] sm:$0x1] }
 0x165   : > { %v2242_v60 = vrot.slane %v2240_v59, 5  ;;  %v1300_v62 = vsel %vm13418_vm7, %v1292_v44, %v1299_v49  ;;  %v2244_v10 = vshrl.u32 %v1624_v38, 16  ;;  %v2250_v11 = vshll.u32 %v1625_v54, 16  ;;  %v782_v49 = vld [vmem:[%s13406_s28 + $0xf0] sm:$0xf] }
 0x166   : > { %v5619_v9 = vrot.slane %v5618_v61, 4  ;;  %1557 = vst.msk [vmem:[#allocation2 + $0x134] sm:$0xf] %vm648_vm6, %v1300_v62  ;;  %v2237_v12 = vor.u32 %v2236_v8, %v2233_v6  ;;  %v560_v13 = vsel %vm13384_vm4, 0, %v559_v42  ;;  %v1301_v2 = vrot.slane %v1296_v52, 4 }
 0x167   : > { %v1303_v16 = vshrl.u32 %v781_v1, 16  ;;  %v2246_v20 = vrot.slane %v2244_v10, 4  ;;  %v2252_v30 = vrot.slane %v2250_v11, 5  ;;  %561 = vst [vmem:[#allocation2 + $0x13c] sm:$0x1] %v560_v13  ;;  %v1306_v22 = vshll.u32 %v781_v1, 16 }
 0x168   : > { %v5624_v19 = vsel %vm13521_vm12, %v5619_v9, %v5623_v0  ;;  %v2238_v31 = vrot.slane %v2237_v12, 4  ;;  %v2254_v21 = vshrl.u32 %v1625_v54, 16  ;;  %v2260_v35 = vshll.u32 %v1626_v63, 16 }
 0x169   : > { %v10935_v14 = vcombine.low %v5614_v45, %v5624_v19  ;;  %v1305_v32 = vrot.slane %v1303_v16, 7  ;;  %v2247_v33 = vor.u32 %v2246_v20, %v2242_v60  ;;  %v2264_v36 = vshrl.u32 %v1626_v63, 16  ;;  %v783_v63 = vld [vmem:[%s13406_s28 + $0xf4] sm:$0xf] }
 0x16a   : > { %v2270_v29 = vshll.u32 %v1652_v17, 16  ;;  %v5000_v38 = vld [vmem:[#allocation2 + $0x130] sm:$0xf]  ;;  %v2243_v37 = vsel %vm13521_vm12, %v2238_v31, %v2242_v60  ;;  %v2256_v39 = vrot.slane %v2254_v21, 4  ;;  %v2262_v53 = vrot.slane %v2260_v35, 5 }
 0x16b   : > { %12066 = vmatmul.mubr.msk.bf16.gmra.mrb[52].mxu0 %vm2475_vm11, %v10935_v14  ;;  %v1308_v40 = vor.u32 %v1306_v22, %v1305_v32  ;;  %v1310_v41 = vrot.slane %v1305_v32, 4  ;;  %v5635_v44 = vshll.u32 %v5000_v38, 16  ;;  %v5639_v46 = vshrl.u32 %v5000_v38, 16  ;;  %v4999_v52 = vld [vmem:[#allocation2 + $0x12c] sm:$0xf] }
 0x16c   : > { %v2248_v50 = vrot.slane %v2247_v33, 4  ;;  %v2257_v42 = vor.u32 %v2256_v39, %v2252_v30  ;;  %v2266_v55 = vrot.slane %v2264_v36, 4  ;;  %v2272_v57 = vrot.slane %v2270_v29, 5  ;;  %v784_v17 = vld [vmem:[%s13406_s28 + $0xf8] sm:$0xf] }
 0x16d   : > { %v1309_v54 = vsel %vm13418_vm7, %v1301_v2, %v1308_v40  ;;  %v5001_v58 = vld [vmem:[#allocation2 + $0x134] sm:$0xf]  ;;  %v5626_v59 = vshrl.u32 %v4999_v52, 16  ;;  %v5629_v45 = vshll.u32 %v4999_v52, 16  ;;  %v5637_v61 = vrot.slane %v5635_v44, 5 }
 0x16e   : > { %v5641_v0 = vrot.slane %v5639_v46, 4  ;;  %1558 = vst.msk [vmem:[#allocation2 + $0x138] sm:$0xf] %vm648_vm6, %v1309_v54  ;;  %v5645_v1 = vshll.u32 %v5001_v58, 16  ;;  %v2253_v4 = vsel %vm13521_vm12, %v2248_v50, %v2252_v30  ;;  %v1559_v6 = vld [vmem:[#allocation2 + $0x13c] sm:$0x1]  ;;  %v2267_v30 = vor.u32 %v2266_v55, %v2262_v53 }
 0x16f   : > { %v5649_v8 = vshrl.u32 %v5001_v58, 16  ;;  %v2258_v60 = vrot.slane %v2257_v42, 4  ;;  %v5628_v9 = vrot.slane %v5626_v59, 4  ;;  %v5631_v62 = vrot.slane %v5629_v45, 5  ;;  %v1627_v52 = vld [vmem:[#allocation2 + $0x118] sm:$0xf] }
 0x170   : > { %v5642_v10 = vor.u32 %v5641_v0, %v5637_v61  ;;  %v10642_v11 = vcombine.low %v2243_v37, %v2253_v4  ;;  %v5647_v12 = vrot.slane %v5645_v1, 5  ;;  %v1560_v13 = vsel %vm13376_vm2, %v1310_v41, %v1559_v6  ;;  %v562_v1 = vld [vmem:[#allocation2 + $0x150] sm:$0x1] }
 0x171   : > { %v5651_v2 = vrot.slane %v5649_v8, 4  ;;  %v2263_v16 = vsel %vm13521_vm12, %v2258_v60, %v2262_v53  ;;  %v5632_v19 = vor.u32 %v5631_v62, %v5628_v9  ;;  %1561 = vst [vmem:[#allocation2 + $0x13c] sm:$0x1] %v1560_v13  ;;  %v507_v22 = vsel %vm13376_vm2, 0, %v506_v47 }
 0x172   : > { %v5643_v20 = vrot.slane %v5642_v10, 4  ;;  %11793 = vmatprep.mubr.msk.bf16.mxu1 %vm2475_vm11, %v10642_v11  ;;  %508 = vst [vmem:[#allocation2 + $0x140] sm:$0x1] %v507_v22  ;;  %v1312_v31 = vshrl.u32 %v782_v49, 16  ;;  %v1315_v32 = vshll.u32 %v782_v49, 16  ;;  %v1320_v21 = vshrl.u32 %v783_v63, 16 }
 0x173   : > { %v5652_v14 = vor.u32 %v5651_v2, %v5647_v12  ;;  %v5633_v33 = vrot.slane %v5632_v19, 4  ;;  %v2268_v36 = vrot.slane %v2267_v30, 4  ;;  %v1323_v29 = vshll.u32 %v783_v63, 16  ;;  %v1628_v49 = vld [vmem:[#allocation2 + $0x11c] sm:$0xf] }
 0x174   : > { %v5648_v35 = vsel %vm13521_vm12, %v5643_v20, %v5647_v12  ;;  %v1314_v40 = vrot.slane %v1312_v31, 7  ;;  %v1322_v41 = vrot.slane %v1320_v21, 7  ;;  %v1329_v39 = vshrl.u32 %v784_v17, 16  ;;  %v1629_v63 = vld [vmem:[#allocation2 + $0x120] sm:$0xf] }
 0x175   : > { %v14191_v38 = vld [vmem:[#allocation2 + $0x138] sm:$0xf]  ;;  %v5653_v37 = vrot.slane %v5652_v14, 4  ;;  %v5638_v44 = vsel %vm13521_vm12, %v5633_v33, %v5637_v61  ;;  %v2273_v53 = vsel %vm13521_vm12, %v2268_v36, %v2272_v57  ;;  %v1332_v57 = vshll.u32 %v784_v17, 16  ;;  %v785_v22 = vld [vmem:[%s13406_s28 + $0xfc] sm:$0xf] }
 0x176   : > { %v5655_v46 = vshll.u32 %v14191_v38, 16  ;;  %v5659_v50 = vshrl.u32 %v14191_v38, 16  ;;  %v10936_v54 = vcombine.low %v5638_v44, %v5648_v35  ;;  %v10643_v42 = vcombine.low %v2263_v16, %v2273_v53  ;;  %v14219_v33 = vld [vmem:[#allocation2 + $0x124] sm:$0xf]  ;;  %s10603_s28 = sshll.u32 %s16224_s15, 2 }
 0x177   : > { %v1317_v55 = vor.u32 %v1315_v32, %v1314_v40  ;;  %v1318_v47 = vrot.slane %v1314_v40, 4  ;;  %v1325_v45 = vor.u32 %v1323_v29, %v1322_v41  ;;  %v1327_v0 = vrot.slane %v1322_v41, 4  ;;  %v1653_v40 = vld [vmem:[#allocation2 + $0x128] sm:$0x1]  ;;  %s427_s20 = sadd.s32 %s10603_s28, %s13389_s10 }
 0x178   : > { %v5657_v58 = vrot.slane %v5655_v46, 5  ;;  %v5661_v59 = vrot.slane %v5659_v50, 4  ;;  %12069 = vmatprep.mubr.msk.bf16.mxu0 %vm2475_vm11, %v10936_v54  ;;  %v14200_v61 = vld [vmem:[#allocation2 + $0x13c] sm:$0x1]  ;;  %11794 = vmatmul.mubr.msk.bf16.gmra.mrb[52].mxu1 %vm2475_vm11, %v10643_v42  ;;  %v14203_v4 = vrot.slane %v1329_v39, 7  ;;  %v2275_v6 = vshrl.u32 %v1627_v52, 16 }
 0x179   : > { %v2278_v8 = vshll.u32 %v1627_v52, 16  ;;  %v5665_v62 = vshll.u32 %v14200_v61, 16  ;;  %v1326_v10 = vsel %vm13418_vm7, %v1318_v47, %v1325_v45  ;;  %v1562_v11 = vld [vmem:[#allocation2 + $0x140] sm:$0xf]  ;;  %v2284_v20 = vshll.u32 %v1628_v49, 16  ;;  %s10605_s7 = sshll.u32 %s427_s20, 2 }
 0x17a   : > { %v5658_v60 = vsel %vm13521_vm12, %v5653_v37, %v5657_v58  ;;  %v5662_v9 = vor.u32 %v5661_v59, %v5657_v58  ;;  %v1334_v12 = vor.u32 %v1332_v57, %v14203_v4  ;;  %v1563_v13 = vsel %vm13425_vm8, %v1317_v55, %v1562_v11  ;;  %1565 = vst.msk [vmem:[#allocation2 + $0x144] sm:$0xf] %vm648_vm6, %v1326_v10  ;;  %s14650_s10 = scalar_lea.vmem %s16099_s2, %s10605_s7 }
 0x17b   : > { %v2277_v2 = vrot.slane %v2275_v6, 4  ;;  %v2280_v16 = vrot.slane %v2278_v8, 5  ;;  %v5667_v19 = vrot.slane %v5665_v62, 5  ;;  %1564 = vst [vmem:[#allocation2 + $0x140] sm:$0xf] %v1563_v13  ;;  %v2288_v30 = vshrl.u32 %v1628_v49, 16 }
 0x17c   : > { %v5663_v17 = vrot.slane %v5662_v9, 4  ;;  %v1335_v14 = vsel %vm13418_vm7, %v1327_v0, %v1334_v12  ;;  %v2294_v32 = vshll.u32 %v1629_v63, 16  ;;  %v563_v21 = vsel %vm13384_vm4, 0, %v562_v1 }
 0x17d   : > { %v2281_v31 = vor.u32 %v2280_v16, %v2277_v2  ;;  %1566 = vst.msk [vmem:[#allocation2 + $0x148] sm:$0xf] %vm648_vm6, %v1335_v14  ;;  %v2286_v36 = vrot.slane %v2284_v20, 5  ;;  %v2290_v29 = vrot.slane %v2288_v30, 4  ;;  %564 = vst [vmem:[#allocation2 + $0x150] sm:$0x1] %v563_v21 }
 0x17e   : > { %v5668_v35 = vsel %vm13521_vm12, %v5663_v17, %v5667_v19  ;;  %v1336_v37 = vrot.slane %v14203_v4, 4  ;;  %v2296_v44 = vrot.slane %v2294_v32, 5  ;;  %v1338_v46 = vshrl.u32 %v785_v22, 16  ;;  %v6275_v17 = vld [vmem:[#allocation2 + $0x14] sm:$0xe] }
 0x17f   : > { %v10937_v41 = vcombine.low %v5658_v60, %v5668_v35  ;;  %v2282_v39 = vrot.slane %v2281_v31, 4  ;;  %v2291_v50 = vor.u32 %v2290_v29, %v2286_v36  ;;  %v1341_v53 = vshll.u32 %v785_v22, 16  ;;  %v14240_v19 = vld [vmem:[#allocation2 + $0x12c] sm:$0xf] }
 0x180   : > { %v2298_v52 = vshrl.u32 %v1629_v63, 16  ;;  %v2304_v54 = vshll.u32 %v14219_v33, 16  ;;  %v1340_v55 = vrot.slane %v1338_v46, 7  ;;  %v2308_v47 = vshrl.u32 %v14219_v33, 16 }
 0x181   : > { %12070 = vmatmul.mubr.msk.bf16.gmra.mrb[56].mxu0 %vm2475_vm11, %v10937_v41  ;;  %v2287_v42 = vsel %vm13521_vm12, %v2282_v39, %v2286_v36  ;;  %v2314_v58 = vshll.u32 %v1653_v40, 16  ;;  %v14230_v59 = vld [vmem:[#allocation2 + $0x144] sm:$0xf]  ;;  %v2292_v45 = vrot.slane %v2291_v50, 4  ;;  %vm3466_vm13 = vcmask 1042432  }
 0x182   : > { %v2300_v0 = vrot.slane %v2298_v52, 4  ;;  %v2306_v49 = vrot.slane %v2304_v54, 5  ;;  %v5004_v1 = vld [vmem:[#allocation2 + $0x140] sm:$0xf]  ;;  %v5679_v4 = vshll.u32 %v14230_v59, 16  ;;  %v5683_v57 = vshrl.u32 %v14230_v59, 16 }
 0x183   : > { %v1343_v6 = vor.u32 %v1341_v53, %v1340_v55  ;;  %v1345_v8 = vrot.slane %v1340_v55, 4  ;;  %v5670_v60 = vshrl.u32 %v5004_v1, 16  ;;  %v5673_v9 = vshll.u32 %v5004_v1, 16  ;;  %v14275_v1 = vld [vmem:[#allocation2 + $0x130] sm:$0xf] }
 0x184   : > { %v2297_v62 = vsel %vm13521_vm12, %v2292_v45, %v2296_v44  ;;  %v2301_v10 = vor.u32 %v2300_v0, %v2296_v44  ;;  %v14236_v11 = vld [vmem:[#allocation2 + $0x148] sm:$0xf]  ;;  %v5681_v63 = vrot.slane %v5679_v4, 5  ;;  %v5685_v12 = vrot.slane %v5683_v57, 4  ;;  %v1568_v16 = vld [vmem:[#allocation2 + $0x150] sm:$0x1] }
 0x185   : > { %v10644_v13 = vcombine.low %v2287_v42, %v2297_v62  ;;  %v1344_v2 = vsel %vm13418_vm7, %v1336_v37, %v1343_v6  ;;  %v5672_v20 = vrot.slane %v5670_v60, 4  ;;  %v5675_v30 = vrot.slane %v5673_v9, 5  ;;  %v14277_v4 = vld [vmem:[#allocation2 + $0x134] sm:$0xf] }
 0x186   : > { %v5689_v22 = vshll.u32 %v14236_v11, 16  ;;  %1567 = vst.msk [vmem:[#allocation2 + $0x14c] sm:$0xf] %vm648_vm6, %v1344_v2  ;;  %v1569_v14 = vsel %vm13376_vm2, %v1345_v8, %v1568_v16  ;;  %v5686_v31 = vor.u32 %v5685_v12, %v5681_v63  ;;  %v5693_v32 = vshrl.u32 %v14236_v11, 16 }
 0x187   : > { %11797 = vmatprep.mubr.msk.bf16.mxu1 %vm2475_vm11, %v10644_v13  ;;  %1570 = vst [vmem:[#allocation2 + $0x150] sm:$0x1] %v1569_v14  ;;  %v2302_v21 = vrot.slane %v2301_v10, 4  ;;  %v2310_v35 = vrot.slane %v2308_v47, 4  ;;  %v5676_v36 = vor.u32 %v5675_v30, %v5672_v20  ;;  %v2316_v37 = vrot.slane %v2314_v58, 5 }
 0x188   : > { %v5691_v29 = vrot.slane %v5689_v22, 5  ;;  %vm3467_vm14 = vcmask 1046532   ;;  %v5687_v40 = vrot.slane %v5686_v31, 4  ;;  %v5695_v41 = vrot.slane %v5693_v32, 4  ;;  %v14302_v22 = vld [vmem:[#allocation2 + $0x138] sm:$0xf] }
 0x189   : > { %v2307_v39 = vsel %vm13521_vm12, %v2302_v21, %v2306_v49  ;;  %v2311_v44 = vor.u32 %v2310_v35, %v2306_v49  ;;  %vm14251_vm15 = vmor %vm3466_vm13, %vm3467_vm14  ;;  %v5677_v50 = vrot.slane %v5676_v36, 4  ;;  %v10974_v53 = vrot.slane %v6275_v17, 9  ;;  %v1654_v21 = vld [vmem:[#allocation2 + $0x13c] sm:$0x1] }
 0x18a   : > { %v6375_v52 = vrot.slane %v6373_v25, 4  ;;  %v2319_v54 = vshrl.u32 %v14240_v19, 16  ;;  %v5692_v42 = vsel %vm13521_vm12, %v5687_v40, %v5691_v29  ;;  %v5696_v55 = vor.u32 %v5695_v41, %v5691_v29  ;;  %v6276_v41 = vld [vmem:[#allocation2 + $0x28] sm:$0xe] }
 0x18b   : > { %v2312_v47 = vrot.slane %v2311_v44, 4  ;;  %v2322_v58 = vshll.u32 %v14240_v19, 16  ;;  %v5682_v45 = vsel %vm13521_vm12, %v5677_v50, %v5681_v63  ;;  %v14267_v0 = vsel %vm14251_vm15, %v10974_v53, %v6373_v25 }
 0x18c   : > { %v14273_v49 = vsel %vm14251_vm15, %v6375_v52, %v6376_v51  ;;  %v2321_v57 = vrot.slane %v2319_v54, 4  ;;  %v10938_v6 = vcombine.low %v5682_v45, %v5692_v42  ;;  %v5697_v60 = vrot.slane %v5696_v55, 4 }
 0x18d   : > { %v14279_v8 = vld [vmem:[#allocation2 + $0x14c] sm:$0xf]  ;;  %v2317_v15 = vsel %vm13521_vm12, %v2312_v47, %v2316_v37  ;;  %v10994_v25 = vcombine.low %v14267_v0, %v14273_v49  ;;  %v2324_v10 = vrot.slane %v2322_v58, 5  ;;  %v2328_v12 = vshll.u32 %v14275_v1, 16 }
 0x18e   : > { %v14285_v18 = vld [vmem:[#allocation2 + $0x150] sm:$0x1]  ;;  %v5699_v51 = vshll.u32 %v14279_v8, 16  ;;  %v5703_v9 = vshrl.u32 %v14279_v8, 16  ;;  %v10645_v62 = vcombine.low %v2307_v39, %v2317_v15  ;;  %12073 = vmatprep.mubr.msk.bf16.mxu0 %vm2475_vm11, %v10938_v6  ;;  %v2332_v13 = vshrl.u32 %v14275_v1, 16 }
 0x18f   : > { %v5709_v63 = vshll.u32 %v14285_v18, 16  ;;  %v2338_v2 = vshll.u32 %v14277_v4, 16  ;;  %v2325_v20 = vor.u32 %v2324_v10, %v2321_v57  ;;  %v14300_v30 = vsel %vm14251_vm15, %v13581_v48, %v6379_v23  ;;  %v13087_v47 = vld [vmem:[#allocation2 + $0x2c] sm:$0xf]  ;;  %v13088_v57 = vld [vmem:[#allocation2 + $0x30] sm:$0xf] }
 0x190   : > { %v5701_v16 = vrot.slane %v5699_v51, 5  ;;  %v5705_v17 = vrot.slane %v5703_v9, 4  ;;  %11798 = vmatmul.mubr.msk.bf16.gmra.mrb[56].mxu1 %vm2475_vm11, %v10645_v62  ;;  %v2330_v31 = vrot.slane %v2328_v12, 5  ;;  %v2334_v32 = vrot.slane %v2332_v13, 4 }
 0x191   : > { %v5711_v14 = vrot.slane %v5709_v63, 5  ;;  %v2326_v36 = vrot.slane %v2325_v20, 4  ;;  %v2340_v29 = vrot.slane %v2338_v2, 5  ;;  %v6383_v27 = vsel %vm14251_vm15, %v13948_v7, %v6382_v26  ;;  %v13089_v63 = vld [vmem:[#allocation2 + $0x34] sm:$0xf] }
 0x192   : > { %v5706_v35 = vor.u32 %v5705_v17, %v5701_v16  ;;  %v2335_v37 = vor.u32 %v2334_v32, %v2330_v31  ;;  %v10995_v40 = vcombine.low %v14300_v30, %v6383_v27  ;;  %v2342_v48 = vshrl.u32 %v14277_v4, 16  ;;  %v13090_v20 = vld [vmem:[#allocation2] sm:$0xf]  ;;  %v14332_v30 = vld [vmem:[#allocation2 + $0x4] sm:$0xf] }
 0x193   : > { %v2348_v23 = vshll.u32 %v14302_v22, 16  ;;  %v5702_v39 = vsel %vm13521_vm12, %v5697_v60, %v5701_v16  ;;  %v2352_v50 = vshrl.u32 %v14302_v22, 16  ;;  %v2358_v53 = vshll.u32 %v1654_v21, 16  ;;  %v13093_v27 = vld [vmem:[#allocation2 + $0x38] sm:$0x1] }
 0x194   : > { %v5707_v44 = vrot.slane %v5706_v35, 4  ;;  %v2331_v34 = vsel %vm13521_vm12, %v2326_v36, %v2330_v31  ;;  %v2336_v52 = vrot.slane %v2335_v37, 4  ;;  %v2344_v26 = vrot.slane %v2342_v48, 4  ;;  %v13092_v31 = vld [vmem:[#allocation2 + $0x40] sm:$0xf] }
 0x195   : > { %v2350_v7 = vrot.slane %v2348_v23, 5  ;;  %v2354_v42 = vrot.slane %v2352_v50, 4  ;;  %v10975_v55 = vrot.slane %v6276_v41, 9  ;;  %v6386_v58 = vrot.slane %v13087_v47, 5  ;;  %v13094_v41 = vld [vmem:[#allocation2 + $0x44] sm:$0xf] }
 0x196   : > { %v5712_v54 = vsel %vm13521_vm12, %v5707_v44, %v5711_v14  ;;  %v2341_v0 = vsel %vm13521_vm12, %v2336_v52, %v2340_v29  ;;  %v2345_v49 = vor.u32 %v2344_v26, %v2340_v29  ;;  %v6389_v6 = vrot.slane %v13088_v57, 5  ;;  %v6277_v14 = vld [vmem:[#allocation2 + $0x3c] sm:$0xe]  ;;  %v13010_v44 = vld [vmem:[%s16101_s4 + $0x68] sm:$0xff]   ;;  %v13015_v50 = vld [vmem:[%s16101_s4 + $0x20] sm:$0xff]  }
 0x197   : > { %v10939_v45 = vcombine.low %v5702_v39, %v5712_v54  ;;  %v10646_v60 = vcombine.low %v2331_v34, %v2341_v0  ;;  %v2355_v15 = vor.u32 %v2354_v42, %v2350_v7  ;;  %v2360_v51 = vrot.slane %v2358_v53, 5  ;;  %v13095_v52 = vld [vmem:[#allocation2 + $0x48] sm:$0xf]  ;;  %v14352_v54 = vld [vmem:[#allocation2 + $0xc] sm:$0xf]  ;;  %11873 = vmatprep.subr.bf16.mxu1 %v13015_v50 }
 0x198   : > { %v6388_v9 = vrot.slane %v6386_v58, 4  ;;  %v2346_v62 = vrot.slane %v2345_v49, 4  ;;  %v6392_v12 = vrot.slane %v13089_v63, 5  ;;  %v6387_v2 = vsel %vm14251_vm15, %v10975_v55, %v6386_v58  ;;  %v13098_v47 = vld [vmem:[#allocation2 + $0x54] sm:$0xf] }
 0x199   : > { %12074 = vmatmul.mubr.msk.bf16.gmra.mrb[60].mxu0 %vm2475_vm11, %v10939_v45  ;;  %11801 = vmatprep.mubr.msk.bf16.mxu1 %vm2475_vm11, %v10646_v60  ;;  %v2356_v10 = vrot.slane %v2355_v15, 4  ;;  %v6399_v32 = vrot.slane %v13092_v31, 5  ;;  %v6391_v36 = vrot.slane %v6389_v6, 4  ;;  %v6395_v37 = vrot.slane %v13093_v27, 5  ;;  %v13099_v45 = vld [vmem:[#allocation2 + $0x14] sm:$0xf] }
 0x19a   : > { %12081 = vmatprep.mubr.msk.bf16.mxu0 %vm2475_vm11, %v10994_v25  ;;  %v2351_v13 = vsel %vm13521_vm12, %v2346_v62, %v2350_v7  ;;  %v6390_v16 = vsel %vm14251_vm15, %v6388_v9, %v6389_v6  ;;  %v10682_v25 = vcombine.low %v13090_v20, %v14332_v30  ;;  %v6394_v29 = vrot.slane %v6392_v12, 4  ;;  %v14350_v7 = vld [vmem:[#allocation2 + $0x8] sm:$0xf]  ;;  %v14360_v0 = vld [vmem:[#allocation2 + $0x18] sm:$0xf] }
 0x19b   : > { %v2361_v17 = vsel %vm13521_vm12, %v2356_v10, %v2360_v51  ;;  %v10996_v35 = vcombine.low %v6387_v2, %v6390_v16  ;;  %v10976_v48 = vrot.slane %v6277_v14, 9  ;;  %v6401_v23 = vrot.slane %v6399_v32, 4  ;;  %v6278_v49 = vld [vmem:[#allocation2 + $0x50] sm:$0xe]  ;;  %v13016_v6 = vld [vmem:[%s16101_s4 + $0x28] sm:$0xff]  }
 0x19c   : > { %v10647_v21 = vcombine.low %v2351_v13, %v2361_v17  ;;  %v6402_v39 = vrot.slane %v13094_v41, 5  ;;  %v6393_v53 = vsel %vm14251_vm15, %v6391_v36, %v6392_v12  ;;  %v6396_v34 = vsel %vm14251_vm15, %v6394_v29, %v6395_v37  ;;  %v13101_v9 = vld [vmem:[#allocation2 + $0x4c] sm:$0x1]  ;;  %v13102_v12 = vld [vmem:[#allocation2 + $0x58] sm:$0xf] }
 0x19d   : > { %v6405_v26 = vrot.slane %v13095_v52, 5  ;;  %v10683_v42 = vcombine.low %v14350_v7, %v14352_v54  ;;  %v6412_v58 = vrot.slane %v13098_v47, 5  ;;  %v10997_v57 = vcombine.low %v6393_v53, %v6396_v34  ;;  %v13103_v17 = vld [vmem:[#allocation2 + $0x5c] sm:$0xf]  ;;  %v14376_v14 = vld [vmem:[#allocation2 + $0x20] sm:$0xf] }
 0x19e   : > { %11802 = vmatmul.mubr.msk.bf16.gmra.mrb[60].mxu1 %vm2475_vm11, %v10647_v21  ;;  %v6403_v55 = vsel %vm14251_vm15, %v6401_v23, %v6402_v39  ;;  %v6404_v15 = vrot.slane %v6402_v39, 4  ;;  %v6408_v62 = vrot.slane %v13101_v9, 5  ;;  %v10977_v10 = vrot.slane %v6278_v49, 9  ;;  %v13107_v29 = vld [vmem:[#allocation2 + $0x28] sm:$0xf] }
 0x19f   : > { %11809 = vmatprep.mubr.msk.bf16.mxu1 %vm2475_vm11, %v10682_v25  ;;  %v6407_v51 = vrot.slane %v6405_v26, 4  ;;  %v6414_v63 = vrot.slane %v6412_v58, 4  ;;  %v6415_v13 = vrot.slane %v13102_v12, 5  ;;  %v6418_v20 = vrot.slane %v13103_v17, 5  ;;  %v14374_v25 = vld [vmem:[#allocation2 + $0x1c] sm:$0xf] }
 0x1a0   : > { %v6406_v2 = vsel %vm14251_vm15, %v6404_v15, %v6405_v26  ;;  %v10685_v31 = vcombine.low %v14374_v25, %v14376_v14  ;;  %v14384_v27 = vld [vmem:[#allocation2 + $0x2c] sm:$0xf]  ;;  %v13111_v47 = vld [vmem:[#allocation2 + $0x70] sm:$0xf]  ;;  %v14405_v9 = vld [vmem:[#allocation2 + $0x40] sm:$0xf] }
 0x1a1   : > { %12082 = vmatmul.mubr.msk.bf16.vlgmr.msra.gmra.mrb[0].mxu0 %vm2475_vm11, %v10995_v40  ;;  %v6400_v40 = vsel %vm14251_vm15, %v10976_v48, %v6399_v32  ;;  %v6409_v16 = vsel %vm14251_vm15, %v6407_v51, %v6408_v62  ;;  %v6413_v32 = vsel %vm14251_vm15, %v10977_v10, %v6412_v58  ;;  %v6416_v21 = vsel %vm14251_vm15, %v6414_v63, %v6415_v13  ;;  %v6279_v48 = vld [vmem:[#allocation2 + $0x64] sm:$0xe]  ;;  %v13110_v26 = vld [vmem:[#allocation2 + $0x6c] sm:$0xf]  ;;  %v13115_v51 = vld [vmem:[#allocation2 + $0x3c] sm:$0xf] }
 0x1a2   : > { %12085 = vmatprep.mubr.msk.bf16.mxu0 %vm2475_vm11, %v10996_v35  ;;  %12146 = vmatpush3.bf16.msra.mxu0 %v14139_v56  ;;  %v10684_v56 = vcombine.low %v13099_v45, %v14360_v0  ;;  %v10998_v60 = vcombine.low %v6400_v40, %v6403_v55  ;;  %v13106_v35 = vld [vmem:[#allocation2 + $0x68] sm:$0xf]  ;;  %v10686_v37 = vcombine.low %v13107_v29, %v14384_v27  ;;  %v6417_v39 = vrot.slane %v6415_v13, 4  ;;  %v14395_v45 = vld [vmem:[#allocation2 + $0x30] sm:$0xf] }
 0x1a3   : > { %12147 = vmatprep.subr.bf16.mxu0 %v13010_v44  ;;  %v6425_v36 = vrot.slane %v13106_v35, 5  ;;  %v10999_v23 = vcombine.low %v6406_v2, %v6409_v16  ;;  %v11000_v41 = vcombine.low %v6413_v32, %v6416_v21  ;;  %v10978_v34 = vrot.slane %v6279_v48, 9  ;;  %v6280_v10 = vld [vmem:[#allocation2 + $0x78] sm:$0xe]  ;;  %v13117_v16 = vld [vmem:[#allocation2 + $0x74] sm:$0x1] }
 0x1a4   : > { %v6419_v40 = vsel %vm14251_vm15, %v6417_v39, %v6418_v20  ;;  %v6431_v58 = vrot.slane %v13111_v47, 5  ;;  %v10688_v62 = vcombine.low %v13115_v51, %v14405_v9  ;;  %v6434_v17 = vrot.slane %v13117_v16, 5  ;;  %v13118_v32 = vld [vmem:[#allocation2 + $0x80] sm:$0xf]  ;;  %v13119_v29 = vld [vmem:[#allocation2 + $0x84] sm:$0xf] }
 0x1a5   : > { %v6427_v52 = vrot.slane %v6425_v36, 4  ;;  %v6441_v21 = vrot.slane %v13118_v32, 5  ;;  %v14416_v48 = vld [vmem:[#allocation2 + $0x44] sm:$0xf]  ;;  %v3477_v28 = vrot.slane %v14352_v54, 5  ;;  %vm10051_vm1 = vcmask 64512  }
 0x1a6   : > { %12148 = vmatpush3.bf16.msra.mxu0 %v13010_v44  ;;  %11810 = vmatmul.mubr.msk.bf16.vlgmr.msra.gmra.mrb[0].mxu1 %vm2475_vm11, %v10683_v42  ;;  %v6420_v44 = vrot.slane %v6418_v20, 4  ;;  %v6428_v42 = vrot.slane %v13110_v26, 5  ;;  %v6433_v2 = vrot.slane %v6431_v58, 4  ;;  %v10979_v20 = vrot.slane %v6280_v10, 9 }
 0x1a7   : > { %11813 = vmatprep.mubr.msk.bf16.mxu1 %vm2475_vm11, %v10684_v56  ;;  %11874 = vmatpush3.bf16.msra.mxu1 %v13015_v50  ;;  %v13109_v50 = vld [vmem:[#allocation2 + $0x60] sm:$0x1]  ;;  %v14397_v56 = vld [vmem:[#allocation2 + $0x34] sm:$0xf]  ;;  %v6443_v47 = vrot.slane %v6441_v21, 4 }
 0x1a8   : > { %11875 = vmatprep.subr.bf16.mxu1 %v13016_v6  ;;  %v6421_v53 = vrot.slane %v13109_v50, 5  ;;  %v10687_v49 = vcombine.low %v14395_v45, %v14397_v56  ;;  %v6430_v13 = vrot.slane %v6428_v42, 4  ;;  %v13122_v50 = vld [vmem:[#allocation2 + $0x90] sm:$0xf] }
 0x1a9   : > { %12086 = vmatmul.mubr.msk.bf16.gmra.mrb[4].mxu0 %vm2475_vm11, %v10997_v57  ;;  %v6426_v57 = vsel %vm14251_vm15, %v10978_v34, %v6425_v36  ;;  %v6435_v36 = vsel %vm14251_vm15, %v6433_v2, %v6434_v17  ;;  %v13123_v34 = vld [vmem:[#allocation2 + $0x50] sm:$0xf]  ;;  %v14439_v2 = vld [vmem:[#allocation2 + $0x5c] sm:$0xf] }
 0x1aa   : > { %12089 = vmatprep.mubr.msk.bf16.mxu0 %vm2475_vm11, %v10998_v60  ;;  %v6422_v55 = vsel %vm14251_vm15, %v6420_v44, %v6421_v53  ;;  %v13114_v60 = vld [vmem:[#allocation2 + $0x7c] sm:$0xf]  ;;  %v6432_v35 = vsel %vm14251_vm15, %v6430_v13, %v6431_v58  ;;  %v6451_v53 = vrot.slane %v13122_v50, 5  ;;  %v14437_v13 = vld [vmem:[#allocation2 + $0x58] sm:$0xf] }
 0x1ab   : > { %11876 = vmatpush3.bf16.msra.mxu1 %v13016_v6  ;;  %v6429_v6 = vsel %vm14251_vm15, %v6427_v52, %v6428_v42  ;;  %v6438_v15 = vrot.slane %v13114_v60, 5  ;;  %v11001_v63 = vcombine.low %v6419_v40, %v6422_v55  ;;  %v14426_v52 = vld [vmem:[#allocation2 + $0x54] sm:$0xf]  ;;  %v6281_v42 = vld [vmem:[#allocation2 + $0x8c] sm:$0xe]  ;;  %v11003_v40 = vcombine.low %v6432_v35, %v6435_v36 }
 0x1ac   : > { %v11002_v12 = vcombine.low %v6426_v57, %v6429_v6  ;;  %v10690_v26 = vcombine.low %v13123_v34, %v14426_v52  ;;  %v10980_v6 = vrot.slane %v6281_v42, 9  ;;  %v6453_v60 = vrot.slane %v6451_v53, 4  ;;  %v14447_v35 = vld [vmem:[#allocation2 + $0x68] sm:$0xf]  ;;  %v13133_v50 = vld [vmem:[#allocation2 + $0x9c] sm:$0x1] }
 0x1ad   : > { %v6439_v39 = vsel %vm14251_vm15, %v10979_v20, %v6438_v15  ;;  %v10691_v16 = vcombine.low %v14437_v13, %v14439_v2  ;;  %v6460_v34 = vrot.slane %v13133_v50, 5  ;;  %v13134_v42 = vld [vmem:[#allocation2 + $0xa8] sm:$0xf] }
 0x1ae   : > { %11814 = vmatmul.mubr.msk.bf16.gmra.mrb[4].mxu1 %vm2475_vm11, %v10685_v31  ;;  %v6440_v31 = vrot.slane %v6438_v15, 4  ;;  %v13126_v15 = vld [vmem:[#allocation2 + $0x94] sm:$0xf]  ;;  %v6452_v17 = vsel %vm14251_vm15, %v10980_v6, %v6451_v53  ;;  %v14460_v6 = vld [vmem:[#allocation2 + $0x70] sm:$0xf] }
 0x1af   : > { %11817 = vmatprep.mubr.msk.bf16.mxu1 %vm2475_vm11, %v10686_v37  ;;  %v6444_v37 = vrot.slane %v13119_v29, 5  ;;  %v6454_v51 = vrot.slane %v13126_v15, 5  ;;  %v6282_v29 = vld [vmem:[#allocation2 + $0xa0] sm:$0xe] }
 0x1b0   : > { %v6442_v44 = vsel %vm14251_vm15, %v6440_v31, %v6441_v21  ;;  %v13130_v31 = vld [vmem:[#allocation2 + $0xa4] sm:$0xf]  ;;  %v10981_v53 = vrot.slane %v6282_v29, 9  ;;  %v13141_v29 = vld [vmem:[#allocation2 + $0xb0] sm:$0x1] }
 0x1b1   : > { %12090 = vmatmul.mubr.msk.bf16.gmra.mrb[8].mxu0 %vm2475_vm11, %v10999_v23  ;;  %v14418_v23 = vld [vmem:[#allocation2 + $0x48] sm:$0xf]  ;;  %v11004_v55 = vcombine.low %v6439_v39, %v6442_v44  ;;  %v6446_v58 = vrot.slane %v6444_v37, 4  ;;  %v6455_v20 = vsel %vm14251_vm15, %v6453_v60, %v6454_v51  ;;  %v6464_v32 = vrot.slane %v13130_v31, 5  ;;  %v13131_v21 = vld [vmem:[#allocation2 + $0x64] sm:$0xf] }
 0x1b2   : > { %12093 = vmatprep.mubr.msk.bf16.mxu0 %vm2475_vm11, %v11000_v41  ;;  %v10689_v41 = vcombine.low %v14416_v48, %v14418_v23  ;;  %v10692_v36 = vcombine.low %v13131_v21, %v14447_v35  ;;  %v6456_v39 = vrot.slane %v6454_v51, 4 }
 0x1b3   : > { %v6465_v15 = vsel %vm14251_vm15, %v10981_v53, %v6464_v32  ;;  %v13143_v53 = vld [vmem:[#allocation2 + $0xc0] sm:$0xf] }
 0x1b6   : > { %11818 = vmatmul.mubr.msk.bf16.gmra.mrb[8].mxu1 %vm2475_vm11, %v10687_v49  ;;  %v13125_v49 = vld [vmem:[#allocation2 + $0x88] sm:$0x1] }
 0x1b7   : > { %11821 = vmatprep.mubr.msk.bf16.mxu1 %vm2475_vm11, %v10688_v62  ;;  %v6447_v57 = vrot.slane %v13125_v49, 5  ;;  %v6445_v62 = vsel %vm14251_vm15, %v6443_v47, %v6444_v37 }
 0x1b9   : > { %12094 = vmatmul.mubr.msk.bf16.gmra.mrb[12].mxu0 %vm2475_vm11, %v11001_v63  ;;  %v6448_v10 = vsel %vm14251_vm15, %v6446_v58, %v6447_v57  ;;  %v13127_v63 = vld [vmem:[#allocation2 + $0x98] sm:$0xf]  ;;  %v13135_v58 = vld [vmem:[#allocation2 + $0xac] sm:$0xf] }
 0x1ba   : > { %12097 = vmatprep.mubr.msk.bf16.mxu0 %vm2475_vm11, %v11002_v12  ;;  %v6457_v12 = vrot.slane %v13127_v63, 5  ;;  %v11005_v37 = vcombine.low %v6445_v62, %v6448_v10  ;;  %v6470_v49 = vrot.slane %v13135_v58, 5  ;;  %v14458_v57 = vld [vmem:[#allocation2 + $0x6c] sm:$0xf]  ;;  %v13138_v62 = vld [vmem:[#allocation2 + $0xb8] sm:$0xf] }
 0x1bb   : > { %v10693_v60 = vcombine.low %v14458_v57, %v14460_v6  ;;  %v6477_v10 = vrot.slane %v13138_v62, 5  ;;  %v13139_v63 = vld [vmem:[#allocation2 + $0x78] sm:$0xf] }
 0x1bc   : > { %v6459_v44 = vrot.slane %v6457_v12, 4 }
 0x1be   : > { %11822 = vmatmul.mubr.msk.bf16.gmra.mrb[12].mxu1 %vm2475_vm11, %v10689_v41  ;;  %v11006_v41 = vcombine.low %v6452_v17, %v6455_v20  ;;  %v6461_v47 = vsel %vm14251_vm15, %v6459_v44, %v6460_v34  ;;  %v6283_v17 = vld [vmem:[#allocation2 + $0xb4] sm:$0xe] }
 0x1bf   : > { %11825 = vmatprep.mubr.msk.bf16.mxu1 %vm2475_vm11, %v10690_v26  ;;  %v6466_v26 = vrot.slane %v6464_v32, 4  ;;  %v10982_v32 = vrot.slane %v6283_v17, 9 }
 0x1c1   : > { %12098 = vmatmul.mubr.msk.bf16.gmra.mrb[16].mxu0 %vm2475_vm11, %v11003_v40  ;;  %v6467_v40 = vrot.slane %v13134_v42, 5  ;;  %v14479_v42 = vld [vmem:[#allocation2 + $0x80] sm:$0xf] }
 0x1c2   : > { %12101 = vmatprep.mubr.msk.bf16.mxu0 %vm2475_vm11, %v11004_v55  ;;  %v6458_v55 = vsel %vm14251_vm15, %v6456_v39, %v6457_v12  ;;  %v14468_v12 = vld [vmem:[#allocation2 + $0x7c] sm:$0xf] }
 0x1c3   : > { %v6468_v51 = vsel %vm14251_vm15, %v6466_v26, %v6467_v40  ;;  %v11007_v20 = vcombine.low %v6458_v55, %v6461_v47  ;;  %v6469_v21 = vrot.slane %v6467_v40, 4  ;;  %v13142_v39 = vld [vmem:[#allocation2 + $0xbc] sm:$0xf]  ;;  %v6483_v26 = vrot.slane %v13143_v53, 5  ;;  %v14481_v40 = vld [vmem:[#allocation2 + $0x84] sm:$0xf] }
 0x1c4   : > { %v11008_v31 = vcombine.low %v6465_v15, %v6468_v51  ;;  %v6480_v44 = vrot.slane %v13142_v39, 5  ;;  %v10695_v55 = vcombine.low %v14479_v42, %v14481_v40  ;;  %v6478_v47 = vsel %vm14251_vm15, %v10982_v32, %v6477_v10  ;;  %v13147_v15 = vld [vmem:[#allocation2 + $0x8c] sm:$0xf]  ;;  %v14489_v51 = vld [vmem:[#allocation2 + $0x90] sm:$0xf] }
 0x1c5   : > { %v6471_v50 = vsel %vm14251_vm15, %v6469_v21, %v6470_v49  ;;  %v10696_v62 = vcombine.low %v13147_v15, %v14489_v51  ;;  %v13149_v21 = vld [vmem:[#allocation2 + $0xc4] sm:$0x1]  ;;  %v14505_v53 = vld [vmem:[#allocation2 + $0x94] sm:$0xf] }
 0x1c6   : > { %11826 = vmatmul.mubr.msk.bf16.gmra.mrb[16].mxu1 %vm2475_vm11, %v10691_v16  ;;  %v10694_v16 = vcombine.low %v13139_v63, %v14468_v12  ;;  %v6284_v63 = vld [vmem:[#allocation2 + $0xc8] sm:$0xe] }
 0x1c7   : > { %11829 = vmatprep.mubr.msk.bf16.mxu1 %vm2475_vm11, %v10692_v36  ;;  %v6472_v36 = vrot.slane %v6470_v49, 4 }
 0x1c9   : > { %12102 = vmatmul.mubr.msk.bf16.gmra.mrb[20].mxu0 %vm2475_vm11, %v11005_v37  ;;  %v6473_v37 = vrot.slane %v13141_v29, 5 }
 0x1ca   : > { %12105 = vmatprep.mubr.msk.bf16.mxu0 %vm2475_vm11, %v11006_v41  ;;  %v6479_v41 = vrot.slane %v6477_v10, 4  ;;  %v10983_v10 = vrot.slane %v6284_v63, 9  ;;  %v13156_v63 = vld [vmem:[#allocation2 + $0xa0] sm:$0xf] }
 0x1cb   : > { %v6474_v34 = vsel %vm14251_vm15, %v6472_v36, %v6473_v37  ;;  %v6486_v36 = vrot.slane %v13149_v21, 5  ;;  %v13150_v37 = vld [vmem:[#allocation2 + $0xd0] sm:$0xf] }
 0x1cc   : > { %v6481_v58 = vsel %vm14251_vm15, %v6479_v41, %v6480_v44  ;;  %v6493_v32 = vrot.slane %v13150_v37, 5  ;;  %v13157_v37 = vld [vmem:[#allocation2 + $0xd8] sm:$0x1] }
 0x1cd   : > { %v11010_v17 = vcombine.low %v6478_v47, %v6481_v58 }
 0x1ce   : > { %11830 = vmatmul.mubr.msk.bf16.gmra.mrb[20].mxu1 %vm2475_vm11, %v10693_v60  ;;  %v13146_v60 = vld [vmem:[#allocation2 + $0xcc] sm:$0xf]  ;;  %v6495_v21 = vrot.slane %v6493_v32, 4 }
 0x1cf   : > { %11833 = vmatprep.mubr.msk.bf16.mxu1 %vm2475_vm11, %v10694_v16  ;;  %v6490_v49 = vrot.slane %v13146_v60, 5  ;;  %v11009_v16 = vcombine.low %v6471_v50, %v6474_v34  ;;  %v14503_v34 = vld [vmem:[%s16101_s4 + $0x70] sm:$0xff]   ;;  %v13154_v60 = vld [vmem:[#allocation2 + $0xe0] sm:$0xf] }
 0x1d0   : > { %v6503_v15 = vrot.slane %v13154_v60, 5  ;;  %12213 = vmatprep.subr.bf16.mxu0 %v14503_v34 }
 0x1d1   : > { %12106 = vmatmul.mubr.msk.bf16.gmra.mrb[24].mxu0 %vm2475_vm11, %v11007_v20  ;;  %v6482_v20 = vrot.slane %v6480_v44, 4  ;;  %v6492_v29 = vrot.slane %v6490_v49, 4  ;;  %v13151_v44 = vld [vmem:[#allocation2 + $0xd4] sm:$0xf] }
 0x1d2   : > { %12109 = vmatprep.mubr.msk.bf16.mxu0 %vm2475_vm11, %v11008_v31  ;;  %v6485_v31 = vrot.slane %v6483_v26, 4  ;;  %v6496_v50 = vrot.slane %v13151_v44, 5  ;;  %v6499_v44 = vrot.slane %v13157_v37, 5  ;;  %v6286_v37 = vld [vmem:[#allocation2 + $0xf0] sm:$0xe] }
 0x1d3   : > { %v6484_v41 = vsel %vm14251_vm15, %v6482_v20, %v6483_v26  ;;  %v6491_v26 = vsel %vm14251_vm15, %v10983_v10, %v6490_v49  ;;  %v6494_v58 = vsel %vm14251_vm15, %v6492_v29, %v6493_v32  ;;  %v6505_v10 = vrot.slane %v6503_v15, 4  ;;  %v13158_v29 = vld [vmem:[#allocation2 + $0xe4] sm:$0xf] }
 0x1d4   : > { %v6487_v39 = vsel %vm14251_vm15, %v6485_v31, %v6486_v36  ;;  %v11012_v31 = vcombine.low %v6491_v26, %v6494_v58  ;;  %v6498_v36 = vrot.slane %v6496_v50, 4  ;;  %v6506_v60 = vrot.slane %v13158_v29, 5  ;;  %v14527_v58 = vld [vmem:[#allocation2 + $0xa8] sm:$0xf] }
 0x1d5   : > { %v11011_v20 = vcombine.low %v6484_v41, %v6487_v39  ;;  %v6497_v41 = vsel %vm14251_vm15, %v6495_v21, %v6496_v50  ;;  %v13159_v39 = vld [vmem:[#allocation2 + $0xe8] sm:$0xf]  ;;  %16139 = vst [vmem:[#allocation6_spill] sm:$0xff] %v14527_v58  ;;  %v14537_v21 = vld [vmem:[#allocation2 + $0xb8] sm:$0xf] }
 0x1d6   : > { %11834 = vmatmul.mubr.msk.bf16.gmra.mrb[24].mxu1 %vm2475_vm11, %v10695_v55  ;;  %v14507_v55 = vld [vmem:[#allocation2 + $0x98] sm:$0xf]  ;;  %v6500_v32 = vsel %vm14251_vm15, %v6498_v36, %v6499_v44  ;;  %v6509_v26 = vrot.slane %v13159_v39, 5  ;;  %16141 = vst [vmem:[#allocation8_spill] sm:$0xff] %v14537_v21  ;;  %v6508_v39 = vrot.slane %v6506_v60, 4 }
 0x1d7   : > { %11837 = vmatprep.mubr.msk.bf16.mxu1 %vm2475_vm11, %v10696_v62  ;;  %v10697_v47 = vcombine.low %v14505_v53, %v14507_v55  ;;  %v14515_v62 = vld [vmem:[#allocation2 + $0xa4] sm:$0xf]  ;;  %v11013_v44 = vcombine.low %v6497_v41, %v6500_v32  ;;  %v13167_v32 = vld [vmem:[#allocation2 + $0xfc] sm:$0xf] }
 0x1d8   : > { %v6511_v5 = vrot.slane %v6509_v26, 4  ;;  %v6510_v41 = vsel %vm14251_vm15, %v6508_v39, %v6509_v26 }
 0x1d9   : > { %12110 = vmatmul.mubr.msk.bf16.gmra.mrb[28].mxu0 %vm2475_vm11, %v11009_v16  ;;  %v10698_v16 = vcombine.low %v13156_v63, %v14515_v62 }
 0x1da   : > { %12113 = vmatprep.mubr.msk.bf16.mxu0 %vm2475_vm11, %v11010_v17  ;;  %v6285_v17 = vld [vmem:[#allocation2 + $0xdc] sm:$0xe] }
 0x1db   : > { %v10984_v49 = vrot.slane %v6285_v17, 9  ;;  %v6507_v17 = vsel %vm14251_vm15, %v6505_v10, %v6506_v60 }
 0x1de   : > { %11838 = vmatmul.mubr.msk.bf16.gmra.mrb[28].mxu1 %vm2475_vm11, %v10697_v47  ;;  %v14529_v47 = vld [vmem:[#allocation2 + $0xac] sm:$0xf] }
 0x1df   : > { %11841 = vmatprep.mubr.msk.bf16.mxu1 %vm2475_vm11, %v10698_v16  ;;  %16140 = vst [vmem:[#allocation7_spill] sm:$0xff] %v14529_v47  ;;  %v10699_v63 = vcombine.low %v14527_v58, %v14529_v47  ;;  %v6504_v16 = vsel %vm14251_vm15, %v10984_v49, %v6503_v15  ;;  %v6512_v47 = vrot.slane %v13165_v43, 5  ;;  %v10985_v15 = vrot.slane %v6286_v37, 9  ;;  %v13166_v58 = vld [vmem:[#allocation2 + $0xf8] sm:$0xf] }
 0x1e0   : > { %v11014_v29 = vcombine.low %v6504_v16, %v6507_v17  ;;  %v6519_v10 = vrot.slane %v13166_v58, 5  ;;  %v6522_v43 = vrot.slane %v13167_v32, 5  ;;  %v14548_v16 = vld [vmem:[#allocation2 + $0xbc] sm:$0xf]  ;;  %v14558_v37 = vld [vmem:[#allocation2 + $0xcc] sm:$0xf] }
 0x1e1   : > { %12114 = vmatmul.mubr.msk.bf16.gmra.mrb[32].mxu0 %vm2475_vm11, %v11011_v20  ;;  %v13162_v20 = vld [vmem:[#allocation2 + $0xf4] sm:$0xf]  ;;  %v6513_v60 = vsel %vm14251_vm15, %v6511_v5, %v6512_v47  ;;  %16142 = vst [vmem:[#allocation9_spill] sm:$0xff] %v14548_v16  ;;  %16144 = vst [vmem:[#allocation11_spill] sm:$0xff] %v14558_v37  ;;  %v6287_v47 = vld [vmem:[#allocation2 + $0x104] sm:$0xe] }
 0x1e2   : > { %12117 = vmatprep.mubr.msk.bf16.mxu0 %vm2475_vm11, %v11012_v31  ;;  %v6516_v50 = vrot.slane %v13162_v20, 5  ;;  %v13163_v31 = vld [vmem:[#allocation2 + $0xb4] sm:$0xf]  ;;  %v6521_v39 = vrot.slane %v6519_v10, 4  ;;  %v6524_v32 = vrot.slane %v6522_v43, 4 }
 0x1e3   : > { %v10700_v36 = vcombine.low %v13163_v31, %v14537_v21  ;;  %v13170_v31 = vld [vmem:[#allocation2 + $0x108] sm:$0xf]  ;;  %v13173_v21 = vld [vmem:[#allocation2 + $0x100] sm:$0x1] }
 0x1e4   : > { %v6518_v49 = vrot.slane %v6516_v50, 4  ;;  %v6517_v17 = vsel %vm14251_vm15, %v10985_v15, %v6516_v50  ;;  %v6529_v26 = vrot.slane %v13170_v31, 5  ;;  %v10986_v50 = vrot.slane %v6287_v47, 9  ;;  %v14579_v47 = vld [vmem:[#allocation2 + $0xe0] sm:$0xf] }
 0x1e6   : > { %11842 = vmatmul.mubr.msk.bf16.gmra.mrb[32].mxu1 %vm2475_vm11, %v10699_v63  ;;  %v14550_v63 = vld [vmem:[#allocation2 + $0xc0] sm:$0xf]  ;;  %v6520_v20 = vsel %vm14251_vm15, %v6518_v49, %v6519_v10  ;;  %v6531_v15 = vrot.slane %v6529_v26, 4 }
 0x1e7   : > { %11845 = vmatprep.mubr.msk.bf16.mxu1 %vm2475_vm11, %v10700_v36  ;;  %16143 = vst [vmem:[#allocation10_spill] sm:$0xff] %v14550_v63  ;;  %v10701_v58 = vcombine.low %v14548_v16, %v14550_v63  ;;  %v13171_v36 = vld [vmem:[#allocation2 + $0xc8] sm:$0xf]  ;;  %v6525_v63 = vrot.slane %v13173_v21, 5  ;;  %v13174_v16 = vld [vmem:[#allocation2 + $0x10c] sm:$0xf] }
 0x1e8   : > { %v10702_v5 = vcombine.low %v13171_v36, %v14558_v37  ;;  %v6532_v49 = vrot.slane %v13174_v16, 5  ;;  %v13175_v21 = vld [vmem:[#allocation2 + $0x110] sm:$0xf] }
 0x1e9   : > { %12118 = vmatmul.mubr.msk.bf16.gmra.mrb[36].mxu0 %vm2475_vm11, %v11013_v44  ;;  %v11015_v44 = vcombine.low %v6510_v41, %v6513_v60  ;;  %v6523_v41 = vsel %vm14251_vm15, %v6521_v39, %v6522_v43  ;;  %v6526_v10 = vsel %vm14251_vm15, %v6524_v32, %v6525_v63  ;;  %v6535_v60 = vrot.slane %v13175_v21, 5  ;;  %v13178_v43 = vld [vmem:[#allocation2 + $0x11c] sm:$0xf] }
 0x1ea   : > { %12121 = vmatprep.mubr.msk.bf16.mxu0 %vm2475_vm11, %v11014_v29  ;;  %v11016_v29 = vcombine.low %v6517_v17, %v6520_v20  ;;  %v14571_v17 = vld [vmem:[#allocation2 + $0xd4] sm:$0xf]  ;;  %v6530_v20 = vsel %vm14251_vm15, %v10986_v50, %v6529_v26  ;;  %v6533_v31 = vsel %vm14251_vm15, %v6531_v15, %v6532_v49  ;;  %v6542_v36 = vrot.slane %v13178_v43, 5  ;;  %v13182_v15 = vld [vmem:[#allocation2 + $0x120] sm:$0xf] }
 0x1eb   : > { %16146 = vst [vmem:[#allocation13_spill] sm:$0xff] %v14571_v17  ;;  %v11018_v39 = vcombine.low %v6530_v20, %v6533_v31  ;;  %v6534_v32 = vrot.slane %v6532_v49, 4  ;;  %v6537_v21 = vrot.slane %v6535_v60, 4  ;;  %v6545_v37 = vrot.slane %v13182_v15, 5  ;;  %v14595_v20 = vld [vmem:[#allocation2 + $0xe8] sm:$0xf] }
 0x1ec   : > { %v6544_v50 = vrot.slane %v6542_v36, 4  ;;  %16148 = vst [vmem:[#allocation15_spill] sm:$0xff] %v14595_v20 }
 0x1ed   : > { %v6536_v49 = vsel %vm14251_vm15, %v6534_v32, %v6535_v60 }
 0x1ee   : > { %11846 = vmatmul.mubr.msk.bf16.gmra.mrb[36].mxu1 %vm2475_vm11, %v10701_v58  ;;  %v14569_v58 = vld [vmem:[#allocation2 + $0xd0] sm:$0xf] }
 0x1ef   : > { %11849 = vmatprep.mubr.msk.bf16.mxu1 %vm2475_vm11, %v10702_v5  ;;  %16145 = vst [vmem:[#allocation12_spill] sm:$0xff] %v14569_v58  ;;  %v10703_v16 = vcombine.low %v14569_v58, %v14571_v17  ;;  %v13179_v5 = vld [vmem:[#allocation2 + $0xdc] sm:$0xf]  ;;  %v13181_v17 = vld [vmem:[#allocation2 + $0x114] sm:$0x1] }
 0x1f0   : > { %v10704_v63 = vcombine.low %v13179_v5, %v14579_v47  ;;  %v6538_v58 = vrot.slane %v13181_v17, 5  ;;  %v6546_v5 = vsel %vm14251_vm15, %v6544_v50, %v6545_v37  ;;  %v13189_v50 = vld [vmem:[#allocation2 + $0x128] sm:$0x1] }
 0x1f1   : > { %12122 = vmatmul.mubr.msk.bf16.gmra.mrb[40].mxu0 %vm2475_vm11, %v11015_v44  ;;  %v6288_v44 = vld [vmem:[#allocation2 + $0x118] sm:$0xe]  ;;  %v6551_v15 = vrot.slane %v13189_v50, 5 }
 0x1f2   : > { %12125 = vmatprep.mubr.msk.bf16.mxu0 %vm2475_vm11, %v11016_v29  ;;  %v11017_v29 = vcombine.low %v6523_v41, %v6526_v10  ;;  %v10987_v26 = vrot.slane %v6288_v44, 9  ;;  %v6539_v41 = vsel %vm14251_vm15, %v6537_v21, %v6538_v58  ;;  %v13183_v10 = vld [vmem:[#allocation2 + $0x124] sm:$0xf]  ;;  %v13187_v58 = vld [vmem:[#allocation2 + $0xf0] sm:$0xf]  ;;  %v6547_v21 = vrot.slane %v6545_v37, 4 }
 0x1f3   : > { %v6548_v17 = vrot.slane %v13183_v10, 5  ;;  %v14605_v44 = vld [vmem:[#allocation2 + $0xf4] sm:$0xf]  ;;  %v6561_v37 = vrot.slane %v14191_v38, 5 }
 0x1f4   : > { %v6543_v43 = vsel %vm14251_vm15, %v10987_v26, %v6542_v36  ;;  %16149 = vst [vmem:[#allocation16_spill] sm:$0xff] %v14605_v44  ;;  %v11019_v36 = vcombine.low %v6536_v49, %v6539_v41 }
 0x1f5   : > { %v11020_v32 = vcombine.low %v6543_v43, %v6546_v5  ;;  %v6550_v26 = vrot.slane %v6548_v17, 4  ;;  %v6549_v49 = vsel %vm14251_vm15, %v6547_v21, %v6548_v17  ;;  %v6568_v43 = vrot.slane %v14230_v59, 5  ;;  %v14631_v5 = vld [vmem:[#allocation2 + $0xf8] sm:$0xf]  ;;  %v13193_v59 = vld [vmem:[#allocation2 + $0x104] sm:$0xf] }
 0x1f6   : > { %11850 = vmatmul.mubr.msk.bf16.gmra.mrb[40].mxu1 %vm2475_vm11, %v10703_v16  ;;  %v14593_v16 = vld [vmem:[#allocation2 + $0xe4] sm:$0xf]  ;;  %16151 = vst [vmem:[#allocation17_spill] sm:$0xff] %v14631_v5  ;;  %v6564_v21 = vrot.slane %v14200_v61, 5 }
 0x1f7   : > { %11853 = vmatprep.mubr.msk.bf16.mxu1 %vm2475_vm11, %v10704_v63  ;;  %16147 = vst [vmem:[#allocation14_spill] sm:$0xff] %v14593_v16  ;;  %v10705_v31 = vcombine.low %v14593_v16, %v14595_v20  ;;  %v13186_v63 = vld [vmem:[#allocation2 + $0x130] sm:$0xf]  ;;  %v6552_v41 = vsel %vm14251_vm15, %v6550_v26, %v6551_v15  ;;  %v509_v26 = vld [vmem:[#allocation2 + $0x154] sm:$0x1] }
 0x1f8   : > { %v6555_v60 = vrot.slane %v13186_v63, 5  ;;  %v11021_v50 = vcombine.low %v6549_v49, %v6552_v41  ;;  %v510_v61 = vsel %vm13376_vm2, 0, %v509_v26  ;;  %v660_v49 = vld [vmem:[%s14650_s10] sm:$0xf]  ;;  %v661_v41 = vld [vmem:[%s14650_s10 + $0x4] sm:$0xf] }
 0x1f9   : > { %12126 = vmatmul.mubr.msk.bf16.gmra.mrb[44].mxu0 %vm2475_vm11, %v11017_v29  ;;  %v10706_v29 = vcombine.low %v13187_v58, %v14605_v44  ;;  %v13190_v58 = vld [vmem:[#allocation2 + $0x134] sm:$0xf]  ;;  %511 = vst [vmem:[#allocation2 + $0x154] sm:$0x1] %v510_v61  ;;  %v663_v61 = vld [vmem:[%s14650_s10 + $0xc] sm:$0xf] }
 0x1fa   : > { %12129 = vmatprep.mubr.msk.bf16.mxu0 %vm2475_vm11, %v11018_v39  ;;  %v6289_v39 = vld [vmem:[#allocation2 + $0x12c] sm:$0xe]  ;;  %v6557_v63 = vrot.slane %v6555_v60, 4  ;;  %v6558_v44 = vrot.slane %v13190_v58, 5  ;;  %v6563_v58 = vrot.slane %v6561_v37, 4 }
 0x1fb   : > { %v10988_v10 = vrot.slane %v6289_v39, 9 }
 0x1fc   : > { %v6559_v17 = vsel %vm14251_vm15, %v6557_v63, %v6558_v44  ;;  %v6560_v15 = vrot.slane %v6558_v44, 4  ;;  %v6570_v63 = vrot.slane %v6568_v43, 4 }
 0x1fd   : > { %v6556_v39 = vsel %vm14251_vm15, %v10988_v10, %v6555_v60 }
 0x1fe   : > { %11854 = vmatmul.mubr.msk.bf16.gmra.mrb[44].mxu1 %vm2475_vm11, %v10705_v31  ;;  %v6290_v31 = vld [vmem:[#allocation2 + $0x140] sm:$0xe]  ;;  %v11022_v10 = vcombine.low %v6556_v39, %v6559_v17  ;;  %v6562_v44 = vsel %vm14251_vm15, %v6560_v15, %v6561_v37  ;;  %v6574_v39 = vrot.slane %v14279_v8, 5  ;;  %v662_v17 = vld [vmem:[%s14650_s10 + $0x8] sm:$0xf]  ;;  %s10607_s10 = sshll.u32 %s16216_s22, 3 }
 0x1ff   : > { %11857 = vmatprep.mubr.msk.bf16.mxu1 %vm2475_vm11, %v10706_v29  ;;  %v14633_v29 = vld [vmem:[#allocation2 + $0xfc] sm:$0xf]  ;;  %v10989_v60 = vrot.slane %v6290_v31, 9  ;;  %v14674_v37 = vld [vmem:[#allocation2 + $0x10c] sm:$0xf]  ;;  %s440_s11 = sadd.s32 %s10607_s10, %s16228_s9 }
 0x200   : > { %16152 = vst [vmem:[#allocation18_spill] sm:$0xff] %v14633_v29  ;;  %v10707_v38 = vcombine.low %v14631_v5, %v14633_v29  ;;  %v6571_v29 = vrot.slane %v14236_v11, 5  ;;  %v6565_v11 = vsel %vm14251_vm15, %v6563_v58, %v6564_v21  ;;  %v666_v21 = vstv %s665_s13  ;;  %v14680_v15 = vld [vmem:[#allocation2 + $0x11c] sm:$0xf]  ;;  %s10608_s12 = sshll.u32 %s440_s11, 2 }
 0x201   : > { %12130 = vmatmul.mubr.msk.bf16.gmra.mrb[48].mxu0 %vm2475_vm11, %v11019_v36  ;;  %v14643_v36 = vld [vmem:[#allocation2 + $0x108] sm:$0xf]  ;;  %v6569_v31 = vsel %vm14251_vm15, %v10989_v60, %v6568_v43  ;;  %v11023_v26 = vcombine.low %v6562_v44, %v6565_v11  ;;  %v668_v58 = vmul.bf16 %v666_v21, %v660_v49  ;;  %v669_v60 = vmul.bf16 %v666_v21, %v661_v41  ;;  %v14687_v11 = vld [vmem:[#allocation2 + $0x120] sm:$0xf]  ;;  %s442_s15 = scalar_lea.vmem %s16100_s3, %s10608_s12  ;;  %s452_s17 = scalar_lea.vmem %s16103_s6, %s10608_s12 }
 0x202   : > { %12133 = vmatprep.mubr.msk.bf16.mxu0 %vm2475_vm11, %v11020_v32  ;;  %16153 = vst [vmem:[#allocation19_spill] sm:$0xff] %v14643_v36  ;;  %v10708_v32 = vcombine.low %v13193_v59, %v14643_v36  ;;  %v14676_v59 = vld [vmem:[#allocation2 + $0x110] sm:$0xf]  ;;  %v670_v3 = vmul.bf16 %v666_v21, %v662_v17  ;;  %v6576_v36 = vrot.slane %v6574_v39, 4  ;;  %v10711_v49 = vcombine.low %v14687_v11, %v14219_v33  ;;  %v3418_v41 = vld [vmem:[#allocation2] sm:$0xe] }
 0x203   : > { %v673_v5 = vshrl.u32 %v668_v58, 16  ;;  %v676_v20 = vshll.u32 %v668_v58, 16  ;;  %v681_v16 = vshrl.u32 %v669_v60, 16  ;;  %v684_v44 = vshll.u32 %v669_v60, 16 }
 0x204   : > { %v3471_v17 = vrot.slane %v14332_v30, 5  ;;  %v693_v58 = vshll.u32 %v670_v3, 16 }
 0x206   : > { %11858 = vmatmul.mubr.msk.bf16.gmra.mrb[48].mxu1 %vm2475_vm11, %v10707_v38  ;;  %v6572_v38 = vsel %vm14251_vm15, %v6570_v63, %v6571_v29  ;;  %v6577_v63 = vrot.slane %v14285_v18, 5  ;;  %v671_v18 = vmul.bf16 %v666_v21, %v663_v61  ;;  %v10748_v21 = vrot.slane %v3418_v41, 9 }
 0x207   : > { %11861 = vmatprep.mubr.msk.bf16.mxu1 %vm2475_vm11, %v10708_v32  ;;  %v10709_v32 = vcombine.low %v14674_v37, %v14676_v59  ;;  %v11024_v8 = vcombine.low %v6569_v31, %v6572_v38  ;;  %v683_v31 = vrot.slane %v681_v16, 7  ;;  %v10712_v16 = vcombine.low %v14240_v19, %v14275_v1  ;;  %v13011_v19 = vld [vmem:[#allocation2 + $0x28] sm:$0xff]  }
 0x209   : > { %12134 = vmatmul.mubr.msk.bf16.gmra.mrb[52].mxu0 %vm2475_vm11, %v11021_v50  ;;  %v13197_v50 = vld [vmem:[#allocation2 + $0x118] sm:$0xf] }
 0x20a   : > { %12137 = vmatprep.mubr.msk.bf16.mxu0 %vm2475_vm11, %v11022_v10  ;;  %v10710_v43 = vcombine.low %v13197_v50, %v14680_v15  ;;  %v6573_v10 = vrot.slane %v6571_v29, 4  ;;  %v675_v29 = vrot.slane %v673_v5, 7  ;;  %v690_v50 = vshrl.u32 %v670_v3, 16 }
 0x20b   : > { %v686_v5 = vor.u32 %v684_v44, %v683_v31 }
 0x20c   : > { %v6575_v38 = vsel %vm14251_vm15, %v6573_v10, %v6574_v39  ;;  %v678_v33 = vor.u32 %v676_v20, %v675_v29  ;;  %v679_v60 = vrot.slane %v675_v29, 4  ;;  %v692_v61 = vrot.slane %v690_v50, 7 }
 0x20d   : > { %v3474_v39 = vrot.slane %v14350_v7, 5  ;;  %v3472_v29 = vsel %vm14251_vm15, %v10748_v21, %v3471_v17  ;;  %v10713_v50 = vcombine.low %v14277_v4, %v14302_v22  ;;  %v3490_v21 = vrot.slane %v14376_v14, 5 }
 0x20e   : > { %11862 = vmatmul.mubr.msk.bf16.gmra.mrb[52].mxu1 %vm2475_vm11, %v10709_v32  ;;  %v713_v32 = vld [vmem:[#allocation2 + $0x154] sm:$0xf]  ;;  %v687_v30 = vsel %vm13418_vm7, %v679_v60, %v686_v5  ;;  %v695_v20 = vor.u32 %v693_v58, %v692_v61  ;;  %v697_v1 = vrot.slane %v692_v61, 4 }
 0x20f   : > { %11865 = vmatprep.mubr.msk.bf16.mxu1 %vm2475_vm11, %v10710_v43  ;;  %v6578_v43 = vsel %vm14251_vm15, %v6576_v36, %v6577_v63  ;;  %v714_v3 = vsel %vm13425_vm8, %v678_v33, %v713_v32  ;;  %v3473_v36 = vrot.slane %v3471_v17, 4  ;;  %716 = vst.msk [vmem:[#allocation2 + $0x158] sm:$0xf] %vm648_vm6, %v687_v30  ;;  %v702_v63 = vshll.u32 %v671_v18, 16  ;;  %v13013_v33 = vld [vmem:[#allocation2 + $0x30] sm:$0xff]  }
 0x210   : > { %v11025_v10 = vcombine.low %v6575_v38, %v6578_v43  ;;  %715 = vst [vmem:[#allocation2 + $0x154] sm:$0xf] %v714_v3  ;;  %v13200_v38 = vld [vmem:[#allocation2 + $0x10] sm:$0x1]  ;;  %v3476_v58 = vrot.slane %v3474_v39, 4  ;;  %v3479_v43 = vrot.slane %v3477_v28, 4 }
 0x211   : > { %12138 = vmatmul.mubr.msk.bf16.gmra.mrb[56].mxu0 %vm2475_vm11, %v11023_v26  ;;  %v688_v26 = vrot.slane %v683_v31, 4  ;;  %v3475_v31 = vsel %vm14251_vm15, %v3473_v36, %v3474_v39  ;;  %v3480_v32 = vrot.slane %v13200_v38, 5  ;;  %v3497_v39 = vrot.slane %v14384_v27, 5  ;;  %v3420_v30 = vld [vmem:[#allocation2 + $0x28] sm:$0xe]  ;;  %v13050_v27 = vld [vmem:[%s16101_s4 + $0x38] sm:$0xff]  }
 0x212   : > { %12141 = vmatprep.mubr.msk.bf16.mxu0 %vm2475_vm11, %v11024_v8  ;;  %v699_v8 = vshrl.u32 %v671_v18, 16  ;;  %v3419_v18 = vld [vmem:[#allocation2 + $0x14] sm:$0xe]  ;;  %v10768_v17 = vcombine.low %v3472_v29, %v3475_v31  ;;  %v3478_v4 = vsel %vm14251_vm15, %v3476_v58, %v3477_v28  ;;  %v13201_v36 = vld [vmem:[#allocation2 + $0x24] sm:$0x1]  ;;  %v3503_v29 = vrot.slane %v14397_v56, 5 }
 0x213   : > { %v696_v7 = vsel %vm13418_vm7, %v688_v26, %v695_v20  ;;  %v10749_v60 = vrot.slane %v3419_v18, 9  ;;  %v3481_v22 = vsel %vm14251_vm15, %v3479_v43, %v3480_v32  ;;  %v3493_v20 = vrot.slane %v13201_v36, 5  ;;  %v13019_v28 = vld [vmem:[#allocation2 + $0x50] sm:$0xff]   ;;  %v3421_v18 = vld [vmem:[#allocation2 + $0x3c] sm:$0xe] }
 0x214   : > { %v14706_v44 = vrot.slane %v699_v8, 7  ;;  %717 = vst.msk [vmem:[#allocation2 + $0x15c] sm:$0xf] %vm648_vm6, %v696_v7  ;;  %v10769_v14 = vcombine.low %v3478_v4, %v3481_v22  ;;  %v3500_v7 = vrot.slane %v14395_v45, 5  ;;  %v13202_v56 = vld [vmem:[#allocation2 + $0x38] sm:$0x1] }
 0x215   : > { %v3506_v58 = vrot.slane %v13202_v56, 5  ;;  %v10751_v43 = vrot.slane %v3421_v18, 9  ;;  %v3523_v4 = vrot.slane %v14426_v52, 5  ;;  %v3422_v22 = vld [vmem:[#allocation2 + $0x50] sm:$0xe] }
 0x216   : > { %11866 = vmatmul.mubr.msk.bf16.gmra.mrb[56].mxu1 %vm2475_vm11, %v10711_v49  ;;  %v704_v41 = vor.u32 %v702_v63, %v14706_v44  ;;  %v3484_v49 = vrot.slane %v14360_v0, 5  ;;  %v3487_v0 = vrot.slane %v14374_v25, 5  ;;  %v13049_v25 = vld [vmem:[%s16101_s4 + $0x30] sm:$0xff]   ;;  %v13018_v63 = vld [vmem:[#allocation2 + $0x44] sm:$0xff]   ;;  %v3502_v32 = vrot.slane %v3500_v7, 4 }
 0x217   : > { %11869 = vmatprep.mubr.msk.bf16.mxu1 %vm2475_vm11, %v10712_v16  ;;  %v13017_v16 = vld [vmem:[#allocation2 + $0x3c] sm:$0xff]   ;;  %11941 = vmatprep.subr.bf16.mxu1 %v13049_v25  ;;  %v13025_v18 = vld [vmem:[#allocation2 + $0x8c] sm:$0xff]   ;;  %v3424_v56 = vld [vmem:[#allocation2 + $0x78] sm:$0xe] }
 0x218   : > { %v705_v54 = vsel %vm13418_vm7, %v697_v1, %v704_v41  ;;  %v3486_v5 = vrot.slane %v3484_v49, 4  ;;  %v3485_v26 = vsel %vm14251_vm15, %v10749_v60, %v3484_v49  ;;  %v3489_v8 = vrot.slane %v3487_v0, 4 }
 0x219   : > { %12142 = vmatmul.mubr.msk.bf16.gmra.mrb[60].mxu0 %vm2475_vm11, %v11025_v10  ;;  %718 = vst.msk [vmem:[#allocation2 + $0x160] sm:$0xf] %vm648_vm6, %v705_v54  ;;  %v3492_v10 = vrot.slane %v3490_v21, 4  ;;  %v3499_v1 = vrot.slane %v3497_v39, 4  ;;  %v3510_v49 = vrot.slane %v14405_v9, 5  ;;  %v3513_v60 = vrot.slane %v14416_v48, 5 }
 0x21a   : > { %12149 = vmatprep.mubr.msk.bf16.mxu0 %vm2475_vm11, %v13011_v19  ;;  %v3488_v61 = vsel %vm14251_vm15, %v3486_v5, %v3487_v0  ;;  %v10750_v19 = vrot.slane %v3420_v30, 9  ;;  %v13021_v5 = vld [vmem:[#allocation2 + $0x64] sm:$0xff]   ;;  %v3504_v9 = vsel %vm14251_vm15, %v3502_v32, %v3503_v29 }
 0x21b   : > { %v10770_v3 = vcombine.low %v3485_v26, %v3488_v61  ;;  %v3494_v41 = vsel %vm14251_vm15, %v3492_v10, %v3493_v20  ;;  %v3501_v31 = vsel %vm14251_vm15, %v3499_v1, %v3500_v7  ;;  %v3515_v26 = vrot.slane %v3513_v60, 4  ;;  %v13023_v10 = vld [vmem:[#allocation2 + $0x78] sm:$0xff]   ;;  %v3423_v1 = vld [vmem:[#allocation2 + $0x64] sm:$0xe] }
 0x21c   : > { %v3498_v45 = vsel %vm14251_vm15, %v10750_v19, %v3497_v39  ;;  %v13203_v39 = vld [vmem:[#allocation2 + $0x4c] sm:$0x1]  ;;  %v3529_v20 = vrot.slane %v14439_v2, 5  ;;  %v3536_v19 = vrot.slane %v14447_v35, 5  ;;  %v13024_v2 = vld [vmem:[#allocation2 + $0x80] sm:$0xff]  }
 0x21d   : > { %v10772_v38 = vcombine.low %v3498_v45, %v3501_v31  ;;  %v3519_v30 = vrot.slane %v13203_v39, 5  ;;  %v10753_v45 = vrot.slane %v3423_v1, 9 }
 0x21e   : > { %11870 = vmatmul.mubr.msk.bf16.gmra.mrb[60].mxu1 %vm2475_vm11, %v10713_v50  ;;  %v3505_v50 = vrot.slane %v3503_v29, 4  ;;  %v3538_v31 = vrot.slane %v3536_v19, 4 }
 0x21f   : > { %11877 = vmatprep.mubr.msk.bf16.mxu1 %vm2475_vm11, %v10768_v17  ;;  %v13020_v17 = vld [vmem:[#allocation2 + $0x58] sm:$0xff]   ;;  %v3537_v32 = vsel %vm14251_vm15, %v10753_v45, %v3536_v19  ;;  %v3426_v19 = vld [vmem:[#allocation2 + $0xa0] sm:$0xe] }
 0x220   : > { %v3507_v0 = vsel %vm14251_vm15, %v3505_v50, %v3506_v58  ;;  %v3549_v50 = vrot.slane %v14468_v12, 5  ;;  %v16154_v45 = vld [vmem:[#allocation6_spill] sm:$0xff] }
 0x221   : > { %12150 = vmatmul.mubr.msk.bf16.vlgmr.msra.gmra.mrb[0].mxu0 %vm2475_vm11, %v13013_v33  ;;  %v3512_v33 = vrot.slane %v3510_v49, 4 }
 0x222   : > { %12153 = vmatprep.mubr.msk.bf16.mxu0 %vm2475_vm11, %v13017_v16  ;;  %12214 = vmatpush3.bf16.msra.mxu0 %v14503_v34  ;;  %v3491_v34 = vsel %vm14251_vm15, %v3489_v8, %v3490_v21  ;;  %v3516_v16 = vrot.slane %v14418_v23, 5  ;;  %v10773_v21 = vcombine.low %v3504_v9, %v3507_v0  ;;  %v13022_v23 = vld [vmem:[#allocation2 + $0x6c] sm:$0xff]   ;;  %v3526_v8 = vrot.slane %v14437_v13, 5 }
 0x223   : > { %12215 = vmatprep.subr.bf16.mxu0 %v13048_v24  ;;  %v10771_v54 = vcombine.low %v3491_v34, %v3494_v41  ;;  %v3514_v48 = vsel %vm14251_vm15, %v3512_v33, %v3513_v60  ;;  %v3531_v34 = vrot.slane %v3529_v20, 4  ;;  %v13204_v41 = vld [vmem:[#allocation2 + $0x60] sm:$0x1]  ;;  %v13205_v60 = vld [vmem:[#allocation2 + $0x74] sm:$0x1]  ;;  %v10754_v9 = vrot.slane %v3424_v56, 9 }
 0x224   : > { %v3518_v61 = vrot.slane %v3516_v16, 4  ;;  %v3517_v52 = vsel %vm14251_vm15, %v3515_v26, %v3516_v16  ;;  %v3532_v29 = vrot.slane %v13204_v41, 5  ;;  %v3551_v0 = vrot.slane %v3549_v50, 4  ;;  %v3427_v56 = vld [vmem:[#allocation2 + $0xb4] sm:$0xe] }
 0x225   : > { %v3552_v16 = vrot.slane %v14479_v42, 5 }
 0x226   : > { %12216 = vmatpush3.bf16.msra.mxu0 %v13048_v24  ;;  %11878 = vmatmul.mubr.msk.bf16.vlgmr.msra.gmra.mrb[0].mxu1 %vm2475_vm11, %v10769_v14  ;;  %v3511_v24 = vsel %vm14251_vm15, %v10751_v43, %v3510_v49  ;;  %v10752_v14 = vrot.slane %v3422_v22, 9  ;;  %v3520_v36 = vsel %vm14251_vm15, %v3518_v61, %v3519_v30  ;;  %v3539_v49 = vrot.slane %v14458_v57, 5 }
 0x227   : > { %11881 = vmatprep.mubr.msk.bf16.mxu1 %vm2475_vm11, %v10770_v3  ;;  %11942 = vmatpush3.bf16.msra.mxu1 %v13049_v25  ;;  %v10774_v25 = vcombine.low %v3511_v24, %v3514_v48  ;;  %v3525_v3 = vrot.slane %v3523_v4, 4  ;;  %v10775_v7 = vcombine.low %v3517_v52, %v3520_v36  ;;  %v13027_v24 = vld [vmem:[#allocation2 + $0xa0] sm:$0xff]   ;;  %v3550_v22 = vsel %vm14251_vm15, %v10754_v9, %v3549_v50  ;;  %v13029_v52 = vld [vmem:[#allocation2 + $0xb4] sm:$0xff]  }
 0x228   : > { %11943 = vmatprep.subr.bf16.mxu1 %v13050_v27  ;;  %v3540_v57 = vsel %vm14251_vm15, %v3538_v31, %v3539_v49  ;;  %v3541_v43 = vrot.slane %v3539_v49, 4  ;;  %v3553_v42 = vsel %vm14251_vm15, %v3551_v0, %v3552_v16  ;;  %v3554_v39 = vrot.slane %v3552_v16, 4  ;;  %v13031_v49 = vld [vmem:[#allocation2 + $0xc8] sm:$0xff]   ;;  %v13033_v9 = vld [vmem:[#allocation2 + $0xd0] sm:$0xff]  }
 0x229   : > { %12154 = vmatmul.mubr.msk.bf16.gmra.mrb[4].mxu0 %vm2475_vm11, %v13018_v63  ;;  %v3524_v63 = vsel %vm14251_vm15, %v10752_v14, %v3523_v4  ;;  %v3527_v13 = vsel %vm14251_vm15, %v3525_v3, %v3526_v8  ;;  %v3555_v4 = vrot.slane %v14481_v40, 5  ;;  %v10780_v61 = vcombine.low %v3550_v22, %v3553_v42  ;;  %v13028_v40 = vld [vmem:[#allocation2 + $0xa8] sm:$0xff]   ;;  %v16158_v42 = vld [vmem:[#allocation10_spill] sm:$0xff] }
 0x22a   : > { %12157 = vmatprep.mubr.msk.bf16.mxu0 %vm2475_vm11, %v13019_v28  ;;  %v3528_v28 = vrot.slane %v3526_v8, 4  ;;  %v3578_v31 = vrot.slane %v16154_v45, 5  ;;  %v10757_v0 = vrot.slane %v3427_v56, 9  ;;  %v16164_v56 = vld [vmem:[#allocation16_spill] sm:$0xff] }
 0x22b   : > { %11944 = vmatpush3.bf16.msra.mxu1 %v13050_v27  ;;  %v10776_v27 = vcombine.low %v3524_v63, %v3527_v13  ;;  %v3557_v30 = vrot.slane %v3555_v4, 4  ;;  %v3575_v13 = vrot.slane %v14515_v62, 5 }
 0x22c   : > { %v3530_v35 = vsel %vm14251_vm15, %v3528_v28, %v3529_v20  ;;  %v3568_v20 = vrot.slane %v14507_v55, 5  ;;  %v13030_v55 = vld [vmem:[#allocation2 + $0xbc] sm:$0xff]  }
 0x22e   : > { %11882 = vmatmul.mubr.msk.bf16.gmra.mrb[4].mxu1 %vm2475_vm11, %v10771_v54  ;;  %v3533_v54 = vsel %vm14251_vm15, %v3531_v34, %v3532_v29  ;;  %v3570_v28 = vrot.slane %v3568_v20, 4  ;;  %v13207_v34 = vld [vmem:[#allocation2 + $0x9c] sm:$0x1]  ;;  %v10756_v29 = vrot.slane %v3426_v19, 9 }
 0x22f   : > { %11885 = vmatprep.mubr.msk.bf16.mxu1 %vm2475_vm11, %v10772_v38  ;;  %v3542_v38 = vrot.slane %v14460_v6, 5  ;;  %v10777_v58 = vcombine.low %v3530_v35, %v3533_v54  ;;  %v13026_v6 = vld [vmem:[#allocation2 + $0x94] sm:$0xff]   ;;  %v3571_v41 = vrot.slane %v13207_v34, 5  ;;  %v16155_v35 = vld [vmem:[#allocation7_spill] sm:$0xff]  ;;  %v3614_v34 = vrot.slane %v14579_v47, 5 }
 0x230   : > { %v3581_v54 = vrot.slane %v16155_v35, 5  ;;  %v16163_v35 = vld [vmem:[#allocation15_spill] sm:$0xff] }
 0x231   : > { %12158 = vmatmul.mubr.msk.bf16.gmra.mrb[8].mxu0 %vm2475_vm11, %v13020_v17  ;;  %v10778_v17 = vcombine.low %v3537_v32, %v3540_v57  ;;  %v3544_v33 = vrot.slane %v3542_v38, 4  ;;  %v3543_v12 = vsel %vm14251_vm15, %v3541_v43, %v3542_v38  ;;  %v3576_v38 = vsel %vm14251_vm15, %v10756_v29, %v3575_v13  ;;  %v16156_v57 = vld [vmem:[#allocation8_spill] sm:$0xff] }
 0x232   : > { %12161 = vmatprep.mubr.msk.bf16.mxu0 %vm2475_vm11, %v13021_v5  ;;  %v3545_v5 = vrot.slane %v13205_v60, 5  ;;  %v3588_v50 = vrot.slane %v16156_v57, 5  ;;  %v3583_v60 = vrot.slane %v3581_v54, 4  ;;  %v3616_v57 = vrot.slane %v3614_v34, 4 }
 0x234   : > { %v3546_v48 = vsel %vm14251_vm15, %v3544_v33, %v3545_v5  ;;  %v3580_v33 = vrot.slane %v3578_v31, 4  ;;  %v13208_v5 = vld [vmem:[#allocation2 + $0xb0] sm:$0x1]  ;;  %v3590_v16 = vrot.slane %v3588_v50, 4 }
 0x235   : > { %v10779_v26 = vcombine.low %v3543_v12, %v3546_v48  ;;  %v13034_v48 = vld [vmem:[#allocation2 + $0xdc] sm:$0xff]  }
 0x236   : > { %11886 = vmatmul.mubr.msk.bf16.gmra.mrb[8].mxu1 %vm2475_vm11, %v10773_v21  ;;  %v3562_v21 = vrot.slane %v14489_v51, 5  ;;  %v3556_v51 = vsel %vm14251_vm15, %v3554_v39, %v3555_v4  ;;  %v3582_v4 = vsel %vm14251_vm15, %v3580_v33, %v3581_v54  ;;  %v3620_v54 = vrot.slane %v16163_v35, 5 }
 0x237   : > { %11889 = vmatprep.mubr.msk.bf16.mxu1 %vm2475_vm11, %v10774_v25  ;;  %v3425_v25 = vld [vmem:[#allocation2 + $0x8c] sm:$0xe] }
 0x238   : > { %v10755_v3 = vrot.slane %v3425_v25, 9  ;;  %v3564_v8 = vrot.slane %v3562_v21, 4  ;;  %v3589_v25 = vsel %vm14251_vm15, %v10757_v0, %v3588_v50  ;;  %v13038_v50 = vld [vmem:[#allocation2 + $0x104] sm:$0xff]  }
 0x239   : > { %12162 = vmatmul.mubr.msk.bf16.gmra.mrb[12].mxu0 %vm2475_vm11, %v13022_v23  ;;  %v13206_v23 = vld [vmem:[#allocation2 + $0x88] sm:$0x1] }
 0x23a   : > { %12165 = vmatprep.mubr.msk.bf16.mxu0 %vm2475_vm11, %v13023_v10  ;;  %v3558_v14 = vrot.slane %v13206_v23, 5  ;;  %v3565_v10 = vrot.slane %v14505_v53, 5  ;;  %v3563_v63 = vsel %vm14251_vm15, %v10755_v3, %v3562_v21  ;;  %v3594_v21 = vrot.slane %v16158_v42, 5 }
 0x23c   : > { %v3559_v36 = vsel %vm14251_vm15, %v3557_v30, %v3558_v14  ;;  %v3566_v53 = vsel %vm14251_vm15, %v3564_v8, %v3565_v10  ;;  %v3428_v30 = vld [vmem:[#allocation2 + $0xc8] sm:$0xe]  ;;  %v3596_v3 = vrot.slane %v3594_v21, 4  ;;  %v13209_v8 = vld [vmem:[#allocation2 + $0xc4] sm:$0x1] }
 0x23d   : > { %v10781_v1 = vcombine.low %v3556_v51, %v3559_v36  ;;  %v10758_v51 = vrot.slane %v3428_v30, 9 }
 0x23e   : > { %11890 = vmatmul.mubr.msk.bf16.gmra.mrb[12].mxu1 %vm2475_vm11, %v10775_v7  ;;  %v10782_v7 = vcombine.low %v3563_v63, %v3566_v53  ;;  %v13036_v53 = vld [vmem:[#allocation2 + $0xf0] sm:$0xff]  }
 0x23f   : > { %11893 = vmatprep.mubr.msk.bf16.mxu1 %vm2475_vm11, %v10776_v27  ;;  %v3567_v27 = vrot.slane %v3565_v10, 4  ;;  %v3597_v10 = vrot.slane %v13209_v8, 5 }
 0x241   : > { %12166 = vmatmul.mubr.msk.bf16.gmra.mrb[16].mxu0 %vm2475_vm11, %v13024_v2  ;;  %v3577_v2 = vrot.slane %v3575_v13, 4  ;;  %v3569_v62 = vsel %vm14251_vm15, %v3567_v27, %v3568_v20  ;;  %v16160_v20 = vld [vmem:[#allocation12_spill] sm:$0xff]  ;;  %v3598_v19 = vsel %vm14251_vm15, %v3596_v3, %v3597_v10  ;;  %v16167_v3 = vld [vmem:[#allocation19_spill] sm:$0xff] }
 0x242   : > { %12169 = vmatprep.mubr.msk.bf16.mxu0 %vm2475_vm11, %v13025_v18  ;;  %v3572_v18 = vsel %vm14251_vm15, %v3570_v28, %v3571_v41  ;;  %v3604_v63 = vrot.slane %v16160_v20, 5  ;;  %v3429_v41 = vld [vmem:[#allocation2 + $0xdc] sm:$0xe]  ;;  %v3640_v8 = vrot.slane %v16167_v3, 5 }
 0x243   : > { %v3579_v32 = vsel %vm14251_vm15, %v3577_v2, %v3578_v31  ;;  %v13210_v2 = vld [vmem:[#allocation2 + $0xd8] sm:$0x1] }
 0x244   : > { %v10784_v43 = vcombine.low %v3576_v38, %v3579_v32  ;;  %v3606_v29 = vrot.slane %v3604_v63, 4  ;;  %v3610_v45 = vrot.slane %v13210_v2, 5  ;;  %v13037_v38 = vld [vmem:[#allocation2 + $0xf8] sm:$0xff]   ;;  %v10759_v32 = vrot.slane %v3429_v41, 9 }
 0x245   : > { %v3653_v2 = vrot.slane %v14680_v15, 5 }
 0x246   : > { %11894 = vmatmul.mubr.msk.bf16.gmra.mrb[16].mxu1 %vm2475_vm11, %v10777_v58  ;;  %v14860_v58 = vld [vmem:[%s16101_s4 + $0x80] sm:$0xff]   ;;  %v3615_v0 = vsel %vm14251_vm15, %v10759_v32, %v3614_v34  ;;  %v3643_v34 = vrot.slane %v14674_v37, 5 }
 0x247   : > { %11897 = vmatprep.mubr.msk.bf16.mxu1 %vm2475_vm11, %v10778_v17  ;;  %v10783_v17 = vcombine.low %v3569_v62, %v3572_v18  ;;  %12281 = vmatprep.subr.bf16.mxu0 %v14860_v58  ;;  %v16162_v62 = vld [vmem:[#allocation14_spill] sm:$0xff] }
 0x248   : > { %v3617_v18 = vrot.slane %v16162_v62, 5 }
 0x249   : > { %12170 = vmatmul.mubr.msk.bf16.gmra.mrb[20].mxu0 %vm2475_vm11, %v13026_v6  ;;  %v3584_v6 = vrot.slane %v13208_v5, 5  ;;  %v13211_v5 = vld [vmem:[#allocation2 + $0xec] sm:$0x1] }
 0x24a   : > { %12173 = vmatprep.mubr.msk.bf16.mxu0 %vm2475_vm11, %v13027_v24  ;;  %v16157_v24 = vld [vmem:[#allocation9_spill] sm:$0xff]  ;;  %v3619_v33 = vrot.slane %v3617_v18, 4 }
 0x24b   : > { %v3591_v12 = vrot.slane %v16157_v24, 5  ;;  %v3585_v22 = vsel %vm14251_vm15, %v3583_v60, %v3584_v6  ;;  %v3622_v60 = vrot.slane %v3620_v54, 4  ;;  %v3623_v6 = vrot.slane %v13211_v5, 5  ;;  %v7835_v5 = vld [vmem:[#allocation2 + $0x34] sm:$0xf] }
 0x24c   : > { %v10785_v23 = vcombine.low %v3582_v4, %v3585_v22  ;;  %v16165_v4 = vld [vmem:[#allocation17_spill] sm:$0xff] }
 0x24d   : > { %v3630_v22 = vrot.slane %v16165_v4, 5 }
 0x24e   : > { %11898 = vmatmul.mubr.msk.bf16.gmra.mrb[20].mxu1 %vm2475_vm11, %v10779_v26  ;;  %v3592_v26 = vsel %vm14251_vm15, %v3590_v16, %v3591_v12  ;;  %v3618_v16 = vsel %vm14251_vm15, %v3616_v57, %v3617_v18  ;;  %v13041_v57 = vld [vmem:[#allocation2 + $0x120] sm:$0xff]  }
 0x24f   : > { %11901 = vmatprep.mubr.msk.bf16.mxu1 %vm2475_vm11, %v10780_v61  ;;  %v16159_v61 = vld [vmem:[#allocation11_spill] sm:$0xff]  ;;  %v10786_v14 = vcombine.low %v3589_v25, %v3592_v26  ;;  %v10790_v42 = vcombine.low %v3615_v0, %v3618_v16  ;;  %v3624_v25 = vsel %vm14251_vm15, %v3622_v60, %v3623_v6  ;;  %v3632_v20 = vrot.slane %v3630_v22, 4 }
 0x250   : > { %v3601_v39 = vrot.slane %v16159_v61, 5  ;;  %v7832_v26 = vld [vmem:[#allocation2 + $0x28] sm:$0xf]  ;;  %v13039_v61 = vld [vmem:[#allocation2 + $0x10c] sm:$0xff]   ;;  %v3655_v6 = vrot.slane %v3653_v2, 4 }
 0x251   : > { %12174 = vmatmul.mubr.msk.bf16.gmra.mrb[24].mxu0 %vm2475_vm11, %v13028_v40  ;;  %v3593_v40 = vrot.slane %v3591_v12, 4  ;;  %v13215_v16 = vld [vmem:[#allocation2 + $0x128] sm:$0x1] }
 0x252   : > { %12177 = vmatprep.mubr.msk.bf16.mxu0 %vm2475_vm11, %v13029_v52  ;;  %v13035_v52 = vld [vmem:[#allocation2 + $0xe4] sm:$0xff]   ;;  %v3603_v36 = vrot.slane %v3601_v39, 4  ;;  %v3602_v27 = vsel %vm14251_vm15, %v10758_v51, %v3601_v39 }
 0x253   : > { %v3595_v13 = vsel %vm14251_vm15, %v3593_v40, %v3594_v21  ;;  %v3621_v21 = vsel %vm14251_vm15, %v3619_v33, %v3620_v54  ;;  %v16166_v39 = vld [vmem:[#allocation18_spill] sm:$0xff] }
 0x254   : > { %v3605_v28 = vsel %vm14251_vm15, %v3603_v36, %v3604_v63  ;;  %v3633_v30 = vrot.slane %v16166_v39, 5  ;;  %v3431_v40 = vld [vmem:[#allocation2 + $0x104] sm:$0xe]  ;;  %v10791_v10 = vcombine.low %v3621_v21, %v3624_v25  ;;  %v7913_v36 = vshrl.u32 %v7832_v26, 16  ;;  %v7834_v63 = vld [vmem:[#allocation2 + $0x30] sm:$0xf] }
 0x255   : > { %v10788_v31 = vcombine.low %v3602_v27, %v3605_v28  ;;  %v10761_v28 = vrot.slane %v3431_v40, 9  ;;  %v7932_v35 = vshll.u32 %v7834_v63, 16  ;;  %v7936_v37 = vshrl.u32 %v7834_v63, 16  ;;  %v13216_v63 = vld [vmem:[#allocation2 + $0x130] sm:$0xf] }
 0x256   : > { %11902 = vmatmul.mubr.msk.bf16.gmra.mrb[24].mxu1 %vm2475_vm11, %v10781_v1  ;;  %v16161_v1 = vld [vmem:[#allocation13_spill] sm:$0xff]  ;;  %v7915_v18 = vrot.slane %v7913_v36, 4  ;;  %v7942_v25 = vshll.u32 %v7835_v5, 16 }
 0x257   : > { %11905 = vmatprep.mubr.msk.bf16.mxu1 %vm2475_vm11, %v10782_v7  ;;  %v3607_v7 = vrot.slane %v16161_v1, 5  ;;  %v3635_v1 = vrot.slane %v3633_v30, 4  ;;  %v3641_v15 = vsel %vm14251_vm15, %v10761_v28, %v3640_v8  ;;  %v14940_v4 = vrot.slane %v7932_v35, 5 }
 0x259   : > { %12178 = vmatmul.mubr.msk.bf16.gmra.mrb[28].mxu0 %vm2475_vm11, %v13030_v55  ;;  %v10787_v55 = vcombine.low %v3595_v13, %v3598_v19  ;;  %v3608_v47 = vsel %vm14251_vm15, %v3606_v29, %v3607_v7  ;;  %v3646_v29 = vrot.slane %v14676_v59, 5 }
 0x25a   : > { %12181 = vmatprep.mubr.msk.bf16.mxu0 %vm2475_vm11, %v13031_v49  ;;  %v3609_v49 = vrot.slane %v3607_v7, 4  ;;  %v13212_v7 = vld [vmem:[#allocation2 + $0x100] sm:$0x1] }
 0x25b   : > { %v3636_v27 = vrot.slane %v13212_v7, 5 }
 0x25d   : > { %v3637_v59 = vsel %vm14251_vm15, %v3635_v1, %v3636_v27  ;;  %v14969_v1 = vrot.slane %v7942_v25, 5 }
 0x25e   : > { %11906 = vmatmul.mubr.msk.bf16.gmra.mrb[28].mxu1 %vm2475_vm11, %v10783_v17  ;;  %v3627_v17 = vrot.slane %v16164_v56, 5 }
 0x25f   : > { %11909 = vmatprep.mubr.msk.bf16.mxu1 %vm2475_vm11, %v10784_v43  ;;  %v3611_v43 = vsel %vm14251_vm15, %v3609_v49, %v3610_v45  ;;  %v3432_v45 = vld [vmem:[#allocation2 + $0x118] sm:$0xe]  ;;  %v13213_v49 = vld [vmem:[#allocation2 + $0x124] sm:$0xf] }
 0x260   : > { %v10789_v24 = vcombine.low %v3608_v47, %v3611_v43  ;;  %v3659_v62 = vrot.slane %v13213_v49, 5  ;;  %v13042_v47 = vld [vmem:[#allocation2 + $0x12c] sm:$0xff]   ;;  %v13214_v43 = vld [vmem:[#allocation2 + $0x114] sm:$0x1]  ;;  %v10762_v60 = vrot.slane %v3432_v45, 9 }
 0x261   : > { %12182 = vmatmul.mubr.msk.bf16.gmra.mrb[32].mxu0 %vm2475_vm11, %v13033_v9  ;;  %v3430_v9 = vld [vmem:[#allocation2 + $0xf0] sm:$0xe]  ;;  %v3649_v33 = vrot.slane %v13214_v43, 5  ;;  %v7843_v43 = vld [vmem:[#allocation2 + $0x54] sm:$0xf] }
 0x262   : > { %12185 = vmatprep.mubr.msk.bf16.mxu0 %vm2475_vm11, %v13034_v48  ;;  %v10760_v12 = vrot.slane %v3430_v9, 9  ;;  %v3629_v48 = vrot.slane %v3627_v17, 4  ;;  %v3661_v0 = vrot.slane %v3659_v62, 4 }
 0x264   : > { %v3631_v51 = vsel %vm14251_vm15, %v3629_v48, %v3630_v22  ;;  %v7938_v22 = vrot.slane %v7936_v37, 4 }
 0x266   : > { %11910 = vmatmul.mubr.msk.bf16.gmra.mrb[32].mxu1 %vm2475_vm11, %v10785_v23  ;;  %v7833_v23 = vld [vmem:[#allocation2 + $0x2c] sm:$0xf] }
 0x267   : > { %11913 = vmatprep.mubr.msk.bf16.mxu1 %vm2475_vm11, %v10786_v14  ;;  %v13040_v14 = vld [vmem:[#allocation2 + $0x118] sm:$0xff]   ;;  %v7922_v13 = vshll.u32 %v7833_v23, 16  ;;  %v7926_v19 = vshrl.u32 %v7833_v23, 16  ;;  %v14954_v23 = vsel %vm14251_vm15, %v10762_v60, %v3653_v2 }
 0x269   : > { %12186 = vmatmul.mubr.msk.bf16.gmra.mrb[36].mxu0 %vm2475_vm11, %v13035_v52  ;;  %v3628_v52 = vsel %vm14251_vm15, %v10760_v12, %v3627_v17  ;;  %v7928_v32 = vrot.slane %v7926_v19, 4  ;;  %v3648_v17 = vrot.slane %v3646_v29, 4  ;;  %v13043_v19 = vld [vmem:[#allocation2 + $0x134] sm:$0xff]  }
 0x26a   : > { %12189 = vmatprep.mubr.msk.bf16.mxu0 %vm2475_vm11, %v13036_v53  ;;  %v7916_v53 = vshll.u32 %v7832_v26, 16  ;;  %v10792_v41 = vcombine.low %v3628_v52, %v3631_v51  ;;  %v7946_v26 = vshrl.u32 %v7835_v5, 16  ;;  %v7838_v52 = vld [vmem:[#allocation2 + $0x40] sm:$0xf] }
 0x26b   : > { %v7966_v2 = vshll.u32 %v7838_v52, 16  ;;  %v7970_v45 = vshrl.u32 %v7838_v52, 16 }
 0x26c   : > { %v7918_v54 = vrot.slane %v7916_v53, 5  ;;  %v3666_v53 = vrot.slane %v13216_v63, 5  ;;  %v7948_v7 = vrot.slane %v7946_v26, 4  ;;  %v13218_v26 = vld [vmem:[#allocation2 + $0x138] sm:$0xf] }
 0x26e   : > { %11914 = vmatmul.mubr.msk.bf16.gmra.mrb[36].mxu1 %vm2475_vm11, %v10787_v55  ;;  %v3642_v55 = vrot.slane %v3640_v8, 4  ;;  %v7919_v12 = vor.u32 %v7918_v54, %v7915_v18  ;;  %v7840_v54 = vld [vmem:[#allocation2 + $0x48] sm:$0xf] }
 0x26f   : > { %11917 = vmatprep.mubr.msk.bf16.mxu1 %vm2475_vm11, %v10788_v31  ;;  %v3656_v31 = vrot.slane %v14687_v11, 5  ;;  %v3645_v11 = vrot.slane %v3643_v34, 4  ;;  %v7986_v5 = vshll.u32 %v7840_v54, 16 }
 0x270   : > { %v3644_v56 = vsel %vm14251_vm15, %v3642_v55, %v3643_v34  ;;  %v7920_v51 = vrot.slane %v7919_v12, 4  ;;  %v13044_v34 = vld [vmem:[#allocation2 + $0x140] sm:$0xff]  }
 0x271   : > { %12190 = vmatmul.mubr.msk.bf16.gmra.mrb[40].mxu0 %vm2475_vm11, %v13037_v38  ;;  %v14927_v38 = vrot.slane %v7922_v13, 5  ;;  %v3658_v9 = vrot.slane %v3656_v31, 4  ;;  %v14946_v39 = vsel %vm14251_vm15, %v3645_v11, %v3646_v29  ;;  %v14958_v40 = vsel %vm14251_vm15, %v3655_v6, %v3656_v31  ;;  %v7836_v13 = vld [vmem:[#allocation2 + $0x38] sm:$0x1]  ;;  %v7839_v29 = vld [vmem:[#allocation2 + $0x44] sm:$0xf] }
 0x272   : > { %12193 = vmatprep.mubr.msk.bf16.mxu0 %vm2475_vm11, %v13038_v50  ;;  %v3634_v50 = vsel %vm14251_vm15, %v3632_v20, %v3633_v30  ;;  %v14950_v30 = vsel %vm14251_vm15, %v3648_v17, %v3649_v33  ;;  %v7939_v20 = vor.u32 %v7938_v22, %v14940_v4  ;;  %v10796_v55 = vcombine.low %v14954_v23, %v14958_v40  ;;  %v7841_v40 = vld [vmem:[#allocation2 + $0x4c] sm:$0x1] }
 0x273   : > { %v7929_v48 = vor.u32 %v7928_v32, %v14927_v38  ;;  %v10793_v21 = vcombine.low %v3634_v50, %v3637_v59  ;;  %v14962_v3 = vsel %vm14251_vm15, %v3658_v9, %v3659_v62  ;;  %v13217_v62 = vld [vmem:[#allocation2 + $0x134] sm:$0xf]  ;;  %v7952_v35 = vshll.u32 %v7836_v13, 16 }
 0x274   : > { %v3669_v18 = vrot.slane %v13217_v62, 5  ;;  %v7925_v37 = vsel %vm13521_vm12, %v7920_v51, %v14927_v38  ;;  %v14989_v50 = vrot.slane %v7939_v20, 4  ;;  %v3668_v59 = vrot.slane %v3666_v53, 4 }
 0x275   : > { %v7930_v36 = vrot.slane %v7929_v48, 4  ;;  %v7949_v11 = vor.u32 %v7948_v7, %v14969_v1  ;;  %v7976_v17 = vshll.u32 %v7839_v29, 16  ;;  %v14994_v33 = vrot.slane %v7966_v2, 5  ;;  %v7844_v48 = vld [vmem:[#allocation2 + $0x58] sm:$0xf] }
 0x276   : > { %11918 = vmatmul.mubr.msk.bf16.gmra.mrb[40].mxu1 %vm2475_vm11, %v10789_v24  ;;  %v3662_v24 = vrot.slane %v13215_v16, 5  ;;  %v7972_v38 = vrot.slane %v7970_v45, 4  ;;  %v7980_v60 = vshrl.u32 %v7839_v29, 16  ;;  %v14996_v6 = vrot.slane %v7952_v35, 5  ;;  %v7845_v2 = vld [vmem:[#allocation2 + $0x5c] sm:$0xf] }
 0x277   : > { %11921 = vmatprep.mubr.msk.bf16.mxu1 %vm2475_vm11, %v10790_v42  ;;  %v3433_v42 = vld [vmem:[#allocation2 + $0x12c] sm:$0xe]  ;;  %v7990_v9 = vshrl.u32 %v7840_v54, 16  ;;  %v15002_v12 = vsel %vm14251_vm15, %v3668_v59, %v3669_v18  ;;  %v8014_v22 = vshrl.u32 %v7843_v43, 16  ;;  %v3671_v25 = vrot.slane %v3669_v18, 4 }
 0x278   : > { %v14966_v8 = vsel %vm14251_vm15, %v3661_v0, %v3662_v24  ;;  %v15009_v52 = vrot.slane %v7986_v5, 5  ;;  %v8020_v63 = vshll.u32 %v7844_v48, 16  ;;  %v8024_v7 = vshrl.u32 %v7844_v48, 16  ;;  %v7847_v18 = vld [vmem:[#allocation2 + $0x64] sm:$0xf] }
 0x279   : > { %12194 = vmatmul.mubr.msk.bf16.gmra.mrb[44].mxu0 %vm2475_vm11, %v13039_v61  ;;  %v10794_v61 = vcombine.low %v3641_v15, %v3644_v56  ;;  %v10797_v31 = vcombine.low %v14962_v3, %v14966_v8  ;;  %v7842_v15 = vld [vmem:[#allocation2 + $0x50] sm:$0xf]  ;;  %v7992_v51 = vrot.slane %v7990_v9, 4  ;;  %v7996_v29 = vshll.u32 %v7841_v40, 16  ;;  %v7849_v8 = vld [vmem:[#allocation2 + $0x6c] sm:$0xf] }
 0x27a   : > { %12197 = vmatprep.mubr.msk.bf16.mxu0 %vm2475_vm11, %v13040_v14  ;;  %v7837_v14 = vld [vmem:[#allocation2 + $0x3c] sm:$0xf]  ;;  %v8001_v0 = vshrl.u32 %v7842_v15, 16  ;;  %v8004_v16 = vshll.u32 %v7842_v15, 16  ;;  %v8026_v59 = vrot.slane %v8024_v7, 4  ;;  %v8030_v15 = vshll.u32 %v7845_v2, 16 }
 0x27b   : > { %v7957_v27 = vshrl.u32 %v7837_v14, 16  ;;  %v7960_v28 = vshll.u32 %v7837_v14, 16  ;;  %v7973_v14 = vor.u32 %v7972_v38, %v14994_v33  ;;  %v7993_v35 = vor.u32 %v7992_v51, %v15009_v52 }
 0x27c   : > { %v8006_v20 = vrot.slane %v8004_v16, 5  ;;  %v8045_v38 = vshrl.u32 %v7847_v18, 16 }
 0x27d   : > { %v7962_v56 = vrot.slane %v7960_v28, 5  ;;  %v7974_v62 = vrot.slane %v7973_v14, 4 }
 0x27e   : > { %11922 = vmatmul.mubr.msk.bf16.gmra.mrb[44].mxu1 %vm2475_vm11, %v10791_v10  ;;  %v10763_v10 = vrot.slane %v3433_v42, 9  ;;  %v13045_v42 = vld [vmem:[#allocation2 + $0x148] sm:$0xff]  }
 0x27f   : > { %11925 = vmatprep.mubr.msk.bf16.mxu1 %vm2475_vm11, %v10792_v41  ;;  %v10795_v41 = vcombine.low %v14946_v39, %v14950_v30  ;;  %v15006_v39 = vrot.slane %v7976_v17, 5  ;;  %v13046_v30 = vld [vmem:[#allocation2 + $0x154] sm:$0xff]  }
 0x280   : > { %v14980_v49 = vsel %vm14251_vm15, %v10763_v10, %v3666_v53  ;;  %v7982_v10 = vrot.slane %v7980_v60, 4  ;;  %v8048_v60 = vshll.u32 %v7847_v18, 16 }
 0x281   : > { %12198 = vmatmul.mubr.msk.bf16.gmra.mrb[48].mxu0 %vm2475_vm11, %v13041_v57  ;;  %v7935_v57 = vsel %vm13521_vm12, %v7930_v36, %v14940_v4  ;;  %v8010_v4 = vshll.u32 %v7843_v43, 16  ;;  %v8003_v36 = vrot.slane %v8001_v0, 4  ;;  %v10798_v53 = vcombine.low %v14980_v49, %v15002_v12 }
 0x282   : > { %12201 = vmatprep.mubr.msk.bf16.mxu0 %vm2475_vm11, %v13042_v47  ;;  %v7959_v47 = vrot.slane %v7957_v27, 4  ;;  %v14998_v24 = vcombine.low %v7925_v37, %v7935_v57  ;;  %v7945_v27 = vsel %vm13521_vm12, %v14989_v50, %v14969_v1  ;;  %v7983_v1 = vor.u32 %v7982_v10, %v15006_v39  ;;  %v7848_v57 = vld [vmem:[#allocation2 + $0x68] sm:$0xf]  ;;  %v7850_v10 = vld [vmem:[#allocation2 + $0x70] sm:$0xf] }
 0x283   : > { %v15015_v13 = vrot.slane %v8010_v4, 5  ;;  %v8007_v54 = vor.u32 %v8006_v20, %v8003_v36  ;;  %v8022_v37 = vrot.slane %v8020_v63, 5  ;;  %v7998_v43 = vrot.slane %v7996_v29, 5  ;;  %v7853_v63 = vld [vmem:[#allocation2 + $0x7c] sm:$0xf] }
 0x284   : > { %v7963_v23 = vor.u32 %v7962_v56, %v7959_v47  ;;  %v565_v47 = vld [vmem:[#allocation2 + $0x164] sm:$0x1]  ;;  %v13047_v56 = vld [vmem:[#allocation2 + $0x15c] sm:$0xff]   ;;  %v8054_v9 = vshll.u32 %v7848_v57, 16  ;;  %v8058_v0 = vshrl.u32 %v7848_v57, 16  ;;  %v7984_v16 = vrot.slane %v7983_v1, 4 }
 0x285   : > { %v7994_v12 = vrot.slane %v7993_v35, 4  ;;  %v8008_v48 = vrot.slane %v8007_v54, 4  ;;  %v8078_v29 = vshrl.u32 %v7850_v10, 16  ;;  %v8102_v1 = vshrl.u32 %v7853_v63, 16  ;;  %v13082_v54 = vld [vmem:[%s16101_s4 + $0x88] sm:$0xff]  }
 0x286   : > { %11926 = vmatmul.mubr.msk.bf16.gmra.mrb[48].mxu1 %vm2475_vm11, %v10793_v21  ;;  %v15004_v21 = vrot.slane %v7949_v11, 4  ;;  %v7964_v49 = vrot.slane %v7963_v23, 4  ;;  %v8034_v11 = vshrl.u32 %v7845_v2, 16  ;;  %v15056_v14 = vrot.slane %v8054_v9, 5 }
 0x287   : > { %11929 = vmatprep.mubr.msk.bf16.mxu1 %vm2475_vm11, %v10794_v61  ;;  %v3672_v61 = vrot.slane %v13218_v26, 5  ;;  %v8060_v40 = vrot.slane %v8058_v0, 4  ;;  %v7999_v51 = vsel %vm13521_vm12, %v7994_v12, %v7998_v43  ;;  %v8013_v36 = vsel %vm13521_vm12, %v8008_v48, %v15015_v13  ;;  %v7858_v12 = vld [vmem:[#allocation2 + $0x90] sm:$0xf]  ;;  %v13052_v48 = vld [vmem:[#allocation2 + $0x1c] sm:$0xff]  }
 0x288   : > { %v7969_v5 = vsel %vm13521_vm12, %v7964_v49, %v14994_v33  ;;  %v8036_v26 = vrot.slane %v8034_v11, 4  ;;  %v7855_v11 = vld [vmem:[#allocation2 + $0x84] sm:$0xf]  ;;  %v8104_v4 = vrot.slane %v8102_v1, 4 }
 0x289   : > { %12202 = vmatmul.mubr.msk.bf16.gmra.mrb[52].mxu0 %vm2475_vm11, %v13043_v19  ;;  %v8016_v19 = vrot.slane %v8014_v22, 4  ;;  %v3674_v28 = vrot.slane %v3672_v61, 4  ;;  %v15029_v45 = vsel %vm14251_vm15, %v3671_v25, %v3672_v61  ;;  %v566_v22 = vsel %vm13384_vm4, 0, %v565_v47 }
 0x28a   : > { %12205 = vmatprep.mubr.msk.bf16.mxu0 %vm2475_vm11, %v13044_v34  ;;  %v13219_v34 = vld [vmem:[#allocation2 + $0x13c] sm:$0x1]  ;;  %v15049_v25 = vrot.slane %v8030_v15, 5  ;;  %567 = vst [vmem:[#allocation2 + $0x164] sm:$0x1] %v566_v22  ;;  %v706_v61 = vrot.slane %v14706_v44, 4  ;;  %v7989_v44 = vsel %vm13521_vm12, %v7984_v16, %v15009_v52  ;;  %v8061_v2 = vor.u32 %v8060_v40, %v15056_v14 }
 0x28b   : > { %v8017_v50 = vor.u32 %v8016_v19, %v15015_v13  ;;  %v11137_v49 = vcombine.low %v7989_v44, %v7999_v51  ;;  %v7854_v15 = vld [vmem:[#allocation2 + $0x80] sm:$0xf] }
 0x28c   : > { %v8108_v22 = vshll.u32 %v7854_v15, 16 }
 0x28d   : > { %v8018_v33 = vrot.slane %v8017_v50, 4 }
 0x28e   : > { %11930 = vmatmul.mubr.msk.bf16.gmra.mrb[52].mxu1 %vm2475_vm11, %v10795_v41  ;;  %v3675_v41 = vrot.slane %v13219_v34, 5  ;;  %v8068_v34 = vshrl.u32 %v7849_v8, 16 }
 0x28f   : > { %11933 = vmatprep.mubr.msk.bf16.mxu1 %vm2475_vm11, %v10796_v55  ;;  %v7955_v55 = vsel %vm13521_vm12, %v15004_v21, %v14996_v6  ;;  %v7979_v6 = vsel %vm13521_vm12, %v7974_v62, %v15006_v39  ;;  %v8027_v21 = vor.u32 %v8026_v59, %v8022_v37  ;;  %v8050_v39 = vrot.slane %v8048_v60, 5  ;;  %v7851_v59 = vld [vmem:[#allocation2 + $0x74] sm:$0x1] }
 0x290   : > { %v3676_v17 = vsel %vm14251_vm15, %v3674_v28, %v3675_v41  ;;  %v11135_v3 = vcombine.low %v7945_v27, %v7955_v55  ;;  %v11136_v23 = vcombine.low %v7969_v5, %v7979_v6  ;;  %v8023_v19 = vsel %vm13521_vm12, %v8018_v33, %v8022_v37  ;;  %v7857_v5 = vld [vmem:[#allocation2 + $0x8c] sm:$0xf] }
 0x291   : > { %12206 = vmatmul.mubr.msk.bf16.gmra.mrb[56].mxu0 %vm2475_vm11, %v13045_v42  ;;  %v7846_v42 = vld [vmem:[#allocation2 + $0x60] sm:$0x1]  ;;  %v15068_v7 = vrot.slane %v8027_v21, 4  ;;  %v8037_v27 = vor.u32 %v8036_v26, %v15049_v25  ;;  %v8064_v28 = vshll.u32 %v7849_v8, 16  ;;  %v8074_v41 = vshll.u32 %v7850_v10, 16  ;;  %v13053_v21 = vld [vmem:[#allocation2 + $0x28] sm:$0xff]  }
 0x292   : > { %12209 = vmatprep.mubr.msk.bf16.mxu0 %vm2475_vm11, %v13046_v30  ;;  %v10799_v30 = vcombine.low %v15029_v45, %v3676_v17  ;;  %v8040_v20 = vshll.u32 %v7846_v42, 16  ;;  %v8098_v45 = vshll.u32 %v7853_v63, 16  ;;  %v15073_v62 = vcombine.low %v8013_v36, %v8023_v19  ;;  %v719_v35 = vld [vmem:[#allocation2 + $0x164] sm:$0x1] }
 0x293   : > { %v8033_v37 = vsel %vm13521_vm12, %v15068_v7, %v15049_v25  ;;  %v8038_v57 = vrot.slane %v8037_v27, 4  ;;  %v15085_v50 = vrot.slane %v8064_v28, 5  ;;  %v8070_v43 = vrot.slane %v8068_v34, 4 }
 0x294   : > { %v15075_v18 = vrot.slane %v8040_v20, 5  ;;  %v8080_v60 = vrot.slane %v8078_v29, 4  ;;  %v8062_v6 = vrot.slane %v8061_v2, 4  ;;  %v15093_v16 = vrot.slane %v8098_v45, 5 }
 0x295   : > { %v8112_v33 = vshrl.u32 %v7854_v15, 16  ;;  %v8118_v42 = vshll.u32 %v7855_v11, 16  ;;  %v8122_v26 = vshrl.u32 %v7855_v11, 16  ;;  %v8071_v8 = vor.u32 %v8070_v43, %v15085_v50  ;;  %v7863_v11 = vld [vmem:[#allocation2 + $0xa4] sm:$0xf] }
 0x296   : > { %11934 = vmatmul.mubr.msk.bf16.gmra.mrb[56].mxu1 %vm2475_vm11, %v10797_v31  ;;  %v8047_v31 = vrot.slane %v8045_v38, 4  ;;  %v15090_v38 = vrot.slane %v8074_v41, 5  ;;  %v8043_v25 = vsel %vm13521_vm12, %v8038_v57, %v15075_v18  ;;  %v8067_v40 = vsel %vm13521_vm12, %v8062_v6, %v15085_v50  ;;  %v13055_v57 = vld [vmem:[#allocation2 + $0x3c] sm:$0xff]  }
 0x297   : > { %11937 = vmatprep.mubr.msk.bf16.mxu1 %vm2475_vm11, %v10798_v53  ;;  %v13051_v53 = vld [vmem:[#allocation2 + $0x14] sm:$0xff]   ;;  %v8105_v51 = vor.u32 %v8104_v4, %v15093_v16  ;;  %v15109_v36 = vrot.slane %v8108_v22, 5  ;;  %v8114_v20 = vrot.slane %v8112_v33, 4  ;;  %v8124_v63 = vrot.slane %v8122_v26, 4  ;;  %v13056_v26 = vld [vmem:[#allocation2 + $0x44] sm:$0xff]  }
 0x298   : > { %v8051_v52 = vor.u32 %v8050_v39, %v8047_v31  ;;  %v8084_v31 = vshll.u32 %v7851_v59, 16  ;;  %v7859_v39 = vld [vmem:[#allocation2 + $0x94] sm:$0xf]  ;;  %v8081_v10 = vor.u32 %v8080_v60, %v15090_v38  ;;  %v11139_v34 = vcombine.low %v8033_v37, %v8043_v25 }
 0x299   : > { %12210 = vmatmul.mubr.msk.bf16.gmra.mrb[60].mxu0 %vm2475_vm11, %v13047_v56  ;;  %v720_v56 = vsel %vm13376_vm2, %v706_v61, %v719_v35  ;;  %v8133_v61 = vshrl.u32 %v7857_v5, 16  ;;  %v8152_v7 = vshll.u32 %v7859_v39, 16  ;;  %v8072_v41 = vrot.slane %v8071_v8, 4  ;;  %vm15878_vm2 = vmpackc.low %vm10051_vm1, %vm10051_vm1 }
 0x29a   : > { %12217 = vmatprep.mubr.msk.bf16.mxu0 %vm2475_vm11, %v14998_v24  ;;  %v7852_v24 = vld [vmem:[#allocation2 + $0x78] sm:$0xf]  ;;  %v8052_v17 = vrot.slane %v8051_v52, 4  ;;  %721 = vst [vmem:[#allocation2 + $0x164] sm:$0x1] %v720_v56  ;;  %v8156_v52 = vshrl.u32 %v7859_v39, 16 }
 0x29b   : > { %v8089_v55 = vshrl.u32 %v7852_v24, 16  ;;  %v8092_v13 = vshll.u32 %v7852_v24, 16  ;;  %v15111_v24 = vrot.slane %v8118_v42, 5  ;;  %v8082_v29 = vrot.slane %v8081_v10, 4  ;;  %v7861_v42 = vld [vmem:[#allocation2 + $0x9c] sm:$0x1] }
 0x29c   : > { %v8086_v2 = vrot.slane %v8084_v31, 5  ;;  %v8106_v1 = vrot.slane %v8105_v51, 4  ;;  %v8154_v15 = vrot.slane %v8152_v7, 5  ;;  %v8158_v37 = vrot.slane %v8156_v52, 4  ;;  %v7864_v31 = vld [vmem:[#allocation2 + $0xa8] sm:$0xf] }
 0x29d   : > { %v8091_v9 = vrot.slane %v8089_v55, 4  ;;  %v8094_v0 = vrot.slane %v8092_v13, 5  ;;  %v7860_v55 = vld [vmem:[#allocation2 + $0x98] sm:$0xf]  ;;  %v13054_v13 = vld [vmem:[#allocation2 + $0x30] sm:$0xff]   ;;  %v8125_v50 = vor.u32 %v8124_v63, %v15111_v24  ;;  %v8172_v51 = vshll.u32 %v7861_v42, 16 }
 0x29e   : > { %11938 = vmatmul.mubr.msk.bf16.gmra.mrb[60].mxu1 %vm2475_vm11, %v10799_v30  ;;  %v8142_v30 = vshll.u32 %v7858_v12, 16  ;;  %v8162_v47 = vshll.u32 %v7860_v55, 16  ;;  %v8166_v56 = vshrl.u32 %v7860_v55, 16  ;;  %v8087_v43 = vsel %vm13521_vm12, %v8082_v29, %v8086_v2 }
 0x29f   : > { %11945 = vmatprep.mubr.msk.bf16.mxu1 %vm2475_vm11, %v13051_v53  ;;  %v8095_v44 = vor.u32 %v8094_v0, %v8091_v9  ;;  %v8135_v53 = vrot.slane %v8133_v61, 4  ;;  %v8186_v0 = vshll.u32 %v7863_v11, 16  ;;  %v8126_v4 = vrot.slane %v8125_v50, 4  ;;  %v7870_v50 = vld [vmem:[#allocation2 + $0xc0] sm:$0xf] }
 0x2a0   : > { %v15115_v27 = vrot.slane %v8142_v30, 5  ;;  %v15136_v25 = vrot.slane %v8162_v47, 5 }
 0x2a1   : > { %12218 = vmatmul.mubr.msk.bf16.vlgmr.msra.gmra.mrb[0].mxu0 %vm2475_vm11, %v11135_v3  ;;  %v8136_v3 = vshll.u32 %v7857_v5, 16  ;;  %v8096_v18 = vrot.slane %v8095_v44, 4  ;;  %v15139_v39 = vrot.slane %v8186_v0, 5 }
 0x2a2   : > { %12221 = vmatprep.mubr.msk.bf16.mxu0 %vm2475_vm11, %v11136_v23  ;;  %12282 = vmatpush3.bf16.msra.mxu0 %v14860_v58  ;;  %v8146_v58 = vshrl.u32 %v7858_v12, 16  ;;  %v8057_v23 = vsel %vm13521_vm12, %v8052_v17, %v15056_v14  ;;  %v7856_v14 = vld [vmem:[#allocation2 + $0x88] sm:$0x1]  ;;  %v8077_v17 = vsel %vm13521_vm12, %v8072_v41, %v15090_v38  ;;  %v8190_v12 = vshrl.u32 %v7863_v11, 16 }
 0x2a3   : > { %12283 = vmatprep.subr.bf16.mxu0 %v13082_v54  ;;  %v8138_v19 = vrot.slane %v8136_v3, 5  ;;  %v11140_v45 = vcombine.low %v8057_v23, %v8067_v40  ;;  %v8128_v35 = vshll.u32 %v7856_v14, 16  ;;  %v8101_v6 = vsel %vm13521_vm12, %v8096_v18, %v15093_v16  ;;  %v13057_v40 = vld [vmem:[#allocation2 + $0x50] sm:$0xff]  }
 0x2a4   : > { %v8148_v28 = vrot.slane %v8146_v58, 4  ;;  %v8111_v38 = vsel %vm13521_vm12, %v8106_v1, %v15109_v36  ;;  %v8168_v16 = vrot.slane %v8166_v56, 4  ;;  %v11141_v8 = vcombine.low %v8077_v17, %v8087_v43  ;;  %v7865_v58 = vld [vmem:[#allocation2 + $0xac] sm:$0xf] }
 0x2a5   : > { %v8139_v59 = vor.u32 %v8138_v19, %v8135_v53  ;;  %v8130_v9 = vrot.slane %v8128_v35, 5  ;;  %v8192_v30 = vrot.slane %v8190_v12, 4  ;;  %v11142_v23 = vcombine.low %v8101_v6, %v8111_v38  ;;  %v7868_v19 = vld [vmem:[#allocation2 + $0xb8] sm:$0xf] }
 0x2a6   : > { %12284 = vmatpush3.bf16.msra.mxu0 %v13082_v54  ;;  %11946 = vmatmul.mubr.msk.bf16.vlgmr.msra.gmra.mrb[0].mxu1 %vm2475_vm11, %v13052_v48  ;;  %v7862_v54 = vld [vmem:[#allocation2 + $0xa0] sm:$0xf]  ;;  %v8169_v53 = vor.u32 %v8168_v16, %v15136_v25  ;;  %v8206_v52 = vshll.u32 %v7865_v58, 16  ;;  %v8210_v41 = vshrl.u32 %v7865_v58, 16  ;;  %v8230_v55 = vshll.u32 %v7868_v19, 16 }
 0x2a7   : > { %11949 = vmatprep.mubr.msk.bf16.mxu1 %vm2475_vm11, %v13053_v21  ;;  %v8177_v60 = vshrl.u32 %v7862_v54, 16  ;;  %v8180_v5 = vshll.u32 %v7862_v54, 16  ;;  %v8140_v22 = vrot.slane %v8139_v59, 4  ;;  %v8159_v21 = vor.u32 %v8158_v37, %v8154_v15  ;;  %v7872_v37 = vld [vmem:[#allocation2 + $0xc8] sm:$0xf] }
 0x2a8   : > { %v8131_v44 = vsel %vm13521_vm12, %v8126_v4, %v8130_v9  ;;  %v8170_v35 = vrot.slane %v8169_v53, 4  ;;  %v8174_v54 = vrot.slane %v8172_v51, 5  ;;  %v8212_v56 = vrot.slane %v8210_v41, 4 }
 0x2a9   : > { %12222 = vmatmul.mubr.msk.bf16.gmra.mrb[4].mxu0 %vm2475_vm11, %v11137_v49  ;;  %v8115_v49 = vor.u32 %v8114_v20, %v15109_v36  ;;  %v8179_v61 = vrot.slane %v8177_v60, 4  ;;  %v8182_v3 = vrot.slane %v8180_v5, 5  ;;  %v7867_v36 = vld [vmem:[#allocation2 + $0xb4] sm:$0xf]  ;;  %v8145_v20 = vsel %vm13521_vm12, %v8140_v22, %v15115_v27  ;;  %v7873_v60 = vld [vmem:[#allocation2 + $0xcc] sm:$0xf] }
 0x2aa   : > { %12225 = vmatprep.mubr.msk.bf16.mxu0 %vm2475_vm11, %v15073_v62  ;;  %v8149_v62 = vor.u32 %v8148_v28, %v15115_v27  ;;  %v15151_v63 = vrot.slane %v8159_v21, 4  ;;  %v8196_v28 = vshll.u32 %v7864_v31, 16  ;;  %v8221_v29 = vshrl.u32 %v7867_v36, 16  ;;  %v13059_v5 = vld [vmem:[#allocation2 + $0x64] sm:$0xff]  }
 0x2ab   : > { %v8116_v48 = vrot.slane %v8115_v49, 4  ;;  %v8183_v7 = vor.u32 %v8182_v3, %v8179_v61  ;;  %v8224_v2 = vshll.u32 %v7867_v36, 16  ;;  %v7869_v49 = vld [vmem:[#allocation2 + $0xbc] sm:$0xf]  ;;  %v15165_v6 = vrot.slane %v8230_v55, 5  ;;  %v13060_v36 = vld [vmem:[#allocation2 + $0x6c] sm:$0xff]  }
 0x2ac   : > { %v8150_v33 = vrot.slane %v8149_v62, 4  ;;  %v8165_v1 = vsel %vm13521_vm12, %v15151_v63, %v15136_v25  ;;  %v15163_v62 = vrot.slane %v8206_v52, 5  ;;  %v8223_v17 = vrot.slane %v8221_v29, 4  ;;  %v15188_v55 = vld [vmem:[#allocation2 + $0xe0] sm:$0xf] }
 0x2ad   : > { %v8121_v10 = vsel %vm13521_vm12, %v8116_v48, %v15111_v24  ;;  %v8200_v24 = vshrl.u32 %v7864_v31, 16  ;;  %v8184_v59 = vrot.slane %v8183_v7, 4  ;;  %v8226_v43 = vrot.slane %v8224_v2, 5 }
 0x2ae   : > { %11950 = vmatmul.mubr.msk.bf16.gmra.mrb[4].mxu1 %vm2475_vm11, %v13054_v13  ;;  %v8155_v14 = vsel %vm13521_vm12, %v8150_v33, %v8154_v15  ;;  %v11143_v27 = vcombine.low %v8121_v10, %v8131_v44  ;;  %v8234_v13 = vshrl.u32 %v7868_v19, 16  ;;  %v8198_v15 = vrot.slane %v8196_v28, 5 }
 0x2af   : > { %11953 = vmatprep.mubr.msk.bf16.mxu1 %vm2475_vm11, %v13055_v57  ;;  %v11144_v18 = vcombine.low %v8145_v20, %v8155_v14  ;;  %v7866_v57 = vld [vmem:[#allocation2 + $0xb0] sm:$0x1]  ;;  %v8202_v11 = vrot.slane %v8200_v24, 4  ;;  %v8240_v0 = vshll.u32 %v7869_v49, 16  ;;  %v8244_v12 = vshrl.u32 %v7869_v49, 16  ;;  %v13061_v20 = vld [vmem:[#allocation2 + $0x78] sm:$0xff]  }
 0x2b0   : > { %v8236_v9 = vrot.slane %v8234_v13, 4  ;;  %v8250_v38 = vshll.u32 %v7870_v50, 16  ;;  %v8254_v48 = vshrl.u32 %v7870_v50, 16  ;;  %v8265_v4 = vshrl.u32 %v7872_v37, 16  ;;  %v15186_v24 = vld [vmem:[#allocation2 + $0xd4] sm:$0xf] }
 0x2b1   : > { %12226 = vmatmul.mubr.msk.bf16.gmra.mrb[8].mxu0 %vm2475_vm11, %v11139_v34  ;;  %v8193_v34 = vor.u32 %v8192_v30, %v15139_v39  ;;  %v8268_v22 = vshll.u32 %v7872_v37, 16  ;;  %v8175_v33 = vsel %vm13521_vm12, %v8170_v35, %v8174_v54  ;;  %v8216_v42 = vshll.u32 %v7866_v57, 16 }
 0x2b2   : > { %12229 = vmatprep.mubr.msk.bf16.mxu0 %vm2475_vm11, %v11140_v45  ;;  %v13058_v45 = vld [vmem:[#allocation2 + $0x58] sm:$0xff]   ;;  %v8274_v21 = vshll.u32 %v7873_v60, 16  ;;  %v8278_v25 = vshrl.u32 %v7873_v60, 16  ;;  %v8189_v16 = vsel %vm13521_vm12, %v8184_v59, %v15139_v39  ;;  %v8203_v61 = vor.u32 %v8202_v11, %v8198_v15 }
 0x2b3   : > { %v8194_v47 = vrot.slane %v8193_v34, 4  ;;  %v8213_v3 = vor.u32 %v8212_v56, %v15163_v62  ;;  %v8227_v31 = vor.u32 %v8226_v43, %v8223_v17  ;;  %v8237_v30 = vor.u32 %v8236_v9, %v15165_v6 }
 0x2b4   : > { %v15178_v58 = vrot.slane %v8240_v0, 5  ;;  %v15181_v10 = vrot.slane %v8250_v38, 5  ;;  %v8256_v39 = vrot.slane %v8254_v48, 4  ;;  %v8267_v44 = vrot.slane %v8265_v4, 4  ;;  %v15213_v0 = vld [vmem:[#allocation2 + $0xe4] sm:$0xf] }
 0x2b5   : > { %v8270_v51 = vrot.slane %v8268_v22, 5  ;;  %v15184_v14 = vrot.slane %v8274_v21, 5  ;;  %v8280_v63 = vrot.slane %v8278_v25, 4  ;;  %v8204_v19 = vrot.slane %v8203_v61, 4  ;;  %v13062_v22 = vld [vmem:[#allocation2 + $0x80] sm:$0xff]  }
 0x2b6   : > { %11954 = vmatmul.mubr.msk.bf16.gmra.mrb[8].mxu1 %vm2475_vm11, %v13056_v26  ;;  %v8199_v26 = vsel %vm13521_vm12, %v8194_v47, %v8198_v15  ;;  %v8214_v7 = vrot.slane %v8213_v3, 4  ;;  %v8218_v28 = vrot.slane %v8216_v42, 5  ;;  %v11145_v34 = vcombine.low %v8165_v1, %v8175_v33  ;;  %v15220_v33 = vld [vmem:[#allocation2 + $0xd8] sm:$0x1] }
 0x2b7   : > { %11957 = vmatprep.mubr.msk.bf16.mxu1 %vm2475_vm11, %v13057_v40  ;;  %v7871_v40 = vld [vmem:[#allocation2 + $0xc4] sm:$0x1]  ;;  %v11146_v41 = vcombine.low %v8189_v16, %v8199_v26  ;;  %v8228_v29 = vrot.slane %v8227_v31, 4  ;;  %v8238_v13 = vrot.slane %v8237_v30, 4  ;;  %v8271_v35 = vor.u32 %v8270_v51, %v8267_v44  ;;  %v13063_v16 = vld [vmem:[#allocation2 + $0x8c] sm:$0xff]  }
 0x2b8   : > { %v8260_v2 = vshll.u32 %v7871_v40, 16  ;;  %v8281_v54 = vor.u32 %v8280_v63, %v15184_v14  ;;  %v8294_v49 = vshll.u32 %v15186_v24, 16  ;;  %v8298_v1 = vshrl.u32 %v15186_v24, 16  ;;  %v7882_v51 = vld [vmem:[#allocation2 + $0xf0] sm:$0xf] }
 0x2b9   : > { %12230 = vmatmul.mubr.msk.bf16.gmra.mrb[12].mxu0 %vm2475_vm11, %v11141_v8  ;;  %v7874_v8 = vld [vmem:[#allocation2 + $0xd0] sm:$0xf]  ;;  %v8318_v11 = vshll.u32 %v15188_v55, 16  ;;  %v8209_v37 = vsel %vm13521_vm12, %v8204_v19, %v15163_v62  ;;  %v8219_v47 = vsel %vm13521_vm12, %v8214_v7, %v8218_v28  ;;  %v8322_v17 = vshrl.u32 %v15188_v55, 16  ;;  %v15215_v62 = vld [vmem:[#allocation2 + $0xe8] sm:$0xf] }
 0x2ba   : > { %12233 = vmatprep.mubr.msk.bf16.mxu0 %vm2475_vm11, %v11142_v23  ;;  %v8246_v23 = vrot.slane %v8244_v12, 4  ;;  %v8284_v53 = vshll.u32 %v7874_v8, 16  ;;  %v8288_v52 = vshrl.u32 %v7874_v8, 16  ;;  %v8262_v56 = vrot.slane %v8260_v2, 5 }
 0x2bb   : > { %v8233_v43 = vsel %vm13521_vm12, %v8228_v29, %v15165_v6  ;;  %v8243_v60 = vsel %vm13521_vm12, %v8238_v13, %v15178_v58  ;;  %v8272_v12 = vrot.slane %v8271_v35, 4  ;;  %v8282_v38 = vrot.slane %v8281_v54, 4  ;;  %v13064_v13 = vld [vmem:[#allocation2 + $0x94] sm:$0xff]  }
 0x2bc   : > { %v15193_v57 = vrot.slane %v8284_v53, 5  ;;  %v8290_v50 = vrot.slane %v8288_v52, 4  ;;  %v15218_v48 = vrot.slane %v8294_v49, 5  ;;  %v8300_v4 = vrot.slane %v8298_v1, 4  ;;  %v15254_v52 = vld [vmem:[#allocation2 + $0xec] sm:$0x1] }
 0x2bd   : > { %v15223_v25 = vrot.slane %v8318_v11, 5  ;;  %v8324_v26 = vrot.slane %v8322_v17, 4  ;;  %v8328_v61 = vshll.u32 %v15213_v0, 16  ;;  %v8332_v3 = vshrl.u32 %v15213_v0, 16  ;;  %v15263_v49 = vld [vmem:[#allocation2 + $0xf8] sm:$0xf] }
 0x2be   : > { %11958 = vmatmul.mubr.msk.bf16.gmra.mrb[12].mxu1 %vm2475_vm11, %v13058_v45  ;;  %v8247_v45 = vor.u32 %v8246_v23, %v15178_v58  ;;  %v8291_v6 = vor.u32 %v8290_v50, %v15193_v57  ;;  %v8338_v8 = vshll.u32 %v15215_v62, 16  ;;  %v11147_v31 = vcombine.low %v8209_v37, %v8219_v47  ;;  %v15265_v1 = vld [vmem:[#allocation2 + $0xfc] sm:$0xf]  ;;  %v13066_v50 = vld [vmem:[#allocation2 + $0xa0] sm:$0xff]  }
 0x2bf   : > { %11961 = vmatprep.mubr.msk.bf16.mxu1 %vm2475_vm11, %v13059_v5  ;;  %v11148_v30 = vcombine.low %v8233_v43, %v8243_v60  ;;  %v8342_v58 = vshrl.u32 %v15215_v62, 16  ;;  %v8304_v44 = vshll.u32 %v15220_v33, 16  ;;  %v15249_v19 = vrot.slane %v8328_v61, 5  ;;  %v7887_v47 = vld [vmem:[#allocation2 + $0x104] sm:$0xf] }
 0x2c0   : > { %v8248_v5 = vrot.slane %v8247_v45, 4  ;;  %v15244_v63 = vrot.slane %v8291_v6, 4  ;;  %v8334_v7 = vrot.slane %v8332_v3, 4  ;;  %v15251_v28 = vrot.slane %v8338_v8, 5 }
 0x2c1   : > { %12234 = vmatmul.mubr.msk.bf16.gmra.mrb[16].mxu0 %vm2475_vm11, %v11143_v27  ;;  %v7877_v27 = vld [vmem:[#allocation2 + $0xdc] sm:$0xf]  ;;  %v8356_v29 = vshll.u32 %v7882_v51, 16  ;;  %v8348_v37 = vshll.u32 %v15254_v52, 16  ;;  %v8397_v6 = vshrl.u32 %v7887_v47, 16 }
 0x2c2   : > { %12237 = vmatprep.mubr.msk.bf16.mxu0 %vm2475_vm11, %v11144_v18  ;;  %v8257_v18 = vor.u32 %v8256_v39, %v15181_v10  ;;  %v8309_v59 = vshrl.u32 %v7877_v27, 16  ;;  %v8312_v15 = vshll.u32 %v7877_v27, 16  ;;  %v8253_v23 = vsel %vm13521_vm12, %v8248_v5, %v15181_v10  ;;  %v15272_v5 = vld [vmem:[#allocation2 + $0x108] sm:$0xf] }
 0x2c3   : > { %v8277_v39 = vsel %vm13521_vm12, %v8272_v12, %v15184_v14  ;;  %v8301_v10 = vor.u32 %v8300_v4, %v15218_v48  ;;  %v8325_v14 = vor.u32 %v8324_v26, %v15223_v25  ;;  %v8297_v35 = vsel %vm13521_vm12, %v15244_v63, %v15218_v48  ;;  %v15285_v26 = vld [vmem:[#allocation2 + $0x10c] sm:$0xf] }
 0x2c4   : > { %v8258_v9 = vrot.slane %v8257_v18, 4  ;;  %v8311_v42 = vrot.slane %v8309_v59, 4  ;;  %v8314_v21 = vrot.slane %v8312_v15, 5  ;;  %v8335_v11 = vor.u32 %v8334_v7, %v15249_v19 }
 0x2c5   : > { %v8302_v54 = vrot.slane %v8301_v10, 4  ;;  %v8326_v15 = vrot.slane %v8325_v14, 4  ;;  %v8358_v43 = vrot.slane %v8356_v29, 5  ;;  %v8372_v12 = vshll.u32 %v15263_v49, 16  ;;  %v13068_v14 = vld [vmem:[#allocation2 + $0xb4] sm:$0xff]  }
 0x2c6   : > { %11962 = vmatmul.mubr.msk.bf16.gmra.mrb[16].mxu1 %vm2475_vm11, %v13060_v36  ;;  %v8263_v40 = vsel %vm13521_vm12, %v8258_v9, %v8262_v56  ;;  %v15238_v36 = vld [vmem:[#allocation2 + $0xf4] sm:$0xf]  ;;  %v8315_v53 = vor.u32 %v8314_v21, %v8311_v42  ;;  %v8382_v48 = vshll.u32 %v15265_v1, 16  ;;  %v8400_v42 = vshll.u32 %v7887_v47, 16 }
 0x2c7   : > { %11965 = vmatprep.mubr.msk.bf16.mxu1 %vm2475_vm11, %v13061_v20  ;;  %v8287_v20 = vsel %vm13521_vm12, %v8282_v38, %v15193_v57  ;;  %v8362_v2 = vshll.u32 %v15238_v36, 16  ;;  %v11149_v27 = vcombine.low %v8253_v23, %v8263_v40  ;;  %v8366_v45 = vshrl.u32 %v15238_v36, 16  ;;  %v13067_v23 = vld [vmem:[#allocation2 + $0xa8] sm:$0xff]  }
 0x2c8   : > { %v11150_v18 = vcombine.low %v8277_v39, %v8287_v20  ;;  %v8306_v57 = vrot.slane %v8304_v44, 5  ;;  %v8316_v59 = vrot.slane %v8315_v53, 4  ;;  %v8376_v38 = vshrl.u32 %v15263_v49, 16 }
 0x2c9   : > { %12238 = vmatmul.mubr.msk.bf16.gmra.mrb[20].mxu0 %vm2475_vm11, %v11145_v34  ;;  %v8344_v34 = vrot.slane %v8342_v58, 4  ;;  %v15270_v60 = vrot.slane %v8362_v2, 5  ;;  %v8368_v9 = vrot.slane %v8366_v45, 4  ;;  %v8406_v61 = vshll.u32 %v15272_v5, 16 }
 0x2ca   : > { %12241 = vmatprep.mubr.msk.bf16.mxu0 %vm2475_vm11, %v11146_v41  ;;  %v8353_v41 = vshrl.u32 %v7882_v51, 16  ;;  %v8307_v4 = vsel %vm13521_vm12, %v8302_v54, %v8306_v57  ;;  %v8321_v21 = vsel %vm13521_vm12, %v8316_v59, %v15223_v25  ;;  %v8410_v3 = vshrl.u32 %v15272_v5, 16  ;;  %v15297_v51 = vld [vmem:[#allocation2 + $0x100] sm:$0x1]  ;;  %v7892_v57 = vld [vmem:[#allocation2 + $0x118] sm:$0xf] }
 0x2cb   : > { %v8345_v56 = vor.u32 %v8344_v34, %v15251_v28  ;;  %v8331_v8 = vsel %vm13521_vm12, %v8326_v15, %v15249_v19  ;;  %v8369_v25 = vor.u32 %v8368_v9, %v15270_v60  ;;  %v8374_v40 = vrot.slane %v8372_v12, 5 }
 0x2cc   : > { %v8355_v17 = vrot.slane %v8353_v41, 4  ;;  %v8378_v39 = vrot.slane %v8376_v38, 4  ;;  %v15295_v44 = vrot.slane %v8382_v48, 5  ;;  %v8399_v63 = vrot.slane %v8397_v6, 4 }
 0x2cd   : > { %v8402_v10 = vrot.slane %v8400_v42, 5  ;;  %v8416_v53 = vshll.u32 %v15285_v26, 16  ;;  %v15300_v19 = vrot.slane %v8406_v61, 5  ;;  %v8412_v7 = vrot.slane %v8410_v3, 4  ;;  %v15330_v61 = vld [vmem:[#allocation2 + $0x120] sm:$0xf] }
 0x2ce   : > { %11966 = vmatmul.mubr.msk.bf16.gmra.mrb[20].mxu1 %vm2475_vm11, %v13062_v22  ;;  %v8386_v22 = vshrl.u32 %v15265_v1, 16  ;;  %v8359_v58 = vor.u32 %v8358_v43, %v8355_v17  ;;  %v8420_v34 = vshrl.u32 %v15285_v26, 16  ;;  %v11151_v41 = vcombine.low %v8297_v35, %v8307_v4  ;;  %v13070_v3 = vld [vmem:[#allocation2 + $0xc8] sm:$0xff]  }
 0x2cf   : > { %11969 = vmatprep.mubr.msk.bf16.mxu1 %vm2475_vm11, %v13063_v16  ;;  %v8350_v16 = vrot.slane %v8348_v37, 5  ;;  %v11152_v29 = vcombine.low %v8321_v21, %v8331_v8  ;;  %v8392_v54 = vshll.u32 %v15297_v51, 16  ;;  %v8370_v35 = vrot.slane %v8369_v25, 4 }
 0x2d0   : > { %v8388_v20 = vrot.slane %v8386_v22, 4  ;;  %v8360_v45 = vrot.slane %v8359_v58, 4  ;;  %v8403_v15 = vor.u32 %v8402_v10, %v8399_v63  ;;  %v8422_v37 = vrot.slane %v8420_v34, 4  ;;  %v13069_v22 = vld [vmem:[#allocation2 + $0xbc] sm:$0xff]  }
 0x2d1   : > { %12242 = vmatmul.mubr.msk.bf16.gmra.mrb[24].mxu0 %vm2475_vm11, %v11147_v31  ;;  %v8336_v31 = vrot.slane %v8335_v11, 4  ;;  %v15315_v11 = vrot.slane %v8416_v53, 5  ;;  %v8441_v17 = vshrl.u32 %v7892_v57, 16  ;;  %v8444_v43 = vshll.u32 %v7892_v57, 16  ;;  %v7897_v53 = vld [vmem:[#allocation2 + $0x12c] sm:$0xf] }
 0x2d2   : > { %12245 = vmatprep.mubr.msk.bf16.mxu0 %vm2475_vm11, %v11148_v30  ;;  %v8346_v30 = vrot.slane %v8345_v56, 4  ;;  %v8389_v59 = vor.u32 %v8388_v20, %v15295_v44  ;;  %v8365_v48 = vsel %vm13521_vm12, %v8360_v45, %v15270_v60  ;;  %v8375_v6 = vsel %vm13521_vm12, %v8370_v35, %v8374_v40  ;;  %v15337_v60 = vld [vmem:[#allocation2 + $0x114] sm:$0x1] }
 0x2d3   : > { %v8341_v2 = vsel %vm13521_vm12, %v8336_v31, %v15251_v28  ;;  %v8413_v28 = vor.u32 %v8412_v7, %v15300_v19  ;;  %v8394_v21 = vrot.slane %v8392_v54, 5  ;;  %v8423_v31 = vor.u32 %v8422_v37, %v15315_v11 }
 0x2d4   : > { %v8390_v42 = vrot.slane %v8389_v59, 4  ;;  %v8443_v25 = vrot.slane %v8441_v17, 4  ;;  %v11154_v63 = vcombine.low %v8365_v48, %v8375_v6  ;;  %v8464_v7 = vshrl.u32 %v15330_v61, 16  ;;  %v15367_v59 = vld [vmem:[#allocation2 + $0x128] sm:$0x1] }
 0x2d5   : > { %v8414_v8 = vrot.slane %v8413_v28, 4  ;;  %v8436_v45 = vshll.u32 %v15337_v60, 16  ;;  %v15363_v54 = vrot.slane %v8423_v31, 4  ;;  %v15375_v6 = vld [vmem:[#allocation2 + $0x138] sm:$0xf] }
 0x2d6   : > { %11970 = vmatmul.mubr.msk.bf16.gmra.mrb[24].mxu1 %vm2475_vm11, %v13064_v13  ;;  %v8351_v13 = vsel %vm13521_vm12, %v8346_v30, %v8350_v16  ;;  %v8404_v16 = vrot.slane %v8403_v15, 4  ;;  %v8488_v15 = vshll.u32 %v7897_v53, 16 }
 0x2d7   : > { %11973 = vmatprep.mubr.msk.bf16.mxu1 %vm2475_vm11, %v13066_v50  ;;  %v15311_v50 = vld [vmem:[#allocation2 + $0x11c] sm:$0xf]  ;;  %v11153_v38 = vcombine.low %v8341_v2, %v8351_v13  ;;  %v8395_v2 = vsel %vm13521_vm12, %v8390_v42, %v8394_v21 }
 0x2d8   : > { %v8450_v9 = vshll.u32 %v15311_v50, 16  ;;  %v8454_v12 = vshrl.u32 %v15311_v50, 16 }
 0x2d9   : > { %12246 = vmatmul.mubr.msk.bf16.gmra.mrb[28].mxu0 %vm2475_vm11, %v11149_v27  ;;  %v15306_v27 = vld [vmem:[#allocation2 + $0x110] sm:$0xf] }
 0x2da   : > { %12249 = vmatprep.mubr.msk.bf16.mxu0 %vm2475_vm11, %v11150_v18  ;;  %v8379_v18 = vor.u32 %v8378_v39, %v8374_v40  ;;  %v8426_v47 = vshll.u32 %v15306_v27, 16  ;;  %v8430_v56 = vshrl.u32 %v15306_v27, 16  ;;  %v8446_v39 = vrot.slane %v8444_v43, 5 }
 0x2db   : > { %v15339_v20 = vrot.slane %v8450_v9, 5  ;;  %v8456_v40 = vrot.slane %v8454_v12, 4  ;;  %v8466_v43 = vrot.slane %v8464_v7, 4  ;;  %v8518_v7 = vshrl.u32 %v15375_v6, 16 }
 0x2dc   : > { %v8380_v4 = vrot.slane %v8379_v18, 4  ;;  %v15333_v30 = vrot.slane %v8426_v47, 5  ;;  %v8432_v58 = vrot.slane %v8430_v56, 4  ;;  %v8419_v18 = vsel %vm13521_vm12, %v8414_v8, %v15315_v11  ;;  %v13071_v47 = vld [vmem:[#allocation2 + $0xd0] sm:$0xff]   ;;  %v13072_v56 = vld [vmem:[#allocation2 + $0xdc] sm:$0xff]  }
 0x2dd   : > { %v8447_v57 = vor.u32 %v8446_v39, %v8443_v25  ;;  %v8457_v35 = vor.u32 %v8456_v40, %v15339_v20  ;;  %v7902_v8 = vld [vmem:[#allocation2 + $0x140] sm:$0xf]  ;;  %v15384_v40 = vld [vmem:[#allocation2 + $0x144] sm:$0xf] }
 0x2de   : > { %11974 = vmatmul.mubr.msk.bf16.gmra.mrb[28].mxu1 %vm2475_vm11, %v13067_v23  ;;  %v15335_v23 = vld [vmem:[#allocation2 + $0x124] sm:$0xf]  ;;  %v8385_v10 = vsel %vm13521_vm12, %v8380_v4, %v15295_v44  ;;  %v8409_v44 = vsel %vm13521_vm12, %v8404_v16, %v15300_v19  ;;  %v8433_v13 = vor.u32 %v8432_v58, %v15333_v30  ;;  %v8485_v19 = vshrl.u32 %v7897_v53, 16 }
 0x2df   : > { %11977 = vmatprep.mubr.msk.bf16.mxu1 %vm2475_vm11, %v13068_v14  ;;  %v8460_v14 = vshll.u32 %v15330_v61, 16  ;;  %v8470_v34 = vshll.u32 %v15335_v23, 16  ;;  %v11155_v12 = vcombine.low %v8385_v10, %v8395_v2  ;;  %v8438_v4 = vrot.slane %v8436_v45, 5 }
 0x2e0   : > { %v8434_v48 = vrot.slane %v8433_v13, 4  ;;  %v8429_v42 = vsel %vm13521_vm12, %v15363_v54, %v15333_v30  ;;  %v8448_v21 = vrot.slane %v8447_v57, 4  ;;  %v8458_v16 = vrot.slane %v8457_v35, 4 }
 0x2e1   : > { %12250 = vmatmul.mubr.msk.bf16.gmra.mrb[32].mxu0 %vm2475_vm11, %v11151_v41  ;;  %v8474_v41 = vshrl.u32 %v15335_v23, 16  ;;  %v8462_v17 = vrot.slane %v8460_v14, 5  ;;  %v15371_v11 = vrot.slane %v8470_v34, 5  ;;  %v8487_v31 = vrot.slane %v8485_v19, 4 }
 0x2e2   : > { %12253 = vmatprep.mubr.msk.bf16.mxu0 %vm2475_vm11, %v11152_v29  ;;  %v15349_v29 = vld [vmem:[#allocation2 + $0x130] sm:$0xf]  ;;  %v8490_v58 = vrot.slane %v8488_v15, 5  ;;  %v8514_v14 = vshll.u32 %v15375_v6, 16  ;;  %v8529_v34 = vshrl.u32 %v7902_v8, 16  ;;  %v8439_v2 = vsel %vm13521_vm12, %v8434_v48, %v8438_v4 }
 0x2e3   : > { %v8494_v28 = vshll.u32 %v15349_v29, 16  ;;  %v8498_v37 = vshrl.u32 %v15349_v29, 16  ;;  %v8476_v9 = vrot.slane %v8474_v41, 4  ;;  %v8532_v41 = vshll.u32 %v7902_v8, 16  ;;  %v15409_v4 = vld [vmem:[#allocation2 + $0x148] sm:$0xf] }
 0x2e4   : > { %v8538_v13 = vshll.u32 %v15384_v40, 16  ;;  %v8542_v45 = vshrl.u32 %v15384_v40, 16  ;;  %v8463_v54 = vsel %vm13521_vm12, %v8458_v16, %v8462_v17  ;;  %v8491_v35 = vor.u32 %v8490_v58, %v8487_v31  ;;  %v15414_v58 = vld [vmem:[#allocation2 + $0x14c] sm:$0xf] }
 0x2e5   : > { %v15382_v25 = vrot.slane %v8494_v28, 5  ;;  %v8500_v39 = vrot.slane %v8498_v37, 4  ;;  %v8477_v10 = vor.u32 %v8476_v9, %v15371_v11  ;;  %v8520_v9 = vrot.slane %v8518_v7, 4  ;;  %v15425_v7 = vld [vmem:[#allocation2 + $0x158] sm:$0xf] }
 0x2e6   : > { %11978 = vmatmul.mubr.msk.bf16.gmra.mrb[32].mxu1 %vm2475_vm11, %v13069_v22  ;;  %v15373_v22 = vld [vmem:[#allocation2 + $0x134] sm:$0xf]  ;;  %v11157_v48 = vcombine.low %v8429_v42, %v8439_v2  ;;  %v8562_v2 = vshrl.u32 %v15414_v58, 16 }
 0x2e7   : > { %11981 = vmatprep.mubr.msk.bf16.mxu1 %vm2475_vm11, %v13070_v3  ;;  %v8480_v3 = vshll.u32 %v15367_v59, 16  ;;  %v8504_v53 = vshll.u32 %v15373_v22, 16  ;;  %v8508_v30 = vshrl.u32 %v15373_v22, 16  ;;  %v8501_v19 = vor.u32 %v8500_v39, %v15382_v25 }
 0x2e8   : > { %v8478_v28 = vrot.slane %v8477_v10, 4 }
 0x2e9   : > { %12254 = vmatmul.mubr.msk.bf16.gmra.mrb[36].mxu0 %vm2475_vm11, %v11153_v38  ;;  %v11156_v38 = vcombine.low %v8409_v44, %v8419_v18  ;;  %v8453_v44 = vsel %vm13521_vm12, %v8448_v21, %v15339_v20  ;;  %v13073_v18 = vld [vmem:[#allocation2 + $0xe4] sm:$0xff]   ;;  %v8482_v57 = vrot.slane %v8480_v3, 5  ;;  %v8506_v37 = vrot.slane %v8504_v53, 5 }
 0x2ea   : > { %12257 = vmatprep.mubr.msk.bf16.mxu0 %vm2475_vm11, %v11154_v63  ;;  %v8467_v63 = vor.u32 %v8466_v43, %v8462_v17  ;;  %v8510_v20 = vrot.slane %v8508_v30, 4  ;;  %v15407_v43 = vrot.slane %v8514_v14, 5  ;;  %v15411_v17 = vrot.slane %v8538_v13, 5  ;;  %v7907_v14 = vld [vmem:[#allocation2 + $0x154] sm:$0xf] }
 0x2eb   : > { %v8544_v21 = vrot.slane %v8542_v45, 4  ;;  %v11158_v16 = vcombine.low %v8453_v44, %v8463_v54  ;;  %v8492_v3 = vrot.slane %v8491_v35, 4  ;;  %v8502_v8 = vrot.slane %v8501_v19, 4  ;;  %v13075_v54 = vld [vmem:[#allocation2 + $0xf8] sm:$0xff]  }
 0x2ec   : > { %v8468_v15 = vrot.slane %v8467_v63, 4  ;;  %v8483_v42 = vsel %vm13521_vm12, %v8478_v28, %v8482_v57  ;;  %v8511_v63 = vor.u32 %v8510_v20, %v8506_v37  ;;  %v8521_v10 = vor.u32 %v8520_v9, %v15407_v43  ;;  %v13076_v28 = vld [vmem:[#allocation2 + $0x104] sm:$0xff]  }
 0x2ed   : > { %v8548_v30 = vshll.u32 %v15409_v4, 16  ;;  %v8497_v13 = vsel %vm13521_vm12, %v8492_v3, %v15382_v25  ;;  %v8507_v45 = vsel %vm13521_vm12, %v8502_v8, %v8506_v37  ;;  %v8573_v57 = vshrl.u32 %v7907_v14, 16  ;;  %v15442_v3 = vld [vmem:[#allocation2 + $0x15c] sm:$0xf] }
 0x2ee   : > { %11982 = vmatmul.mubr.msk.bf16.gmra.mrb[36].mxu1 %vm2475_vm11, %v13071_v47  ;;  %v15405_v47 = vld [vmem:[#allocation2 + $0x13c] sm:$0x1]  ;;  %v8473_v39 = vsel %vm13521_vm12, %v8468_v15, %v15371_v11  ;;  %v8552_v11 = vshrl.u32 %v15409_v4, 16  ;;  %v8576_v35 = vshll.u32 %v7907_v14, 16  ;;  %v8582_v19 = vshll.u32 %v15425_v7, 16 }
 0x2ef   : > { %11985 = vmatprep.mubr.msk.bf16.mxu1 %vm2475_vm11, %v13072_v56  ;;  %v13074_v56 = vld [vmem:[#allocation2 + $0xf0] sm:$0xff]   ;;  %v8524_v31 = vshll.u32 %v15405_v47, 16  ;;  %v11159_v44 = vcombine.low %v8473_v39, %v8483_v42  ;;  %v8586_v15 = vshrl.u32 %v15425_v7, 16  ;;  %v8512_v20 = vrot.slane %v8511_v63, 4  ;;  %v15445_v14 = vld [vmem:[#allocation2 + $0x160] sm:$0xf] }
 0x2f0   : > { %v8554_v25 = vrot.slane %v8552_v11, 4  ;;  %v11160_v37 = vcombine.low %v8497_v13, %v8507_v45  ;;  %v8575_v8 = vrot.slane %v8573_v57, 4  ;;  %v8584_v39 = vrot.slane %v8582_v19, 5 }
 0x2f1   : > { %12258 = vmatmul.mubr.msk.bf16.gmra.mrb[40].mxu0 %vm2475_vm11, %v11155_v12  ;;  %v8531_v12 = vrot.slane %v8529_v34, 4  ;;  %v8545_v34 = vor.u32 %v8544_v21, %v15411_v17  ;;  %v8588_v42 = vrot.slane %v8586_v15, 4  ;;  %v8517_v63 = vsel %vm13521_vm12, %v8512_v20, %v15407_v43 }
 0x2f2   : > { %12261 = vmatprep.mubr.msk.bf16.mxu0 %vm2475_vm11, %v11156_v38  ;;  %v8534_v38 = vrot.slane %v8532_v41, 5  ;;  %v8558_v41 = vshll.u32 %v15414_v58, 16  ;;  %v8592_v43 = vshll.u32 %v15442_v3, 16  ;;  %v8602_v13 = vshll.u32 %v15445_v14, 16 }
 0x2f3   : > { %v8606_v45 = vshrl.u32 %v15445_v14, 16 }
 0x2f4   : > { %v8535_v53 = vor.u32 %v8534_v38, %v8531_v12  ;;  %v8550_v12 = vrot.slane %v8548_v30, 5  ;;  %v8546_v38 = vrot.slane %v8545_v34, 4  ;;  %v8560_v21 = vrot.slane %v8558_v41, 5 }
 0x2f5   : > { %v8594_v20 = vrot.slane %v8592_v43, 5 }
 0x2f6   : > { %11986 = vmatmul.mubr.msk.bf16.gmra.mrb[40].mxu1 %vm2475_vm11, %v13073_v18  ;;  %v8526_v18 = vrot.slane %v8524_v31, 5  ;;  %v8536_v9 = vrot.slane %v8535_v53, 4  ;;  %v8578_v31 = vrot.slane %v8576_v35, 5  ;;  %v8551_v34 = vsel %vm13521_vm12, %v8546_v38, %v8550_v12 }
 0x2f7   : > { %11989 = vmatprep.mubr.msk.bf16.mxu1 %vm2475_vm11, %v13074_v56  ;;  %v8522_v56 = vrot.slane %v8521_v10, 4  ;;  %v8555_v11 = vor.u32 %v8554_v25, %v8550_v12  ;;  %v8608_v12 = vrot.slane %v8606_v45, 4 }
 0x2f8   : > { %v8541_v30 = vsel %vm13521_vm12, %v8536_v9, %v15411_v17  ;;  %v13078_v17 = vld [vmem:[#allocation2 + $0x118] sm:$0xff]   ;;  %v8604_v9 = vrot.slane %v8602_v13, 5 }
 0x2f9   : > { %12262 = vmatmul.mubr.msk.bf16.gmra.mrb[44].mxu0 %vm2475_vm11, %v11157_v48  ;;  %v15440_v48 = vld [vmem:[#allocation2 + $0x150] sm:$0x1]  ;;  %v8527_v10 = vsel %vm13521_vm12, %v8522_v56, %v8526_v18  ;;  %v8579_v18 = vor.u32 %v8578_v31, %v8575_v8  ;;  %v11162_v35 = vcombine.low %v8541_v30, %v8551_v34  ;;  %v8556_v19 = vrot.slane %v8555_v11, 4  ;;  %v13220_v34 = vld [vmem:[#allocation2 + $0x2c] sm:$0xf] }
 0x2fa   : > { %12265 = vmatprep.mubr.msk.bf16.mxu0 %vm2475_vm11, %v11158_v16  ;;  %v8564_v16 = vrot.slane %v8562_v2, 4  ;;  %v8568_v53 = vshll.u32 %v15440_v48, 16  ;;  %v8596_v2 = vshrl.u32 %v15442_v3, 16  ;;  %v11161_v57 = vcombine.low %v8517_v63, %v8527_v10  ;;  %v13079_v10 = vld [vmem:[#allocation2 + $0x120] sm:$0xff]  }
 0x2fb   : > { %v8580_v38 = vrot.slane %v8579_v18, 4  ;;  %v9276_v11 = vrot.slane %v13220_v34, 5 }
 0x2fc   : > { %v8565_v41 = vor.u32 %v8564_v16, %v8560_v21  ;;  %v8598_v56 = vrot.slane %v8596_v2, 4  ;;  %v15466_v16 = vld [vmem:[#allocation2 + $0x164] sm:$0x1] }
 0x2fd   : > { %v8612_v63 = vshll.u32 %v15466_v16, 16 }
 0x2fe   : > { %11990 = vmatmul.mubr.msk.bf16.gmra.mrb[44].mxu1 %vm2475_vm11, %v13075_v54  ;;  %v8589_v54 = vor.u32 %v8588_v42, %v8584_v39  ;;  %v8566_v15 = vrot.slane %v8565_v41, 4  ;;  %v8599_v31 = vor.u32 %v8598_v56, %v8594_v20  ;;  %v8609_v42 = vor.u32 %v8608_v12, %v8604_v9  ;;  %v13080_v41 = vld [vmem:[#allocation2 + $0x12c] sm:$0xff]   ;;  %v13223_v12 = vld [vmem:[#allocation2 + $0x40] sm:$0xf] }
 0x2ff   : > { %11993 = vmatprep.mubr.msk.bf16.mxu1 %vm2475_vm11, %v13076_v28  ;;  %v8570_v28 = vrot.slane %v8568_v53, 5  ;;  %v8585_v53 = vsel %vm13521_vm12, %v8580_v38, %v8584_v39  ;;  %v9289_v38 = vrot.slane %v13223_v12, 5 }
 0x300   : > { %v8590_v25 = vrot.slane %v8589_v54, 4  ;;  %v8600_v13 = vrot.slane %v8599_v31, 4  ;;  %v8610_v45 = vrot.slane %v8609_v42, 4  ;;  %v9278_v54 = vrot.slane %v9276_v11, 4 }
 0x301   : > { %12266 = vmatmul.mubr.msk.bf16.gmra.mrb[48].mxu0 %vm2475_vm11, %v11159_v44  ;;  %v13077_v44 = vld [vmem:[#allocation2 + $0x10c] sm:$0xff]   ;;  %v8571_v8 = vsel %vm13521_vm12, %v8566_v15, %v8570_v28  ;;  %v13081_v28 = vld [vmem:[#allocation2 + $0x134] sm:$0xff]  }
 0x302   : > { %12269 = vmatprep.mubr.msk.bf16.mxu0 %vm2475_vm11, %v11160_v37  ;;  %v8561_v37 = vsel %vm13521_vm12, %v8556_v19, %v8560_v21  ;;  %v8595_v30 = vsel %vm13521_vm12, %v8590_v25, %v8594_v20  ;;  %v9178_v21 = vld [vmem:[#allocation2 + $0x28] sm:$0xe]  ;;  %v8605_v39 = vsel %vm13521_vm12, %v8600_v13, %v8604_v9  ;;  %v13222_v19 = vld [vmem:[#allocation2 + $0x34] sm:$0xf]  ;;  %v13083_v25 = vld [vmem:[#allocation2 + $0x140] sm:$0xff]  }
 0x303   : > { %v11163_v43 = vcombine.low %v8561_v37, %v8571_v8  ;;  %v11164_v2 = vcombine.low %v8585_v53, %v8595_v30  ;;  %v11200_v18 = vrot.slane %v9178_v21, 9  ;;  %v9282_v15 = vrot.slane %v13222_v19, 5  ;;  %v9179_v37 = vld [vmem:[#allocation2 + $0x3c] sm:$0xe]  ;;  %v13225_v30 = vld [vmem:[#allocation2 + $0x44] sm:$0xf] }
 0x304   : > { %v9291_v53 = vrot.slane %v9289_v38, 4  ;;  %v9292_v34 = vrot.slane %v13225_v30, 5  ;;  %v13226_v21 = vld [vmem:[#allocation2 + $0x48] sm:$0xf]  ;;  %v13228_v19 = vld [vmem:[#allocation2 + $0x4c] sm:$0x1] }
 0x305   : > { %v9277_v20 = vsel %vm14251_vm15, %v11200_v18, %v9276_v11  ;;  %v9284_v9 = vrot.slane %v9282_v15, 4 }
 0x306   : > { %11994 = vmatmul.mubr.msk.bf16.gmra.mrb[48].mxu1 %vm2475_vm11, %v13077_v44  ;;  %v8614_v44 = vrot.slane %v8612_v63, 5  ;;  %v13224_v63 = vld [vmem:[#allocation2 + $0x38] sm:$0x1] }
 0x307   : > { %11997 = vmatprep.mubr.msk.bf16.mxu1 %vm2475_vm11, %v13078_v17  ;;  %v9285_v32 = vrot.slane %v13224_v63, 5 }
 0x309   : > { %12270 = vmatmul.mubr.msk.bf16.gmra.mrb[52].mxu0 %vm2475_vm11, %v11161_v57  ;;  %v13221_v57 = vld [vmem:[#allocation2 + $0x30] sm:$0xf] }
 0x30a   : > { %12273 = vmatprep.mubr.msk.bf16.mxu0 %vm2475_vm11, %v11162_v35  ;;  %v9279_v17 = vrot.slane %v13221_v57, 5  ;;  %v8615_v35 = vsel %vm13521_vm12, %v8610_v45, %v8614_v44  ;;  %v9293_v45 = vsel %vm14251_vm15, %v9291_v53, %v9292_v34  ;;  %v13227_v44 = vld [vmem:[#allocation2 + $0x54] sm:$0xf] }
 0x30b   : > { %v11165_v8 = vcombine.low %v8605_v39, %v8615_v35  ;;  %v9302_v18 = vrot.slane %v13227_v44, 5  ;;  %v9294_v39 = vrot.slane %v9292_v34, 4 }
 0x30c   : > { %v9280_v56 = vsel %vm14251_vm15, %v9278_v54, %v9279_v17  ;;  %v9281_v31 = vrot.slane %v9279_v17, 4  ;;  %v9180_v54 = vld [vmem:[#allocation2 + $0x50] sm:$0xe] }
 0x30d   : > { %v11220_v42 = vcombine.low %v9277_v20, %v9280_v56  ;;  %v9304_v20 = vrot.slane %v9302_v18, 4  ;;  %v13229_v56 = vld [vmem:[#allocation2 + $0x58] sm:$0xf] }
 0x30e   : > { %11998 = vmatmul.mubr.msk.bf16.gmra.mrb[52].mxu1 %vm2475_vm11, %v13079_v10  ;;  %v11201_v10 = vrot.slane %v9179_v37, 9  ;;  %v9283_v11 = vsel %vm14251_vm15, %v9281_v31, %v9282_v15  ;;  %v9298_v15 = vrot.slane %v13228_v19, 5  ;;  %v9305_v12 = vrot.slane %v13229_v56, 5  ;;  %v13230_v37 = vld [vmem:[#allocation2 + $0x5c] sm:$0xf] }
 0x30f   : > { %12001 = vmatprep.mubr.msk.bf16.mxu1 %vm2475_vm11, %v13080_v41  ;;  %v9286_v41 = vsel %vm14251_vm15, %v9284_v9, %v9285_v32  ;;  %v13231_v9 = vld [vmem:[#allocation2 + $0x68] sm:$0xf]  ;;  %v9181_v32 = vld [vmem:[#allocation2 + $0x64] sm:$0xe]  ;;  %v9182_v19 = vld [vmem:[#allocation2 + $0x78] sm:$0xe] }
 0x310   : > { %v9290_v13 = vsel %vm14251_vm15, %v11201_v10, %v9289_v38  ;;  %v11221_v57 = vcombine.low %v9283_v11, %v9286_v41  ;;  %v9315_v63 = vrot.slane %v13231_v9, 5  ;;  %v9307_v30 = vrot.slane %v9305_v12, 4  ;;  %v13232_v11 = vld [vmem:[#allocation2 + $0x60] sm:$0x1] }
 0x311   : > { %12274 = vmatmul.mubr.msk.bf16.gmra.mrb[56].mxu0 %vm2475_vm11, %v11163_v43  ;;  %v9295_v43 = vrot.slane %v13226_v21, 5  ;;  %v11222_v17 = vcombine.low %v9290_v13, %v9293_v45  ;;  %v9311_v41 = vrot.slane %v13232_v11, 5  ;;  %v11203_v21 = vrot.slane %v9181_v32, 9  ;;  %v9183_v11 = vld [vmem:[#allocation2 + $0x8c] sm:$0xe] }
 0x312   : > { %12277 = vmatprep.mubr.msk.bf16.mxu0 %vm2475_vm11, %v11164_v2  ;;  %v13084_v2 = vld [vmem:[#allocation2 + $0x148] sm:$0xff]  }
 0x313   : > { %v9297_v35 = vrot.slane %v9295_v43, 4  ;;  %v9296_v38 = vsel %vm14251_vm15, %v9294_v39, %v9295_v43  ;;  %v9317_v43 = vrot.slane %v9315_v63, 4  ;;  %v13235_v39 = vld [vmem:[#allocation2 + $0x7c] sm:$0xf] }
 0x316   : > { %12002 = vmatmul.mubr.msk.bf16.gmra.mrb[56].mxu1 %vm2475_vm11, %v13081_v28  ;;  %v11202_v28 = vrot.slane %v9180_v54, 9 }
 0x317   : > { %12005 = vmatprep.mubr.msk.bf16.mxu1 %vm2475_vm11, %v13083_v25  ;;  %v9299_v25 = vsel %vm14251_vm15, %v9297_v35, %v9298_v15  ;;  %v9328_v35 = vrot.slane %v13235_v39, 5 }
 0x318   : > { %v9303_v31 = vsel %vm14251_vm15, %v11202_v28, %v9302_v18  ;;  %v11223_v10 = vcombine.low %v9296_v38, %v9299_v25  ;;  %v13234_v18 = vld [vmem:[#allocation2 + $0x70] sm:$0xf]  ;;  %v11204_v25 = vrot.slane %v9182_v19, 9 }
 0x319   : > { %12278 = vmatmul.mubr.msk.bf16.gmra.mrb[60].mxu0 %vm2475_vm11, %v11165_v8  ;;  %v9308_v8 = vrot.slane %v13230_v37, 5  ;;  %v9321_v54 = vrot.slane %v13234_v18, 5  ;;  %v9330_v37 = vrot.slane %v9328_v35, 4 }
 0x31a   : > { %12285 = vmatprep.mubr.msk.bf16.mxu0 %vm2475_vm11, %v11220_v42  ;;  %v9306_v42 = vsel %vm14251_vm15, %v9304_v20, %v9305_v12  ;;  %v13236_v12 = vld [vmem:[#allocation2 + $0x74] sm:$0x1] }
 0x31b   : > { %v11224_v53 = vcombine.low %v9303_v31, %v9306_v42  ;;  %v9310_v34 = vrot.slane %v9308_v8, 4  ;;  %v9309_v45 = vsel %vm14251_vm15, %v9307_v30, %v9308_v8  ;;  %v9323_v56 = vrot.slane %v9321_v54, 4  ;;  %v13237_v8 = vld [vmem:[#allocation2 + $0x80] sm:$0xf]  ;;  %v13239_v30 = vld [vmem:[#allocation2 + $0x90] sm:$0xf] }
 0x31c   : > { %v9324_v38 = vrot.slane %v13236_v12, 5  ;;  %v9331_v31 = vrot.slane %v13237_v8, 5  ;;  %v9184_v12 = vld [vmem:[#allocation2 + $0xa0] sm:$0xe] }
 0x31d   : > { %v9312_v44 = vsel %vm14251_vm15, %v9310_v34, %v9311_v41  ;;  %v9341_v34 = vrot.slane %v13239_v30, 5 }
 0x31e   : > { %12006 = vmatmul.mubr.msk.bf16.gmra.mrb[60].mxu1 %vm2475_vm11, %v13084_v2  ;;  %v13233_v2 = vld [vmem:[#allocation2 + $0x6c] sm:$0xf]  ;;  %v11225_v15 = vcombine.low %v9309_v45, %v9312_v44  ;;  %v9325_v9 = vsel %vm14251_vm15, %v9323_v56, %v9324_v38  ;;  %v11205_v44 = vrot.slane %v9183_v11, 9 }
 0x31f   : > { %v9318_v13 = vrot.slane %v13233_v2, 5  ;;  %v9343_v18 = vrot.slane %v9341_v34, 4 }
 0x321   : > { %12286 = vmatmul.mubr.msk.bf16.vlgmr.msra.gmra.mrb[0].mxu0 %vm2475_vm11, %v11221_v57  ;;  %v9316_v57 = vsel %vm14251_vm15, %v11203_v21, %v9315_v63  ;;  %v9320_v20 = vrot.slane %v9318_v13, 4  ;;  %v13238_v63 = vld [vmem:[#allocation2 + $0x84] sm:$0xf] }
 0x322   : > { %12289 = vmatprep.mubr.msk.bf16.mxu0 %vm2475_vm11, %v11222_v17  ;;  %v9319_v17 = vsel %vm14251_vm15, %v9317_v43, %v9318_v13  ;;  %v9334_v32 = vrot.slane %v13238_v63, 5  ;;  %v9333_v43 = vrot.slane %v9331_v31, 4  ;;  %v13240_v13 = vld [vmem:[#allocation2 + $0x88] sm:$0x1] }
 0x323   : > { %v11226_v28 = vcombine.low %v9316_v57, %v9319_v17  ;;  %v9322_v42 = vsel %vm14251_vm15, %v9320_v20, %v9321_v54  ;;  %v9337_v45 = vrot.slane %v13240_v13, 5  ;;  %v13241_v54 = vld [vmem:[#allocation2 + $0x94] sm:$0xf]  ;;  %v13243_v20 = vld [vmem:[#allocation2 + $0xa4] sm:$0xf] }
 0x324   : > { %v11227_v41 = vcombine.low %v9322_v42, %v9325_v9  ;;  %v9336_v2 = vrot.slane %v9334_v32, 4  ;;  %v9344_v57 = vrot.slane %v13241_v54, 5  ;;  %v9335_v17 = vsel %vm14251_vm15, %v9333_v43, %v9334_v32  ;;  %v13245_v32 = vld [vmem:[#allocation2 + $0xa8] sm:$0xf]  ;;  %v13247_v43 = vld [vmem:[#allocation2 + $0xb8] sm:$0xf] }
 0x325   : > { %v9354_v56 = vrot.slane %v13243_v20, 5  ;;  %v11206_v9 = vrot.slane %v9184_v12, 9  ;;  %v9185_v13 = vld [vmem:[#allocation2 + $0xb4] sm:$0xe] }
 0x326   : > { %v9338_v39 = vsel %vm14251_vm15, %v9336_v2, %v9337_v45  ;;  %v9367_v2 = vrot.slane %v13247_v43, 5 }
 0x327   : > { %v11229_v38 = vcombine.low %v9335_v17, %v9338_v39  ;;  %v9356_v63 = vrot.slane %v9354_v56, 4  ;;  %v11207_v39 = vrot.slane %v9185_v13, 9 }
 0x329   : > { %12290 = vmatmul.mubr.msk.bf16.gmra.mrb[4].mxu0 %vm2475_vm11, %v11223_v10  ;;  %v9329_v10 = vsel %vm14251_vm15, %v11204_v25, %v9328_v35  ;;  %v13242_v35 = vld [vmem:[#allocation2 + $0x98] sm:$0xf] }
 0x32a   : > { %12293 = vmatprep.mubr.msk.bf16.mxu0 %vm2475_vm11, %v11224_v53  ;;  %v9332_v53 = vsel %vm14251_vm15, %v9330_v37, %v9331_v31  ;;  %v9347_v19 = vrot.slane %v13242_v35, 5  ;;  %v9346_v37 = vrot.slane %v9344_v57, 4  ;;  %v13244_v31 = vld [vmem:[#allocation2 + $0x9c] sm:$0x1]  ;;  %v9369_v35 = vrot.slane %v9367_v2, 4 }
 0x32b   : > { %v11228_v21 = vcombine.low %v9329_v10, %v9332_v53  ;;  %v9350_v42 = vrot.slane %v13244_v31, 5  ;;  %v9357_v10 = vrot.slane %v13245_v32, 5  ;;  %v9186_v31 = vld [vmem:[#allocation2 + $0xc8] sm:$0xe] }
 0x32c   : > { %v9349_v8 = vrot.slane %v9347_v19, 4  ;;  %v9348_v53 = vsel %vm14251_vm15, %v9346_v37, %v9347_v19  ;;  %v13249_v19 = vld [vmem:[#allocation2 + $0xbc] sm:$0xf]  ;;  %v13251_v37 = vld [vmem:[#allocation2 + $0xcc] sm:$0xf] }
 0x32e   : > { %v9351_v30 = vsel %vm14251_vm15, %v9349_v8, %v9350_v42  ;;  %v9380_v8 = vrot.slane %v13251_v37, 5 }
 0x32f   : > { %v11231_v45 = vcombine.low %v9348_v53, %v9351_v30  ;;  %v11208_v30 = vrot.slane %v9186_v31, 9  ;;  %v9402_v31 = vrot.slane %v15254_v52, 5 }
 0x331   : > { %12294 = vmatmul.mubr.msk.bf16.gmra.mrb[8].mxu0 %vm2475_vm11, %v11225_v15  ;;  %v9342_v15 = vsel %vm14251_vm15, %v11205_v44, %v9341_v34  ;;  %v13246_v34 = vld [vmem:[#allocation2 + $0xac] sm:$0xf]  ;;  %v9381_v13 = vsel %vm14251_vm15, %v11208_v30, %v9380_v8 }
 0x332   : > { %12297 = vmatprep.mubr.msk.bf16.mxu0 %vm2475_vm11, %v11226_v28  ;;  %v9345_v28 = vsel %vm14251_vm15, %v9343_v18, %v9344_v57  ;;  %v9360_v11 = vrot.slane %v13246_v34, 5  ;;  %v9359_v18 = vrot.slane %v9357_v10, 4  ;;  %v13248_v57 = vld [vmem:[#allocation2 + $0xb0] sm:$0x1]  ;;  %v9382_v34 = vrot.slane %v9380_v8, 4 }
 0x333   : > { %v11230_v25 = vcombine.low %v9342_v15, %v9345_v28  ;;  %v9363_v17 = vrot.slane %v13248_v57, 5  ;;  %v9370_v15 = vrot.slane %v13249_v19, 5 }
 0x334   : > { %v9362_v54 = vrot.slane %v9360_v11, 4  ;;  %v9361_v28 = vsel %vm14251_vm15, %v9359_v18, %v9360_v11  ;;  %v13253_v11 = vld [vmem:[#allocation2 + $0xd0] sm:$0xf]  ;;  %v9187_v18 = vld [vmem:[#allocation2 + $0xdc] sm:$0xe] }
 0x335   : > { %v11209_v19 = vrot.slane %v9187_v18, 9  ;;  %v9190_v18 = vld [vmem:[#allocation2 + $0x118] sm:$0xe] }
 0x336   : > { %v9364_v20 = vsel %vm14251_vm15, %v9362_v54, %v9363_v17 }
 0x337   : > { %v11233_v42 = vcombine.low %v9361_v28, %v9364_v20  ;;  %v9396_v28 = vrot.slane %v15213_v0, 5  ;;  %v9399_v20 = vrot.slane %v15215_v62, 5  ;;  %v9406_v0 = vrot.slane %v15238_v36, 5 }
 0x339   : > { %12298 = vmatmul.mubr.msk.bf16.gmra.mrb[12].mxu0 %vm2475_vm11, %v11227_v41  ;;  %v9355_v41 = vsel %vm14251_vm15, %v11206_v9, %v9354_v56  ;;  %v13250_v56 = vld [vmem:[#allocation2 + $0xc0] sm:$0xf]  ;;  %v9398_v37 = vrot.slane %v9396_v28, 4  ;;  %v9401_v8 = vrot.slane %v9399_v20, 4 }
 0x33a   : > { %12301 = vmatprep.mubr.msk.bf16.mxu0 %vm2475_vm11, %v11228_v21  ;;  %v9358_v21 = vsel %vm14251_vm15, %v9356_v63, %v9357_v10  ;;  %v9373_v12 = vrot.slane %v13250_v56, 5  ;;  %v9372_v63 = vrot.slane %v9370_v15, 4  ;;  %v13252_v10 = vld [vmem:[#allocation2 + $0xc4] sm:$0x1] }
 0x33b   : > { %v11232_v44 = vcombine.low %v9355_v41, %v9358_v21  ;;  %v9376_v53 = vrot.slane %v13252_v10, 5  ;;  %v9383_v41 = vrot.slane %v13253_v11, 5  ;;  %v9400_v62 = vsel %vm14251_vm15, %v9398_v37, %v9399_v20  ;;  %v9191_v20 = vld [vmem:[#allocation2 + $0x12c] sm:$0xe] }
 0x33c   : > { %v9375_v32 = vrot.slane %v9373_v12, 4  ;;  %v9374_v21 = vsel %vm14251_vm15, %v9372_v63, %v9373_v12  ;;  %v9188_v12 = vld [vmem:[#allocation2 + $0xf0] sm:$0xe]  ;;  %v9409_v63 = vrot.slane %v15263_v49, 5  ;;  %v9403_v36 = vsel %vm14251_vm15, %v9401_v8, %v9402_v31 }
 0x33d   : > { %v9385_v17 = vrot.slane %v9383_v41, 4  ;;  %v9419_v49 = vrot.slane %v15272_v5, 5  ;;  %v11239_v30 = vcombine.low %v9400_v62, %v9403_v36  ;;  %v9448_v8 = vrot.slane %v15373_v22, 5  ;;  %v9192_v36 = vld [vmem:[#allocation2 + $0x140] sm:$0xe] }
 0x33e   : > { %v9377_v43 = vsel %vm14251_vm15, %v9375_v32, %v9376_v53  ;;  %v9412_v32 = vrot.slane %v15265_v1, 5  ;;  %v9189_v53 = vld [vmem:[#allocation2 + $0x104] sm:$0xe]  ;;  %v9411_v11 = vrot.slane %v9409_v63, 4 }
 0x33f   : > { %v11235_v54 = vcombine.low %v9374_v21, %v9377_v43  ;;  %v9415_v21 = vrot.slane %v15297_v51, 5  ;;  %v11211_v43 = vrot.slane %v9189_v53, 9 }
 0x340   : > { %v9413_v1 = vsel %vm14251_vm15, %v9411_v11, %v9412_v32  ;;  %v9461_v11 = vrot.slane %v15409_v4, 5 }
 0x341   : > { %12302 = vmatmul.mubr.msk.bf16.gmra.mrb[16].mxu0 %vm2475_vm11, %v11229_v38  ;;  %v9368_v38 = vsel %vm14251_vm15, %v11207_v39, %v9367_v2  ;;  %v9386_v2 = vrot.slane %v15186_v24, 5 }
 0x342   : > { %12305 = vmatprep.mubr.msk.bf16.mxu0 %vm2475_vm11, %v11230_v25  ;;  %v9371_v25 = vsel %vm14251_vm15, %v9369_v35, %v9370_v15  ;;  %v9389_v35 = vrot.slane %v15220_v33, 5 }
 0x343   : > { %v11234_v9 = vcombine.low %v9368_v38, %v9371_v25  ;;  %v9388_v39 = vrot.slane %v9386_v2, 4  ;;  %v9387_v24 = vsel %vm14251_vm15, %v9385_v17, %v9386_v2  ;;  %v9421_v2 = vrot.slane %v9419_v49, 4 }
 0x349   : > { %12306 = vmatmul.mubr.msk.bf16.gmra.mrb[20].mxu0 %vm2475_vm11, %v11231_v45  ;;  %v9384_v45 = vsel %vm14251_vm15, %v9382_v34, %v9383_v41  ;;  %v9414_v41 = vrot.slane %v9412_v32, 4 }
 0x34a   : > { %12309 = vmatprep.mubr.msk.bf16.mxu0 %vm2475_vm11, %v11232_v44  ;;  %v9393_v44 = vrot.slane %v15188_v55, 5  ;;  %v11236_v57 = vcombine.low %v9381_v13, %v9384_v45  ;;  %v9390_v55 = vsel %vm14251_vm15, %v9388_v39, %v9389_v35  ;;  %v9422_v13 = vrot.slane %v15285_v26, 5 }
 0x34b   : > { %v11237_v38 = vcombine.low %v9387_v24, %v9390_v55  ;;  %v9416_v5 = vsel %vm14251_vm15, %v9414_v41, %v9415_v21  ;;  %v9425_v45 = vrot.slane %v15306_v27, 5  ;;  %v9432_v26 = vrot.slane %v15311_v50, 5 }
 0x34c   : > { %v9395_v15 = vrot.slane %v9393_v44, 4  ;;  %v9394_v56 = vsel %vm14251_vm15, %v11209_v19, %v9393_v44  ;;  %v9420_v44 = vsel %vm14251_vm15, %v11211_v43, %v9419_v49  ;;  %v9423_v51 = vsel %vm14251_vm15, %v9421_v2, %v9422_v13 }
 0x34d   : > { %v9424_v17 = vrot.slane %v9422_v13, 4  ;;  %v9427_v39 = vrot.slane %v9425_v45, 4  ;;  %v9428_v35 = vrot.slane %v15337_v60, 5  ;;  %v11212_v19 = vrot.slane %v9190_v18, 9 }
 0x34e   : > { %v9397_v33 = vsel %vm14251_vm15, %v9395_v15, %v9396_v28  ;;  %v9434_v15 = vrot.slane %v9432_v26, 4  ;;  %v9435_v28 = vrot.slane %v15330_v61, 5  ;;  %v9438_v24 = vrot.slane %v15335_v23, 5 }
 0x34f   : > { %v11238_v25 = vcombine.low %v9394_v56, %v9397_v33  ;;  %v9426_v27 = vsel %vm14251_vm15, %v9424_v17, %v9425_v45  ;;  %v9429_v50 = vsel %vm14251_vm15, %v9427_v39, %v9428_v35  ;;  %v9433_v55 = vsel %vm14251_vm15, %v11212_v19, %v9432_v26 }
 0x350   : > { %v9436_v60 = vsel %vm14251_vm15, %v9434_v15, %v9435_v28  ;;  %v9445_v61 = vrot.slane %v15349_v29, 5  ;;  %v11243_v56 = vcombine.low %v9426_v27, %v9429_v50  ;;  %v9450_v49 = vrot.slane %v9448_v8, 4 }
 0x351   : > { %12310 = vmatmul.mubr.msk.bf16.gmra.mrb[24].mxu0 %vm2475_vm11, %v11233_v42  ;;  %v11210_v42 = vrot.slane %v9188_v12, 9  ;;  %v11244_v33 = vcombine.low %v9433_v55, %v9436_v60  ;;  %v9440_v12 = vrot.slane %v9438_v24, 4  ;;  %v9464_v43 = vrot.slane %v15414_v58, 5 }
 0x352   : > { %12313 = vmatprep.mubr.msk.bf16.mxu0 %vm2475_vm11, %v11234_v9  ;;  %v9408_v9 = vrot.slane %v9406_v0, 4  ;;  %v9447_v37 = vrot.slane %v9445_v61, 4  ;;  %v9471_v13 = vrot.slane %v15425_v7, 5  ;;  %v9463_v26 = vrot.slane %v9461_v11, 4 }
 0x353   : > { %v9407_v10 = vsel %vm14251_vm15, %v11210_v42, %v9406_v0  ;;  %v9437_v0 = vrot.slane %v9435_v28, 4  ;;  %v9451_v42 = vrot.slane %v15375_v6, 5  ;;  %v9454_v6 = vrot.slane %v15405_v47, 5 }
 0x354   : > { %v9410_v52 = vsel %vm14251_vm15, %v9408_v9, %v9409_v63  ;;  %v9449_v22 = vsel %vm14251_vm15, %v9447_v37, %v9448_v8  ;;  %v9458_v63 = vrot.slane %v15384_v40, 5  ;;  %v9466_v18 = vrot.slane %v9464_v43, 4 }
 0x355   : > { %v11240_v34 = vcombine.low %v9407_v10, %v9410_v52  ;;  %v9439_v29 = vsel %vm14251_vm15, %v9437_v0, %v9438_v24  ;;  %v9453_v53 = vrot.slane %v9451_v42, 4  ;;  %v9452_v40 = vsel %vm14251_vm15, %v9450_v49, %v9451_v42 }
 0x356   : > { %v9467_v58 = vrot.slane %v15440_v48, 5  ;;  %v9474_v17 = vrot.slane %v15442_v3, 5  ;;  %v9465_v7 = vsel %vm14251_vm15, %v9463_v26, %v9464_v43  ;;  %v9477_v19 = vrot.slane %v15445_v14, 5 }
 0x357   : > { %v9455_v21 = vsel %vm14251_vm15, %v9453_v53, %v9454_v6 }
 0x358   : > { %v9468_v35 = vsel %vm14251_vm15, %v9466_v18, %v9467_v58  ;;  %v9476_v55 = vrot.slane %v9474_v17, 4  ;;  %v9479_v60 = vrot.slane %v9477_v19, 4 }
 0x359   : > { %12314 = vmatmul.mubr.msk.bf16.gmra.mrb[28].mxu0 %vm2475_vm11, %v11235_v54  ;;  %v11241_v54 = vcombine.low %v9413_v1, %v9416_v5  ;;  %v9193_v5 = vld [vmem:[#allocation2 + $0x154] sm:$0xe]  ;;  %v11249_v50 = vcombine.low %v9465_v7, %v9468_v35  ;;  %v13294_v35 = vmov 0.0  }
 0x35a   : > { %12317 = vmatprep.mubr.msk.bf16.mxu0 %vm2475_vm11, %v11236_v57  ;;  %v11242_v57 = vcombine.low %v9420_v44, %v9423_v51  ;;  %v11247_v44 = vcombine.low %v9452_v40, %v9455_v21 }
 0x361   : > { %12318 = vmatmul.mubr.msk.bf16.gmra.mrb[32].mxu0 %vm2475_vm11, %v11237_v38  ;;  %v9441_v38 = vrot.slane %v15367_v59, 5 }
 0x362   : > { %12321 = vmatprep.mubr.msk.bf16.mxu0 %vm2475_vm11, %v11238_v25  ;;  %v11213_v25 = vrot.slane %v9191_v20, 9  ;;  %v9478_v20 = vsel %vm14251_vm15, %v9476_v55, %v9477_v19 }
 0x363   : > { %v9442_v31 = vsel %vm14251_vm15, %v9440_v12, %v9441_v38 }
 0x364   : > { %v9446_v59 = vsel %vm14251_vm15, %v11213_v25, %v9445_v61  ;;  %v11245_v10 = vcombine.low %v9439_v29, %v9442_v31  ;;  %v9480_v61 = vrot.slane %v15466_v16, 5 }
 0x365   : > { %v11246_v52 = vcombine.low %v9446_v59, %v9449_v22 }
 0x369   : > { %12322 = vmatmul.mubr.msk.bf16.gmra.mrb[36].mxu0 %vm2475_vm11, %v11239_v30  ;;  %v11214_v30 = vrot.slane %v9192_v36, 9 }
 0x36a   : > { %12325 = vmatprep.mubr.msk.bf16.mxu0 %vm2475_vm11, %v11240_v34  ;;  %v9460_v34 = vrot.slane %v9458_v63, 4 }
 0x36b   : > { %v9459_v47 = vsel %vm14251_vm15, %v11214_v30, %v9458_v63 }
 0x36c   : > { %v9462_v4 = vsel %vm14251_vm15, %v9460_v34, %v9461_v11 }
 0x36d   : > { %v11248_v51 = vcombine.low %v9459_v47, %v9462_v4 }
 0x371   : > { %12326 = vmatmul.mubr.msk.bf16.gmra.mrb[40].mxu0 %vm2475_vm11, %v11241_v54  ;;  %v11215_v54 = vrot.slane %v9193_v5, 9 }
 0x372   : > { %12329 = vmatprep.mubr.msk.bf16.mxu0 %vm2475_vm11, %v11242_v57  ;;  %v9473_v57 = vrot.slane %v9471_v13, 4 }
 0x373   : > { %v9472_v48 = vsel %vm14251_vm15, %v11215_v54, %v9471_v13  ;;  %v10044_v54 = vlaneseq }
 0x374   : > { %v9475_v3 = vsel %vm14251_vm15, %v9473_v57, %v9474_v17 }
 0x375   : > { %v11250_v24 = vcombine.low %v9472_v48, %v9475_v3  ;;  %v10045_v57 = vshrl.u32 %v10044_v54, 7  ;;  %v10047_v17 = vand.u32 127, %v10044_v54 }
 0x377   : > { %vm10048_vm0 = vcmp.eq.s32.totalorder %v10045_v57, %v10047_v17 }
 0x378   : > { %v15780_v19 = vsel %vm10048_vm0, 1.0, %v13294_v35 }
 0x379   : > { %12330 = vmatmul.mubr.msk.bf16.gmra.mrb[44].mxu0 %vm2475_vm11, %v11243_v56  ;;  %v15636_v23 = vpop.f32.mrb[0].mxu1  ;;  %v9481_v56 = vsel %vm14251_vm15, %v9479_v60, %v9480_v61  ;;  %16171 = vst [vmem:[#allocation6_spill] sm:$0xff] %v15780_v19  ;;  %11701 = vmatprep.mubr.msk.f32.mxu1 %vm10051_vm1, %v15780_v19 }
 0x37a   : > { %12333 = vmatprep.mubr.msk.bf16.mxu0 %vm2475_vm11, %v11244_v33  ;;  %v15644_v9 = vpop.f32.mrb[1].mxu1  ;;  %v11251_v38 = vcombine.low %v9478_v20, %v9481_v56 }
 0x37b   : > { %v15651_v62 = vpop.f32.mrb[2].mxu1 }
 0x37c   : > { %v15653_v32 = vpop.f32.mrb[3].mxu1 }
 0x381   : > { %12334 = vmatmul.mubr.msk.bf16.gmra.mrb[48].mxu0 %vm2475_vm11, %v11245_v10  ;;  %v15658_v41 = vpop.f32.mrb[4].mxu1 }
 0x382   : > { %12337 = vmatprep.mubr.msk.bf16.mxu0 %vm2475_vm11, %v11246_v52  ;;  %v15666_v2 = vpop.f32.mrb[5].mxu1 }
 0x383   : > { %v15673_v1 = vpop.f32.mrb[6].mxu1 }
 0x384   : > { %v15675_v45 = vpop.f32.mrb[7].mxu1 }
 0x389   : > { %12338 = vmatmul.mubr.msk.bf16.gmra.mrb[52].mxu0 %vm2475_vm11, %v11247_v44  ;;  %v15680_v39 = vpop.f32.mrb[8].mxu1 }
 0x38a   : > { %12341 = vmatprep.mubr.msk.bf16.mxu0 %vm2475_vm11, %v11248_v51  ;;  %v15688_v15 = vpop.f32.mrb[9].mxu1 }
 0x38b   : > { %v15694_v28 = vpop.f32.mrb[10].mxu1 }
 0x38c   : > { %v15696_v27 = vpop.f32.mrb[11].mxu1 }
 0x391   : > { %12342 = vmatmul.mubr.msk.bf16.gmra.mrb[56].mxu0 %vm2475_vm11, %v11249_v50  ;;  %v15700_v14 = vpop.f32.mrb[12].mxu1 }
 0x392   : > { %12345 = vmatprep.mubr.msk.bf16.mxu0 %vm2475_vm11, %v11250_v24  ;;  %v15707_v33 = vpop.f32.mrb[13].mxu1 }
 0x393   : > { %v15709_v0 = vpop.f32.mrb[14].mxu1 }
 0x394   : > { %v15711_v12 = vpop.f32.mrb[15].mxu1 }
 0x399   : > { %12346 = vmatmul.mubr.msk.bf16.gmra.mrb[60].mxu0 %vm2475_vm11, %v11251_v38  ;;  %v15714_v16 = vpop.f32.mrb[16].mxu1 }
 0x39a   : > { %v15716_v25 = vpop.f32.mrb[17].mxu1 }
 0x39b   : > { %v15718_v37 = vpop.f32.mrb[18].mxu1 }
 0x39c   : > { %v15720_v8 = vpop.f32.mrb[19].mxu1 }
 0x3a1   : > { %v15722_v29 = vpop.f32.mrb[20].mxu1 }
 0x3a2   : > { %v15724_v46 = vpop.f32.mrb[21].mxu1 }
 0x3a3   : > { %v15726_v31 = vpop.f32.mrb[22].mxu1 }
 0x3a4   : > { %v15728_v42 = vpop.f32.mrb[23].mxu1 }
 0x3a9   : > { %v15730_v59 = vpop.f32.mrb[24].mxu1 }
 0x3aa   : > { %v15732_v22 = vpop.f32.mrb[25].mxu1 }
 0x3ab   : > { %v15734_v63 = vpop.f32.mrb[26].mxu1 }
 0x3ac   : > { %v15736_v36 = vpop.f32.mrb[27].mxu1 }
 0x3b1   : > { %v15738_v10 = vpop.f32.mrb[28].mxu1 }
 0x3b2   : > { %v15740_v52 = vpop.f32.mrb[29].mxu1 }
 0x3b3   : > { %v15742_v49 = vpop.f32.mrb[30].mxu1 }
 0x3b4   : > { %v15744_v53 = vpop.f32.mrb[31].mxu1 }
 0x3b9   : > { %v15746_v6 = vpop.f32.mrb[32].mxu1 }
 0x3ba   : > { %v15748_v30 = vpop.f32.mrb[33].mxu1 }
 0x3bb   : > { %v15750_v34 = vpop.f32.mrb[34].mxu1 }
 0x3bc   : > { %v15752_v11 = vpop.f32.mrb[35].mxu1 }
 0x3c1   : > { %v15754_v40 = vpop.f32.mrb[36].mxu1 }
 0x3c2   : > { %v15756_v21 = vpop.f32.mrb[37].mxu1 }
 0x3c3   : > { %v15758_v43 = vpop.f32.mrb[38].mxu1 }
 0x3c4   : > { %v15760_v47 = vpop.f32.mrb[39].mxu1 }
 0x3c9   : > { %v15762_v4 = vpop.f32.mrb[40].mxu1 }
 0x3ca   : > { %v15764_v13 = vpop.f32.mrb[41].mxu1 }
 0x3cb   : > { %v15766_v5 = vpop.f32.mrb[42].mxu1 }
 0x3cc   : > { %v15768_v44 = vpop.f32.mrb[43].mxu1 }
 0x3d1   : > { %v15770_v51 = vpop.f32.mrb[44].mxu1 }
 0x3d2   : > { %v15772_v26 = vpop.f32.mrb[45].mxu1 }
 0x3d3   : > { %v15774_v18 = vpop.f32.mrb[46].mxu1 }
 0x3d4   : > { %v15776_v58 = vpop.f32.mrb[47].mxu1 }
 0x3d9   : > { %v15778_v7 = vpop.f32.mrb[48].mxu1 }
 0x3da   : > { %v15782_v48 = vpop.f32.mrb[49].mxu1 }
 0x3db   : > { %v15786_v3 = vpop.f32.mrb[50].mxu1 }
 0x3dc   : > { %v15788_v50 = vpop.f32.mrb[51].mxu1 }
 0x3e1   : > { %v15790_v24 = vpop.f32.mrb[52].mxu1 }
 0x3e2   : > { %16172 = vst [vmem:[#allocation7_spill] sm:$0xff] %v15790_v24  ;;  %v15792_v55 = vpop.f32.mrb[53].mxu1 }
 0x3e3   : > { %16173 = vst [vmem:[#allocation8_spill] sm:$0xff] %v15792_v55  ;;  %v15794_v60 = vpop.f32.mrb[54].mxu1 }
 0x3e4   : > { %16174 = vst [vmem:[#allocation9_spill] sm:$0xff] %v15794_v60  ;;  %v15796_v61 = vpop.f32.mrb[55].mxu1 }
 0x3e5   : > { %16175 = vst [vmem:[#allocation10_spill] sm:$0xff] %v15796_v61 }
 0x3e9   : > { %v15798_v20 = vpop.f32.mrb[56].mxu1 }
 0x3ea   : > { %16176 = vst [vmem:[#allocation11_spill] sm:$0xff] %v15798_v20  ;;  %v15800_v56 = vpop.f32.mrb[57].mxu1 }
 0x3eb   : > { %16177 = vst [vmem:[#allocation12_spill] sm:$0xff] %v15800_v56  ;;  %v15802_v38 = vpop.f32.mrb[58].mxu1 }
 0x3ec   : > { %16178 = vst [vmem:[#allocation13_spill] sm:$0xff] %v15802_v38  ;;  %v15804_v54 = vpop.f32.mrb[59].mxu1 }
 0x3ed   : > { %16179 = vst [vmem:[#allocation14_spill] sm:$0xff] %v15804_v54 }
 0x3f1   : > { %v15806_v57 = vpop.f32.mrb[60].mxu1 }
 0x3f2   : > { %16180 = vst [vmem:[#allocation15_spill] sm:$0xff] %v15806_v57  ;;  %v15808_v17 = vpop.f32.mrb[61].mxu1 }
 0x3f3   : > { %16181 = vst [vmem:[#allocation16_spill] sm:$0xff] %v15808_v17  ;;  %v15810_v24 = vpop.f32.mrb[62].mxu1 }
 0x3f4   : > { %v12287_v35 = vpop.f32.mrb[0].mxu0  ;;  %16182 = vst [vmem:[#allocation17_spill] sm:$0xff] %v15810_v24  ;;  %v15815_v61 = vpop.f32.mrb[63].mxu1 }
 0x3f5   : > { %v15813_v55 = vadd.f32 %v12287_v35, %v15636_v23  ;;  %v9725_v60 = vpop.f32.mrb[1].mxu0  ;;  %16183 = vst [vmem:[#allocation18_spill] sm:$0xff] %v15815_v61 }
 0x3f6   : > { %v12446_v20 = vadd.f32 %v9725_v60, %v15644_v9  ;;  %v12288_v56 = vpop.f32.mrb[2].mxu0 }
 0x3f7   : > { %v15819_v38 = vadd.f32 %v12288_v56, %v15651_v62  ;;  %v9728_v54 = vpop.f32.mrb[3].mxu0 }
 0x3f8   : > { %v12448_v57 = vadd.f32 %v9728_v54, %v15653_v32 }
 0x3f9   : > { %v12358_v17 = vpack.c.bf16 %v15819_v38, %v15813_v55 }
 0x3fa   : > { %v12352_v19 = vpack.c.bf16 %v12448_v57, %v12446_v20 }
 0x3fc   : > { %v12291_v24 = vpop.f32.mrb[4].mxu0 }
 0x3fd   : > { %v15825_v23 = vadd.f32 %v12291_v24, %v15658_v41  ;;  %v9741_v35 = vpop.f32.mrb[5].mxu0 }
 0x3fe   : > { %v15828_v61 = vadd.f32 %v9741_v35, %v15666_v2  ;;  %v12292_v9 = vpop.f32.mrb[6].mxu0 }
 0x3ff   : > { %v15831_v60 = vadd.f32 %v12292_v9, %v15673_v1  ;;  %v9744_v62 = vpop.f32.mrb[7].mxu0 }
 0x400   : > { %v15834_v56 = vadd.f32 %v9744_v62, %v15675_v45 }
 0x402   : > { %v16186_v38 = vpack.c.bf16 %v15834_v56, %v15828_v61  ;;  %v16187_v56 = vpack.c.bf16 %v15831_v60, %v15825_v23 }
 0x404   : > { %v12295_v41 = vpop.f32.mrb[8].mxu0 }
 0x405   : > { %v15841_v24 = vadd.f32 %v12295_v41, %v15680_v39  ;;  %v9757_v2 = vpop.f32.mrb[9].mxu0 }
 0x406   : > { %v15844_v54 = vadd.f32 %v9757_v2, %v15688_v15  ;;  %v12296_v1 = vpop.f32.mrb[10].mxu0 }
 0x407   : > { %v15847_v57 = vadd.f32 %v12296_v1, %v15694_v28  ;;  %v9760_v45 = vpop.f32.mrb[11].mxu0 }
 0x408   : > { %v15850_v35 = vadd.f32 %v9760_v45, %v15696_v27 }
 0x40c   : > { %v12299_v39 = vpop.f32.mrb[12].mxu0 }
 0x40d   : > { %v15857_v41 = vadd.f32 %v12299_v39, %v15700_v14  ;;  %v9773_v15 = vpop.f32.mrb[13].mxu0 }
 0x40e   : > { %v15860_v2 = vadd.f32 %v9773_v15, %v15707_v33  ;;  %v12300_v28 = vpop.f32.mrb[14].mxu0 }
 0x40f   : > { %v15863_v1 = vadd.f32 %v12300_v28, %v15709_v0  ;;  %v9776_v27 = vpop.f32.mrb[15].mxu0 }
 0x410   : > { %v15866_v45 = vadd.f32 %v9776_v27, %v15711_v12 }
 0x414   : > { %v12303_v14 = vpop.f32.mrb[16].mxu0 }
 0x415   : > { %v12461_v39 = vadd.f32 %v12303_v14, %v15714_v16  ;;  %v9789_v32 = vpop.f32.mrb[17].mxu0  ;;  %v10389_v16 = vld [vmem:[%s16102_s5] sm:$0x7] }
 0x416   : > { %v12462_v33 = vadd.f32 %v9789_v32, %v15716_v25  ;;  %v12304_v15 = vpop.f32.mrb[18].mxu0 }
 0x417   : > { %v12463_v0 = vadd.f32 %v12304_v15, %v15718_v37  ;;  %v9792_v28 = vpop.f32.mrb[19].mxu0 }
 0x418   : > { %v12464_v20 = vadd.f32 %v9792_v28, %v15720_v8  ;;  %v13295_v8 = vmov 0  }
 0x419   : > { %v12355_v12 = vpack.c.bf16 %v12463_v0, %v12461_v39  ;;  %12999 = vset.pattern.permute.xlu0 %v13295_v8 }
 0x41a   : > { %v12349_v9 = vpack.c.bf16 %v12464_v20, %v12462_v33  ;;  %10392 = vperm.xlu0 %12999, %v10389_v16  }
 0x41c   : > { %v12307_v62 = vpop.f32.mrb[20].mxu0  ;;  %12351 = vmatprep.subr.msk.bf16.mxu1 %vm15878_vm2, %v12349_v9 }
 0x41d   : > { %v12465_v25 = vadd.f32 %v12307_v62, %v15722_v29  ;;  %v9805_v37 = vpop.f32.mrb[21].mxu0  ;;  %12354 = vmatpush3.bf16.xpose.msk.msra.mxu1 %vm15878_vm2, %v12352_v19 }
 0x41e   : > { %v12466_v32 = vadd.f32 %v9805_v37, %v15724_v46  ;;  %v12308_v14 = vpop.f32.mrb[22].mxu0  ;;  %12357 = vmatprep.subr.msk.bf16.mxu1 %vm15878_vm2, %v12355_v12 }
 0x41f   : > { %v12467_v20 = vadd.f32 %v12308_v14, %v15726_v31  ;;  %v9808_v9 = vpop.f32.mrb[23].mxu0 }
 0x420   : > { %v12468_v39 = vadd.f32 %v9808_v9, %v15728_v42 }
 0x421   : > { %v12367_v33 = vpack.c.bf16 %v12467_v20, %v12465_v25 }
 0x422   : > { %v12361_v29 = vpack.c.bf16 %v12468_v39, %v12466_v32 }
 0x424   : > { %v12311_v62 = vpop.f32.mrb[24].mxu0 }
 0x425   : > { %v12469_v15 = vadd.f32 %v12311_v62, %v15730_v59  ;;  %v9821_v19 = vpop.f32.mrb[25].mxu0  ;;  %12360 = vmatpush3.bf16.xpose.msk.msra.mxu1 %vm15878_vm2, %v12358_v17 }
 0x426   : > { %v12470_v46 = vadd.f32 %v9821_v19, %v15732_v22  ;;  %v12312_v0 = vpop.f32.mrb[26].mxu0  ;;  %12363 = vmatprep.subr.msk.bf16.mxu1 %vm15878_vm2, %v12361_v29 }
 0x427   : > { %v12471_v31 = vadd.f32 %v12312_v0, %v15734_v63  ;;  %v9824_v42 = vpop.f32.mrb[27].mxu0 }
 0x428   : > { %v12472_v28 = vadd.f32 %v9824_v42, %v15736_v36 }
 0x429   : > { %v12379_v12 = vpack.c.bf16 %v12471_v31, %v12469_v15 }
 0x42a   : > { %v12373_v59 = vpack.c.bf16 %v12472_v28, %v12470_v46  ;;  %v16189_v46 = vpack.c.bf16 %v15847_v57, %v15841_v24 }
 0x42c   : > { %v12315_v16 = vpop.f32.mrb[28].mxu0 }
 0x42d   : > { %v12473_v25 = vadd.f32 %v12315_v16, %v15738_v10  ;;  %v9837_v55 = vpop.f32.mrb[29].mxu0  ;;  %12366 = vmatpush3.bf16.xpose.msk.msra.mxu1 %vm15878_vm2, %v16186_v38  ;;  %v16191_v38 = vpack.c.bf16 %v15863_v1, %v15857_v41  ;;  %v16193_v41 = vld [vmem:[#allocation7_spill] sm:$0xff] }
 0x42e   : > { %v12474_v22 = vadd.f32 %v9837_v55, %v15740_v52  ;;  %v12316_v17 = vpop.f32.mrb[30].mxu0  ;;  %12369 = vmatprep.subr.msk.bf16.mxu1 %vm15878_vm2, %v12367_v33 }
 0x42f   : > { %v12475_v63 = vadd.f32 %v12316_v17, %v15742_v49  ;;  %v9840_v36 = vpop.f32.mrb[31].mxu0 }
 0x430   : > { %v12476_v37 = vadd.f32 %v9840_v36, %v15744_v53 }
 0x431   : > { %v12391_v8 = vpack.c.bf16 %v12475_v63, %v12473_v25 }
 0x432   : > { %v12385_v10 = vpack.c.bf16 %v12476_v37, %v12474_v22 }
 0x434   : > { %v12319_v32 = vpop.f32.mrb[32].mxu0 }
 0x435   : > { %v15918_v14 = vadd.f32 %v12319_v32, %v15746_v6  ;;  %v9853_v61 = vpop.f32.mrb[33].mxu0  ;;  %12372 = vmatpush3.bf16.xpose.msk.msra.mxu1 %vm15878_vm2, %v16187_v56  ;;  %v16195_v32 = vld [vmem:[#allocation9_spill] sm:$0xff] }
 0x436   : > { %v12478_v52 = vadd.f32 %v9853_v61, %v15748_v30  ;;  %v12320_v20 = vpop.f32.mrb[34].mxu0  ;;  %12375 = vmatprep.subr.msk.bf16.mxu1 %vm15878_vm2, %v12373_v59  ;;  %v16188_v30 = vpack.c.bf16 %v15850_v35, %v15844_v54 }
 0x437   : > { %v15929_v49 = vadd.f32 %v12320_v20, %v15750_v34  ;;  %v9856_v53 = vpop.f32.mrb[35].mxu0 }
 0x438   : > { %v12480_v6 = vadd.f32 %v9856_v53, %v15752_v11 }
 0x439   : > { %v12406_v9 = vpack.c.bf16 %v15929_v49, %v15918_v14  ;;  %v16202_v49 = vld [vmem:[#allocation16_spill] sm:$0xff] }
 0x43a   : > { %v12400_v39 = vpack.c.bf16 %v12480_v6, %v12478_v52  ;;  %v16196_v52 = vld [vmem:[#allocation10_spill] sm:$0xff] }
 0x43c   : > { %v12323_v23 = vpop.f32.mrb[36].mxu0 }
 0x43d   : > { %v15935_v60 = vadd.f32 %v12323_v23, %v15754_v40  ;;  %v9869_v33 = vpop.f32.mrb[37].mxu0  ;;  %12378 = vmatpush3.bf16.xpose.msk.msra.mxu1 %vm15878_vm2, %v16188_v30 }
 0x43e   : > { %v15943_v34 = vadd.f32 %v9869_v33, %v15756_v21  ;;  %v12324_v29 = vpop.f32.mrb[38].mxu0  ;;  %12381 = vmatprep.subr.msk.bf16.mxu1 %vm15878_vm2, %v12379_v12  ;;  %v16190_v12 = vpack.c.bf16 %v15866_v45, %v15860_v2  ;;  %v16197_v33 = vld [vmem:[#allocation11_spill] sm:$0xff] }
 0x43f   : > { %v15948_v11 = vadd.f32 %v12324_v29, %v15758_v43  ;;  %v9872_v62 = vpop.f32.mrb[39].mxu0  ;;  %v16198_v29 = vld [vmem:[#allocation12_spill] sm:$0xff] }
 0x440   : > { %v15951_v40 = vadd.f32 %v9872_v62, %v15760_v47 }
 0x441   : > { %v12418_v54 = vpack.c.bf16 %v15948_v11, %v15935_v60  ;;  %v10399_v60 = vld [vmem:[%s442_s15] sm:$0x77] }
 0x442   : > { %v12412_v35 = vpack.c.bf16 %v15951_v40, %v15943_v34  ;;  %v10403_v40 = vcombine.high %v10399_v60, %v10399_v60 }
 0x444   : > { %v12327_v15 = vpop.f32.mrb[40].mxu0 }
 0x445   : > { %v15958_v21 = vadd.f32 %v12327_v15, %v15762_v4  ;;  %v9885_v19 = vpop.f32.mrb[41].mxu0  ;;  %12384 = vmatpush3.bf16.xpose.msk.msra.mxu1 %vm15878_vm2, %v16189_v46 }
 0x446   : > { %v15966_v43 = vadd.f32 %v9885_v19, %v15764_v13  ;;  %v12328_v47 = vpop.f32.mrb[42].mxu0  ;;  %12387 = vmatprep.subr.msk.bf16.mxu1 %vm15878_vm2, %v12385_v10  ;;  %v16199_v19 = vld [vmem:[#allocation13_spill] sm:$0xff] }
 0x447   : > { %v15971_v0 = vadd.f32 %v12328_v47, %v15766_v5  ;;  %v9888_v31 = vpop.f32.mrb[43].mxu0 }
 0x448   : > { %v15974_v4 = vadd.f32 %v9888_v31, %v15768_v44  ;;  %v16200_v31 = vld [vmem:[#allocation14_spill] sm:$0xff] }
 0x449   : > { %v12430_v24 = vpack.c.bf16 %v15971_v0, %v15958_v21 }
 0x44a   : > { %v12424_v57 = vpack.c.bf16 %v15974_v4, %v15966_v43  ;;  %v10400_v4 = vld [vmem:[%s442_s15 + $0x8] sm:$0x77] }
 0x44c   : > { %v12331_v42 = vpop.f32.mrb[44].mxu0 }
 0x44d   : > { %v15981_v13 = vadd.f32 %v12331_v42, %v15770_v51  ;;  %v9901_v28 = vpop.f32.mrb[45].mxu0  ;;  %12390 = vmatpush3.bf16.xpose.msk.msra.mxu1 %vm15878_vm2, %v16190_v12 }
 0x44e   : > { %v15989_v5 = vadd.f32 %v9901_v28, %v15772_v26  ;;  %v12332_v44 = vpop.f32.mrb[46].mxu0  ;;  %12393 = vmatprep.subr.msk.bf16.mxu1 %vm15878_vm2, %v12391_v8 }
 0x44f   : > { %v15994_v59 = vadd.f32 %v12332_v44, %v15774_v18  ;;  %v9904_v16 = vpop.f32.mrb[47].mxu0 }
 0x450   : > { %v12492_v51 = vadd.f32 %v9904_v16, %v15776_v58  ;;  %v16203_v16 = vld [vmem:[#allocation17_spill] sm:$0xff] }
 0x451   : > { %v12442_v25 = vpack.c.bf16 %v15994_v59, %v15981_v13 }
 0x452   : > { %v12436_v2 = vpack.c.bf16 %v12492_v51, %v15989_v5  ;;  %v16201_v5 = vld [vmem:[#allocation15_spill] sm:$0xff] }
 0x454   : > { %v12335_v45 = vpop.f32.mrb[48].mxu0 }
 0x455   : > { %v12493_v55 = vadd.f32 %v12335_v45, %v15778_v7  ;;  %v9917_v26 = vpop.f32.mrb[49].mxu0  ;;  %12396 = vmatpush3.bf16.xpose.msk.msra.mxu1 %vm15878_vm2, %v16191_v38  ;;  %v16192_v7 = vld [vmem:[#allocation6_spill] sm:$0xff] }
 0x456   : > { %v12494_v18 = vadd.f32 %v9917_v26, %v15782_v48  ;;  %v12336_v22 = vpop.f32.mrb[50].mxu0  ;;  %v16194_v48 = vld [vmem:[#allocation8_spill] sm:$0xff] }
 0x457   : > { %v12495_v58 = vadd.f32 %v12336_v22, %v15786_v3  ;;  %v9920_v17 = vpop.f32.mrb[51].mxu0 }
 0x458   : > { %v12496_v63 = vadd.f32 %v9920_v17, %v15788_v50 }
 0x459   : > { %v12403_v36 = vpack.c.bf16 %v12495_v58, %v12493_v55  ;;  %v16204_v55 = vld [vmem:[#allocation18_spill] sm:$0xff] }
 0x45a   : > { %v12397_v37 = vpack.c.bf16 %v12496_v63, %v12494_v18 }
 0x45c   : > { %v12339_v8 = vpop.f32.mrb[52].mxu0  ;;  %12399 = vmatprep.subr.msk.bf16.mxu1 %vm15878_vm2, %v12397_v37  ;;  %11702 = vmatmul.mubr.msk.f32.vlgmr.msra.gmra.mrb[64].mxu1 %vm10051_vm1, %v16192_v7 }
 0x45d   : > { %v12497_v1 = vadd.f32 %v12339_v8, %v16193_v41  ;;  %v9933_v10 = vpop.f32.mrb[53].mxu0  ;;  %12402 = vmatpush3.bf16.xpose.msk.msra.mxu1 %vm15878_vm2, %v12400_v39  ;;  %11735 = vmatprep.mubr.msk.f32.mxu1 %vm10051_vm1, %v16192_v7 }
 0x45e   : > { %v12498_v3 = vadd.f32 %v9933_v10, %v16194_v48  ;;  %v12340_v50 = vpop.f32.mrb[54].mxu0  ;;  %12405 = vmatprep.subr.msk.bf16.mxu1 %vm15878_vm2, %v12403_v36 }
 0x45f   : > { %v12499_v61 = vadd.f32 %v12340_v50, %v16195_v32  ;;  %v9936_v56 = vpop.f32.mrb[55].mxu0 }
 0x460   : > { %v12500_v20 = vadd.f32 %v9936_v56, %v16196_v52 }
 0x461   : > { %v12415_v53 = vpack.c.bf16 %v12499_v61, %v12497_v1 }
 0x462   : > { %v12409_v6 = vpack.c.bf16 %v12500_v20, %v12498_v3 }
 0x464   : > { %v12343_v23 = vpop.f32.mrb[56].mxu0 }
 0x465   : > { %v12501_v30 = vadd.f32 %v12343_v23, %v16197_v33  ;;  %v9949_v39 = vpop.f32.mrb[57].mxu0  ;;  %12408 = vmatpush3.bf16.xpose.msk.msra.mxu1 %vm15878_vm2, %v12406_v9 }
 0x466   : > { %v12502_v62 = vadd.f32 %v9949_v39, %v16198_v29  ;;  %v12344_v15 = vpop.f32.mrb[58].mxu0  ;;  %12411 = vmatprep.subr.msk.bf16.mxu1 %vm15878_vm2, %v12409_v6 }
 0x467   : > { %v12503_v46 = vadd.f32 %v12344_v15, %v16199_v19  ;;  %v9952_v47 = vpop.f32.mrb[59].mxu0 }
 0x468   : > { %v12504_v42 = vadd.f32 %v9952_v47, %v16200_v31 }
 0x469   : > { %v12427_v13 = vpack.c.bf16 %v12503_v46, %v12501_v30 }
 0x46a   : > { %v12421_v28 = vpack.c.bf16 %v12504_v42, %v12502_v62 }
 0x46c   : > { %v12347_v12 = vpop.f32.mrb[60].mxu0 }
 0x46d   : > { %v12505_v44 = vadd.f32 %v12347_v12, %v16201_v5  ;;  %v9965_v14 = vpop.f32.mrb[61].mxu0  ;;  %12414 = vmatpush3.bf16.xpose.msk.msra.mxu1 %vm15878_vm2, %v12412_v35 }
 0x46e   : > { %v12506_v9 = vadd.f32 %v9965_v14, %v16202_v49  ;;  %v12348_v59 = vpop.f32.mrb[62].mxu0  ;;  %12417 = vmatprep.subr.msk.bf16.mxu1 %vm15878_vm2, %v12415_v53 }
 0x46f   : > { %v12507_v51 = vadd.f32 %v12348_v59, %v16203_v16  ;;  %v9968_v45 = vpop.f32.mrb[63].mxu0 }
 0x470   : > { %v12508_v26 = vadd.f32 %v9968_v45, %v16204_v55 }
 0x471   : > { %v12439_v38 = vpack.c.bf16 %v12507_v51, %v12505_v44 }
 0x472   : > { %v12433_v18 = vpack.c.bf16 %v12508_v26, %v12506_v9 }
 0x475   : > { %12420 = vmatpush3.bf16.xpose.msk.msra.mxu1 %vm15878_vm2, %v12418_v54 }
 0x476   : > { %12423 = vmatprep.subr.msk.bf16.mxu1 %vm15878_vm2, %v12421_v28 }
 0x47d   : > { %12426 = vmatpush3.bf16.xpose.msk.msra.mxu1 %vm15878_vm2, %v12424_v57  ;;  %v10404_v57 = vcombine.high %v10400_v4, %v10400_v4 }
 0x47e   : > { %12429 = vmatprep.subr.msk.bf16.mxu1 %vm15878_vm2, %v12427_v13 }
 0x485   : > { %12432 = vmatpush3.bf16.xpose.msk.msra.mxu1 %vm15878_vm2, %v12430_v24 }
 0x486   : > { %12435 = vmatprep.subr.msk.bf16.mxu1 %vm15878_vm2, %v12433_v18 }
 0x48d   : > { %12438 = vmatpush3.bf16.xpose.msk.msra.mxu1 %vm15878_vm2, %v12436_v2 }
 0x48e   : > { %12441 = vmatprep.subr.msk.bf16.mxu1 %vm15878_vm2, %v12439_v38 }
 0x495   : > { %12444 = vmatpush3.bf16.xpose.msk.msra.mxu1 %vm15878_vm2, %v12442_v25 }
 0x499   : > { %v10393_v34 = vpop.permute.xlu0 %10392 }
 0x49c   : > { %11736 = vmatmul.mubr.msk.f32.vlgmr.msra.gmra.mrb[66].mxu1 %vm10051_vm1, %v16192_v7 }
 0x52f   : > { %v10313_v11 = vpop.f32.mrb[64].mxu1 }
 0x530   : > { %v10395_v54 = vadd.f32 %v10393_v34, %v10313_v11  ;;  %v10315_v27 = vpop.f32.mrb[65].mxu1 }
 0x531   : > { %v10396_v35 = vadd.f32 %v10393_v34, %v10315_v27 }
 0x532   : > { %v10407_v21 = vadd.f32 %v10399_v60, %v10395_v54 }
 0x533   : > { %v10408_v43 = vadd.f32 %v10403_v40, %v10396_v35 }
 0x535   : > { %v10415_v0 = vcombine.low %v10407_v21, %v10408_v43 }
 0x537   : > { %10419 = vst [vmem:[%s452_s17] sm:$0x77] %v10415_v0 }
 0x56f   : > { %v10384_v24 = vpop.f32.mrb[66].mxu1 }
 0x570   : > { %v10397_v25 = vadd.f32 %v10393_v34, %v10384_v24  ;;  %v10386_v2 = vpop.f32.mrb[67].mxu1 }
 0x571   : > { %v10398_v22 = vadd.f32 %v10393_v34, %v10386_v2 }
 0x572   : > { %v10409_v58 = vadd.f32 %v10400_v4, %v10397_v25 }
 0x573   : > { %v10410_v17 = vadd.f32 %v10404_v57, %v10398_v22 }
 0x575   : > { %v10416_v63 = vcombine.low %v10409_v58, %v10410_v17 }
 0x577   : > { %10420 = vst [vmem:[%s452_s17 + $0x8] sm:$0x77] %v10416_v63 }
 0x578 PF: > { %s16_s25 = sadd.s32 1, %s13292_s25   ;;  %s16205_s21 = smov %s13284_s23 }
 0x579   : > { %p13_p1 = scmp.ge.s32.totalorder %s16_s25, 6   ;;  %s16206_s22 = smov %s13288_s24 }
 0x57a   : > { %s16207_s23 = smov %s16210_s26  ;;  %s16208_s24 = smov %s16214_s27 }
 0x57b   :  { %15 = sbr.rel (!%p13_p1) target bundleno = 3 (0x3), region = 94 }

</bundles_post_ra>
